<compile_context>
chip_gen: v7x
topology: tpu7x:2x2x1
jax: 0.10.0
libtpu: 0.0.40
codegen_flags: <defaults>
</compile_context>

<pallas_src>
import functools

import jax
import jax.numpy as jnp
from jax.experimental import pallas as pl
from jax.experimental.pallas import tpu as pltpu


def _round_up(x, m):
    return (x + m - 1) // m * m


def _pad2d(x, rows, cols):
    pr, pc = rows - x.shape[0], cols - x.shape[1]
    if pr == 0 and pc == 0:
        return x
    return jnp.pad(x, ((0, pr), (0, pc)))


# ------------------------------------------------------------------
# Pallas kernels
# ------------------------------------------------------------------
def _nin_block_kernel(a_ref, w0_ref, b0_ref, w1_ref, b1_ref, w2_ref, b2_ref, o_ref):
    """Fused nin block on one M-tile: three (dot -> +bias -> ReLU) stages.

    a_ref:  (tm, Kp)  bf16 im2col patches of the KxK conv
    w0_ref: (Kp, Cp)  bf16     b0_ref: (1, Cp) f32
    w1_ref: (Cp, Cp)  bf16     b1_ref: (1, Cp) f32      (1x1 conv)
    w2_ref: (Cp, Cp)  bf16     b2_ref: (1, Cp) f32      (1x1 conv)
    o_ref:  (tm, Cp)  bf16
    K reduction is a single full block, so no cross-step accumulator is needed.
    """
    h = jnp.dot(a_ref[...], w0_ref[...], preferred_element_type=jnp.float32)
    h = jnp.maximum(h + b0_ref[...], 0.0)
    h = jnp.dot(h.astype(jnp.bfloat16), w1_ref[...], preferred_element_type=jnp.float32)
    h = jnp.maximum(h + b1_ref[...], 0.0)
    h = jnp.dot(h.astype(jnp.bfloat16), w2_ref[...], preferred_element_type=jnp.float32)
    h = jnp.maximum(h + b2_ref[...], 0.0)
    o_ref[...] = h.astype(o_ref.dtype)


def _maxpool_kernel(p_ref, o_ref):
    """p_ref: (KK, M, C) window taps -> elementwise max over the tap axis (VPU work).

    f32 intermediate keeps the max robust on chips without bf16 VALU (v5e).
    """
    o_ref[...] = jnp.max(p_ref[...].astype(jnp.float32), axis=0).astype(o_ref.dtype)


# ------------------------------------------------------------------
# Pallas wrappers
# ------------------------------------------------------------------
def _nin_block_gemm(patches, w0, b0, w1, b1, w2, b2, *, grid_m, tm):
    Mp, Kp = patches.shape
    Cp = w0.shape[1]
    return pl.pallas_call(
        _nin_block_kernel,
        out_shape=jax.ShapeDtypeStruct((Mp, Cp), jnp.bfloat16),
        grid_spec=pltpu.PrefetchScalarGridSpec(
            num_scalar_prefetch=0,
            grid=(grid_m,),
            in_specs=[
                pl.BlockSpec((tm, Kp), lambda i: (i, 0)),   # patches, tiled over M
                pl.BlockSpec((Kp, Cp), lambda i: (0, 0)),   # W0 (resident across M tiles)
                pl.BlockSpec((1, Cp), lambda i: (0, 0)),    # b0
                pl.BlockSpec((Cp, Cp), lambda i: (0, 0)),   # W1 (resident)
                pl.BlockSpec((1, Cp), lambda i: (0, 0)),    # b1
                pl.BlockSpec((Cp, Cp), lambda i: (0, 0)),   # W2 (resident)
                pl.BlockSpec((1, Cp), lambda i: (0, 0)),    # b2
            ],
            out_specs=pl.BlockSpec((tm, Cp), lambda i: (i, 0)),
        ),
        compiler_params=pltpu.CompilerParams(
            dimension_semantics=("parallel",),        # lets v7x shard M tiles across TCs
            vmem_limit_bytes=32 * 1024 * 1024,        # headroom over ~5 MiB worst case
        ),
    )(patches, w0, b0, w1, b1, w2, b2)


def _im2col(x, kh, kw, stride, pad):
    """x: (N,H,W,C) NHWC -> patches (N*OH*OW, kh*kw*C); K ordering = (kh, kw, C)."""
    n, h, w, c = x.shape
    if pad > 0:
        x = jnp.pad(x, ((0, 0), (pad, pad), (pad, pad), (0, 0)))
    hp, wp = h + 2 * pad, w + 2 * pad
    oh = (hp - kh) // stride + 1
    ow = (wp - kw) // stride + 1
    cols = []
    for i in range(kh):
        for j in range(kw):
            cols.append(x[:, i:i + stride * oh:stride, j:j + stride * ow:stride, :])
    patches = jnp.stack(cols, axis=3)              # (n, oh, ow, kh*kw, c)
    return patches.reshape(n * oh * ow, kh * kw * c), oh, ow, n
    # TODO(synk): im2col could move inside the Pallas kernel as a per-tap K-reduction
    # to avoid the kh*kw patch materialization; left in XLA (activations are tiny here).


def nin_block_forward(x_nhwc, blk, *, k, stride, pad):
    """Full nin block (KxK conv + two 1x1 convs, all with ReLU) as one pallas_call."""
    patches, oh, ow, n = _im2col(x_nhwc, k, k, stride, pad)
    M, K = patches.shape
    w0 = blk["w0"]
    Kp, Cp = w0.shape
    grid_m = 2 if M >= 64 else 1                    # 2 parallel M tiles when worthwhile
    tm = _round_up(-(-M // grid_m), 16)             # bf16 output -> sublane pack of 16
    Mp = tm * grid_m
    patches = _pad2d(patches, Mp, Kp)
    out = _nin_block_gemm(patches, w0, blk["b0"], blk["w1"], blk["b1"],
                          blk["w2"], blk["b2"], grid_m=grid_m, tm=tm)
    if Mp != M:
        out = out[:M]
    return out.reshape(n, oh, ow, Cp)


def maxpool2d(x_nhwc, k=3, stride=2):
    """MaxPool2d(3, stride=2): tap extraction in XLA (tiny), max reduce in Pallas.

    Activations here are <=0.25 MiB so the whole tap tensor fits VMEM in one shot
    (single-block pallas_call, no grid); output last dim is a multiple of 128 so the
    store is lane-dense.
    """
    n, h, w, c = x_nhwc.shape
    oh = (h - k) // stride + 1
    ow = (w - k) // stride + 1
    cols = []
    for i in range(k):
        for j in range(k):
            cols.append(x_nhwc[:, i:i + stride * oh:stride, j:j + stride * ow:stride, :])
    patches = jnp.stack(cols, axis=0).reshape(k * k, n * oh * ow, c)
    out = pl.pallas_call(
        _maxpool_kernel,
        out_shape=jax.ShapeDtypeStruct((n * oh * ow, c), x_nhwc.dtype),
    )(patches)
    return out.reshape(n, oh, ow, c)


# ------------------------------------------------------------------
# Parameters (PyTorch-style) + one-time kernel-friendly prep
# ------------------------------------------------------------------
def init_params(key, input_channel=1, num_classes=10):
    specs = [
        ("1", 96, input_channel, 11), ("1a", 96, 96, 1), ("1b", 96, 96, 1),
        ("2", 256, 96, 5), ("2a", 256, 256, 1), ("2b", 256, 256, 1),
        ("3", 384, 256, 3), ("3a", 384, 384, 1), ("3b", 384, 384, 1),
        ("4", num_classes, 384, 3),
        ("4a", num_classes, num_classes, 1),
        ("4b", num_classes, num_classes, 1),
    ]
    params = {}
    for name, cout, cin, k in specs:
        key, kw_, kb_ = jax.random.split(key, 3)
        fan_in = cin * k * k
        bound = 1.0 / (fan_in ** 0.5)
        params["w" + name] = jax.random.uniform(
            kw_, (cout, cin, k, k), jnp.float32, -bound, bound)
        params["b" + name] = jax.random.uniform(
            kb_, (cout,), jnp.float32, -bound, bound)
    return params


def prepare_params(params, input_channel=1, num_classes=10):
    """One-time (outside jit) weight prep: OIHW -> padded (Kp, Cp) bf16 GEMM matrices,
    1x1 convs -> padded (Cp, Cp) bf16, biases -> (1, Cp) f32 rows."""
    specs = [("1", "1a", "1b", 11, input_channel, 96),
             ("2", "2a", "2b", 5, 96, 256),
             ("3", "3a", "3b", 3, 256, 384),
             ("4", "4a", "4b", 3, 384, num_classes)]
    prepped = {}
    cin_pad = input_channel          # channel width arriving at this block
    for bi, (n0, n1, n2, k, cin, cout) in enumerate(specs, start=1):
        Cp = _round_up(cout, 128)
        K = k * k * cin_pad
        Kp = _round_up(K, 128)

        w0 = params["w" + n0]                                    # (cout, cin, k, k)
        w0 = jnp.pad(w0, ((0, 0), (0, cin_pad - cin), (0, 0), (0, 0)))
        w0 = jnp.transpose(w0, (2, 3, 1, 0)).reshape(K, cout)    # rows ordered (kh,kw,cin)
        w0 = _pad2d(w0, Kp, Cp).astype(jnp.bfloat16)

        def one_by_one(name):
            w = params["w" + name][:, :, 0, 0].T                 # (cin=cout, cout)
            return _pad2d(w, Cp, Cp).astype(jnp.bfloat16)

        def bias(name):
            return jnp.pad(params["b" + name], (0, Cp - cout)
                           ).reshape(1, Cp).astype(jnp.float32)

        prepped["block%d" % bi] = dict(
            w0=w0, b0=bias(n0),
            w1=one_by_one(n1), b1=bias(n1),
            w2=one_by_one(n2), b2=bias(n2))
        cin_pad = Cp
    return prepped


# ------------------------------------------------------------------
# Forward pass
# ------------------------------------------------------------------
@functools.partial(jax.jit, static_argnames=("num_classes",))
def ninnet_forward(x_nchw, prepped, *, num_classes=10):
    # NCHW (PyTorch) -> NHWC (lane = channels); bf16 activations (f32 MXU accumulate).
    x = jnp.transpose(x_nchw, (0, 2, 3, 1)).astype(jnp.bfloat16)

    # nin_block(1, 96, k=11, s=4, p=0) + MaxPool(3,2)
    x = nin_block_forward(x, prepped["block1"], k=11, stride=4, pad=0)
    x = maxpool2d(x)
    # nin_block(96, 256, k=5, s=1, p=2) + MaxPool(3,2)
    x = nin_block_forward(x, prepped["block2"], k=5, stride=1, pad=2)
    x = maxpool2d(x)
    # nin_block(256, 384, k=3, s=1, p=1) + MaxPool(3,2)
    x = nin_block_forward(x, prepped["block3"], k=3, stride=1, pad=1)
    x = maxpool2d(x)

    # TODO(synk): nn.Dropout(0.5) is identity in eval mode; training-mode dropout not implemented.

    # nin_block(384, num_classes, k=3, s=1, p=1)
    x = nin_block_forward(x, prepped["block4"], k=3, stride=1, pad=1)

    # AdaptiveAvgPool2d((1,1)) + Flatten: spatial is 1x1 here, so it is a reshape.
    n, h, w, cp = x.shape
    if h * w == 1:
        x = x.reshape(n, cp)
    else:
        x = jnp.mean(x.astype(jnp.float32).reshape(n, h * w, cp), axis=1)
    # Trim the lane-padded classifier channels down to the real classes.
    return x[:, :num_classes].astype(jnp.float32)


# ------------------------------------------------------------------
# Main
# ------------------------------------------------------------------
if __name__ == "__main__":
    key = jax.random.PRNGKey(0)
    k_params, k_input = jax.random.split(key)

    params = init_params(k_params, input_channel=1, num_classes=10)
    prepped = prepare_params(params, input_channel=1, num_classes=10)

    # Smallest spatial size that survives conv(11, s4) + 3x MaxPool(3, s2) is 67.
    x = jax.random.normal(k_input, (2, 1, 67, 67), dtype=jnp.float32)

    out = ninnet_forward(x, prepped, num_classes=10)
    out = jax.block_until_ready(out)

    assert out.shape == (2, 10), out.shape
    assert out.dtype == jnp.float32
    print("KERNEL_OK")
</pallas_src>

<mosaic_0001>
module attributes {stable_mosaic.version = 11 : i64} {
  func.func @_nin_block_kernel(%arg0: i32, %arg1: memref<240x128xbf16, #tpu.memory_space<vmem>>, %arg2: memref<128x128xbf16, #tpu.memory_space<vmem>>, %arg3: memref<1x128xf32, #tpu.memory_space<vmem>>, %arg4: memref<128x128xbf16, #tpu.memory_space<vmem>>, %arg5: memref<1x128xf32, #tpu.memory_space<vmem>>, %arg6: memref<128x128xbf16, #tpu.memory_space<vmem>>, %arg7: memref<1x128xf32, #tpu.memory_space<vmem>>, %arg8: memref<240x128xbf16, #tpu.memory_space<vmem>>) attributes {dimension_semantics = [#tpu.dimension_semantics<parallel>], iteration_bounds = array<i64: 2>, scalar_prefetch = 0 : i64, scratch_operands = 0 : i64, tpu.core_type = #tpu.core_type<tc>, window_params = [{transform_indices = @transform_0, window_bounds = array<i64: 240, 128>}, {pipeline_mode = #tpu.pipeline_mode<synchronous>, transform_indices = @transform_1, window_bounds = array<i64: 128, 128>}, {pipeline_mode = #tpu.pipeline_mode<synchronous>, transform_indices = @transform_2, window_bounds = array<i64: 1, 128>}, {pipeline_mode = #tpu.pipeline_mode<synchronous>, transform_indices = @transform_3, window_bounds = array<i64: 128, 128>}, {pipeline_mode = #tpu.pipeline_mode<synchronous>, transform_indices = @transform_4, window_bounds = array<i64: 1, 128>}, {pipeline_mode = #tpu.pipeline_mode<synchronous>, transform_indices = @transform_5, window_bounds = array<i64: 128, 128>}, {pipeline_mode = #tpu.pipeline_mode<synchronous>, transform_indices = @transform_6, window_bounds = array<i64: 1, 128>}, {transform_indices = @transform_7, window_bounds = array<i64: 240, 128>}]} {
    %c0 = arith.constant 0 : index
    %c0_0 = arith.constant 0 : index
    %0 = vector.load %arg1[%c0, %c0_0] : memref<240x128xbf16, #tpu.memory_space<vmem>>, vector<240x128xbf16>
    %c0_1 = arith.constant 0 : index
    %c0_2 = arith.constant 0 : index
    %1 = vector.load %arg2[%c0_1, %c0_2] : memref<128x128xbf16, #tpu.memory_space<vmem>>, vector<128x128xbf16>
    %cst = arith.constant dense<0.000000e+00> : vector<240x128xf32>
    %2 = tpu.matmul %0, %1, %cst {dimension_numbers = #tpu.dot_dimension_numbers<[1], [0], [0], [1], [0, 0, 1, 1], [], []>} : vector<240x128xbf16>, vector<128x128xbf16>, vector<240x128xf32> -> vector<240x128xf32>
    %c0_3 = arith.constant 0 : index
    %c0_4 = arith.constant 0 : index
    %3 = vector.load %arg3[%c0_3, %c0_4] : memref<1x128xf32, #tpu.memory_space<vmem>>, vector<1x128xf32>
    %4 = vector.broadcast %3 : vector<1x128xf32> to vector<240x128xf32>
    %5 = arith.addf %2, %4 : vector<240x128xf32>
    %cst_5 = arith.constant 0.000000e+00 : f32
    %6 = vector.broadcast %cst_5 : f32 to vector<240x128xf32>
    %7 = arith.maximumf %5, %6 : vector<240x128xf32>
    %8 = arith.truncf %7 : vector<240x128xf32> to vector<240x128xbf16>
    %c0_6 = arith.constant 0 : index
    %c0_7 = arith.constant 0 : index
    %9 = vector.load %arg4[%c0_6, %c0_7] : memref<128x128xbf16, #tpu.memory_space<vmem>>, vector<128x128xbf16>
    %cst_8 = arith.constant dense<0.000000e+00> : vector<240x128xf32>
    %10 = tpu.matmul %8, %9, %cst_8 {dimension_numbers = #tpu.dot_dimension_numbers<[1], [0], [0], [1], [0, 0, 1, 1], [], []>} : vector<240x128xbf16>, vector<128x128xbf16>, vector<240x128xf32> -> vector<240x128xf32>
    %c0_9 = arith.constant 0 : index
    %c0_10 = arith.constant 0 : index
    %11 = vector.load %arg5[%c0_9, %c0_10] : memref<1x128xf32, #tpu.memory_space<vmem>>, vector<1x128xf32>
    %12 = vector.broadcast %11 : vector<1x128xf32> to vector<240x128xf32>
    %13 = arith.addf %10, %12 : vector<240x128xf32>
    %cst_11 = arith.constant 0.000000e+00 : f32
    %14 = vector.broadcast %cst_11 : f32 to vector<240x128xf32>
    %15 = arith.maximumf %13, %14 : vector<240x128xf32>
    %16 = arith.truncf %15 : vector<240x128xf32> to vector<240x128xbf16>
    %c0_12 = arith.constant 0 : index
    %c0_13 = arith.constant 0 : index
    %17 = vector.load %arg6[%c0_12, %c0_13] : memref<128x128xbf16, #tpu.memory_space<vmem>>, vector<128x128xbf16>
    %cst_14 = arith.constant dense<0.000000e+00> : vector<240x128xf32>
    %18 = tpu.matmul %16, %17, %cst_14 {dimension_numbers = #tpu.dot_dimension_numbers<[1], [0], [0], [1], [0, 0, 1, 1], [], []>} : vector<240x128xbf16>, vector<128x128xbf16>, vector<240x128xf32> -> vector<240x128xf32>
    %c0_15 = arith.constant 0 : index
    %c0_16 = arith.constant 0 : index
    %19 = vector.load %arg7[%c0_15, %c0_16] : memref<1x128xf32, #tpu.memory_space<vmem>>, vector<1x128xf32>
    %20 = vector.broadcast %19 : vector<1x128xf32> to vector<240x128xf32>
    %21 = arith.addf %18, %20 : vector<240x128xf32>
    %cst_17 = arith.constant 0.000000e+00 : f32
    %22 = vector.broadcast %cst_17 : f32 to vector<240x128xf32>
    %23 = arith.maximumf %21, %22 : vector<240x128xf32>
    %24 = arith.truncf %23 : vector<240x128xf32> to vector<240x128xbf16>
    %c0_18 = arith.constant 0 : index
    %c0_19 = arith.constant 0 : index
    %25 = vector.load %arg8[%c0_18, %c0_19] : memref<240x128xbf16, #tpu.memory_space<vmem>>, vector<240x128xbf16>
    tpu.vector_store %arg8[%c0_18, %c0_19], %24 {strides = array<i32>} : memref<240x128xbf16, #tpu.memory_space<vmem>>, vector<240x128xbf16>,
    return
  }
  func.func @transform_0(%arg0: i32) -> (i32, i32) {
    %c0_i32 = arith.constant 0 : i32
    %c0_i32_0 = arith.constant 0 : i32
    return %arg0, %c0_i32 : i32, i32
  }
  func.func @transform_1(%arg0: i32) -> (i32, i32) {
    %c0_i32 = arith.constant 0 : i32
    %c0_i32_0 = arith.constant 0 : i32
    %c0_i32_1 = arith.constant 0 : i32
    return %c0_i32, %c0_i32_0 : i32, i32
  }
  func.func @transform_2(%arg0: i32) -> (i32, i32) {
    %c0_i32 = arith.constant 0 : i32
    %c0_i32_0 = arith.constant 0 : i32
    %c0_i32_1 = arith.constant 0 : i32
    return %c0_i32, %c0_i32_0 : i32, i32
  }
  func.func @transform_3(%arg0: i32) -> (i32, i32) {
    %c0_i32 = arith.constant 0 : i32
    %c0_i32_0 = arith.constant 0 : i32
    %c0_i32_1 = arith.constant 0 : i32
    return %c0_i32, %c0_i32_0 : i32, i32
  }
  func.func @transform_4(%arg0: i32) -> (i32, i32) {
    %c0_i32 = arith.constant 0 : i32
    %c0_i32_0 = arith.constant 0 : i32
    %c0_i32_1 = arith.constant 0 : i32
    return %c0_i32, %c0_i32_0 : i32, i32
  }
  func.func @transform_5(%arg0: i32) -> (i32, i32) {
    %c0_i32 = arith.constant 0 : i32
    %c0_i32_0 = arith.constant 0 : i32
    %c0_i32_1 = arith.constant 0 : i32
    return %c0_i32, %c0_i32_0 : i32, i32
  }
  func.func @transform_6(%arg0: i32) -> (i32, i32) {
    %c0_i32 = arith.constant 0 : i32
    %c0_i32_0 = arith.constant 0 : i32
    %c0_i32_1 = arith.constant 0 : i32
    return %c0_i32, %c0_i32_0 : i32, i32
  }
  func.func @transform_7(%arg0: i32) -> (i32, i32) {
    %c0_i32 = arith.constant 0 : i32
    %c0_i32_0 = arith.constant 0 : i32
    return %arg0, %c0_i32 : i32, i32
  }
}

module attributes {stable_mosaic.version = 11 : i64} {
  func.func @_maxpool_kernel(%arg0: memref<9x98x128xbf16, #tpu.memory_space<vmem>>, %arg1: memref<98x128xbf16, #tpu.memory_space<vmem>>) attributes {dimension_semantics = [], scalar_prefetch = 0 : i64, scratch_operands = 0 : i64, tpu.core_type = #tpu.core_type<tc>} {
    %c0 = arith.constant 0 : index
    %c0_0 = arith.constant 0 : index
    %c0_1 = arith.constant 0 : index
    %0 = vector.load %arg0[%c0, %c0_0, %c0_1] : memref<9x98x128xbf16, #tpu.memory_space<vmem>>, vector<9x98x128xbf16>
    %1 = arith.extf %0 : vector<9x98x128xbf16> to vector<9x98x128xf32>
    %cst = arith.constant dense<0xFF800000> : vector<98x128xf32>
    %2 = vector.multi_reduction <maximumf>, %1, %cst [0] : vector<9x98x128xf32> to vector<98x128xf32>
    %3 = arith.truncf %2 : vector<98x128xf32> to vector<98x128xbf16>
    %c0_2 = arith.constant 0 : index
    %c0_3 = arith.constant 0 : index
    %4 = vector.load %arg1[%c0_2, %c0_3] : memref<98x128xbf16, #tpu.memory_space<vmem>>, vector<98x128xbf16>
    tpu.vector_store %arg1[%c0_2, %c0_3], %3 {strides = array<i32>} : memref<98x128xbf16, #tpu.memory_space<vmem>>, vector<98x128xbf16>,
    return
  }
}

module attributes {stable_mosaic.version = 11 : i64} {
  func.func @_nin_block_kernel(%arg0: i32, %arg1: memref<64x3200xbf16, #tpu.memory_space<vmem>>, %arg2: memref<3200x256xbf16, #tpu.memory_space<vmem>>, %arg3: memref<1x256xf32, #tpu.memory_space<vmem>>, %arg4: memref<256x256xbf16, #tpu.memory_space<vmem>>, %arg5: memref<1x256xf32, #tpu.memory_space<vmem>>, %arg6: memref<256x256xbf16, #tpu.memory_space<vmem>>, %arg7: memref<1x256xf32, #tpu.memory_space<vmem>>, %arg8: memref<64x256xbf16, #tpu.memory_space<vmem>>) attributes {dimension_semantics = [#tpu.dimension_semantics<parallel>], iteration_bounds = array<i64: 2>, scalar_prefetch = 0 : i64, scratch_operands = 0 : i64, tpu.core_type = #tpu.core_type<tc>, window_params = [{transform_indices = @transform_0, window_bounds = array<i64: 64, 3200>}, {pipeline_mode = #tpu.pipeline_mode<synchronous>, transform_indices = @transform_1, window_bounds = array<i64: 3200, 256>}, {pipeline_mode = #tpu.pipeline_mode<synchronous>, transform_indices = @transform_2, window_bounds = array<i64: 1, 256>}, {pipeline_mode = #tpu.pipeline_mode<synchronous>, transform_indices = @transform_3, window_bounds = array<i64: 256, 256>}, {pipeline_mode = #tpu.pipeline_mode<synchronous>, transform_indices = @transform_4, window_bounds = array<i64: 1, 256>}, {pipeline_mode = #tpu.pipeline_mode<synchronous>, transform_indices = @transform_5, window_bounds = array<i64: 256, 256>}, {pipeline_mode = #tpu.pipeline_mode<synchronous>, transform_indices = @transform_6, window_bounds = array<i64: 1, 256>}, {transform_indices = @transform_7, window_bounds = array<i64: 64, 256>}]} {
    %c0 = arith.constant 0 : index
    %c0_0 = arith.constant 0 : index
    %0 = vector.load %arg1[%c0, %c0_0] : memref<64x3200xbf16, #tpu.memory_space<vmem>>, vector<64x3200xbf16>
    %c0_1 = arith.constant 0 : index
    %c0_2 = arith.constant 0 : index
    %1 = vector.load %arg2[%c0_1, %c0_2] : memref<3200x256xbf16, #tpu.memory_space<vmem>>, vector<3200x256xbf16>
    %cst = arith.constant dense<0.000000e+00> : vector<64x256xf32>
    %2 = tpu.matmul %0, %1, %cst {dimension_numbers = #tpu.dot_dimension_numbers<[1], [0], [0], [1], [0, 0, 1, 1], [], []>} : vector<64x3200xbf16>, vector<3200x256xbf16>, vector<64x256xf32> -> vector<64x256xf32>
    %c0_3 = arith.constant 0 : index
    %c0_4 = arith.constant 0 : index
    %3 = vector.load %arg3[%c0_3, %c0_4] : memref<1x256xf32, #tpu.memory_space<vmem>>, vector<1x256xf32>
    %4 = vector.broadcast %3 : vector<1x256xf32> to vector<64x256xf32>
    %5 = arith.addf %2, %4 : vector<64x256xf32>
    %cst_5 = arith.constant 0.000000e+00 : f32
    %6 = vector.broadcast %cst_5 : f32 to vector<64x256xf32>
    %7 = arith.maximumf %5, %6 : vector<64x256xf32>
    %8 = arith.truncf %7 : vector<64x256xf32> to vector<64x256xbf16>
    %c0_6 = arith.constant 0 : index
    %c0_7 = arith.constant 0 : index
    %9 = vector.load %arg4[%c0_6, %c0_7] : memref<256x256xbf16, #tpu.memory_space<vmem>>, vector<256x256xbf16>
    %cst_8 = arith.constant dense<0.000000e+00> : vector<64x256xf32>
    %10 = tpu.matmul %8, %9, %cst_8 {dimension_numbers = #tpu.dot_dimension_numbers<[1], [0], [0], [1], [0, 0, 1, 1], [], []>} : vector<64x256xbf16>, vector<256x256xbf16>, vector<64x256xf32> -> vector<64x256xf32>
    %c0_9 = arith.constant 0 : index
    %c0_10 = arith.constant 0 : index
    %11 = vector.load %arg5[%c0_9, %c0_10] : memref<1x256xf32, #tpu.memory_space<vmem>>, vector<1x256xf32>
    %12 = vector.broadcast %11 : vector<1x256xf32> to vector<64x256xf32>
    %13 = arith.addf %10, %12 : vector<64x256xf32>
    %cst_11 = arith.constant 0.000000e+00 : f32
    %14 = vector.broadcast %cst_11 : f32 to vector<64x256xf32>
    %15 = arith.maximumf %13, %14 : vector<64x256xf32>
    %16 = arith.truncf %15 : vector<64x256xf32> to vector<64x256xbf16>
    %c0_12 = arith.constant 0 : index
    %c0_13 = arith.constant 0 : index
    %17 = vector.load %arg6[%c0_12, %c0_13] : memref<256x256xbf16, #tpu.memory_space<vmem>>, vector<256x256xbf16>
    %cst_14 = arith.constant dense<0.000000e+00> : vector<64x256xf32>
    %18 = tpu.matmul %16, %17, %cst_14 {dimension_numbers = #tpu.dot_dimension_numbers<[1], [0], [0], [1], [0, 0, 1, 1], [], []>} : vector<64x256xbf16>, vector<256x256xbf16>, vector<64x256xf32> -> vector<64x256xf32>
    %c0_15 = arith.constant 0 : index
    %c0_16 = arith.constant 0 : index
    %19 = vector.load %arg7[%c0_15, %c0_16] : memref<1x256xf32, #tpu.memory_space<vmem>>, vector<1x256xf32>
    %20 = vector.broadcast %19 : vector<1x256xf32> to vector<64x256xf32>
    %21 = arith.addf %18, %20 : vector<64x256xf32>
    %cst_17 = arith.constant 0.000000e+00 : f32
    %22 = vector.broadcast %cst_17 : f32 to vector<64x256xf32>
    %23 = arith.maximumf %21, %22 : vector<64x256xf32>
    %24 = arith.truncf %23 : vector<64x256xf32> to vector<64x256xbf16>
    %c0_18 = arith.constant 0 : index
    %c0_19 = arith.constant 0 : index
    %25 = vector.load %arg8[%c0_18, %c0_19] : memref<64x256xbf16, #tpu.memory_space<vmem>>, vector<64x256xbf16>
    tpu.vector_store %arg8[%c0_18, %c0_19], %24 {strides = array<i32>} : memref<64x256xbf16, #tpu.memory_space<vmem>>, vector<64x256xbf16>,
    return
  }
  func.func @transform_0(%arg0: i32) -> (i32, i32) {
    %c0_i32 = arith.constant 0 : i32
    %c0_i32_0 = arith.constant 0 : i32
    return %arg0, %c0_i32 : i32, i32
  }
  func.func @transform_1(%arg0: i32) -> (i32, i32) {
    %c0_i32 = arith.constant 0 : i32
    %c0_i32_0 = arith.constant 0 : i32
    %c0_i32_1 = arith.constant 0 : i32
    return %c0_i32, %c0_i32_0 : i32, i32
  }
  func.func @transform_2(%arg0: i32) -> (i32, i32) {
    %c0_i32 = arith.constant 0 : i32
    %c0_i32_0 = arith.constant 0 : i32
    %c0_i32_1 = arith.constant 0 : i32
    return %c0_i32, %c0_i32_0 : i32, i32
  }
  func.func @transform_3(%arg0: i32) -> (i32, i32) {
    %c0_i32 = arith.constant 0 : i32
    %c0_i32_0 = arith.constant 0 : i32
    %c0_i32_1 = arith.constant 0 : i32
    return %c0_i32, %c0_i32_0 : i32, i32
  }
  func.func @transform_4(%arg0: i32) -> (i32, i32) {
    %c0_i32 = arith.constant 0 : i32
    %c0_i32_0 = arith.constant 0 : i32
    %c0_i32_1 = arith.constant 0 : i32
    return %c0_i32, %c0_i32_0 : i32, i32
  }
  func.func @transform_5(%arg0: i32) -> (i32, i32) {
    %c0_i32 = arith.constant 0 : i32
    %c0_i32_0 = arith.constant 0 : i32
    %c0_i32_1 = arith.constant 0 : i32
    return %c0_i32, %c0_i32_0 : i32, i32
  }
  func.func @transform_6(%arg0: i32) -> (i32, i32) {
    %c0_i32 = arith.constant 0 : i32
    %c0_i32_0 = arith.constant 0 : i32
    %c0_i32_1 = arith.constant 0 : i32
    return %c0_i32, %c0_i32_0 : i32, i32
  }
  func.func @transform_7(%arg0: i32) -> (i32, i32) {
    %c0_i32 = arith.constant 0 : i32
    %c0_i32_0 = arith.constant 0 : i32
    return %arg0, %c0_i32 : i32, i32
  }
}

module attributes {stable_mosaic.version = 11 : i64} {
  func.func @_maxpool_kernel(%arg0: memref<9x18x256xbf16, #tpu.memory_space<vmem>>, %arg1: memref<18x256xbf16, #tpu.memory_space<vmem>>) attributes {dimension_semantics = [], scalar_prefetch = 0 : i64, scratch_operands = 0 : i64, tpu.core_type = #tpu.core_type<tc>} {
    %c0 = arith.constant 0 : index
    %c0_0 = arith.constant 0 : index
    %c0_1 = arith.constant 0 : index
    %0 = vector.load %arg0[%c0, %c0_0, %c0_1] : memref<9x18x256xbf16, #tpu.memory_space<vmem>>, vector<9x18x256xbf16>
    %1 = arith.extf %0 : vector<9x18x256xbf16> to vector<9x18x256xf32>
    %cst = arith.constant dense<0xFF800000> : vector<18x256xf32>
    %2 = vector.multi_reduction <maximumf>, %1, %cst [0] : vector<9x18x256xf32> to vector<18x256xf32>
    %3 = arith.truncf %2 : vector<18x256xf32> to vector<18x256xbf16>
    %c0_2 = arith.constant 0 : index
    %c0_3 = arith.constant 0 : index
    %4 = vector.load %arg1[%c0_2, %c0_3] : memref<18x256xbf16, #tpu.memory_space<vmem>>, vector<18x256xbf16>
    tpu.vector_store %arg1[%c0_2, %c0_3], %3 {strides = array<i32>} : memref<18x256xbf16, #tpu.memory_space<vmem>>, vector<18x256xbf16>,
    return
  }
}

module attributes {stable_mosaic.version = 11 : i64} {
  func.func @_nin_block_kernel(%arg0: i32, %arg1: memref<32x2304xbf16, #tpu.memory_space<vmem>>, %arg2: memref<2304x384xbf16, #tpu.memory_space<vmem>>, %arg3: memref<1x384xf32, #tpu.memory_space<vmem>>, %arg4: memref<384x384xbf16, #tpu.memory_space<vmem>>, %arg5: memref<1x384xf32, #tpu.memory_space<vmem>>, %arg6: memref<384x384xbf16, #tpu.memory_space<vmem>>, %arg7: memref<1x384xf32, #tpu.memory_space<vmem>>, %arg8: memref<32x384xbf16, #tpu.memory_space<vmem>>) attributes {dimension_semantics = [#tpu.dimension_semantics<parallel>], iteration_bounds = array<i64: 1>, scalar_prefetch = 0 : i64, scratch_operands = 0 : i64, tpu.core_type = #tpu.core_type<tc>, window_params = [{transform_indices = @transform_0, window_bounds = array<i64: 32, 2304>}, {pipeline_mode = #tpu.pipeline_mode<synchronous>, transform_indices = @transform_1, window_bounds = array<i64: 2304, 384>}, {pipeline_mode = #tpu.pipeline_mode<synchronous>, transform_indices = @transform_2, window_bounds = array<i64: 1, 384>}, {pipeline_mode = #tpu.pipeline_mode<synchronous>, transform_indices = @transform_3, window_bounds = array<i64: 384, 384>}, {pipeline_mode = #tpu.pipeline_mode<synchronous>, transform_indices = @transform_4, window_bounds = array<i64: 1, 384>}, {pipeline_mode = #tpu.pipeline_mode<synchronous>, transform_indices = @transform_5, window_bounds = array<i64: 384, 384>}, {pipeline_mode = #tpu.pipeline_mode<synchronous>, transform_indices = @transform_6, window_bounds = array<i64: 1, 384>}, {transform_indices = @transform_7, window_bounds = array<i64: 32, 384>}]} {
    %c0 = arith.constant 0 : index
    %c0_0 = arith.constant 0 : index
    %0 = vector.load %arg1[%c0, %c0_0] : memref<32x2304xbf16, #tpu.memory_space<vmem>>, vector<32x2304xbf16>
    %c0_1 = arith.constant 0 : index
    %c0_2 = arith.constant 0 : index
    %1 = vector.load %arg2[%c0_1, %c0_2] : memref<2304x384xbf16, #tpu.memory_space<vmem>>, vector<2304x384xbf16>
    %cst = arith.constant dense<0.000000e+00> : vector<32x384xf32>
    %2 = tpu.matmul %0, %1, %cst {dimension_numbers = #tpu.dot_dimension_numbers<[1], [0], [0], [1], [0, 0, 1, 1], [], []>} : vector<32x2304xbf16>, vector<2304x384xbf16>, vector<32x384xf32> -> vector<32x384xf32>
    %c0_3 = arith.constant 0 : index
    %c0_4 = arith.constant 0 : index
    %3 = vector.load %arg3[%c0_3, %c0_4] : memref<1x384xf32, #tpu.memory_space<vmem>>, vector<1x384xf32>
    %4 = vector.broadcast %3 : vector<1x384xf32> to vector<32x384xf32>
    %5 = arith.addf %2, %4 : vector<32x384xf32>
    %cst_5 = arith.constant 0.000000e+00 : f32
    %6 = vector.broadcast %cst_5 : f32 to vector<32x384xf32>
    %7 = arith.maximumf %5, %6 : vector<32x384xf32>
    %8 = arith.truncf %7 : vector<32x384xf32> to vector<32x384xbf16>
    %c0_6 = arith.constant 0 : index
    %c0_7 = arith.constant 0 : index
    %9 = vector.load %arg4[%c0_6, %c0_7] : memref<384x384xbf16, #tpu.memory_space<vmem>>, vector<384x384xbf16>
    %cst_8 = arith.constant dense<0.000000e+00> : vector<32x384xf32>
    %10 = tpu.matmul %8, %9, %cst_8 {dimension_numbers = #tpu.dot_dimension_numbers<[1], [0], [0], [1], [0, 0, 1, 1], [], []>} : vector<32x384xbf16>, vector<384x384xbf16>, vector<32x384xf32> -> vector<32x384xf32>
    %c0_9 = arith.constant 0 : index
    %c0_10 = arith.constant 0 : index
    %11 = vector.load %arg5[%c0_9, %c0_10] : memref<1x384xf32, #tpu.memory_space<vmem>>, vector<1x384xf32>
    %12 = vector.broadcast %11 : vector<1x384xf32> to vector<32x384xf32>
    %13 = arith.addf %10, %12 : vector<32x384xf32>
    %cst_11 = arith.constant 0.000000e+00 : f32
    %14 = vector.broadcast %cst_11 : f32 to vector<32x384xf32>
    %15 = arith.maximumf %13, %14 : vector<32x384xf32>
    %16 = arith.truncf %15 : vector<32x384xf32> to vector<32x384xbf16>
    %c0_12 = arith.constant 0 : index
    %c0_13 = arith.constant 0 : index
    %17 = vector.load %arg6[%c0_12, %c0_13] : memref<384x384xbf16, #tpu.memory_space<vmem>>, vector<384x384xbf16>
    %cst_14 = arith.constant dense<0.000000e+00> : vector<32x384xf32>
    %18 = tpu.matmul %16, %17, %cst_14 {dimension_numbers = #tpu.dot_dimension_numbers<[1], [0], [0], [1], [0, 0, 1, 1], [], []>} : vector<32x384xbf16>, vector<384x384xbf16>, vector<32x384xf32> -> vector<32x384xf32>
    %c0_15 = arith.constant 0 : index
    %c0_16 = arith.constant 0 : index
    %19 = vector.load %arg7[%c0_15, %c0_16] : memref<1x384xf32, #tpu.memory_space<vmem>>, vector<1x384xf32>
    %20 = vector.broadcast %19 : vector<1x384xf32> to vector<32x384xf32>
    %21 = arith.addf %18, %20 : vector<32x384xf32>
    %cst_17 = arith.constant 0.000000e+00 : f32
    %22 = vector.broadcast %cst_17 : f32 to vector<32x384xf32>
    %23 = arith.maximumf %21, %22 : vector<32x384xf32>
    %24 = arith.truncf %23 : vector<32x384xf32> to vector<32x384xbf16>
    %c0_18 = arith.constant 0 : index
    %c0_19 = arith.constant 0 : index
    %25 = vector.load %arg8[%c0_18, %c0_19] : memref<32x384xbf16, #tpu.memory_space<vmem>>, vector<32x384xbf16>
    tpu.vector_store %arg8[%c0_18, %c0_19], %24 {strides = array<i32>} : memref<32x384xbf16, #tpu.memory_space<vmem>>, vector<32x384xbf16>,
    return
  }
  func.func @transform_0(%arg0: i32) -> (i32, i32) {
    %c0_i32 = arith.constant 0 : i32
    %c0_i32_0 = arith.constant 0 : i32
    return %arg0, %c0_i32 : i32, i32
  }
  func.func @transform_1(%arg0: i32) -> (i32, i32) {
    %c0_i32 = arith.constant 0 : i32
    %c0_i32_0 = arith.constant 0 : i32
    %c0_i32_1 = arith.constant 0 : i32
    return %c0_i32, %c0_i32_0 : i32, i32
  }
  func.func @transform_2(%arg0: i32) -> (i32, i32) {
    %c0_i32 = arith.constant 0 : i32
    %c0_i32_0 = arith.constant 0 : i32
    %c0_i32_1 = arith.constant 0 : i32
    return %c0_i32, %c0_i32_0 : i32, i32
  }
  func.func @transform_3(%arg0: i32) -> (i32, i32) {
    %c0_i32 = arith.constant 0 : i32
    %c0_i32_0 = arith.constant 0 : i32
    %c0_i32_1 = arith.constant 0 : i32
    return %c0_i32, %c0_i32_0 : i32, i32
  }
  func.func @transform_4(%arg0: i32) -> (i32, i32) {
    %c0_i32 = arith.constant 0 : i32
    %c0_i32_0 = arith.constant 0 : i32
    %c0_i32_1 = arith.constant 0 : i32
    return %c0_i32, %c0_i32_0 : i32, i32
  }
  func.func @transform_5(%arg0: i32) -> (i32, i32) {
    %c0_i32 = arith.constant 0 : i32
    %c0_i32_0 = arith.constant 0 : i32
    %c0_i32_1 = arith.constant 0 : i32
    return %c0_i32, %c0_i32_0 : i32, i32
  }
  func.func @transform_6(%arg0: i32) -> (i32, i32) {
    %c0_i32 = arith.constant 0 : i32
    %c0_i32_0 = arith.constant 0 : i32
    %c0_i32_1 = arith.constant 0 : i32
    return %c0_i32, %c0_i32_0 : i32, i32
  }
  func.func @transform_7(%arg0: i32) -> (i32, i32) {
    %c0_i32 = arith.constant 0 : i32
    %c0_i32_0 = arith.constant 0 : i32
    return %arg0, %c0_i32 : i32, i32
  }
}

module attributes {stable_mosaic.version = 11 : i64} {
  func.func @_maxpool_kernel(%arg0: memref<9x2x384xbf16, #tpu.memory_space<vmem>>, %arg1: memref<2x384xbf16, #tpu.memory_space<vmem>>) attributes {dimension_semantics = [], scalar_prefetch = 0 : i64, scratch_operands = 0 : i64, tpu.core_type = #tpu.core_type<tc>} {
    %c0 = arith.constant 0 : index
    %c0_0 = arith.constant 0 : index
    %c0_1 = arith.constant 0 : index
    %0 = vector.load %arg0[%c0, %c0_0, %c0_1] : memref<9x2x384xbf16, #tpu.memory_space<vmem>>, vector<9x2x384xbf16>
    %1 = arith.extf %0 : vector<9x2x384xbf16> to vector<9x2x384xf32>
    %cst = arith.constant dense<0xFF800000> : vector<2x384xf32>
    %2 = vector.multi_reduction <maximumf>, %1, %cst [0] : vector<9x2x384xf32> to vector<2x384xf32>
    %3 = arith.truncf %2 : vector<2x384xf32> to vector<2x384xbf16>
    %c0_2 = arith.constant 0 : index
    %c0_3 = arith.constant 0 : index
    %4 = vector.load %arg1[%c0_2, %c0_3] : memref<2x384xbf16, #tpu.memory_space<vmem>>, vector<2x384xbf16>
    tpu.vector_store %arg1[%c0_2, %c0_3], %3 {strides = array<i32>} : memref<2x384xbf16, #tpu.memory_space<vmem>>, vector<2x384xbf16>,
    return
  }
}

module attributes {stable_mosaic.version = 11 : i64} {
  func.func @_nin_block_kernel(%arg0: i32, %arg1: memref<16x3456xbf16, #tpu.memory_space<vmem>>, %arg2: memref<3456x128xbf16, #tpu.memory_space<vmem>>, %arg3: memref<1x128xf32, #tpu.memory_space<vmem>>, %arg4: memref<128x128xbf16, #tpu.memory_space<vmem>>, %arg5: memref<1x128xf32, #tpu.memory_space<vmem>>, %arg6: memref<128x128xbf16, #tpu.memory_space<vmem>>, %arg7: memref<1x128xf32, #tpu.memory_space<vmem>>, %arg8: memref<16x128xbf16, #tpu.memory_space<vmem>>) attributes {dimension_semantics = [#tpu.dimension_semantics<parallel>], iteration_bounds = array<i64: 1>, scalar_prefetch = 0 : i64, scratch_operands = 0 : i64, tpu.core_type = #tpu.core_type<tc>, window_params = [{transform_indices = @transform_0, window_bounds = array<i64: 16, 3456>}, {pipeline_mode = #tpu.pipeline_mode<synchronous>, transform_indices = @transform_1, window_bounds = array<i64: 3456, 128>}, {pipeline_mode = #tpu.pipeline_mode<synchronous>, transform_indices = @transform_2, window_bounds = array<i64: 1, 128>}, {pipeline_mode = #tpu.pipeline_mode<synchronous>, transform_indices = @transform_3, window_bounds = array<i64: 128, 128>}, {pipeline_mode = #tpu.pipeline_mode<synchronous>, transform_indices = @transform_4, window_bounds = array<i64: 1, 128>}, {pipeline_mode = #tpu.pipeline_mode<synchronous>, transform_indices = @transform_5, window_bounds = array<i64: 128, 128>}, {pipeline_mode = #tpu.pipeline_mode<synchronous>, transform_indices = @transform_6, window_bounds = array<i64: 1, 128>}, {transform_indices = @transform_7, window_bounds = array<i64: 16, 128>}]} {
    %c0 = arith.constant 0 : index
    %c0_0 = arith.constant 0 : index
    %0 = vector.load %arg1[%c0, %c0_0] : memref<16x3456xbf16, #tpu.memory_space<vmem>>, vector<16x3456xbf16>
    %c0_1 = arith.constant 0 : index
    %c0_2 = arith.constant 0 : index
    %1 = vector.load %arg2[%c0_1, %c0_2] : memref<3456x128xbf16, #tpu.memory_space<vmem>>, vector<3456x128xbf16>
    %cst = arith.constant dense<0.000000e+00> : vector<16x128xf32>
    %2 = tpu.matmul %0, %1, %cst {dimension_numbers = #tpu.dot_dimension_numbers<[1], [0], [0], [1], [0, 0, 1, 1], [], []>} : vector<16x3456xbf16>, vector<3456x128xbf16>, vector<16x128xf32> -> vector<16x128xf32>
    %c0_3 = arith.constant 0 : index
    %c0_4 = arith.constant 0 : index
    %3 = vector.load %arg3[%c0_3, %c0_4] : memref<1x128xf32, #tpu.memory_space<vmem>>, vector<1x128xf32>
    %4 = vector.broadcast %3 : vector<1x128xf32> to vector<16x128xf32>
    %5 = arith.addf %2, %4 : vector<16x128xf32>
    %cst_5 = arith.constant 0.000000e+00 : f32
    %6 = vector.broadcast %cst_5 : f32 to vector<16x128xf32>
    %7 = arith.maximumf %5, %6 : vector<16x128xf32>
    %8 = arith.truncf %7 : vector<16x128xf32> to vector<16x128xbf16>
    %c0_6 = arith.constant 0 : index
    %c0_7 = arith.constant 0 : index
    %9 = vector.load %arg4[%c0_6, %c0_7] : memref<128x128xbf16, #tpu.memory_space<vmem>>, vector<128x128xbf16>
    %cst_8 = arith.constant dense<0.000000e+00> : vector<16x128xf32>
    %10 = tpu.matmul %8, %9, %cst_8 {dimension_numbers = #tpu.dot_dimension_numbers<[1], [0], [0], [1], [0, 0, 1, 1], [], []>} : vector<16x128xbf16>, vector<128x128xbf16>, vector<16x128xf32> -> vector<16x128xf32>
    %c0_9 = arith.constant 0 : index
    %c0_10 = arith.constant 0 : index
    %11 = vector.load %arg5[%c0_9, %c0_10] : memref<1x128xf32, #tpu.memory_space<vmem>>, vector<1x128xf32>
    %12 = vector.broadcast %11 : vector<1x128xf32> to vector<16x128xf32>
    %13 = arith.addf %10, %12 : vector<16x128xf32>
    %cst_11 = arith.constant 0.000000e+00 : f32
    %14 = vector.broadcast %cst_11 : f32 to vector<16x128xf32>
    %15 = arith.maximumf %13, %14 : vector<16x128xf32>
    %16 = arith.truncf %15 : vector<16x128xf32> to vector<16x128xbf16>
    %c0_12 = arith.constant 0 : index
    %c0_13 = arith.constant 0 : index
    %17 = vector.load %arg6[%c0_12, %c0_13] : memref<128x128xbf16, #tpu.memory_space<vmem>>, vector<128x128xbf16>
    %cst_14 = arith.constant dense<0.000000e+00> : vector<16x128xf32>
    %18 = tpu.matmul %16, %17, %cst_14 {dimension_numbers = #tpu.dot_dimension_numbers<[1], [0], [0], [1], [0, 0, 1, 1], [], []>} : vector<16x128xbf16>, vector<128x128xbf16>, vector<16x128xf32> -> vector<16x128xf32>
    %c0_15 = arith.constant 0 : index
    %c0_16 = arith.constant 0 : index
    %19 = vector.load %arg7[%c0_15, %c0_16] : memref<1x128xf32, #tpu.memory_space<vmem>>, vector<1x128xf32>
    %20 = vector.broadcast %19 : vector<1x128xf32> to vector<16x128xf32>
    %21 = arith.addf %18, %20 : vector<16x128xf32>
    %cst_17 = arith.constant 0.000000e+00 : f32
    %22 = vector.broadcast %cst_17 : f32 to vector<16x128xf32>
    %23 = arith.maximumf %21, %22 : vector<16x128xf32>
    %24 = arith.truncf %23 : vector<16x128xf32> to vector<16x128xbf16>
    %c0_18 = arith.constant 0 : index
    %c0_19 = arith.constant 0 : index
    %25 = vector.load %arg8[%c0_18, %c0_19] : memref<16x128xbf16, #tpu.memory_space<vmem>>, vector<16x128xbf16>
    tpu.vector_store %arg8[%c0_18, %c0_19], %24 {strides = array<i32>} : memref<16x128xbf16, #tpu.memory_space<vmem>>, vector<16x128xbf16>,
    return
  }
  func.func @transform_0(%arg0: i32) -> (i32, i32) {
    %c0_i32 = arith.constant 0 : i32
    %c0_i32_0 = arith.constant 0 : i32
    return %arg0, %c0_i32 : i32, i32
  }
  func.func @transform_1(%arg0: i32) -> (i32, i32) {
    %c0_i32 = arith.constant 0 : i32
    %c0_i32_0 = arith.constant 0 : i32
    %c0_i32_1 = arith.constant 0 : i32
    return %c0_i32, %c0_i32_0 : i32, i32
  }
  func.func @transform_2(%arg0: i32) -> (i32, i32) {
    %c0_i32 = arith.constant 0 : i32
    %c0_i32_0 = arith.constant 0 : i32
    %c0_i32_1 = arith.constant 0 : i32
    return %c0_i32, %c0_i32_0 : i32, i32
  }
  func.func @transform_3(%arg0: i32) -> (i32, i32) {
    %c0_i32 = arith.constant 0 : i32
    %c0_i32_0 = arith.constant 0 : i32
    %c0_i32_1 = arith.constant 0 : i32
    return %c0_i32, %c0_i32_0 : i32, i32
  }
  func.func @transform_4(%arg0: i32) -> (i32, i32) {
    %c0_i32 = arith.constant 0 : i32
    %c0_i32_0 = arith.constant 0 : i32
    %c0_i32_1 = arith.constant 0 : i32
    return %c0_i32, %c0_i32_0 : i32, i32
  }
  func.func @transform_5(%arg0: i32) -> (i32, i32) {
    %c0_i32 = arith.constant 0 : i32
    %c0_i32_0 = arith.constant 0 : i32
    %c0_i32_1 = arith.constant 0 : i32
    return %c0_i32, %c0_i32_0 : i32, i32
  }
  func.func @transform_6(%arg0: i32) -> (i32, i32) {
    %c0_i32 = arith.constant 0 : i32
    %c0_i32_0 = arith.constant 0 : i32
    %c0_i32_1 = arith.constant 0 : i32
    return %c0_i32, %c0_i32_0 : i32, i32
  }
  func.func @transform_7(%arg0: i32) -> (i32, i32) {
    %c0_i32 = arith.constant 0 : i32
    %c0_i32_0 = arith.constant 0 : i32
    return %arg0, %c0_i32 : i32, i32
  }
}

</mosaic_0001>

<bundles_post_ra>
// kernel: ninnet_forward.8
= control target key start
LH: loop header
LB: loop body
LE: loop exit
PB: predicated region body
PF: predicated region fallthrough
CT: control target
= control target key end

     0   :  { %s2013_s24 = smov 0   ;;  %s2385_s0 = inlined_call_operand.vmem [shape: bf16[480,128], index: 0, kind: input, shape index: {}]   ;;  %s2386_s1 = inlined_call_operand.vmem [shape: bf16[128,128], index: 1, kind: input, shape index: {}]   ;;  %s2387_s2 = inlined_call_operand.vmem [shape: f32[1,128], index: 2, kind: input, shape index: {}]   ;;  %s2388_s3 = inlined_call_operand.vmem [shape: bf16[128,128], index: 3, kind: input, shape index: {}]   ;;  %s2389_s4 = inlined_call_operand.vmem [shape: f32[1,128], index: 4, kind: input, shape index: {}]   ;;  %s2390_s5 = inlined_call_operand.vmem [shape: bf16[128,128], index: 5, kind: input, shape index: {}]   ;;  %s2391_s6 = inlined_call_operand.vmem [shape: f32[1,128], index: 6, kind: input, shape index: {}]   ;;  %s2392_s7 = inlined_call_operand.vmem [shape: bf16[480,128], index: 7, kind: output, shape index: {}]  }
   0x1 LB: > { %s1401_s25 = sadd.s32 4294967295, %s1969_s24   ;;  %p1405_p0 = scmp.ge.s32.totalorder %s1969_s24, 1  ;;  %s1969_s24 = sphi %s2013_s24, %s17_s24  }
   0x2   : > { %p238_p1 = scmp.lt.s32.totalorder %s1969_s24, 3 }
   0x4   : > { %p239_p2 = pnand %p1405_p0, %p238_p1 }
   0x5   : > { %v1924_v0 = vld [vmem:[%s2386_s1] sm:$0xff] (!%p239_p2)   ;;  %v1971_v1 = vmov (!%p239_p2), 0.0   ;;  %v1925_v2 = vld [vmem:[%s2386_s1 + $0x8] sm:$0xff] (!%p239_p2)   ;;  %vm1972_vm0 = vmmov (!%p239_p2), 0   ;;  %s270_s30 = smul.u32 (!%p239_p2), 30, %s1401_s25  ;;  %v1926_v3 = vld [vmem:[%s2386_s1 + $0x10] sm:$0xff] (!%p239_p2)  }
   0x6   : > { %242 = sbr.rel (%p239_p2) target bundleno = 811 (0x32b), region = 48  ;;  %1670 = vmatprep.subr.bf16.mxu0 (!%p239_p2), %v1971_v1  ;;  %1898 = vmatprep.subr.bf16.mxu1 (!%p239_p2), %v1971_v1  ;;  %v1927_v4 = vld [vmem:[%s2386_s1 + $0x18] sm:$0xff] (!%p239_p2)   ;;  %v1928_v5 = vld [vmem:[%s2386_s1 + $0x20] sm:$0xff] (!%p239_p2)   ;;  %v1929_v6 = vld [vmem:[%s2386_s1 + $0x28] sm:$0xff] (!%p239_p2)  }
   0x7   : > { %1671 = vmatpush3.bf16.msra.mxu0 (!%p239_p2), %v1924_v0  ;;  %1686 = vmatprep.mubr.msk.bf16.mxu0 (!%p239_p2), %vm1972_vm0, %v1971_v1  ;;  %p271_p3 = scmp.lt.s32.totalorder (!%p239_p2), %s270_s30, 59  ;;  %v1930_v7 = vld [vmem:[%s2386_s1 + $0x30] sm:$0xff] (!%p239_p2)   ;;  %v1931_v8 = vld [vmem:[%s2386_s1 + $0x38] sm:$0xff] (!%p239_p2)   ;;  %v1947_v10 = vld [vmem:[%s2388_s3] sm:$0xff] (!%p239_p2)  }
   0x8   : > { %1672 = vmatprep.subr.bf16.mxu0 (!%p239_p2), %v1971_v1  ;;  %1906 = vmatpush3.bf16.msra.mxu1 (!%p239_p2), %v1924_v0  ;;  %v1948_v12 = vld [vmem:[%s2388_s3 + $0x8] sm:$0xff] (!%p239_p2)   ;;  %v1949_v15 = vld [vmem:[%s2388_s3 + $0x10] sm:$0xff] (!%p239_p2)   ;;  %v1950_v16 = vld [vmem:[%s2388_s3 + $0x18] sm:$0xff] (!%p239_p2)  }
   0x9   : > { %1899 = vmatprep.subr.bf16.mxu1 (!%p239_p2), %v1971_v1  ;;  %1718 = vmatprep.mubr.msk.bf16.mxu1 (!%p239_p2), %vm1972_vm0, %v1971_v1  ;;  %v1951_v19 = vld [vmem:[%s2388_s3 + $0x20] sm:$0xff] (!%p239_p2)   ;;  %v1952_v20 = vld [vmem:[%s2388_s3 + $0x28] sm:$0xff] (!%p239_p2)   ;;  %v1953_v23 = vld [vmem:[%s2388_s3 + $0x30] sm:$0xff] (!%p239_p2)  }
   0xa   : > { %v1954_v31 = vld [vmem:[%s2388_s3 + $0x38] sm:$0xff] (!%p239_p2)   ;;  %v1955_v32 = vld [vmem:[%s2390_s5] sm:$0xff] (!%p239_p2)   ;;  %v1956_v33 = vld [vmem:[%s2390_s5 + $0x8] sm:$0xff] (!%p239_p2)  }
   0xb   : > { %1673 = vmatpush3.bf16.msra.mxu0 (!%p239_p2), %v1925_v2  ;;  %v2163_v34 = vld [vmem:[%s2387_s2] ss:$0 sm:$0xff] (!%p239_p2)  ;;  %v1957_v35 = vld [vmem:[%s2390_s5 + $0x10] sm:$0xff] (!%p239_p2)   ;;  %v1958_v46 = vld [vmem:[%s2390_s5 + $0x18] sm:$0xff] (!%p239_p2)  }
   0xc   : > { %1674 = vmatprep.subr.bf16.mxu0 (!%p239_p2), %v1971_v1  ;;  %1907 = vmatpush3.bf16.msra.mxu1 (!%p239_p2), %v1925_v2  ;;  %v1959_v54 = vld [vmem:[%s2390_s5 + $0x20] sm:$0xff] (!%p239_p2)  }
   0xd   : > { %s2394_s30 = smov (!%p271_p3, %s270_s30), 59  ;;  %1900 = vmatprep.subr.bf16.mxu1 %v1971_v1 }
   0xe   : > { %s1406_s10 = sshll.u32 %s2394_s30, 2 }
   0xf   : > { %s2048_s13 = scalar_lea.vmem %s2385_s0, %s1406_s10  ;;  %1675 = vmatpush3.bf16.msra.mxu0 %v1926_v3 }
  0x10   : > { %1676 = vmatprep.subr.bf16.mxu0 %v1971_v1  ;;  %1908 = vmatpush3.bf16.msra.mxu1 %v1926_v3  ;;  %v1932_v9 = vld [vmem:[%s2048_s13] sm:$0xff]   ;;  %v1933_v13 = vld [vmem:[%s2048_s13 + $0x8] sm:$0xff]   ;;  %v1934_v17 = vld [vmem:[%s2048_s13 + $0x10] sm:$0xff]  }
  0x11   : > { %1901 = vmatprep.subr.bf16.mxu1 %v1971_v1  ;;  %v1940_v11 = vld [vmem:[%s2048_s13 + $0x40] sm:$0xff]   ;;  %v1941_v14 = vld [vmem:[%s2048_s13 + $0x48] sm:$0xff]   ;;  %v1942_v18 = vld [vmem:[%s2048_s13 + $0x50] sm:$0xff]  }
  0x12   : > { %v1935_v21 = vld [vmem:[%s2048_s13 + $0x18] sm:$0xff]   ;;  %v1936_v24 = vld [vmem:[%s2048_s13 + $0x20] sm:$0xff]   ;;  %v1937_v26 = vld [vmem:[%s2048_s13 + $0x28] sm:$0xff]  }
  0x13   : > { %1677 = vmatpush3.bf16.msra.mxu0 %v1927_v4  ;;  %v1943_v22 = vld [vmem:[%s2048_s13 + $0x58] sm:$0xff]   ;;  %v1944_v25 = vld [vmem:[%s2048_s13 + $0x60] sm:$0xff]   ;;  %v1945_v27 = vld [vmem:[%s2048_s13 + $0x68] sm:$0xff]  }
  0x14   : > { %1678 = vmatprep.subr.bf16.mxu0 %v1971_v1  ;;  %1909 = vmatpush3.bf16.msra.mxu1 %v1927_v4  ;;  %v1938_v28 = vld [vmem:[%s2048_s13 + $0x30] sm:$0xff]   ;;  %v1939_v30 = vld [vmem:[%s2048_s13 + $0x38] sm:$0xff]   ;;  %v1960_v3 = vld [vmem:[%s2390_s5 + $0x28] sm:$0xff]  }
  0x15   : > { %1902 = vmatprep.subr.bf16.mxu1 %v1971_v1  ;;  %v1946_v29 = vld [vmem:[%s2048_s13 + $0x70] sm:$0xff]   ;;  %s2337_s13 = scalar_lea.vmem %s2392_s7, %s1406_s10 }
  0x17   : > { %1679 = vmatpush3.bf16.msra.mxu0 %v1928_v5 }
  0x18   : > { %1680 = vmatprep.subr.bf16.mxu0 %v1971_v1  ;;  %1910 = vmatpush3.bf16.msra.mxu1 %v1928_v5 }
  0x19   : > { %1903 = vmatprep.subr.bf16.mxu1 %v1971_v1 }
  0x1b   : > { %1681 = vmatpush3.bf16.msra.mxu0 %v1929_v6 }
  0x1c   : > { %1682 = vmatprep.subr.bf16.mxu0 %v1971_v1  ;;  %1911 = vmatpush3.bf16.msra.mxu1 %v1929_v6 }
  0x1d   : > { %1904 = vmatprep.subr.bf16.mxu1 %v1971_v1 }
  0x1f   : > { %1683 = vmatpush3.bf16.msra.mxu0 %v1930_v7 }
  0x20   : > { %1684 = vmatprep.subr.bf16.mxu0 %v1971_v1  ;;  %1912 = vmatpush3.bf16.msra.mxu1 %v1930_v7 }
  0x21   : > { %1905 = vmatprep.subr.bf16.mxu1 %v1971_v1 }
  0x23   : > { %1685 = vmatpush3.bf16.msra.mxu0 %v1931_v8 }
  0x24   : > { %1913 = vmatpush3.bf16.msra.mxu1 %v1931_v8  ;;  %1822 = vmatprep.subr.bf16.mxu0 %v1971_v1 }
  0x25   : > { %1746 = vmatprep.subr.bf16.mxu1 %v1971_v1 }
  0x26   : > { %1687 = vmatmul.mubr.bf16.vlgmr.msra.gmra.mrb[0].mxu0 %v1932_v9 }
  0x27   : > { %1690 = vmatprep.mubr.msk.bf16.mxu0 %vm1972_vm0, %v1971_v1  ;;  %1719 = vmatmul.mubr.bf16.vlgmr.msra.gmra.mrb[0].mxu1 %v1940_v11  ;;  %v1961_v11 = vld [vmem:[%s2390_s5 + $0x30] sm:$0xff]  }
  0x28   : > { %1722 = vmatprep.mubr.msk.bf16.mxu1 %vm1972_vm0, %v1971_v1  ;;  %1747 = vmatpush3.bf16.msra.mxu1 %v1947_v10 }
  0x29   : > { %1748 = vmatprep.subr.bf16.mxu1 %v1971_v1  ;;  %1823 = vmatpush3.bf16.msra.mxu0 %v1955_v32 }
  0x2a   : > { %1824 = vmatprep.subr.bf16.mxu0 %v1971_v1 }
  0x2c   : > { %1749 = vmatpush3.bf16.msra.mxu1 %v1948_v12 }
  0x2d   : > { %1750 = vmatprep.subr.bf16.mxu1 %v1971_v1  ;;  %1825 = vmatpush3.bf16.msra.mxu0 %v1956_v33 }
  0x2e   : > { %1691 = vmatmul.mubr.bf16.gmra.mrb[4].mxu0 %v1933_v13  ;;  %1826 = vmatprep.subr.bf16.mxu0 %v1971_v1 }
  0x2f   : > { %1694 = vmatprep.mubr.msk.bf16.mxu0 %vm1972_vm0, %v1971_v1  ;;  %1723 = vmatmul.mubr.bf16.gmra.mrb[4].mxu1 %v1941_v14 }
  0x30   : > { %1726 = vmatprep.mubr.msk.bf16.mxu1 %vm1972_vm0, %v1971_v1  ;;  %1751 = vmatpush3.bf16.msra.mxu1 %v1949_v15 }
  0x31   : > { %1752 = vmatprep.subr.bf16.mxu1 %v1971_v1  ;;  %1827 = vmatpush3.bf16.msra.mxu0 %v1957_v35 }
  0x32   : > { %1828 = vmatprep.subr.bf16.mxu0 %v1971_v1 }
  0x34   : > { %1753 = vmatpush3.bf16.msra.mxu1 %v1950_v16 }
  0x35   : > { %1754 = vmatprep.subr.bf16.mxu1 %v1971_v1  ;;  %1829 = vmatpush3.bf16.msra.mxu0 %v1958_v46 }
  0x36   : > { %1695 = vmatmul.mubr.bf16.gmra.mrb[8].mxu0 %v1934_v17  ;;  %1830 = vmatprep.subr.bf16.mxu0 %v1971_v1 }
  0x37   : > { %1698 = vmatprep.mubr.msk.bf16.mxu0 %vm1972_vm0, %v1971_v1  ;;  %1727 = vmatmul.mubr.bf16.gmra.mrb[8].mxu1 %v1942_v18 }
  0x38   : > { %1730 = vmatprep.mubr.msk.bf16.mxu1 %vm1972_vm0, %v1971_v1  ;;  %1755 = vmatpush3.bf16.msra.mxu1 %v1951_v19 }
  0x39   : > { %1756 = vmatprep.subr.bf16.mxu1 %v1971_v1  ;;  %1831 = vmatpush3.bf16.msra.mxu0 %v1959_v54 }
  0x3a   : > { %1832 = vmatprep.subr.bf16.mxu0 %v1971_v1 }
  0x3c   : > { %1757 = vmatpush3.bf16.msra.mxu1 %v1952_v20 }
  0x3d   : > { %1758 = vmatprep.subr.bf16.mxu1 %v1971_v1  ;;  %1833 = vmatpush3.bf16.msra.mxu0 %v1960_v3 }
  0x3e   : > { %1699 = vmatmul.mubr.bf16.gmra.mrb[12].mxu0 %v1935_v21  ;;  %1834 = vmatprep.subr.bf16.mxu0 %v1971_v1 }
  0x3f   : > { %1702 = vmatprep.mubr.msk.bf16.mxu0 %vm1972_vm0, %v1971_v1  ;;  %1731 = vmatmul.mubr.bf16.gmra.mrb[12].mxu1 %v1943_v22 }
  0x40   : > { %1734 = vmatprep.mubr.msk.bf16.mxu1 %vm1972_vm0, %v1971_v1  ;;  %1759 = vmatpush3.bf16.msra.mxu1 %v1953_v23 }
  0x41   : > { %1760 = vmatprep.subr.bf16.mxu1 %v1971_v1  ;;  %1835 = vmatpush3.bf16.msra.mxu0 %v1961_v11 }
  0x42   : > { %1836 = vmatprep.subr.bf16.mxu0 %v1971_v1 }
  0x44   : > { %1761 = vmatpush3.bf16.msra.mxu1 %v1954_v31 }
  0x46   : > { %1703 = vmatmul.mubr.bf16.gmra.mrb[16].mxu0 %v1936_v24 }
  0x47   : > { %1706 = vmatprep.mubr.msk.bf16.mxu0 %vm1972_vm0, %v1971_v1  ;;  %1735 = vmatmul.mubr.bf16.gmra.mrb[16].mxu1 %v1944_v25 }
  0x48   : > { %1738 = vmatprep.mubr.msk.bf16.mxu1 %vm1972_vm0, %v1971_v1 }
  0x4e   : > { %1707 = vmatmul.mubr.bf16.gmra.mrb[20].mxu0 %v1937_v26 }
  0x4f   : > { %1710 = vmatprep.mubr.msk.bf16.mxu0 %vm1972_vm0, %v1971_v1  ;;  %1739 = vmatmul.mubr.bf16.gmra.mrb[20].mxu1 %v1945_v27 }
  0x50   : > { %1742 = vmatprep.mubr.msk.bf16.mxu1 %vm1972_vm0, %v1971_v1 }
  0x56   : > { %1711 = vmatmul.mubr.bf16.gmra.mrb[24].mxu0 %v1938_v28 }
  0x57   : > { %1714 = vmatprep.mubr.msk.bf16.mxu0 %vm1972_vm0, %v1971_v1  ;;  %1743 = vmatmul.mubr.bf16.gmra.mrb[24].mxu1 %v1946_v29 }
  0x58   : > { %1762 = vmatprep.mubr.msk.bf16.mxu1 %vm1972_vm0, %v1971_v1 }
  0x5e   : > { %1715 = vmatmul.mubr.bf16.gmra.mrb[28].mxu0 %v1939_v30 }
  0x5f   : > { %1838 = vmatprep.mubr.msk.bf16.mxu0 %vm1972_vm0, %v1971_v1 }
  0xf9   : > { %v508_v36 = vpop.f32.mrb[0].mxu0 }
  0xfa   : > { %v509_v37 = vadd.f32 %v2163_v34, %v508_v36  ;;  %v1688_v38 = vpop.f32.mrb[1].mxu0  ;;  %v572_v39 = vpop.f32.mrb[0].mxu1 }
  0xfb   : > { %v511_v40 = vpop.f32.mrb[2].mxu0  ;;  %v573_v41 = vadd.f32 %v2163_v34, %v572_v39  ;;  %v1720_v42 = vpop.f32.mrb[1].mxu1 }
  0xfc   : > { %v512_v43 = vadd.f32 %v2163_v34, %v511_v40  ;;  %v1689_v44 = vpop.f32.mrb[3].mxu0  ;;  %v575_v45 = vpop.f32.mrb[2].mxu1  ;;  %v627_v50 = vmax.f32 %v509_v37, 0.0 }
  0xfd   : > { %v643_v47 = vmax.f32 %v573_v41, 0.0  ;;  %v576_v48 = vadd.f32 %v2163_v34, %v575_v45  ;;  %v1721_v49 = vpop.f32.mrb[3].mxu1 }
  0xfe   : > { %v628_v51 = vmax.f32 %v512_v43, 0.0 }
  0xff   : > { %v644_v52 = vmax.f32 %v576_v48, 0.0 }
 0x100   : > { %v657_v53 = vpack.c.bf16 %v628_v51, %v627_v50 }
 0x101   : > { %v516_v55 = vpop.f32.mrb[4].mxu0  ;;  %v2180_v56 = vpack.c.bf16 %v644_v52, %v643_v47 }
 0x102   : > { %v517_v57 = vadd.f32 %v2163_v34, %v516_v55  ;;  %v1692_v58 = vpop.f32.mrb[5].mxu0  ;;  %1763 = vmatmul.mubr.bf16.vlgmr.msra.gmra.mrb[28].mxu1 %v657_v53  ;;  %v580_v59 = vpop.f32.mrb[4].mxu1 }
 0x103   : > { %v519_v60 = vpop.f32.mrb[6].mxu0  ;;  %1766 = vmatprep.mubr.msk.bf16.mxu1 %vm1972_vm0, %v1971_v1  ;;  %v581_v61 = vadd.f32 %v2163_v34, %v580_v59  ;;  %v1724_v62 = vpop.f32.mrb[5].mxu1 }
 0x104   : > { %v520_v63 = vadd.f32 %v2163_v34, %v519_v60  ;;  %v1693_v0 = vpop.f32.mrb[7].mxu0  ;;  %v583_v2 = vpop.f32.mrb[6].mxu1  ;;  %v629_v7 = vmax.f32 %v517_v57, 0.0 }
 0x105   : > { %v645_v4 = vmax.f32 %v581_v61, 0.0  ;;  %v584_v5 = vadd.f32 %v2163_v34, %v583_v2  ;;  %v1725_v6 = vpop.f32.mrb[7].mxu1 }
 0x106   : > { %v630_v8 = vmax.f32 %v520_v63, 0.0 }
 0x107   : > { %v646_v9 = vmax.f32 %v584_v5, 0.0 }
 0x108   : > { %v658_v10 = vpack.c.bf16 %v630_v8, %v629_v7 }
 0x109   : > { %v524_v12 = vpop.f32.mrb[8].mxu0  ;;  %v2196_v13 = vpack.c.bf16 %v646_v9, %v645_v4 }
 0x10a   : > { %v525_v14 = vadd.f32 %v2163_v34, %v524_v12  ;;  %v1696_v15 = vpop.f32.mrb[9].mxu0  ;;  %1767 = vmatmul.mubr.bf16.gmra.mrb[32].mxu1 %v658_v10  ;;  %v588_v16 = vpop.f32.mrb[8].mxu1 }
 0x10b   : > { %v527_v17 = vpop.f32.mrb[10].mxu0  ;;  %1770 = vmatprep.mubr.msk.bf16.mxu1 %vm1972_vm0, %v1971_v1  ;;  %v589_v18 = vadd.f32 %v2163_v34, %v588_v16  ;;  %v1728_v19 = vpop.f32.mrb[9].mxu1 }
 0x10c   : > { %v528_v20 = vadd.f32 %v2163_v34, %v527_v17  ;;  %v1697_v21 = vpop.f32.mrb[11].mxu0  ;;  %v591_v22 = vpop.f32.mrb[10].mxu1  ;;  %v631_v26 = vmax.f32 %v525_v14, 0.0 }
 0x10d   : > { %v647_v23 = vmax.f32 %v589_v18, 0.0  ;;  %v592_v24 = vadd.f32 %v2163_v34, %v591_v22  ;;  %v1729_v25 = vpop.f32.mrb[11].mxu1 }
 0x10e   : > { %v632_v27 = vmax.f32 %v528_v20, 0.0 }
 0x10f   : > { %v648_v28 = vmax.f32 %v592_v24, 0.0 }
 0x110   : > { %v659_v29 = vpack.c.bf16 %v632_v27, %v631_v26 }
 0x111   : > { %v532_v30 = vpop.f32.mrb[12].mxu0  ;;  %v2206_v31 = vpack.c.bf16 %v648_v28, %v647_v23 }
 0x112   : > { %v533_v32 = vadd.f32 %v2163_v34, %v532_v30  ;;  %v1700_v33 = vpop.f32.mrb[13].mxu0  ;;  %1771 = vmatmul.mubr.bf16.gmra.mrb[36].mxu1 %v659_v29  ;;  %v596_v35 = vpop.f32.mrb[12].mxu1 }
 0x113   : > { %v535_v36 = vpop.f32.mrb[14].mxu0  ;;  %1774 = vmatprep.mubr.msk.bf16.mxu1 %vm1972_vm0, %v1971_v1  ;;  %v597_v37 = vadd.f32 %v2163_v34, %v596_v35  ;;  %v1732_v38 = vpop.f32.mrb[13].mxu1 }
 0x114   : > { %v536_v39 = vadd.f32 %v2163_v34, %v535_v36  ;;  %v1701_v40 = vpop.f32.mrb[15].mxu0  ;;  %v599_v41 = vpop.f32.mrb[14].mxu1  ;;  %v633_v45 = vmax.f32 %v533_v32, 0.0 }
 0x115   : > { %v649_v42 = vmax.f32 %v597_v37, 0.0  ;;  %v600_v43 = vadd.f32 %v2163_v34, %v599_v41  ;;  %v1733_v44 = vpop.f32.mrb[15].mxu1 }
 0x116   : > { %v634_v46 = vmax.f32 %v536_v39, 0.0 }
 0x117   : > { %v650_v47 = vmax.f32 %v600_v43, 0.0 }
 0x118   : > { %v660_v48 = vpack.c.bf16 %v634_v46, %v633_v45 }
 0x119   : > { %v540_v49 = vpop.f32.mrb[16].mxu0  ;;  %v2214_v50 = vpack.c.bf16 %v650_v47, %v649_v42 }
 0x11a   : > { %v541_v51 = vadd.f32 %v2163_v34, %v540_v49  ;;  %v1704_v52 = vpop.f32.mrb[17].mxu0  ;;  %1775 = vmatmul.mubr.bf16.gmra.mrb[40].mxu1 %v660_v48  ;;  %v604_v53 = vpop.f32.mrb[16].mxu1 }
 0x11b   : > { %v543_v54 = vpop.f32.mrb[18].mxu0  ;;  %1778 = vmatprep.mubr.msk.bf16.mxu1 %vm1972_vm0, %v1971_v1  ;;  %v605_v55 = vadd.f32 %v2163_v34, %v604_v53  ;;  %v1736_v57 = vpop.f32.mrb[17].mxu1 }
 0x11c   : > { %v544_v58 = vadd.f32 %v2163_v34, %v543_v54  ;;  %v1705_v59 = vpop.f32.mrb[19].mxu0  ;;  %v607_v60 = vpop.f32.mrb[18].mxu1  ;;  %v635_v0 = vmax.f32 %v541_v51, 0.0 }
 0x11d   : > { %v651_v61 = vmax.f32 %v605_v55, 0.0  ;;  %v608_v62 = vadd.f32 %v2163_v34, %v607_v60  ;;  %v1737_v63 = vpop.f32.mrb[19].mxu1 }
 0x11e   : > { %v636_v2 = vmax.f32 %v544_v58, 0.0 }
 0x11f   : > { %v652_v3 = vmax.f32 %v608_v62, 0.0 }
 0x120   : > { %v661_v4 = vpack.c.bf16 %v636_v2, %v635_v0 }
 0x121   : > { %v548_v5 = vpop.f32.mrb[20].mxu0  ;;  %v2222_v6 = vpack.c.bf16 %v652_v3, %v651_v61 }
 0x122   : > { %v549_v7 = vadd.f32 %v2163_v34, %v548_v5  ;;  %v1708_v8 = vpop.f32.mrb[21].mxu0  ;;  %1779 = vmatmul.mubr.bf16.gmra.mrb[44].mxu1 %v661_v4  ;;  %v612_v9 = vpop.f32.mrb[20].mxu1 }
 0x123   : > { %v551_v10 = vpop.f32.mrb[22].mxu0  ;;  %1782 = vmatprep.mubr.msk.bf16.mxu1 %vm1972_vm0, %v1971_v1  ;;  %v613_v11 = vadd.f32 %v2163_v34, %v612_v9  ;;  %v1740_v12 = vpop.f32.mrb[21].mxu1 }
 0x124   : > { %v552_v14 = vadd.f32 %v2163_v34, %v551_v10  ;;  %v1709_v15 = vpop.f32.mrb[23].mxu0  ;;  %v615_v16 = vpop.f32.mrb[22].mxu1  ;;  %v637_v20 = vmax.f32 %v549_v7, 0.0 }
 0x125   : > { %v653_v17 = vmax.f32 %v613_v11, 0.0  ;;  %v616_v18 = vadd.f32 %v2163_v34, %v615_v16  ;;  %v1741_v19 = vpop.f32.mrb[23].mxu1 }
 0x126   : > { %v638_v21 = vmax.f32 %v552_v14, 0.0 }
 0x127   : > { %v654_v22 = vmax.f32 %v616_v18, 0.0 }
 0x128   : > { %v662_v23 = vpack.c.bf16 %v638_v21, %v637_v20 }
 0x129   : > { %v556_v24 = vpop.f32.mrb[24].mxu0  ;;  %v670_v25 = vpack.c.bf16 %v654_v22, %v653_v17 }
 0x12a   : > { %v557_v26 = vadd.f32 %v2163_v34, %v556_v24  ;;  %v1712_v27 = vpop.f32.mrb[25].mxu0  ;;  %1783 = vmatmul.mubr.bf16.gmra.mrb[48].mxu1 %v662_v23  ;;  %v620_v28 = vpop.f32.mrb[24].mxu1 }
 0x12b   : > { %v559_v29 = vpop.f32.mrb[26].mxu0  ;;  %1786 = vmatprep.mubr.msk.bf16.mxu1 %vm1972_vm0, %v1971_v1  ;;  %v621_v30 = vadd.f32 %v2163_v34, %v620_v28  ;;  %v1744_v32 = vpop.f32.mrb[25].mxu1 }
 0x12c   : > { %v560_v33 = vadd.f32 %v2163_v34, %v559_v29  ;;  %v1713_v35 = vpop.f32.mrb[27].mxu0  ;;  %v623_v36 = vpop.f32.mrb[26].mxu1  ;;  %v639_v40 = vmax.f32 %v557_v26, 0.0 }
 0x12d   : > { %v655_v37 = vmax.f32 %v621_v30, 0.0  ;;  %v624_v38 = vadd.f32 %v2163_v34, %v623_v36  ;;  %v1745_v39 = vpop.f32.mrb[27].mxu1 }
 0x12e   : > { %v640_v41 = vmax.f32 %v560_v33, 0.0 }
 0x12f   : > { %v656_v42 = vmax.f32 %v624_v38, 0.0 }
 0x130   : > { %v663_v43 = vpack.c.bf16 %v640_v41, %v639_v40 }
 0x131   : > { %v564_v44 = vpop.f32.mrb[28].mxu0  ;;  %v671_v45 = vpack.c.bf16 %v656_v42, %v655_v37 }
 0x132   : > { %v565_v46 = vadd.f32 %v2163_v34, %v564_v44  ;;  %v1716_v47 = vpop.f32.mrb[29].mxu0  ;;  %1787 = vmatmul.mubr.bf16.gmra.mrb[52].mxu1 %v663_v43 }
 0x133   : > { %v567_v48 = vpop.f32.mrb[30].mxu0  ;;  %1790 = vmatprep.mubr.msk.bf16.mxu1 %vm1972_vm0, %v1971_v1 }
 0x134   : > { %v568_v49 = vadd.f32 %v2163_v34, %v567_v48  ;;  %v1717_v51 = vpop.f32.mrb[31].mxu0  ;;  %v641_v52 = vmax.f32 %v565_v46, 0.0  ;;  %v1962_v34 = vld [vmem:[%s2390_s5 + $0x38] sm:$0xff]  }
 0x135   : > { %1837 = vmatpush3.bf16.msra.mxu0 %v1962_v34 }
 0x136   : > { %v642_v53 = vmax.f32 %v568_v49, 0.0 }
 0x138   : > { %v664_v54 = vpack.c.bf16 %v642_v53, %v641_v52 }
 0x13a   : > { %1791 = vmatmul.mubr.bf16.gmra.mrb[56].mxu1 %v664_v54 }
 0x13b   : > { %1794 = vmatprep.mubr.msk.bf16.mxu1 %vm1972_vm0, %v1971_v1 }
 0x142   : > { %1795 = vmatmul.mubr.bf16.gmra.mrb[60].mxu1 %v2180_v56  ;;  %v2265_v56 = vld [vmem:[%s2389_s4] ss:$0 sm:$0xff] }
 0x143   : > { %1798 = vmatprep.mubr.msk.bf16.mxu1 %vm1972_vm0, %v1971_v1 }
 0x14a   : > { %1799 = vmatmul.mubr.bf16.gmra.mrb[64].mxu1 %v2196_v13 }
 0x14b   : > { %1802 = vmatprep.mubr.msk.bf16.mxu1 %vm1972_vm0, %v1971_v1 }
 0x152   : > { %1803 = vmatmul.mubr.bf16.gmra.mrb[68].mxu1 %v2206_v31 }
 0x153   : > { %1806 = vmatprep.mubr.msk.bf16.mxu1 %vm1972_vm0, %v1971_v1 }
 0x15a   : > { %1807 = vmatmul.mubr.bf16.gmra.mrb[72].mxu1 %v2214_v50 }
 0x15b   : > { %1810 = vmatprep.mubr.msk.bf16.mxu1 %vm1972_vm0, %v1971_v1 }
 0x162   : > { %1811 = vmatmul.mubr.bf16.gmra.mrb[76].mxu1 %v2222_v6 }
 0x163   : > { %1814 = vmatprep.mubr.msk.bf16.mxu1 %vm1972_vm0, %v1971_v1 }
 0x16a   : > { %1815 = vmatmul.mubr.bf16.gmra.mrb[80].mxu1 %v670_v25 }
 0x16b   : > { %1818 = vmatprep.mubr.msk.bf16.mxu1 %vm1972_vm0, %v1971_v1 }
 0x172   : > { %1819 = vmatmul.mubr.bf16.gmra.mrb[84].mxu1 %v671_v45 }
 0x1d5   : > { %v777_v13 = vpop.f32.mrb[28].mxu1 }
 0x1d6   : > { %v778_v31 = vadd.f32 %v2265_v56, %v777_v13  ;;  %v1764_v50 = vpop.f32.mrb[29].mxu1 }
 0x1d7   : > { %v780_v55 = vpop.f32.mrb[30].mxu1 }
 0x1d8   : > { %v781_v57 = vadd.f32 %v2265_v56, %v780_v55  ;;  %v1765_v58 = vpop.f32.mrb[31].mxu1  ;;  %v896_v59 = vmax.f32 %v778_v31, 0.0 }
 0x1da   : > { %v897_v60 = vmax.f32 %v781_v57, 0.0 }
 0x1dc   : > { %v926_v61 = vpack.c.bf16 %v897_v60, %v896_v59 }
 0x1dd   : > { %v785_v62 = vpop.f32.mrb[32].mxu1 }
 0x1de   : > { %v786_v63 = vadd.f32 %v2265_v56, %v785_v62  ;;  %v1768_v0 = vpop.f32.mrb[33].mxu1  ;;  %1839 = vmatmul.mubr.bf16.vlgmr.msra.gmra.mrb[32].mxu0 %v926_v61 }
 0x1df   : > { %v788_v2 = vpop.f32.mrb[34].mxu1  ;;  %1842 = vmatprep.mubr.msk.bf16.mxu0 %vm1972_vm0, %v1971_v1 }
 0x1e0   : > { %v789_v3 = vadd.f32 %v2265_v56, %v788_v2  ;;  %v1769_v4 = vpop.f32.mrb[35].mxu1  ;;  %v898_v5 = vmax.f32 %v786_v63, 0.0 }
 0x1e2   : > { %v899_v6 = vmax.f32 %v789_v3, 0.0 }
 0x1e4   : > { %v927_v7 = vpack.c.bf16 %v899_v6, %v898_v5 }
 0x1e5   : > { %v793_v8 = vpop.f32.mrb[36].mxu1 }
 0x1e6   : > { %v794_v9 = vadd.f32 %v2265_v56, %v793_v8  ;;  %v1772_v10 = vpop.f32.mrb[37].mxu1  ;;  %1843 = vmatmul.mubr.bf16.gmra.mrb[36].mxu0 %v927_v7 }
 0x1e7   : > { %v796_v11 = vpop.f32.mrb[38].mxu1  ;;  %1846 = vmatprep.mubr.msk.bf16.mxu0 %vm1972_vm0, %v1971_v1 }
 0x1e8   : > { %v797_v12 = vadd.f32 %v2265_v56, %v796_v11  ;;  %v1773_v14 = vpop.f32.mrb[39].mxu1  ;;  %v900_v15 = vmax.f32 %v794_v9, 0.0 }
 0x1ea   : > { %v901_v16 = vmax.f32 %v797_v12, 0.0 }
 0x1ec   : > { %v928_v17 = vpack.c.bf16 %v901_v16, %v900_v15 }
 0x1ed   : > { %v801_v18 = vpop.f32.mrb[40].mxu1 }
 0x1ee   : > { %v802_v19 = vadd.f32 %v2265_v56, %v801_v18  ;;  %v1776_v20 = vpop.f32.mrb[41].mxu1  ;;  %1847 = vmatmul.mubr.bf16.gmra.mrb[40].mxu0 %v928_v17 }
 0x1ef   : > { %v804_v21 = vpop.f32.mrb[42].mxu1  ;;  %1850 = vmatprep.mubr.msk.bf16.mxu0 %vm1972_vm0, %v1971_v1 }
 0x1f0   : > { %v805_v22 = vadd.f32 %v2265_v56, %v804_v21  ;;  %v1777_v23 = vpop.f32.mrb[43].mxu1  ;;  %v902_v24 = vmax.f32 %v802_v19, 0.0 }
 0x1f2   : > { %v903_v25 = vmax.f32 %v805_v22, 0.0 }
 0x1f4   : > { %v929_v26 = vpack.c.bf16 %v903_v25, %v902_v24 }
 0x1f5   : > { %v809_v27 = vpop.f32.mrb[44].mxu1 }
 0x1f6   : > { %v810_v28 = vadd.f32 %v2265_v56, %v809_v27  ;;  %v1780_v29 = vpop.f32.mrb[45].mxu1  ;;  %1851 = vmatmul.mubr.bf16.gmra.mrb[44].mxu0 %v929_v26 }
 0x1f7   : > { %v812_v30 = vpop.f32.mrb[46].mxu1  ;;  %1854 = vmatprep.mubr.msk.bf16.mxu0 %vm1972_vm0, %v1971_v1 }
 0x1f8   : > { %v813_v32 = vadd.f32 %v2265_v56, %v812_v30  ;;  %v1781_v33 = vpop.f32.mrb[47].mxu1  ;;  %v904_v35 = vmax.f32 %v810_v28, 0.0 }
 0x1fa   : > { %v905_v36 = vmax.f32 %v813_v32, 0.0 }
 0x1fc   : > { %v930_v37 = vpack.c.bf16 %v905_v36, %v904_v35 }
 0x1fd   : > { %v817_v38 = vpop.f32.mrb[48].mxu1 }
 0x1fe   : > { %v818_v39 = vadd.f32 %v2265_v56, %v817_v38  ;;  %v1784_v40 = vpop.f32.mrb[49].mxu1  ;;  %1855 = vmatmul.mubr.bf16.gmra.mrb[48].mxu0 %v930_v37 }
 0x1ff   : > { %v820_v41 = vpop.f32.mrb[50].mxu1  ;;  %1858 = vmatprep.mubr.msk.bf16.mxu0 %vm1972_vm0, %v1971_v1 }
 0x200   : > { %v821_v42 = vadd.f32 %v2265_v56, %v820_v41  ;;  %v1785_v43 = vpop.f32.mrb[51].mxu1  ;;  %v906_v44 = vmax.f32 %v818_v39, 0.0 }
 0x202   : > { %v907_v45 = vmax.f32 %v821_v42, 0.0 }
 0x204   : > { %v931_v46 = vpack.c.bf16 %v907_v45, %v906_v44 }
 0x205   : > { %v825_v47 = vpop.f32.mrb[52].mxu1 }
 0x206   : > { %v826_v48 = vadd.f32 %v2265_v56, %v825_v47  ;;  %v1788_v49 = vpop.f32.mrb[53].mxu1  ;;  %1859 = vmatmul.mubr.bf16.gmra.mrb[52].mxu0 %v931_v46 }
 0x207   : > { %v828_v51 = vpop.f32.mrb[54].mxu1  ;;  %1862 = vmatprep.mubr.msk.bf16.mxu0 %vm1972_vm0, %v1971_v1 }
 0x208   : > { %v829_v52 = vadd.f32 %v2265_v56, %v828_v51  ;;  %v1789_v53 = vpop.f32.mrb[55].mxu1  ;;  %v908_v54 = vmax.f32 %v826_v48, 0.0 }
 0x20a   : > { %v909_v34 = vmax.f32 %v829_v52, 0.0 }
 0x20c   : > { %v932_v13 = vpack.c.bf16 %v909_v34, %v908_v54 }
 0x20d   : > { %v833_v31 = vpop.f32.mrb[56].mxu1 }
 0x20e   : > { %v834_v50 = vadd.f32 %v2265_v56, %v833_v31  ;;  %v1792_v55 = vpop.f32.mrb[57].mxu1  ;;  %1863 = vmatmul.mubr.bf16.gmra.mrb[56].mxu0 %v932_v13 }
 0x20f   : > { %v836_v57 = vpop.f32.mrb[58].mxu1  ;;  %1866 = vmatprep.mubr.msk.bf16.mxu0 %vm1972_vm0, %v1971_v1 }
 0x210   : > { %v837_v58 = vadd.f32 %v2265_v56, %v836_v57  ;;  %v1793_v59 = vpop.f32.mrb[59].mxu1  ;;  %v910_v60 = vmax.f32 %v834_v50, 0.0 }
 0x212   : > { %v911_v61 = vmax.f32 %v837_v58, 0.0 }
 0x214   : > { %v933_v62 = vpack.c.bf16 %v911_v61, %v910_v60 }
 0x215   : > { %v841_v63 = vpop.f32.mrb[60].mxu1 }
 0x216   : > { %v842_v0 = vadd.f32 %v2265_v56, %v841_v63  ;;  %v1796_v2 = vpop.f32.mrb[61].mxu1  ;;  %1867 = vmatmul.mubr.bf16.gmra.mrb[60].mxu0 %v933_v62 }
 0x217   : > { %v844_v3 = vpop.f32.mrb[62].mxu1  ;;  %1870 = vmatprep.mubr.msk.bf16.mxu0 %vm1972_vm0, %v1971_v1 }
 0x218   : > { %v845_v4 = vadd.f32 %v2265_v56, %v844_v3  ;;  %v1797_v5 = vpop.f32.mrb[63].mxu1  ;;  %v912_v6 = vmax.f32 %v842_v0, 0.0  ;;  %v2328_v0 = vld [vmem:[%s2391_s6] ss:$0 sm:$0xff] }
 0x21a   : > { %v913_v7 = vmax.f32 %v845_v4, 0.0 }
 0x21c   : > { %v934_v8 = vpack.c.bf16 %v913_v7, %v912_v6 }
 0x21d   : > { %v849_v9 = vpop.f32.mrb[64].mxu1 }
 0x21e   : > { %v850_v10 = vadd.f32 %v2265_v56, %v849_v9  ;;  %v1800_v11 = vpop.f32.mrb[65].mxu1  ;;  %1871 = vmatmul.mubr.bf16.gmra.mrb[64].mxu0 %v934_v8 }
 0x21f   : > { %v852_v12 = vpop.f32.mrb[66].mxu1  ;;  %1874 = vmatprep.mubr.msk.bf16.mxu0 %vm1972_vm0, %v1971_v1 }
 0x220   : > { %v853_v14 = vadd.f32 %v2265_v56, %v852_v12  ;;  %v1801_v15 = vpop.f32.mrb[67].mxu1  ;;  %v914_v16 = vmax.f32 %v850_v10, 0.0 }
 0x222   : > { %v915_v17 = vmax.f32 %v853_v14, 0.0 }
 0x224   : > { %v935_v18 = vpack.c.bf16 %v915_v17, %v914_v16 }
 0x225   : > { %v857_v19 = vpop.f32.mrb[68].mxu1 }
 0x226   : > { %v858_v20 = vadd.f32 %v2265_v56, %v857_v19  ;;  %v1804_v21 = vpop.f32.mrb[69].mxu1  ;;  %1875 = vmatmul.mubr.bf16.gmra.mrb[68].mxu0 %v935_v18 }
 0x227   : > { %v860_v22 = vpop.f32.mrb[70].mxu1  ;;  %1878 = vmatprep.mubr.msk.bf16.mxu0 %vm1972_vm0, %v1971_v1 }
 0x228   : > { %v861_v23 = vadd.f32 %v2265_v56, %v860_v22  ;;  %v1805_v24 = vpop.f32.mrb[71].mxu1  ;;  %v916_v25 = vmax.f32 %v858_v20, 0.0 }
 0x22a   : > { %v917_v26 = vmax.f32 %v861_v23, 0.0 }
 0x22c   : > { %v936_v27 = vpack.c.bf16 %v917_v26, %v916_v25 }
 0x22d   : > { %v865_v28 = vpop.f32.mrb[72].mxu1 }
 0x22e   : > { %v866_v29 = vadd.f32 %v2265_v56, %v865_v28  ;;  %v1808_v30 = vpop.f32.mrb[73].mxu1  ;;  %1879 = vmatmul.mubr.bf16.gmra.mrb[72].mxu0 %v936_v27 }
 0x22f   : > { %v868_v32 = vpop.f32.mrb[74].mxu1  ;;  %1882 = vmatprep.mubr.msk.bf16.mxu0 %vm1972_vm0, %v1971_v1 }
 0x230   : > { %v869_v33 = vadd.f32 %v2265_v56, %v868_v32  ;;  %v1809_v35 = vpop.f32.mrb[75].mxu1  ;;  %v918_v36 = vmax.f32 %v866_v29, 0.0 }
 0x232   : > { %v919_v37 = vmax.f32 %v869_v33, 0.0 }
 0x234   : > { %v937_v38 = vpack.c.bf16 %v919_v37, %v918_v36 }
 0x235   : > { %v873_v39 = vpop.f32.mrb[76].mxu1 }
 0x236   : > { %v874_v40 = vadd.f32 %v2265_v56, %v873_v39  ;;  %v1812_v41 = vpop.f32.mrb[77].mxu1  ;;  %1883 = vmatmul.mubr.bf16.gmra.mrb[76].mxu0 %v937_v38 }
 0x237   : > { %v876_v42 = vpop.f32.mrb[78].mxu1  ;;  %1886 = vmatprep.mubr.msk.bf16.mxu0 %vm1972_vm0, %v1971_v1 }
 0x238   : > { %v877_v43 = vadd.f32 %v2265_v56, %v876_v42  ;;  %v1813_v44 = vpop.f32.mrb[79].mxu1  ;;  %v920_v45 = vmax.f32 %v874_v40, 0.0 }
 0x23a   : > { %v921_v46 = vmax.f32 %v877_v43, 0.0 }
 0x23c   : > { %v938_v47 = vpack.c.bf16 %v921_v46, %v920_v45 }
 0x23d   : > { %v881_v48 = vpop.f32.mrb[80].mxu1 }
 0x23e   : > { %v882_v49 = vadd.f32 %v2265_v56, %v881_v48  ;;  %v1816_v51 = vpop.f32.mrb[81].mxu1  ;;  %1887 = vmatmul.mubr.bf16.gmra.mrb[80].mxu0 %v938_v47 }
 0x23f   : > { %v884_v52 = vpop.f32.mrb[82].mxu1  ;;  %1890 = vmatprep.mubr.msk.bf16.mxu0 %vm1972_vm0, %v1971_v1 }
 0x240   : > { %v885_v53 = vadd.f32 %v2265_v56, %v884_v52  ;;  %v1817_v54 = vpop.f32.mrb[83].mxu1  ;;  %v922_v34 = vmax.f32 %v882_v49, 0.0 }
 0x242   : > { %v923_v13 = vmax.f32 %v885_v53, 0.0 }
 0x244   : > { %v939_v31 = vpack.c.bf16 %v923_v13, %v922_v34 }
 0x245   : > { %v889_v50 = vpop.f32.mrb[84].mxu1 }
 0x246   : > { %v890_v55 = vadd.f32 %v2265_v56, %v889_v50  ;;  %v1820_v57 = vpop.f32.mrb[85].mxu1  ;;  %1891 = vmatmul.mubr.bf16.gmra.mrb[84].mxu0 %v939_v31 }
 0x247   : > { %v892_v58 = vpop.f32.mrb[86].mxu1  ;;  %1894 = vmatprep.mubr.msk.bf16.mxu0 %vm1972_vm0, %v1971_v1 }
 0x248   : > { %v893_v59 = vadd.f32 %v2265_v56, %v892_v58  ;;  %v1821_v60 = vpop.f32.mrb[87].mxu1  ;;  %v924_v61 = vmax.f32 %v890_v55, 0.0 }
 0x24a   : > { %v925_v62 = vmax.f32 %v893_v59, 0.0 }
 0x24c   : > { %v940_v63 = vpack.c.bf16 %v925_v62, %v924_v61 }
 0x24e   : > { %1895 = vmatmul.mubr.bf16.gmra.mrb[88].mxu0 %v940_v63 }
 0x2b1   : > { %v1046_v2 = vpop.f32.mrb[32].mxu0 }
 0x2b2   : > { %v1047_v3 = vadd.f32 %v2328_v0, %v1046_v2  ;;  %v1840_v4 = vpop.f32.mrb[33].mxu0 }
 0x2b3   : > { %v1049_v5 = vpop.f32.mrb[34].mxu0 }
 0x2b4   : > { %v1050_v1 = vadd.f32 %v2328_v0, %v1049_v5  ;;  %v1841_v6 = vpop.f32.mrb[35].mxu0  ;;  %v1165_v7 = vmax.f32 %v1047_v3, 0.0 }
 0x2b6   : > { %v1166_v56 = vmax.f32 %v1050_v1, 0.0 }
 0x2b8   : > { %v1515_v8 = vpack.c.bf16 %v1166_v56, %v1165_v7 }
 0x2b9   : > { %v1054_v9 = vpop.f32.mrb[36].mxu0 }
 0x2ba   : > { %1516 = vst [vmem:[%s2337_s13] sm:$0xff] %v1515_v8   ;;  %v1055_v10 = vadd.f32 %v2328_v0, %v1054_v9  ;;  %v1844_v11 = vpop.f32.mrb[37].mxu0 }
 0x2bb   : > { %v1057_v12 = vpop.f32.mrb[38].mxu0 }
 0x2bc   : > { %v1058_v14 = vadd.f32 %v2328_v0, %v1057_v12  ;;  %v1845_v15 = vpop.f32.mrb[39].mxu0  ;;  %v1167_v16 = vmax.f32 %v1055_v10, 0.0 }
 0x2be   : > { %v1168_v17 = vmax.f32 %v1058_v14, 0.0 }
 0x2c0   : > { %v1520_v18 = vpack.c.bf16 %v1168_v17, %v1167_v16 }
 0x2c1   : > { %v1062_v19 = vpop.f32.mrb[40].mxu0 }
 0x2c2   : > { %1587 = vst [vmem:[%s2337_s13 + $0x8] sm:$0xff] %v1520_v18   ;;  %v1063_v20 = vadd.f32 %v2328_v0, %v1062_v19  ;;  %v1848_v21 = vpop.f32.mrb[41].mxu0 }
 0x2c3   : > { %v1065_v22 = vpop.f32.mrb[42].mxu0 }
 0x2c4   : > { %v1066_v23 = vadd.f32 %v2328_v0, %v1065_v22  ;;  %v1849_v24 = vpop.f32.mrb[43].mxu0  ;;  %v1169_v25 = vmax.f32 %v1063_v20, 0.0 }
 0x2c6   : > { %v1170_v26 = vmax.f32 %v1066_v23, 0.0 }
 0x2c8   : > { %v1525_v27 = vpack.c.bf16 %v1170_v26, %v1169_v25 }
 0x2c9   : > { %v1070_v28 = vpop.f32.mrb[44].mxu0 }
 0x2ca   : > { %1588 = vst [vmem:[%s2337_s13 + $0x10] sm:$0xff] %v1525_v27   ;;  %v1071_v29 = vadd.f32 %v2328_v0, %v1070_v28  ;;  %v1852_v30 = vpop.f32.mrb[45].mxu0 }
 0x2cb   : > { %v1073_v32 = vpop.f32.mrb[46].mxu0 }
 0x2cc   : > { %v1074_v33 = vadd.f32 %v2328_v0, %v1073_v32  ;;  %v1853_v35 = vpop.f32.mrb[47].mxu0  ;;  %v1171_v36 = vmax.f32 %v1071_v29, 0.0 }
 0x2ce   : > { %v1172_v37 = vmax.f32 %v1074_v33, 0.0 }
 0x2d0   : > { %v1530_v38 = vpack.c.bf16 %v1172_v37, %v1171_v36 }
 0x2d1   : > { %v1078_v39 = vpop.f32.mrb[48].mxu0 }
 0x2d2   : > { %1589 = vst [vmem:[%s2337_s13 + $0x18] sm:$0xff] %v1530_v38   ;;  %v1079_v40 = vadd.f32 %v2328_v0, %v1078_v39  ;;  %v1856_v41 = vpop.f32.mrb[49].mxu0 }
 0x2d3   : > { %v1081_v42 = vpop.f32.mrb[50].mxu0 }
 0x2d4   : > { %v1082_v43 = vadd.f32 %v2328_v0, %v1081_v42  ;;  %v1857_v44 = vpop.f32.mrb[51].mxu0  ;;  %v1173_v45 = vmax.f32 %v1079_v40, 0.0 }
 0x2d6   : > { %v1174_v46 = vmax.f32 %v1082_v43, 0.0 }
 0x2d8   : > { %v1535_v47 = vpack.c.bf16 %v1174_v46, %v1173_v45 }
 0x2d9   : > { %v1086_v48 = vpop.f32.mrb[52].mxu0 }
 0x2da   : > { %1590 = vst [vmem:[%s2337_s13 + $0x20] sm:$0xff] %v1535_v47   ;;  %v1087_v49 = vadd.f32 %v2328_v0, %v1086_v48  ;;  %v1860_v51 = vpop.f32.mrb[53].mxu0 }
 0x2db   : > { %v1089_v52 = vpop.f32.mrb[54].mxu0 }
 0x2dc   : > { %v1090_v53 = vadd.f32 %v2328_v0, %v1089_v52  ;;  %v1861_v54 = vpop.f32.mrb[55].mxu0  ;;  %v1175_v34 = vmax.f32 %v1087_v49, 0.0 }
 0x2de   : > { %v1176_v13 = vmax.f32 %v1090_v53, 0.0 }
 0x2e0   : > { %v1540_v31 = vpack.c.bf16 %v1176_v13, %v1175_v34 }
 0x2e1   : > { %v1094_v50 = vpop.f32.mrb[56].mxu0 }
 0x2e2   : > { %1591 = vst [vmem:[%s2337_s13 + $0x28] sm:$0xff] %v1540_v31   ;;  %v1095_v55 = vadd.f32 %v2328_v0, %v1094_v50  ;;  %v1864_v57 = vpop.f32.mrb[57].mxu0 }
 0x2e3   : > { %v1097_v58 = vpop.f32.mrb[58].mxu0 }
 0x2e4   : > { %v1098_v59 = vadd.f32 %v2328_v0, %v1097_v58  ;;  %v1865_v60 = vpop.f32.mrb[59].mxu0  ;;  %v1177_v61 = vmax.f32 %v1095_v55, 0.0 }
 0x2e6   : > { %v1178_v62 = vmax.f32 %v1098_v59, 0.0 }
 0x2e8   : > { %v1545_v63 = vpack.c.bf16 %v1178_v62, %v1177_v61 }
 0x2e9   : > { %v1102_v2 = vpop.f32.mrb[60].mxu0 }
 0x2ea   : > { %1592 = vst [vmem:[%s2337_s13 + $0x30] sm:$0xff] %v1545_v63   ;;  %v1103_v3 = vadd.f32 %v2328_v0, %v1102_v2  ;;  %v1868_v4 = vpop.f32.mrb[61].mxu0 }
 0x2eb   : > { %v1105_v5 = vpop.f32.mrb[62].mxu0 }
 0x2ec   : > { %v1106_v1 = vadd.f32 %v2328_v0, %v1105_v5  ;;  %v1869_v6 = vpop.f32.mrb[63].mxu0  ;;  %v1179_v7 = vmax.f32 %v1103_v3, 0.0 }
 0x2ee   : > { %v1180_v56 = vmax.f32 %v1106_v1, 0.0 }
 0x2f0   : > { %v1550_v8 = vpack.c.bf16 %v1180_v56, %v1179_v7 }
 0x2f1   : > { %v1110_v9 = vpop.f32.mrb[64].mxu0 }
 0x2f2   : > { %1593 = vst [vmem:[%s2337_s13 + $0x38] sm:$0xff] %v1550_v8   ;;  %v1111_v10 = vadd.f32 %v2328_v0, %v1110_v9  ;;  %v1872_v11 = vpop.f32.mrb[65].mxu0 }
 0x2f3   : > { %v1113_v12 = vpop.f32.mrb[66].mxu0 }
 0x2f4   : > { %v1114_v14 = vadd.f32 %v2328_v0, %v1113_v12  ;;  %v1873_v15 = vpop.f32.mrb[67].mxu0  ;;  %v1181_v16 = vmax.f32 %v1111_v10, 0.0 }
 0x2f6   : > { %v1182_v17 = vmax.f32 %v1114_v14, 0.0 }
 0x2f8   : > { %v1555_v18 = vpack.c.bf16 %v1182_v17, %v1181_v16 }
 0x2f9   : > { %v1118_v19 = vpop.f32.mrb[68].mxu0 }
 0x2fa   : > { %1594 = vst [vmem:[%s2337_s13 + $0x40] sm:$0xff] %v1555_v18   ;;  %v1119_v20 = vadd.f32 %v2328_v0, %v1118_v19  ;;  %v1876_v21 = vpop.f32.mrb[69].mxu0 }
 0x2fb   : > { %v1121_v22 = vpop.f32.mrb[70].mxu0 }
 0x2fc   : > { %v1122_v23 = vadd.f32 %v2328_v0, %v1121_v22  ;;  %v1877_v24 = vpop.f32.mrb[71].mxu0  ;;  %v1183_v25 = vmax.f32 %v1119_v20, 0.0 }
 0x2fe   : > { %v1184_v26 = vmax.f32 %v1122_v23, 0.0 }
 0x300   : > { %v1560_v27 = vpack.c.bf16 %v1184_v26, %v1183_v25 }
 0x301   : > { %v1126_v28 = vpop.f32.mrb[72].mxu0 }
 0x302   : > { %1595 = vst [vmem:[%s2337_s13 + $0x48] sm:$0xff] %v1560_v27   ;;  %v1127_v29 = vadd.f32 %v2328_v0, %v1126_v28  ;;  %v1880_v30 = vpop.f32.mrb[73].mxu0 }
 0x303   : > { %v1129_v32 = vpop.f32.mrb[74].mxu0 }
 0x304   : > { %v1130_v33 = vadd.f32 %v2328_v0, %v1129_v32  ;;  %v1881_v35 = vpop.f32.mrb[75].mxu0  ;;  %v1185_v36 = vmax.f32 %v1127_v29, 0.0 }
 0x306   : > { %v1186_v37 = vmax.f32 %v1130_v33, 0.0 }
 0x308   : > { %v1565_v38 = vpack.c.bf16 %v1186_v37, %v1185_v36 }
 0x309   : > { %v1134_v39 = vpop.f32.mrb[76].mxu0 }
 0x30a   : > { %1596 = vst [vmem:[%s2337_s13 + $0x50] sm:$0xff] %v1565_v38   ;;  %v1135_v40 = vadd.f32 %v2328_v0, %v1134_v39  ;;  %v1884_v41 = vpop.f32.mrb[77].mxu0 }
 0x30b   : > { %v1137_v42 = vpop.f32.mrb[78].mxu0 }
 0x30c   : > { %v1138_v43 = vadd.f32 %v2328_v0, %v1137_v42  ;;  %v1885_v44 = vpop.f32.mrb[79].mxu0  ;;  %v1187_v45 = vmax.f32 %v1135_v40, 0.0 }
 0x30e   : > { %v1188_v46 = vmax.f32 %v1138_v43, 0.0 }
 0x310   : > { %v1570_v47 = vpack.c.bf16 %v1188_v46, %v1187_v45 }
 0x311   : > { %v1142_v48 = vpop.f32.mrb[80].mxu0 }
 0x312   : > { %1597 = vst [vmem:[%s2337_s13 + $0x58] sm:$0xff] %v1570_v47   ;;  %v1143_v49 = vadd.f32 %v2328_v0, %v1142_v48  ;;  %v1888_v51 = vpop.f32.mrb[81].mxu0 }
 0x313   : > { %v1145_v52 = vpop.f32.mrb[82].mxu0 }
 0x314   : > { %v1146_v53 = vadd.f32 %v2328_v0, %v1145_v52  ;;  %v1889_v54 = vpop.f32.mrb[83].mxu0  ;;  %v1189_v34 = vmax.f32 %v1143_v49, 0.0 }
 0x316   : > { %v1190_v13 = vmax.f32 %v1146_v53, 0.0 }
 0x318   : > { %v1575_v31 = vpack.c.bf16 %v1190_v13, %v1189_v34 }
 0x319   : > { %v1150_v50 = vpop.f32.mrb[84].mxu0 }
 0x31a   : > { %1598 = vst [vmem:[%s2337_s13 + $0x60] sm:$0xff] %v1575_v31   ;;  %v1151_v55 = vadd.f32 %v2328_v0, %v1150_v50  ;;  %v1892_v57 = vpop.f32.mrb[85].mxu0 }
 0x31b   : > { %v1153_v58 = vpop.f32.mrb[86].mxu0 }
 0x31c   : > { %v1154_v59 = vadd.f32 %v2328_v0, %v1153_v58  ;;  %v1893_v60 = vpop.f32.mrb[87].mxu0  ;;  %v1191_v61 = vmax.f32 %v1151_v55, 0.0 }
 0x31e   : > { %v1192_v62 = vmax.f32 %v1154_v59, 0.0 }
 0x320   : > { %v1580_v63 = vpack.c.bf16 %v1192_v62, %v1191_v61 }
 0x321   : > { %v1158_v2 = vpop.f32.mrb[88].mxu0 }
 0x322   : > { %1599 = vst [vmem:[%s2337_s13 + $0x68] sm:$0xff] %v1580_v63   ;;  %v1159_v3 = vadd.f32 %v2328_v0, %v1158_v2  ;;  %v1896_v4 = vpop.f32.mrb[89].mxu0 }
 0x323   : > { %v1161_v5 = vpop.f32.mrb[90].mxu0 }
 0x324   : > { %v1162_v1 = vadd.f32 %v2328_v0, %v1161_v5  ;;  %v1897_v6 = vpop.f32.mrb[91].mxu0  ;;  %v1193_v7 = vmax.f32 %v1159_v3, 0.0 }
 0x326   : > { %v1194_v56 = vmax.f32 %v1162_v1, 0.0 }
 0x328   : > { %v1585_v8 = vpack.c.bf16 %v1194_v56, %v1193_v7 }
 0x32a   : > { %1600 = vst [vmem:[%s2337_s13 + $0x70] sm:$0xff] %v1585_v8  }
 0x32b PF: > { %s17_s24 = sadd.s32 1, %s1969_s24  }
 0x32c   : > { %p14_p4 = scmp.ge.s32.totalorder %s17_s24, 4  }
 0x32e   :  { %16 = sbr.rel (!%p14_p4) target bundleno = 1 (0x1), region = 78 }

// kernel: ninnet_forward.9
= control target key start
LH: loop header
LB: loop body
LE: loop exit
PB: predicated region body
PF: predicated region fallthrough
CT: control target
= control target key end

     0   :  { %vm338_vm0 = vcmask 1041408   ;;  %s1077_s0 = inlined_call_operand.vmem [shape: bf16[9,98,128], index: 0, kind: input, shape index: {}]   ;;  %s1078_s1 = inlined_call_operand.vmem [shape: bf16[98,128], index: 1, kind: output, shape index: {}]  }
   0x1   :  { %v453_v0 = vld [vmem:[%s1077_s0] sm:$0xff]   ;;  %v21_v1 = vld [vmem:[%s1077_s0 + $0x34] ss:$104 sps:$4 sm:$0xff]   ;;  %v692_v6 = vld [vmem:[%s1077_s0 + $0x68] sm:$0xff]  }
   0x2   :  { %v687_v2 = vld [vmem:[%s1077_s0 + $0x38] sm:$0xff]   ;;  %v454_v3 = vunpack.c.l.bf16 %v453_v0  ;;  %v455_v4 = vunpack.c.h.bf16 %v453_v0  ;;  %v761_v7 = vld [vmem:[%s1077_s0 + $0xa0] sm:$0xff]   ;;  %v703_v8 = vld [vmem:[%s1077_s0 + $0xd0] sm:$0xff]   ;;  %v138_v9 = vunpack.c.l.bf16 %v21_v1  ;;  %v498_v11 = vunpack.c.l.bf16 %v692_v6 }
   0x3   :  { %v478_v5 = vunpack.c.l.bf16 %v687_v2  ;;  %v769_v10 = vld [vmem:[%s1077_s0 + $0x108] sm:$0xff]   ;;  %v499_v12 = vunpack.c.h.bf16 %v692_v6  ;;  %v714_v13 = vld [vmem:[%s1077_s0 + $0x138] sm:$0xff]   ;;  %v777_v14 = vld [vmem:[%s1077_s0 + $0x170] sm:$0xff]   ;;  %v522_v16 = vunpack.c.l.bf16 %v761_v7  ;;  %v542_v17 = vunpack.c.l.bf16 %v703_v8 }
   0x4   :  { %v782_v15 = vld [vmem:[%s1077_s0 + $0x1a0] sm:$0xff]   ;;  %v543_v18 = vunpack.c.h.bf16 %v703_v8  ;;  %v566_v20 = vunpack.c.l.bf16 %v769_v10  ;;  %v164_v21 = vunpack.c.h.bf16 %v21_v1  ;;  %v242_v22 = vmax.f32 %v454_v3, %v138_v9  ;;  %v682_v24 = vld [vmem:[%s1077_s0 + $0x8] sm:$0xff]   ;;  %v693_v30 = vld [vmem:[%s1077_s0 + $0x70] sm:$0xff]  }
   0x5   :  { %v788_v19 = vld [vmem:[%s1077_s0 + $0x104] ss:$104 sps:$4 sm:$0xff]   ;;  %v250_v23 = vmax.f32 %v455_v4, %v478_v5  ;;  %v586_v26 = vunpack.c.l.bf16 %v714_v13  ;;  %v587_v27 = vunpack.c.h.bf16 %v714_v13  ;;  %v610_v28 = vunpack.c.l.bf16 %v777_v14  ;;  %v704_v36 = vld [vmem:[%s1077_s0 + $0xd8] sm:$0xff]   ;;  %v819_v45 = vld [vmem:[%s1077_s0 + $0x110] sm:$0xff]  }
   0x6   :  { %v797_v25 = vld [vmem:[%s1077_s0 + $0x40] sm:$0xff]   ;;  %v630_v29 = vunpack.c.l.bf16 %v782_v15  ;;  %v631_v31 = vunpack.c.h.bf16 %v782_v15  ;;  %v190_v32 = vunpack.c.l.bf16 %v788_v19  ;;  %v243_v33 = vmax.f32 %v242_v22, %v498_v11  ;;  %v809_v35 = vld [vmem:[%s1077_s0 + $0xa8] sm:$0xff]   ;;  %v832_v55 = vld [vmem:[%s1077_s0 + $0x178] sm:$0xff]  }
   0x7   :  { %v251_v34 = vmax.f32 %v250_v23, %v499_v12  ;;  %v458_v37 = vunpack.c.l.bf16 %v682_v24  ;;  %v459_v38 = vunpack.c.h.bf16 %v682_v24  ;;  %v479_v39 = vunpack.c.h.bf16 %v687_v2  ;;  %v824_v46 = vld [vmem:[%s1077_s0 + $0x140] sm:$0xff]   ;;  %v837_v56 = vld [vmem:[%s1077_s0 + $0x1a8] sm:$0xff]   ;;  %v683_v61 = vld [vmem:[%s1077_s0 + $0x10] sm:$0xff]  }
   0x8   :  { %v482_v40 = vunpack.c.l.bf16 %v797_v25  ;;  %v216_v41 = vunpack.c.h.bf16 %v788_v19  ;;  %v244_v42 = vmax.f32 %v243_v33, %v164_v21  ;;  %v502_v44 = vunpack.c.l.bf16 %v693_v30  ;;  %v851_v6 = vld [vmem:[%s1077_s0 + $0x48] sm:$0xff]  }
   0x9   :  { %v252_v43 = vmax.f32 %v251_v34, %v522_v16  ;;  %v503_v47 = vunpack.c.h.bf16 %v693_v30  ;;  %v523_v48 = vunpack.c.h.bf16 %v761_v7  ;;  %v526_v49 = vunpack.c.l.bf16 %v809_v35  ;;  %v694_v7 = vld [vmem:[%s1077_s0 + $0x78] sm:$0xff]   ;;  %v861_v16 = vld [vmem:[%s1077_s0 + $0xb0] sm:$0xff]  }
   0xa   :  { %v546_v50 = vunpack.c.l.bf16 %v704_v36  ;;  %v245_v51 = vmax.f32 %v244_v42, %v542_v17  ;;  %v547_v53 = vunpack.c.h.bf16 %v704_v36  ;;  %v567_v54 = vunpack.c.h.bf16 %v769_v10  ;;  %v705_v17 = vld [vmem:[%s1077_s0 + $0xe0] sm:$0xff]  }
   0xb   :  { %v253_v52 = vmax.f32 %v252_v43, %v543_v18  ;;  %v570_v57 = vunpack.c.l.bf16 %v819_v45  ;;  %v590_v58 = vunpack.c.l.bf16 %v824_v46  ;;  %v258_v59 = vmax.f32 %v458_v37, %v479_v39 }
   0xc   :  { %v266_v60 = vmax.f32 %v459_v38, %v482_v40  ;;  %v246_v62 = vmax.f32 %v245_v51, %v190_v32  ;;  %v591_v0 = vunpack.c.h.bf16 %v824_v46  ;;  %v611_v1 = vunpack.c.h.bf16 %v777_v14  ;;  %v900_v51 = vld [vmem:[%s1077_s0 + $0x50] sm:$0xff]  }
   0xd   :  { %v254_v63 = vmax.f32 %v253_v52, %v566_v20  ;;  %v614_v2 = vunpack.c.l.bf16 %v832_v55  ;;  %v634_v3 = vunpack.c.l.bf16 %v837_v56  ;;  %v259_v4 = vmax.f32 %v258_v59, %v502_v44 }
   0xe   :  { %v267_v5 = vmax.f32 %v266_v60, %v503_v47  ;;  %v247_v8 = vmax.f32 %v246_v62, %v586_v26  ;;  %v635_v10 = vunpack.c.h.bf16 %v837_v56  ;;  %v462_v11 = vunpack.c.l.bf16 %v683_v61  ;;  %v706_v62 = vld [vmem:[%s1077_s0 + $0xe8] sm:$0xff]  }
   0xf   :  { %v255_v9 = vmax.f32 %v254_v63, %v587_v27  ;;  %v260_v12 = vmax.f32 %v259_v4, %v523_v48  ;;  %v463_v14 = vunpack.c.h.bf16 %v683_v61  ;;  %v483_v15 = vunpack.c.h.bf16 %v797_v25  ;;  %v871_v25 = vld [vmem:[%s1077_s0 + $0x118] sm:$0xff]  }
  0x10   :  { %v268_v13 = vmax.f32 %v267_v5, %v526_v49  ;;  %v248_v18 = vmax.f32 %v247_v8, %v216_v41  ;;  %v486_v20 = vunpack.c.l.bf16 %v851_v6  ;;  %v506_v21 = vunpack.c.l.bf16 %v694_v7  ;;  %v910_v61 = vld [vmem:[%s1077_s0 + $0xb8] sm:$0xff]  }
  0x11   :  { %v256_v19 = vmax.f32 %v255_v9, %v610_v28  ;;  %v261_v22 = vmax.f32 %v260_v12, %v546_v50  ;;  %v507_v24 = vunpack.c.h.bf16 %v694_v7  ;;  %v527_v26 = vunpack.c.h.bf16 %v809_v35  ;;  %v716_v28 = vld [vmem:[%s1077_s0 + $0x148] sm:$0xff]   ;;  %v881_v35 = vld [vmem:[%s1077_s0 + $0x180] sm:$0xff]  }
  0x12   :  { %v269_v23 = vmax.f32 %v268_v13, %v547_v53  ;;  %v249_v27 = vmax.f32 %v248_v18, %v630_v29  ;;  %v530_v32 = vunpack.c.l.bf16 %v861_v16  ;;  %v550_v33 = vunpack.c.l.bf16 %v705_v17  ;;  %v920_v9 = vld [vmem:[%s1077_s0 + $0x120] sm:$0xff]   ;;  %v933_v18 = vld [vmem:[%s1077_s0 + $0x188] sm:$0xff]  }
  0x13   :  { %v257_v30 = vmax.f32 %v256_v19, %v631_v31  ;;  %v262_v34 = vmax.f32 %v261_v22, %v567_v54  ;;  %v551_v37 = vunpack.c.h.bf16 %v705_v17  ;;  %v571_v38 = vunpack.c.h.bf16 %v819_v45  ;;  %v887_v31 = vld [vmem:[%s1077_s0 + $0x1b0] sm:$0xff]   ;;  %v684_v45 = vld [vmem:[%s1077_s0 + $0x18] sm:$0xff]  }
  0x14   :  { %v270_v36 = vmax.f32 %v269_v23, %v570_v57  ;;  %v574_v29 = vunpack.c.l.bf16 %v871_v25  ;;  %v274_v40 = vmax.f32 %v462_v11, %v483_v15  ;;  %v282_v41 = vmax.f32 %v463_v14, %v486_v20  ;;  %v695_v57 = vld [vmem:[%s1077_s0 + $0x80] sm:$0xff]   ;;  %v925_v11 = vld [vmem:[%s1077_s0 + $0x150] sm:$0xff]   ;;  %v938_v19 = vld [vmem:[%s1077_s0 + $0x1b8] sm:$0xff]  }
  0x15   :  { %v655_v39 = vpack.c.bf16 %v257_v30, %v249_v27  ;;  %v263_v42 = vmax.f32 %v262_v34, %v590_v58  ;;  %v594_v44 = vunpack.c.l.bf16 %v716_v28  ;;  %v595_v46 = vunpack.c.h.bf16 %v716_v28  ;;  %v685_v23 = vld [vmem:[%s1077_s0 + $0x20] sm:$0xff]   ;;  %v955_v34 = vld [vmem:[%s1077_s0 + $0x58] sm:$0xff]  }
  0x16   :  { %v271_v43 = vmax.f32 %v270_v36, %v591_v0  ;;  %v615_v47 = vunpack.c.h.bf16 %v832_v55  ;;  %v618_v48 = vunpack.c.l.bf16 %v881_v35  ;;  %v275_v49 = vmax.f32 %v274_v40, %v506_v21  ;;  %v696_v36 = vld [vmem:[%s1077_s0 + $0x88] sm:$0xff]  }
  0x17   :  { %656 = vst [vmem:[%s1078_s1] sm:$0xff] %v655_v39   ;;  %v283_v50 = vmax.f32 %v282_v41, %v507_v24  ;;  %v264_v52 = vmax.f32 %v263_v42, %v611_v1  ;;  %v638_v54 = vunpack.c.l.bf16 %v887_v31  ;;  %v639_v56 = vunpack.c.h.bf16 %v887_v31  ;;  %v965_v42 = vld [vmem:[%s1077_s0 + $0xc0] sm:$0xff]  }
  0x18   :  { %v272_v53 = vmax.f32 %v271_v43, %v614_v2  ;;  %v276_v55 = vmax.f32 %v275_v49, %v527_v26  ;;  %v466_v59 = vunpack.c.l.bf16 %v684_v45  ;;  %v467_v60 = vunpack.c.h.bf16 %v684_v45  ;;  %v707_v43 = vld [vmem:[%s1077_s0 + $0xf0] sm:$0xff]  }
  0x19   :  { %v284_v58 = vmax.f32 %v283_v50, %v530_v32  ;;  %v265_v63 = vmax.f32 %v264_v52, %v634_v3  ;;  %v487_v1 = vunpack.c.h.bf16 %v851_v6  ;;  %v490_v2 = vunpack.c.l.bf16 %v900_v51 }
  0x1a   :  { %v273_v0 = vmax.f32 %v272_v53, %v635_v10  ;;  %v277_v4 = vmax.f32 %v276_v55, %v550_v33  ;;  %v510_v7 = vunpack.c.l.bf16 %v695_v57  ;;  %v511_v8 = vunpack.c.h.bf16 %v695_v57  ;;  %v980_v53 = vld [vmem:[%s1077_s0 + $0x158] sm:$0xff]  }
  0x1b   :  { %v285_v5 = vmax.f32 %v284_v58, %v551_v37  ;;  %v531_v10 = vunpack.c.h.bf16 %v861_v16  ;;  %v534_v6 = vunpack.c.l.bf16 %v910_v61  ;;  %v554_v12 = vunpack.c.l.bf16 %v706_v62 }
  0x1c   :  { %v660_v3 = vpack.c.bf16 %v273_v0, %v265_v63  ;;  %v278_v13 = vmax.f32 %v277_v4, %v571_v38  ;;  %v555_v15 = vunpack.c.h.bf16 %v706_v62  ;;  %v575_v17 = vunpack.c.h.bf16 %v871_v25  ;;  %v992_v62 = vld [vmem:[%s1077_s0 + $0x1c0] sm:$0xff]  }
  0x1d   :  { %v286_v14 = vmax.f32 %v285_v5, %v574_v29  ;;  %v578_v16 = vunpack.c.l.bf16 %v920_v9  ;;  %v598_v20 = vunpack.c.l.bf16 %v925_v11  ;;  %v290_v21 = vmax.f32 %v466_v59, %v487_v1  ;;  %v686_v5 = vld [vmem:[%s1077_s0 + $0x28] sm:$0xff]  }
  0x1e   :  { %731 = vst [vmem:[%s1078_s1 + $0x8] sm:$0xff] %v660_v3   ;;  %v298_v22 = vmax.f32 %v467_v60, %v490_v2  ;;  %v279_v24 = vmax.f32 %v278_v13, %v594_v44  ;;  %v599_v25 = vunpack.c.h.bf16 %v925_v11  ;;  %v619_v27 = vunpack.c.h.bf16 %v881_v35  ;;  %v697_v3 = vld [vmem:[%s1077_s0 + $0x90] sm:$0xff]  }
  0x1f   :  { %v287_v26 = vmax.f32 %v286_v14, %v595_v46  ;;  %v622_v30 = vunpack.c.l.bf16 %v933_v18  ;;  %v642_v32 = vunpack.c.l.bf16 %v938_v19  ;;  %v291_v33 = vmax.f32 %v290_v21, %v510_v7 }
  0x20   :  { %v299_v28 = vmax.f32 %v298_v22, %v511_v8  ;;  %v280_v37 = vmax.f32 %v279_v24, %v615_v47  ;;  %v643_v39 = vunpack.c.h.bf16 %v938_v19  ;;  %v470_v35 = vunpack.c.l.bf16 %v685_v23 }
  0x21   :  { %v288_v38 = vmax.f32 %v287_v26, %v618_v48  ;;  %v292_v29 = vmax.f32 %v291_v33, %v531_v10  ;;  %v471_v40 = vunpack.c.h.bf16 %v685_v23  ;;  %v491_v41 = vunpack.c.h.bf16 %v900_v51  ;;  %v975_v51 = vld [vmem:[%s1077_s0 + $0x128] sm:$0xff]  }
  0x22   :  { %v300_v31 = vmax.f32 %v299_v28, %v534_v6  ;;  %v281_v44 = vmax.f32 %v280_v37, %v638_v54  ;;  %v494_v45 = vunpack.c.l.bf16 %v955_v34  ;;  %v514_v47 = vunpack.c.l.bf16 %v696_v36 }
  0x23   :  { %v289_v46 = vmax.f32 %v288_v38, %v639_v56  ;;  %v293_v48 = vmax.f32 %v292_v29, %v554_v12  ;;  %v515_v50 = vunpack.c.h.bf16 %v696_v36  ;;  %v535_v52 = vunpack.c.h.bf16 %v910_v61  ;;  %v987_v61 = vld [vmem:[%s1077_s0 + $0x190] sm:$0xff]   ;;  %v719_v36 = vld [vmem:[%s1077_s0 + $0x160] sm:$0xff]  }
  0x24   :  { %v301_v49 = vmax.f32 %v300_v31, %v555_v15  ;;  %v538_v56 = vunpack.c.l.bf16 %v965_v42  ;;  %v558_v57 = vunpack.c.l.bf16 %v707_v43  ;;  %v559_v55 = vunpack.c.h.bf16 %v707_v43  ;;  %v20_v38 = vld [vmem:[%s1077_s0 + $0x30] sm:$0x1]  ;;  %v46_v43 = vld [vmem:[%s1077_s0 + $0x98] sm:$0x1] }
  0x25   :  { %v665_v54 = vpack.c.bf16 %v289_v46, %v281_v44  ;;  %v294_v58 = vmax.f32 %v293_v48, %v575_v17  ;;  %v579_v60 = vunpack.c.h.bf16 %v920_v9  ;;  %v306_v63 = vmax.f32 %v470_v35, %v491_v41  ;;  %v59_v44 = vld [vmem:[%s1077_s0 + $0xcc] sm:$0x1] }
  0x26   :  { %v302_v59 = vmax.f32 %v301_v49, %v578_v16  ;;  %v582_v0 = vunpack.c.l.bf16 %v975_v51  ;;  %v602_v1 = vunpack.c.l.bf16 %v980_v53  ;;  %v603_v2 = vunpack.c.h.bf16 %v980_v53  ;;  %v708_v16 = vld [vmem:[%s1077_s0 + $0xf8] sm:$0xff]  }
  0x27   :  { %732 = vst [vmem:[%s1078_s1 + $0x10] sm:$0xff] %v665_v54   ;;  %v314_v4 = vmax.f32 %v471_v40, %v494_v45  ;;  %v295_v7 = vmax.f32 %v294_v58, %v598_v20  ;;  %v623_v9 = vunpack.c.h.bf16 %v933_v18  ;;  %v307_v11 = vmax.f32 %v306_v63, %v514_v47  ;;  %v32_v18 = vld [vmem:[%s1077_s0 + $0x60] ss:$104 sps:$4 sm:$0xff]   ;;  %v84_v45 = vld [vmem:[%s1077_s0 + $0x130] ss:$104 sps:$4 sm:$0xff]  }
  0x28   :  { %v303_v8 = vmax.f32 %v302_v59, %v599_v25  ;;  %v626_v10 = vunpack.c.l.bf16 %v987_v61  ;;  %v646_v6 = vunpack.c.l.bf16 %v992_v62  ;;  %v647_v12 = vunpack.c.h.bf16 %v992_v62  ;;  %v72_v54 = vld [vmem:[%s1077_s0 + $0x100] sm:$0x1] }
  0x29   :  { %v315_v13 = vmax.f32 %v314_v4, %v515_v50  ;;  %v296_v14 = vmax.f32 %v295_v7, %v619_v27  ;;  %v308_v17 = vmax.f32 %v307_v11, %v535_v52  ;;  %v474_v19 = vunpack.c.l.bf16 %v686_v5  ;;  %v98_v11 = vld [vmem:[%s1077_s0 + $0x168] sm:$0x1] }
  0x2a   :  { %v304_v15 = vmax.f32 %v303_v8, %v622_v30  ;;  %v475_v21 = vunpack.c.h.bf16 %v686_v5  ;;  %v495_v22 = vunpack.c.h.bf16 %v955_v34  ;;  %v518_v23 = vunpack.c.l.bf16 %v697_v3 }
  0x2b   :  { %v316_v20 = vmax.f32 %v315_v13, %v538_v56  ;;  %v297_v24 = vmax.f32 %v296_v14, %v642_v32  ;;  %v309_v25 = vmax.f32 %v308_v17, %v558_v57  ;;  %v519_v27 = vunpack.c.h.bf16 %v697_v3  ;;  %v33_v32 = vld [vmem:[%s1077_s0 + $0x64] sm:$0x1] }
  0x2c   :  { %v305_v26 = vmax.f32 %v304_v15, %v643_v39  ;;  %v539_v33 = vunpack.c.h.bf16 %v965_v42  ;;  %v562_v28 = vunpack.c.l.bf16 %v708_v16  ;;  %v149_v37 = vunpack.c.l.bf16 %v32_v18 }
  0x2d   :  { %v317_v30 = vmax.f32 %v316_v20, %v559_v55  ;;  %v310_v39 = vmax.f32 %v309_v25, %v579_v60  ;;  %v563_v35 = vunpack.c.h.bf16 %v708_v16  ;;  %v583_v29 = vunpack.c.h.bf16 %v975_v51 }
  0x2e   :  { %v670_v34 = vpack.c.bf16 %v305_v26, %v297_v24  ;;  %v175_v40 = vunpack.c.h.bf16 %v32_v18  ;;  %v322_v41 = vmax.f32 %v474_v19, %v495_v22  ;;  %v330_v42 = vmax.f32 %v475_v21, %v149_v37  ;;  %v111_v19 = vld [vmem:[%s1077_s0 + $0x19c] sm:$0x1]  ;;  %v124_v26 = vld [vmem:[%s1077_s0 + $0x1d0] sm:$0x1] }
  0x2f   :  { %v318_v31 = vmax.f32 %v317_v30, %v582_v0  ;;  %v311_v46 = vmax.f32 %v310_v39, %v602_v1  ;;  %v606_v47 = vunpack.c.l.bf16 %v719_v36  ;;  %v137_v48 = vunpack.c.l.bf16 %v20_v38  ;;  %v85_v0 = vld [vmem:[%s1077_s0 + $0x134] sm:$0x1] }
  0x30   :  { %733 = vst [vmem:[%s1078_s1 + $0x18] sm:$0xff] %v670_v34   ;;  %v150_v49 = vunpack.c.l.bf16 %v33_v32  ;;  %v607_v52 = vunpack.c.h.bf16 %v719_v36  ;;  %v323_v51 = vmax.f32 %v322_v41, %v518_v23  ;;  %v331_v53 = vmax.f32 %v330_v42, %v519_v27 }
  0x31   :  { %v319_v50 = vmax.f32 %v318_v31, %v603_v2  ;;  %v312_v56 = vmax.f32 %v311_v46, %v623_v9  ;;  %v627_v57 = vunpack.c.h.bf16 %v987_v61  ;;  %v163_v55 = vunpack.c.l.bf16 %v46_v43  ;;  %v730_v61 = vld [vmem:[%s1077_s0 + $0x1c8] sm:$0xff]  }
  0x32   :  { %v176_v58 = vunpack.c.l.bf16 %v59_v44  ;;  %v201_v60 = vunpack.c.l.bf16 %v84_v45  ;;  %v324_v62 = vmax.f32 %v323_v51, %v539_v33  ;;  %v332_v63 = vmax.f32 %v331_v53, %v175_v40 }
  0x33   :  { %v320_v59 = vmax.f32 %v319_v50, %v626_v10  ;;  %v313_v1 = vmax.f32 %v312_v56, %v646_v6  ;;  %v189_v2 = vunpack.c.l.bf16 %v72_v54  ;;  %v339_v4 = vsel %vm338_vm0, %v137_v48, -inf }
  0x34   :  { %v340_v5 = vsel %vm338_vm0, %v150_v49, -inf  ;;  %v325_v8 = vmax.f32 %v324_v62, %v562_v28  ;;  %v333_v9 = vmax.f32 %v332_v63, %v563_v35  ;;  %v227_v10 = vunpack.c.h.bf16 %v84_v45 }
  0x35   :  { %v321_v7 = vmax.f32 %v320_v59, %v647_v12  ;;  %v341_v3 = vmax.f32 %v339_v4, %v340_v5  ;;  %v202_v13 = vunpack.c.l.bf16 %v85_v0  ;;  %v342_v6 = vsel %vm338_vm0, %v163_v55, -inf }
  0x36   :  { %v344_v14 = vsel %vm338_vm0, %v176_v58, -inf  ;;  %v326_v17 = vmax.f32 %v325_v8, %v583_v29  ;;  %v334_v12 = vmax.f32 %v333_v9, %v201_v60  ;;  %v650_v16 = vunpack.c.l.bf16 %v730_v61 }
  0x37   :  { %v675_v15 = vpack.c.bf16 %v321_v7, %v313_v1  ;;  %v343_v18 = vmax.f32 %v341_v3, %v342_v6  ;;  %v215_v20 = vunpack.c.l.bf16 %v98_v11  ;;  %v346_v21 = vsel %vm338_vm0, %v189_v2, -inf }
  0x38   :  { %v651_v22 = vunpack.c.h.bf16 %v730_v61  ;;  %v327_v23 = vmax.f32 %v326_v17, %v606_v47  ;;  %v335_v24 = vmax.f32 %v334_v12, %v607_v52  ;;  %v228_v27 = vunpack.c.l.bf16 %v111_v19 }
  0x39   :  { %734 = vst [vmem:[%s1078_s1 + $0x20] sm:$0xff] %v675_v15   ;;  %v345_v25 = vmax.f32 %v343_v18, %v344_v14  ;;  %v348_v30 = vsel %vm338_vm0, %v202_v13, -inf  ;;  %v241_v37 = vunpack.c.l.bf16 %v124_v26  ;;  %v350_v38 = vsel %vm338_vm0, %v215_v20, -inf }
  0x3a   :  { %v328_v33 = vmax.f32 %v327_v23, %v627_v57  ;;  %v336_v28 = vmax.f32 %v335_v24, %v227_v10  ;;  %v352_v35 = vsel %vm338_vm0, %v228_v27, -inf }
  0x3b   :  { %v347_v36 = vmax.f32 %v345_v25, %v346_v21  ;;  %v354_v40 = vsel %vm338_vm0, %v241_v37, -inf }
  0x3c   :  { %v329_v32 = vmax.f32 %v328_v33, %v650_v16  ;;  %v337_v34 = vmax.f32 %v336_v28, %v651_v22 }
  0x3d   :  { %v349_v39 = vmax.f32 %v347_v36, %v348_v30 }
  0x3e   :  { %v680_v29 = vpack.c.bf16 %v337_v34, %v329_v32 }
  0x3f   :  { %v351_v31 = vmax.f32 %v349_v39, %v350_v38 }
  0x40   :  { %735 = vst [vmem:[%s1078_s1 + $0x28] sm:$0xff] %v680_v29  }
  0x41   :  { %v353_v41 = vmax.f32 %v351_v31, %v352_v35 }
  0x43   :  { %v355_v42 = vmax.f32 %v353_v41, %v354_v40 }
  0x45   :  { %v451_v43 = vpack.c.bf16 %v355_v42, %v355_v42 }
  0x47   :  { %421 = vst [vmem:[%s1078_s1 + $0x30] sm:$0x1] %v451_v43 }

// kernel: ninnet_forward.11
= control target key start
LH: loop header
LB: loop body
LE: loop exit
PB: predicated region body
PF: predicated region fallthrough
CT: control target
= control target key end

     0   :  { %vm121_vm0 = vcmask 1041408   ;;  %s311_s0 = inlined_call_operand.vmem [shape: bf16[9,18,256], index: 0, kind: input, shape index: {}]   ;;  %s312_s1 = inlined_call_operand.vmem [shape: bf16[18,256], index: 1, kind: output, shape index: {}]  }
   0x1   :  { %v8_v0 = vld [vmem:[%s311_s0] sm:$0xff]  ;;  %v11_v1 = vld [vmem:[%s311_s0 + $0x18] sm:$0xff]  ;;  %v14_v2 = vld [vmem:[%s311_s0 + $0x30] sm:$0xff] }
   0x2   :  { %v35_v3 = vunpack.c.l.bf16 %v8_v0  ;;  %v36_v4 = vunpack.c.h.bf16 %v8_v0  ;;  %v41_v5 = vunpack.c.l.bf16 %v11_v1  ;;  %v42_v6 = vunpack.c.h.bf16 %v11_v1  ;;  %v17_v7 = vld [vmem:[%s311_s0 + $0x48] sm:$0xff]  ;;  %v20_v8 = vld [vmem:[%s311_s0 + $0x60] sm:$0xff]  ;;  %v23_v9 = vld [vmem:[%s311_s0 + $0x78] sm:$0xff] }
   0x3   :  { %v47_v10 = vunpack.c.l.bf16 %v14_v2  ;;  %v48_v11 = vunpack.c.h.bf16 %v14_v2  ;;  %v26_v12 = vld [vmem:[%s311_s0 + $0x90] sm:$0xff]  ;;  %v53_v13 = vunpack.c.l.bf16 %v17_v7  ;;  %v54_v14 = vunpack.c.h.bf16 %v17_v7  ;;  %v9_v17 = vld [vmem:[%s311_s0 + $0x8] sm:$0xff]  ;;  %v12_v18 = vld [vmem:[%s311_s0 + $0x20] sm:$0xff] }
   0x4   :  { %v89_v15 = vmax.f32 %v35_v3, %v41_v5  ;;  %v97_v16 = vmax.f32 %v36_v4, %v42_v6  ;;  %v29_v19 = vld [vmem:[%s311_s0 + $0xa8] sm:$0xff]  ;;  %v59_v20 = vunpack.c.l.bf16 %v20_v8  ;;  %v60_v21 = vunpack.c.h.bf16 %v20_v8  ;;  %v232_v23 = vld [vmem:[%s311_s0 + $0xc0] sm:$0xff]  ;;  %v15_v28 = vld [vmem:[%s311_s0 + $0x38] sm:$0xff] }
   0x5   :  { %v65_v22 = vunpack.c.l.bf16 %v23_v9  ;;  %v66_v24 = vunpack.c.h.bf16 %v23_v9  ;;  %v71_v25 = vunpack.c.l.bf16 %v26_v12  ;;  %v18_v29 = vld [vmem:[%s311_s0 + $0x50] sm:$0xff]  ;;  %v37_v30 = vunpack.c.l.bf16 %v9_v17  ;;  %v21_v38 = vld [vmem:[%s311_s0 + $0x68] sm:$0xff]  ;;  %v24_v41 = vld [vmem:[%s311_s0 + $0x80] sm:$0xff] }
   0x6   :  { %v90_v26 = vmax.f32 %v89_v15, %v47_v10  ;;  %v98_v27 = vmax.f32 %v97_v16, %v48_v11  ;;  %v38_v31 = vunpack.c.h.bf16 %v9_v17  ;;  %v43_v32 = vunpack.c.l.bf16 %v12_v18  ;;  %v27_v47 = vld [vmem:[%s311_s0 + $0x98] sm:$0xff]  ;;  %v30_v49 = vld [vmem:[%s311_s0 + $0xb0] sm:$0xff]  ;;  %v13_v63 = vld [vmem:[%s311_s0 + $0x28] sm:$0x11] }
   0x7   :  { %v44_v33 = vunpack.c.h.bf16 %v12_v18  ;;  %v72_v34 = vunpack.c.h.bf16 %v26_v12  ;;  %v77_v35 = vunpack.c.l.bf16 %v29_v19  ;;  %v78_v39 = vunpack.c.h.bf16 %v29_v19  ;;  %v10_v58 = vld [vmem:[%s311_s0 + $0x10] sm:$0x11]  ;;  %v16_v0 = vld [vmem:[%s311_s0 + $0x40] sm:$0x11]  ;;  %v33_v3 = vld [vmem:[%s311_s0 + $0xc8] sm:$0xff] }
   0x8   :  { %v91_v36 = vmax.f32 %v90_v26, %v53_v13  ;;  %v99_v37 = vmax.f32 %v98_v27, %v54_v14  ;;  %v83_v40 = vunpack.c.l.bf16 %v232_v23  ;;  %v49_v42 = vunpack.c.l.bf16 %v15_v28  ;;  %v19_v9 = vld [vmem:[%s311_s0 + $0x58] sm:$0x11]  ;;  %v22_v13 = vld [vmem:[%s311_s0 + $0x70] sm:$0x11]  ;;  %v25_v26 = vld [vmem:[%s311_s0 + $0x88] sm:$0x11] }
   0x9   :  { %v50_v43 = vunpack.c.h.bf16 %v15_v28  ;;  %v84_v44 = vunpack.c.h.bf16 %v232_v23  ;;  %v55_v48 = vunpack.c.l.bf16 %v18_v29  ;;  %v56_v50 = vunpack.c.h.bf16 %v18_v29 }
   0xa   :  { %v92_v45 = vmax.f32 %v91_v36, %v59_v20  ;;  %v100_v46 = vmax.f32 %v99_v37, %v60_v21  ;;  %v61_v51 = vunpack.c.l.bf16 %v21_v38  ;;  %v105_v52 = vmax.f32 %v37_v30, %v43_v32  ;;  %v28_v30 = vld [vmem:[%s311_s0 + $0xa0] sm:$0x11] }
   0xb   :  { %v113_v53 = vmax.f32 %v38_v31, %v44_v33  ;;  %v62_v56 = vunpack.c.h.bf16 %v21_v38  ;;  %v67_v57 = vunpack.c.l.bf16 %v24_v41  ;;  %v68_v59 = vunpack.c.h.bf16 %v24_v41 }
   0xc   :  { %v93_v54 = vmax.f32 %v92_v45, %v65_v22  ;;  %v101_v55 = vmax.f32 %v100_v46, %v66_v24  ;;  %v73_v60 = vunpack.c.l.bf16 %v27_v47  ;;  %v106_v61 = vmax.f32 %v105_v52, %v49_v42 }
   0xd   :  { %v114_v62 = vmax.f32 %v113_v53, %v50_v43  ;;  %v74_v4 = vunpack.c.h.bf16 %v27_v47  ;;  %v79_v5 = vunpack.c.l.bf16 %v30_v49  ;;  %v80_v6 = vunpack.c.h.bf16 %v30_v49 }
   0xe   :  { %v94_v1 = vmax.f32 %v93_v54, %v71_v25  ;;  %v102_v2 = vmax.f32 %v101_v55, %v72_v34  ;;  %v107_v7 = vmax.f32 %v106_v61, %v55_v48  ;;  %v39_v10 = vunpack.c.l.bf16 %v10_v58 }
   0xf   :  { %v115_v8 = vmax.f32 %v114_v62, %v56_v50  ;;  %v45_v14 = vunpack.c.l.bf16 %v13_v63  ;;  %v51_v15 = vunpack.c.l.bf16 %v16_v0  ;;  %v85_v16 = vunpack.c.l.bf16 %v33_v3 }
  0x10   :  { %v95_v11 = vmax.f32 %v94_v1, %v77_v35  ;;  %v103_v12 = vmax.f32 %v102_v2, %v78_v39  ;;  %v108_v17 = vmax.f32 %v107_v7, %v61_v51  ;;  %v40_v19 = vunpack.c.h.bf16 %v10_v58 }
  0x11   :  { %v116_v18 = vmax.f32 %v115_v8, %v62_v56  ;;  %v46_v22 = vunpack.c.h.bf16 %v13_v63  ;;  %v57_v23 = vunpack.c.l.bf16 %v19_v9  ;;  %v52_v27 = vunpack.c.h.bf16 %v16_v0 }
  0x12   :  { %v96_v20 = vmax.f32 %v95_v11, %v83_v40  ;;  %v104_v21 = vmax.f32 %v103_v12, %v84_v44  ;;  %v109_v24 = vmax.f32 %v108_v17, %v67_v57  ;;  %v63_v28 = vunpack.c.l.bf16 %v22_v13  ;;  %v31_v44 = vld [vmem:[%s311_s0 + $0xb8] sm:$0x11] }
  0x13   :  { %v117_v25 = vmax.f32 %v116_v18, %v68_v59  ;;  %v122_v31 = vsel %vm121_vm0, %v39_v10, -inf  ;;  %v123_v32 = vsel %vm121_vm0, %v45_v14, -inf  ;;  %v125_v33 = vsel %vm121_vm0, %v51_v15, -inf }
  0x14   :  { %v186_v29 = vpack.c.bf16 %v104_v21, %v96_v20  ;;  %v86_v34 = vunpack.c.h.bf16 %v33_v3  ;;  %v110_v35 = vmax.f32 %v109_v24, %v73_v60  ;;  %v124_v37 = vmax.f32 %v122_v31, %v123_v32  ;;  %v34_v60 = vld [vmem:[%s311_s0 + $0xd0] sm:$0x11] }
  0x15   :  { %v118_v36 = vmax.f32 %v117_v25, %v74_v4  ;;  %v58_v38 = vunpack.c.h.bf16 %v19_v9  ;;  %v64_v39 = vunpack.c.h.bf16 %v22_v13  ;;  %v69_v40 = vunpack.c.l.bf16 %v25_v26 }
  0x16   :  { %176 = vst [vmem:[%s312_s1] sm:$0xff] %v186_v29  ;;  %v127_v41 = vsel %vm121_vm0, %v57_v23, -inf  ;;  %v111_v42 = vmax.f32 %v110_v35, %v79_v5  ;;  %v75_v45 = vunpack.c.l.bf16 %v28_v30  ;;  %v126_v46 = vmax.f32 %v124_v37, %v125_v33 }
  0x17   :  { %v119_v43 = vmax.f32 %v118_v36, %v80_v6  ;;  %v129_v47 = vsel %vm121_vm0, %v63_v28, -inf  ;;  %v139_v48 = vsel %vm121_vm0, %v40_v19, -inf  ;;  %v140_v49 = vsel %vm121_vm0, %v46_v22, -inf }
  0x18   :  { %v142_v50 = vsel %vm121_vm0, %v52_v27, -inf  ;;  %v112_v51 = vmax.f32 %v111_v42, %v85_v16  ;;  %v128_v53 = vmax.f32 %v126_v46, %v127_v41  ;;  %v141_v54 = vmax.f32 %v139_v48, %v140_v49 }
  0x19   :  { %v120_v52 = vmax.f32 %v119_v43, %v86_v34  ;;  %v70_v55 = vunpack.c.h.bf16 %v25_v26  ;;  %v81_v56 = vunpack.c.l.bf16 %v31_v44  ;;  %v131_v57 = vsel %vm121_vm0, %v69_v40, -inf }
  0x1a   :  { %v144_v58 = vsel %vm121_vm0, %v58_v38, -inf  ;;  %v130_v61 = vmax.f32 %v128_v53, %v129_v47  ;;  %v143_v62 = vmax.f32 %v141_v54, %v142_v50  ;;  %v76_v63 = vunpack.c.h.bf16 %v28_v30 }
  0x1b   :  { %v187_v59 = vpack.c.bf16 %v120_v52, %v112_v51  ;;  %v133_v0 = vsel %vm121_vm0, %v75_v45, -inf  ;;  %v146_v1 = vsel %vm121_vm0, %v64_v39, -inf  ;;  %v82_v4 = vunpack.c.h.bf16 %v31_v44 }
  0x1c   :  { %v132_v2 = vmax.f32 %v130_v61, %v131_v57  ;;  %v145_v3 = vmax.f32 %v143_v62, %v144_v58  ;;  %v87_v5 = vunpack.c.l.bf16 %v34_v60  ;;  %v135_v6 = vsel %vm121_vm0, %v81_v56, -inf }
  0x1d   :  { %177 = vst [vmem:[%s312_s1 + $0x8] sm:$0xff] %v187_v59  ;;  %v148_v7 = vsel %vm121_vm0, %v70_v55, -inf  ;;  %v88_v10 = vunpack.c.h.bf16 %v34_v60  ;;  %v150_v11 = vsel %vm121_vm0, %v76_v63, -inf  ;;  %v152_v15 = vsel %vm121_vm0, %v82_v4, -inf }
  0x1e   :  { %v134_v8 = vmax.f32 %v132_v2, %v133_v0  ;;  %v147_v9 = vmax.f32 %v145_v3, %v146_v1  ;;  %v137_v14 = vsel %vm121_vm0, %v87_v5, -inf }
  0x1f   :  { %v154_v17 = vsel %vm121_vm0, %v88_v10, -inf }
  0x20   :  { %v136_v12 = vmax.f32 %v134_v8, %v135_v6  ;;  %v149_v13 = vmax.f32 %v147_v9, %v148_v7 }
  0x22   :  { %v151_v16 = vmax.f32 %v149_v13, %v150_v11  ;;  %v138_v18 = vmax.f32 %v136_v12, %v137_v14 }
  0x24   :  { %v153_v19 = vmax.f32 %v151_v16, %v152_v15 }
  0x26   :  { %v155_v20 = vmax.f32 %v153_v19, %v154_v17 }
  0x28   :  { %v188_v21 = vpack.c.bf16 %v155_v20, %v138_v18 }
  0x2a   :  { %178 = vst [vmem:[%s312_s1 + $0x10] sm:$0x11] %v188_v21 }

// kernel: ninnet_forward.10
= control target key start
LH: loop header
LB: loop body
LE: loop exit
PB: predicated region body
PF: predicated region fallthrough
CT: control target
= control target key end

     0   :  { %s6693_s24 = smov 0   ;;  %s8283_s0 = inlined_call_operand.vmem [shape: bf16[128,3200], index: 0, kind: input, shape index: {}]   ;;  %s8284_s1 = inlined_call_operand.vmem [shape: bf16[3200,256], index: 1, kind: input, shape index: {}]   ;;  %s8285_s2 = inlined_call_operand.vmem [shape: f32[1,256], index: 2, kind: input, shape index: {}]   ;;  %s8286_s3 = inlined_call_operand.vmem [shape: bf16[256,256], index: 3, kind: input, shape index: {}]   ;;  %s8287_s4 = inlined_call_operand.vmem [shape: f32[1,256], index: 4, kind: input, shape index: {}]   ;;  %s8288_s5 = inlined_call_operand.vmem [shape: bf16[256,256], index: 5, kind: input, shape index: {}]   ;;  %s8289_s6 = inlined_call_operand.vmem [shape: f32[1,256], index: 6, kind: input, shape index: {}]   ;;  %s8290_s7 = inlined_call_operand.vmem [shape: bf16[128,256], index: 7, kind: output, shape index: {}]  }
   0x1 LB: > { %s4989_s25 = sadd.s32 4294967295, %s6650_s24   ;;  %p4993_p0 = scmp.ge.s32.totalorder %s6650_s24, 1  ;;  %s6650_s24 = sphi %s6693_s24, %s17_s24  }
   0x2   : > { %p239_p1 = scmp.lt.s32.totalorder %s6650_s24, 3 }
   0x4   : > { %p240_p2 = pnand %p4993_p0, %p239_p1 }
   0x5   : > { %v5800_v0 = vld [vmem:[%s8284_s1 + $0x4] ss:$8 sps:$4 sm:$0xff] (!%p240_p2)   ;;  %v5804_v2 = vld [vmem:[%s8284_s1] ss:$8 sps:$4 sm:$0xff] (!%p240_p2)   ;;  %v5806_v4 = vld [vmem:[%s8284_s1 + $0x14] ss:$8 sps:$4 sm:$0xff] (!%p240_p2)  }
   0x6   : > { %243 = sbr.rel (%p240_p2) target bundleno = 1177 (0x499), region = 48  ;;  %v5802_v1 = vld [vmem:[%s8284_s1 + $0x504] ss:$8 sps:$4 sm:$0xff] (!%p240_p2)   ;;  %3308 = vmatprep.subr.bf16.mxu1 (!%p240_p2), %v5800_v0  ;;  %v5805_v3 = vld [vmem:[%s8284_s1 + $0x500] ss:$8 sps:$4 sm:$0xff] (!%p240_p2)   ;;  %s4994_s21 = sshll.u32 (!%p240_p2), %s4989_s25, 3 }
   0x7   : > { %3673 = vmatprep.subr.bf16.mxu0 (!%p240_p2), %v5802_v1  ;;  %3309 = vmatpush1.bf16.msra.mxu1 (!%p240_p2), %v5804_v2  ;;  %v5808_v5 = vld [vmem:[%s8284_s1 + $0x514] ss:$8 sps:$4 sm:$0xff] (!%p240_p2)   ;;  %v5810_v6 = vld [vmem:[%s8284_s1 + $0x10] ss:$8 sps:$4 sm:$0xff] (!%p240_p2)   ;;  %v5812_v8 = vld [vmem:[%s8284_s1 + $0x24] ss:$8 sps:$4 sm:$0xff] (!%p240_p2)  }
   0x8   : > { %3674 = vmatpush1.bf16.msra.mxu0 (!%p240_p2), %v5805_v3  ;;  %3310 = vmatprep.subr.bf16.mxu1 (!%p240_p2), %v5806_v4  ;;  %v5811_v7 = vld [vmem:[%s8284_s1 + $0x510] ss:$8 sps:$4 sm:$0xff] (!%p240_p2)   ;;  %v5814_v9 = vld [vmem:[%s8284_s1 + $0x524] ss:$8 sps:$4 sm:$0xff] (!%p240_p2)   ;;  %v5816_v10 = vld [vmem:[%s8284_s1 + $0x20] ss:$8 sps:$4 sm:$0xff] (!%p240_p2)  }
   0x9   : > { %3675 = vmatprep.subr.bf16.mxu0 (!%p240_p2), %v5808_v5  ;;  %v5817_v11 = vld [vmem:[%s8284_s1 + $0x520] ss:$8 sps:$4 sm:$0xff] (!%p240_p2)   ;;  %v5818_v12 = vld [vmem:[%s8284_s1 + $0x34] ss:$8 sps:$4 sm:$0xff] (!%p240_p2)   ;;  %v5822_v14 = vld [vmem:[%s8284_s1 + $0x30] ss:$8 sps:$4 sm:$0xff] (!%p240_p2)  }
   0xa   : > { %v5820_v13 = vld [vmem:[%s8284_s1 + $0x534] ss:$8 sps:$4 sm:$0xff] (!%p240_p2)   ;;  %v5823_v15 = vld [vmem:[%s8284_s1 + $0x530] ss:$8 sps:$4 sm:$0xff] (!%p240_p2)   ;;  %v5824_v16 = vld [vmem:[%s8284_s1 + $0x44] ss:$8 sps:$4 sm:$0xff] (!%p240_p2)  }
   0xb   : > { %3311 = vmatpush1.bf16.msra.mxu1 (!%p240_p2), %v5810_v6  ;;  %v5826_v17 = vld [vmem:[%s8284_s1 + $0x544] ss:$8 sps:$4 sm:$0xff] (!%p240_p2)   ;;  %v5828_v18 = vld [vmem:[%s8284_s1 + $0x40] ss:$8 sps:$4 sm:$0xff] (!%p240_p2)   ;;  %v5830_v20 = vld [vmem:[%s8284_s1 + $0x54] ss:$8 sps:$4 sm:$0xff] (!%p240_p2)  }
   0xc   : > { %3676 = vmatpush1.bf16.msra.mxu0 (!%p240_p2), %v5811_v7  ;;  %3312 = vmatprep.subr.bf16.mxu1 (!%p240_p2), %v5812_v8  ;;  %v5829_v19 = vld [vmem:[%s8284_s1 + $0x540] ss:$8 sps:$4 sm:$0xff] (!%p240_p2)   ;;  %v5832_v21 = vld [vmem:[%s8284_s1 + $0x554] ss:$8 sps:$4 sm:$0xff] (!%p240_p2)   ;;  %v5834_v22 = vld [vmem:[%s8284_s1 + $0x50] ss:$8 sps:$4 sm:$0xff] (!%p240_p2)  }
   0xd   : > { %3677 = vmatprep.subr.bf16.mxu0 %v5814_v9  ;;  %v5835_v23 = vld [vmem:[%s8284_s1 + $0x550] ss:$8 sps:$4 sm:$0xff]   ;;  %v5836_v24 = vld [vmem:[%s8284_s1 + $0x64] ss:$8 sps:$4 sm:$0xff]   ;;  %v5840_v26 = vld [vmem:[%s8284_s1 + $0x60] ss:$8 sps:$4 sm:$0xff]  }
   0xe   : > { %v5838_v25 = vld [vmem:[%s8284_s1 + $0x564] ss:$8 sps:$4 sm:$0xff]   ;;  %v5841_v27 = vld [vmem:[%s8284_s1 + $0x560] ss:$8 sps:$4 sm:$0xff]   ;;  %v5842_v28 = vld [vmem:[%s8284_s1 + $0x74] ss:$8 sps:$4 sm:$0xff]  }
   0xf   : > { %3313 = vmatpush1.bf16.msra.mxu1 %v5816_v10  ;;  %v5844_v29 = vld [vmem:[%s8284_s1 + $0x574] ss:$8 sps:$4 sm:$0xff]   ;;  %v5846_v30 = vld [vmem:[%s8284_s1 + $0x70] ss:$8 sps:$4 sm:$0xff]   ;;  %v5848_v32 = vld [vmem:[%s8284_s1 + $0x84] ss:$8 sps:$4 sm:$0xff]  }
  0x10   : > { %3678 = vmatpush1.bf16.msra.mxu0 %v5817_v11  ;;  %3314 = vmatprep.subr.bf16.mxu1 %v5818_v12  ;;  %v5847_v31 = vld [vmem:[%s8284_s1 + $0x570] ss:$8 sps:$4 sm:$0xff]   ;;  %p274_p3 = scmp.lt.s32.totalorder %s4994_s21, 15  ;;  %v5850_v33 = vld [vmem:[%s8284_s1 + $0x584] ss:$8 sps:$4 sm:$0xff]  }
  0x11   : > { %3679 = vmatprep.subr.bf16.mxu0 %v5820_v13  ;;  %v5852_v34 = vld [vmem:[%s8284_s1 + $0x80] ss:$8 sps:$4 sm:$0xff]   ;;  %v5854_v36 = vld [vmem:[%s8284_s1 + $0x94] ss:$8 sps:$4 sm:$0xff]   ;;  %v5858_v38 = vld [vmem:[%s8284_s1 + $0x90] ss:$8 sps:$4 sm:$0xff]  }
  0x12   : > { %v5853_v35 = vld [vmem:[%s8284_s1 + $0x580] ss:$8 sps:$4 sm:$0xff]   ;;  %s8292_s21 = smov (!%p274_p3, %s4994_s21), 15  ;;  %v5856_v37 = vld [vmem:[%s8284_s1 + $0x594] ss:$8 sps:$4 sm:$0xff]  }
  0x13   : > { %3315 = vmatpush1.bf16.msra.mxu1 %v5822_v14  ;;  %v5859_v39 = vld [vmem:[%s8284_s1 + $0x590] ss:$8 sps:$4 sm:$0xff]   ;;  %v5860_v40 = vld [vmem:[%s8284_s1 + $0xa4] ss:$8 sps:$4 sm:$0xff]   ;;  %s5790_s23 = smul.u32 100, %s8292_s21  ;;  %s5573_s13 = sshll.u32 %s8292_s21, 3 }
  0x14   : > { %3680 = vmatpush1.bf16.msra.mxu0 %v5823_v15  ;;  %3316 = vmatprep.subr.bf16.mxu1 %v5824_v16  ;;  %v5862_v41 = vld [vmem:[%s8284_s1 + $0x5a4] ss:$8 sps:$4 sm:$0xff]   ;;  %v5864_v42 = vld [vmem:[%s8284_s1 + $0xa0] ss:$8 sps:$4 sm:$0xff]   ;;  %v5866_v44 = vld [vmem:[%s8284_s1 + $0xb4] ss:$8 sps:$4 sm:$0xff]   ;;  %s8270_s16 = scalar_lea.vmem %s8290_s7, %s5573_s13 }
  0x15   : > { %3681 = vmatprep.subr.bf16.mxu0 %v5826_v17  ;;  %v5865_v43 = vld [vmem:[%s8284_s1 + $0x5a0] ss:$8 sps:$4 sm:$0xff]   ;;  %s6844_s12 = scalar_lea.vmem %s8283_s0, %s5790_s23  ;;  %v5868_v45 = vld [vmem:[%s8284_s1 + $0x5b4] ss:$8 sps:$4 sm:$0xff]   ;;  %v5870_v46 = vld [vmem:[%s8284_s1 + $0xb0] ss:$8 sps:$4 sm:$0xff]  }
  0x16   : > { %v5871_v47 = vld [vmem:[%s8284_s1 + $0x5b0] ss:$8 sps:$4 sm:$0xff]   ;;  %v5898_v48 = vld [vmem:[%s6844_s12 + $0x4] ss:$100 sps:$4 sm:$0xff]   ;;  %v5878_v54 = vld [vmem:[%s8284_s1 + $0xd4] ss:$8 sps:$4 sm:$0xff]  }
  0x17   : > { %3317 = vmatpush1.bf16.msra.mxu1 %v5828_v18  ;;  %v5872_v49 = vld [vmem:[%s8284_s1 + $0xc4] ss:$8 sps:$4 sm:$0xff]   ;;  %3340 = vmatprep.mubr.bf16.mxu1 %v5898_v48  ;;  %v5876_v52 = vld [vmem:[%s8284_s1 + $0xc0] ss:$8 sps:$4 sm:$0xff]   ;;  %v5880_v55 = vld [vmem:[%s8284_s1 + $0x5d4] ss:$8 sps:$4 sm:$0xff]  }
  0x18   : > { %3682 = vmatpush1.bf16.msra.mxu0 %v5829_v19  ;;  %3318 = vmatprep.subr.bf16.mxu1 %v5830_v20  ;;  %v5874_v50 = vld [vmem:[%s8284_s1 + $0x5c4] ss:$8 sps:$4 sm:$0xff]   ;;  %v5877_v53 = vld [vmem:[%s8284_s1 + $0x5c0] ss:$8 sps:$4 sm:$0xff]   ;;  %v5882_v56 = vld [vmem:[%s8284_s1 + $0xd0] ss:$8 sps:$4 sm:$0xff]  }
  0x19   : > { %3683 = vmatprep.subr.bf16.mxu0 %v5832_v21  ;;  %v5904_v51 = vld [vmem:[%s6844_s12 + $0x2c] ss:$100 sps:$4 sm:$0xff]   ;;  %v5888_v60 = vld [vmem:[%s8284_s1 + $0xe0] ss:$8 sps:$4 sm:$0xff]   ;;  %v5890_v62 = vld [vmem:[%s8284_s1 + $0xf4] ss:$8 sps:$4 sm:$0xff]  }
  0x1a   : > { %3705 = vmatprep.mubr.bf16.mxu0 %v5904_v51  ;;  %v5883_v57 = vld [vmem:[%s8284_s1 + $0x5d0] ss:$8 sps:$4 sm:$0xff]   ;;  %v5884_v58 = vld [vmem:[%s8284_s1 + $0xe4] ss:$8 sps:$4 sm:$0xff]   ;;  %v5889_v61 = vld [vmem:[%s8284_s1 + $0x5e0] ss:$8 sps:$4 sm:$0xff]  }
  0x1b   : > { %3319 = vmatpush1.bf16.msra.mxu1 %v5834_v22  ;;  %v5886_v59 = vld [vmem:[%s8284_s1 + $0x5e4] ss:$8 sps:$4 sm:$0xff]   ;;  %v5892_v63 = vld [vmem:[%s8284_s1 + $0x5f4] ss:$8 sps:$4 sm:$0xff]   ;;  %v5894_v0 = vld [vmem:[%s8284_s1 + $0xf0] ss:$8 sps:$4 sm:$0xff]  }
  0x1c   : > { %3684 = vmatpush1.bf16.msra.mxu0 %v5835_v23  ;;  %3320 = vmatprep.subr.bf16.mxu1 %v5836_v24  ;;  %v5895_v1 = vld [vmem:[%s8284_s1 + $0x5f0] ss:$8 sps:$4 sm:$0xff]   ;;  %v5901_v2 = vld [vmem:[%s8284_s1 + $0x104] ss:$8 sps:$4 sm:$0xff]   ;;  %v5899_v5 = vld [vmem:[%s8284_s1 + $0x100] ss:$8 sps:$4 sm:$0xff]  }
  0x1d   : > { %3685 = vmatprep.subr.bf16.mxu0 %v5838_v25  ;;  %v5907_v3 = vld [vmem:[%s8284_s1 + $0x604] ss:$8 sps:$4 sm:$0xff]   ;;  %v5905_v7 = vld [vmem:[%s8284_s1 + $0x600] ss:$8 sps:$4 sm:$0xff]   ;;  %v5910_v8 = vld [vmem:[%s8284_s1 + $0x114] ss:$8 sps:$4 sm:$0xff]  }
  0x1e   : > { %v5896_v4 = vld [vmem:[%s6844_s12] ss:$100 sps:$4 sm:$0xff]   ;;  %v5902_v6 = vld [vmem:[%s6844_s12 + $0x28] ss:$100 sps:$4 sm:$0xff]   ;;  %v5913_v9 = vld [vmem:[%s8284_s1 + $0x614] ss:$8 sps:$4 sm:$0xff]  }
  0x1f   : > { %3321 = vmatpush1.bf16.msra.mxu1 %v5840_v26  ;;  %v5908_v10 = vld [vmem:[%s8284_s1 + $0x110] ss:$8 sps:$4 sm:$0xff]   ;;  %v5916_v12 = vld [vmem:[%s8284_s1 + $0x124] ss:$8 sps:$4 sm:$0xff]   ;;  %v5914_v14 = vld [vmem:[%s8284_s1 + $0x120] ss:$8 sps:$4 sm:$0xff]  }
  0x20   : > { %3686 = vmatpush1.bf16.msra.mxu0 %v5841_v27  ;;  %3322 = vmatprep.subr.bf16.mxu1 %v5842_v28  ;;  %v5911_v11 = vld [vmem:[%s8284_s1 + $0x610] ss:$8 sps:$4 sm:$0xff]   ;;  %v5919_v13 = vld [vmem:[%s8284_s1 + $0x624] ss:$8 sps:$4 sm:$0xff]   ;;  %v5917_v15 = vld [vmem:[%s8284_s1 + $0x620] ss:$8 sps:$4 sm:$0xff]  }
  0x21   : > { %3687 = vmatprep.subr.bf16.mxu0 %v5844_v29  ;;  %v5922_v16 = vld [vmem:[%s8284_s1 + $0x134] ss:$8 sps:$4 sm:$0xff]   ;;  %v5962_v17 = vld [vmem:[%s6844_s12 + $0xcc] ss:$100 sps:$4 sm:$0xff]   ;;  %v5926_v26 = vld [vmem:[%s8284_s1 + $0x140] ss:$8 sps:$4 sm:$0xff]  }
  0x22   : > { %v5925_v18 = vld [vmem:[%s8284_s1 + $0x634] ss:$8 sps:$4 sm:$0xff]   ;;  %v5920_v19 = vld [vmem:[%s8284_s1 + $0x130] ss:$8 sps:$4 sm:$0xff]   ;;  %v5928_v22 = vld [vmem:[%s8284_s1 + $0x144] ss:$8 sps:$4 sm:$0xff]  }
  0x23   : > { %3323 = vmatpush1.bf16.msra.mxu1 %v5846_v30  ;;  %v5923_v20 = vld [vmem:[%s8284_s1 + $0x630] ss:$8 sps:$4 sm:$0xff]   ;;  %v5931_v23 = vld [vmem:[%s8284_s1 + $0x644] ss:$8 sps:$4 sm:$0xff]   ;;  %v5929_v27 = vld [vmem:[%s8284_s1 + $0x640] ss:$8 sps:$4 sm:$0xff]  }
  0x24   : > { %3688 = vmatpush1.bf16.msra.mxu0 %v5847_v31  ;;  %3324 = vmatprep.subr.bf16.mxu1 %v5848_v32  ;;  %v5967_v21 = vld [vmem:[%s6844_s12 + $0xf4] ss:$100 sps:$4 sm:$0xff]   ;;  %v5972_v24 = vld [vmem:[%s6844_s12 + $0xc8] ss:$100 sps:$4 sm:$0xff]  }
  0x25   : > { %3689 = vmatprep.subr.bf16.mxu0 %v5850_v33  ;;  %v5973_v25 = vld [vmem:[%s6844_s12 + $0xf0] ss:$100 sps:$4 sm:$0xff]   ;;  %v5985_v33 = vld [vmem:[%s6844_s12 + $0x1bc] ss:$100 sps:$4 sm:$0xff]  }
  0x26   : > { %v5934_v28 = vld [vmem:[%s8284_s1 + $0x154] ss:$8 sps:$4 sm:$0xff]   ;;  %v5932_v31 = vld [vmem:[%s8284_s1 + $0x150] ss:$8 sps:$4 sm:$0xff]   ;;  %v5953_v51 = vld [vmem:[%s8284_s1 + $0x680] ss:$8 sps:$4 sm:$0xff]  }
  0x27   : > { %3325 = vmatpush1.bf16.msra.mxu1 %v5852_v34  ;;  %v5980_v29 = vld [vmem:[%s6844_s12 + $0x194] ss:$100 sps:$4 sm:$0xff]   ;;  %v5940_v34 = vld [vmem:[%s8284_s1 + $0x164] ss:$8 sps:$4 sm:$0xff]  }
  0x28   : > { %3690 = vmatpush1.bf16.msra.mxu0 %v5853_v35  ;;  %3326 = vmatprep.subr.bf16.mxu1 %v5854_v36  ;;  %v5937_v30 = vld [vmem:[%s8284_s1 + $0x654] ss:$8 sps:$4 sm:$0xff]   ;;  %v5935_v32 = vld [vmem:[%s8284_s1 + $0x650] ss:$8 sps:$4 sm:$0xff]   ;;  %v5943_v35 = vld [vmem:[%s8284_s1 + $0x664] ss:$8 sps:$4 sm:$0xff]  }
  0x29   : > { %3691 = vmatprep.subr.bf16.mxu0 %v5856_v37  ;;  %v5990_v36 = vld [vmem:[%s6844_s12 + $0x190] ss:$100 sps:$4 sm:$0xff]   ;;  %v5991_v37 = vld [vmem:[%s6844_s12 + $0x1b8] ss:$100 sps:$4 sm:$0xff]  }
  0x2a   : > { %v6008_v48 = vld [vmem:[%s6844_s12 + $0x258] ss:$100 sps:$4 sm:$0xff]  }
  0x2b   : > { %3327 = vmatpush1.bf16.msra.mxu1 %v5858_v38  ;;  %v5938_v38 = vld [vmem:[%s8284_s1 + $0x160] ss:$8 sps:$4 sm:$0xff]  }
  0x2c   : > { %3692 = vmatpush1.bf16.msra.mxu0 %v5859_v39  ;;  %3328 = vmatprep.subr.bf16.mxu1 %v5860_v40  ;;  %v5941_v39 = vld [vmem:[%s8284_s1 + $0x660] ss:$8 sps:$4 sm:$0xff]   ;;  %v5946_v40 = vld [vmem:[%s8284_s1 + $0x174] ss:$8 sps:$4 sm:$0xff]  }
  0x2d   : > { %3693 = vmatprep.subr.bf16.mxu0 %v5862_v41  ;;  %v5998_v41 = vld [vmem:[%s6844_s12 + $0x25c] ss:$100 sps:$4 sm:$0xff]  }
  0x2f   : > { %3329 = vmatpush1.bf16.msra.mxu1 %v5864_v42  ;;  %v5949_v42 = vld [vmem:[%s8284_s1 + $0x674] ss:$8 sps:$4 sm:$0xff]  }
  0x30   : > { %3694 = vmatpush1.bf16.msra.mxu0 %v5865_v43  ;;  %3330 = vmatprep.subr.bf16.mxu1 %v5866_v44  ;;  %v5944_v43 = vld [vmem:[%s8284_s1 + $0x170] ss:$8 sps:$4 sm:$0xff]  }
  0x31   : > { %3695 = vmatprep.subr.bf16.mxu0 %v5868_v45  ;;  %v5947_v44 = vld [vmem:[%s8284_s1 + $0x670] ss:$8 sps:$4 sm:$0xff]   ;;  %v6003_v45 = vld [vmem:[%s6844_s12 + $0x284] ss:$100 sps:$4 sm:$0xff]  }
  0x33   : > { %3331 = vmatpush1.bf16.msra.mxu1 %v5870_v46  ;;  %v5952_v46 = vld [vmem:[%s8284_s1 + $0x184] ss:$8 sps:$4 sm:$0xff]  }
  0x34   : > { %3696 = vmatpush1.bf16.msra.mxu0 %v5871_v47  ;;  %3332 = vmatprep.subr.bf16.mxu1 %v5872_v49  ;;  %v5955_v47 = vld [vmem:[%s8284_s1 + $0x684] ss:$8 sps:$4 sm:$0xff]  }
  0x35   : > { %3697 = vmatprep.subr.bf16.mxu0 %v5874_v50  ;;  %v6009_v49 = vld [vmem:[%s6844_s12 + $0x280] ss:$100 sps:$4 sm:$0xff]  }
  0x36   : > { %v5950_v50 = vld [vmem:[%s8284_s1 + $0x180] ss:$8 sps:$4 sm:$0xff]  }
  0x37   : > { %3333 = vmatpush1.bf16.msra.mxu1 %v5876_v52  ;;  %v5958_v52 = vld [vmem:[%s8284_s1 + $0x194] ss:$8 sps:$4 sm:$0xff]  }
  0x38   : > { %3698 = vmatpush1.bf16.msra.mxu0 %v5877_v53  ;;  %3334 = vmatprep.subr.bf16.mxu1 %v5878_v54  ;;  %v5961_v53 = vld [vmem:[%s8284_s1 + $0x694] ss:$8 sps:$4 sm:$0xff]   ;;  %v6018_v54 = vld [vmem:[%s6844_s12 + $0xc] ss:$100 sps:$4 sm:$0xff]  }
  0x39   : > { %3699 = vmatprep.subr.bf16.mxu0 %v5880_v55  ;;  %v5956_v55 = vld [vmem:[%s8284_s1 + $0x190] ss:$8 sps:$4 sm:$0xff]  }
  0x3b   : > { %3335 = vmatpush1.bf16.msra.mxu1 %v5882_v56  ;;  %v5959_v56 = vld [vmem:[%s8284_s1 + $0x690] ss:$8 sps:$4 sm:$0xff]  }
  0x3c   : > { %3700 = vmatpush1.bf16.msra.mxu0 %v5883_v57  ;;  %3336 = vmatprep.subr.bf16.mxu1 %v5884_v58  ;;  %v6024_v57 = vld [vmem:[%s6844_s12 + $0x34] ss:$100 sps:$4 sm:$0xff]   ;;  %v5966_v58 = vld [vmem:[%s8284_s1 + $0x1a4] ss:$8 sps:$4 sm:$0xff]  }
  0x3d   : > { %3701 = vmatprep.subr.bf16.mxu0 %v5886_v59  ;;  %v5971_v59 = vld [vmem:[%s8284_s1 + $0x6a4] ss:$8 sps:$4 sm:$0xff]  }
  0x3f   : > { %3337 = vmatpush1.bf16.msra.mxu1 %v5888_v60  ;;  %v5964_v60 = vld [vmem:[%s8284_s1 + $0x1a0] ss:$8 sps:$4 sm:$0xff]  }
  0x40   : > { %3702 = vmatpush1.bf16.msra.mxu0 %v5889_v61  ;;  %3338 = vmatprep.subr.bf16.mxu1 %v5890_v62  ;;  %v5969_v61 = vld [vmem:[%s8284_s1 + $0x6a0] ss:$8 sps:$4 sm:$0xff]   ;;  %v5976_v62 = vld [vmem:[%s8284_s1 + $0x1b4] ss:$8 sps:$4 sm:$0xff]  }
  0x41   : > { %3703 = vmatprep.subr.bf16.mxu0 %v5892_v63  ;;  %v5979_v63 = vld [vmem:[%s8284_s1 + $0x6b4] ss:$8 sps:$4 sm:$0xff]  }
  0x43   : > { %3339 = vmatpush1.bf16.msra.mxu1 %v5894_v0  ;;  %v5974_v0 = vld [vmem:[%s8284_s1 + $0x1b0] ss:$8 sps:$4 sm:$0xff]  }
  0x44   : > { %3704 = vmatpush1.bf16.msra.mxu0 %v5895_v1  ;;  %3381 = vmatprep.subr.bf16.mxu1 %v5901_v2  ;;  %v5977_v1 = vld [vmem:[%s8284_s1 + $0x6b0] ss:$8 sps:$4 sm:$0xff]   ;;  %v5984_v2 = vld [vmem:[%s8284_s1 + $0x1c4] ss:$8 sps:$4 sm:$0xff]  }
  0x45   : > { %3746 = vmatprep.subr.bf16.mxu0 %v5907_v3  ;;  %v5989_v3 = vld [vmem:[%s8284_s1 + $0x6c4] ss:$8 sps:$4 sm:$0xff]  }
  0x46   : > { %3341 = vmatmul.mubr.bf16.vlgmr.msra.gmra.mrb[0].mxu1 %v5896_v4  ;;  %v5982_v4 = vld [vmem:[%s8284_s1 + $0x1c0] ss:$8 sps:$4 sm:$0xff]  }
  0x47   : > { %3706 = vmatmul.mubr.bf16.vlgmr.msra.gmra.mrb[0].mxu0 %v5902_v6  ;;  %3382 = vmatpush1.bf16.msra.mxu1 %v5899_v5  ;;  %v5987_v5 = vld [vmem:[%s8284_s1 + $0x6c0] ss:$8 sps:$4 sm:$0xff]   ;;  %v5994_v6 = vld [vmem:[%s8284_s1 + $0x1d4] ss:$8 sps:$4 sm:$0xff]  }
  0x48   : > { %3747 = vmatpush1.bf16.msra.mxu0 %v5905_v7  ;;  %3383 = vmatprep.subr.bf16.mxu1 %v5910_v8  ;;  %v5997_v7 = vld [vmem:[%s8284_s1 + $0x6d4] ss:$8 sps:$4 sm:$0xff]   ;;  %v5992_v8 = vld [vmem:[%s8284_s1 + $0x1d0] ss:$8 sps:$4 sm:$0xff]  }
  0x49   : > { %3748 = vmatprep.subr.bf16.mxu0 %v5913_v9  ;;  %3350 = vmatprep.mubr.bf16.mxu1 %v5962_v17  ;;  %v5995_v9 = vld [vmem:[%s8284_s1 + $0x6d0] ss:$8 sps:$4 sm:$0xff]  }
  0x4a   : > { %3715 = vmatprep.mubr.bf16.mxu0 %v5967_v21  ;;  %v6013_v17 = vld [vmem:[%s8284_s1 + $0x6f0] ss:$8 sps:$4 sm:$0xff]   ;;  %v6019_v21 = vld [vmem:[%s8284_s1 + $0x200] ss:$8 sps:$4 sm:$0xff]  }
  0x4b   : > { %3384 = vmatpush1.bf16.msra.mxu1 %v5908_v10  ;;  %v6002_v10 = vld [vmem:[%s8284_s1 + $0x1e4] ss:$8 sps:$4 sm:$0xff]  }
  0x4c   : > { %3749 = vmatpush1.bf16.msra.mxu0 %v5911_v11  ;;  %3385 = vmatprep.subr.bf16.mxu1 %v5916_v12  ;;  %v6007_v11 = vld [vmem:[%s8284_s1 + $0x6e4] ss:$8 sps:$4 sm:$0xff]   ;;  %v6000_v12 = vld [vmem:[%s8284_s1 + $0x1e0] ss:$8 sps:$4 sm:$0xff]  }
  0x4d   : > { %3750 = vmatprep.subr.bf16.mxu0 %v5919_v13  ;;  %v6005_v13 = vld [vmem:[%s8284_s1 + $0x6e0] ss:$8 sps:$4 sm:$0xff]  }
  0x4e   : > { %3351 = vmatmul.mubr.bf16.gmra.mrb[4].mxu1 %v5972_v24  ;;  %v6030_v24 = vld [vmem:[%s8284_s1 + $0x214] ss:$8 sps:$4 sm:$0xff]  }
  0x4f   : > { %3386 = vmatpush1.bf16.msra.mxu1 %v5914_v14  ;;  %3716 = vmatmul.mubr.bf16.gmra.mrb[4].mxu0 %v5973_v25  ;;  %v6012_v14 = vld [vmem:[%s8284_s1 + $0x1f4] ss:$8 sps:$4 sm:$0xff]  }
  0x50   : > { %3751 = vmatpush1.bf16.msra.mxu0 %v5917_v15  ;;  %3387 = vmatprep.subr.bf16.mxu1 %v5922_v16  ;;  %v6015_v15 = vld [vmem:[%s8284_s1 + $0x6f4] ss:$8 sps:$4 sm:$0xff]   ;;  %v6010_v16 = vld [vmem:[%s8284_s1 + $0x1f0] ss:$8 sps:$4 sm:$0xff]  }
  0x51   : > { %3752 = vmatprep.subr.bf16.mxu0 %v5925_v18  ;;  %3360 = vmatprep.mubr.bf16.mxu1 %v5980_v29  ;;  %v6021_v18 = vld [vmem:[%s8284_s1 + $0x204] ss:$8 sps:$4 sm:$0xff]   ;;  %v6033_v25 = vld [vmem:[%s8284_s1 + $0x714] ss:$8 sps:$4 sm:$0xff]   ;;  %v6031_v29 = vld [vmem:[%s8284_s1 + $0x710] ss:$8 sps:$4 sm:$0xff]  }
  0x52   : > { %3725 = vmatprep.mubr.bf16.mxu0 %v5985_v33  ;;  %v6092_v33 = vld [vmem:[%s6844_s12 + $0xd0] ss:$100 sps:$4 sm:$0xff]  }
  0x53   : > { %3388 = vmatpush1.bf16.msra.mxu1 %v5920_v19  ;;  %v6027_v19 = vld [vmem:[%s8284_s1 + $0x704] ss:$8 sps:$4 sm:$0xff]  }
  0x54   : > { %3753 = vmatpush1.bf16.msra.mxu0 %v5923_v20  ;;  %3389 = vmatprep.subr.bf16.mxu1 %v5928_v22  ;;  %v6016_v20 = vld [vmem:[%s6844_s12 + $0x8] ss:$100 sps:$4 sm:$0xff]   ;;  %v6022_v22 = vld [vmem:[%s6844_s12 + $0x30] ss:$100 sps:$4 sm:$0xff]  }
  0x55   : > { %3754 = vmatprep.subr.bf16.mxu0 %v5931_v23  ;;  %v6025_v23 = vld [vmem:[%s8284_s1 + $0x700] ss:$8 sps:$4 sm:$0xff]  }
  0x56   : > { %3361 = vmatmul.mubr.bf16.gmra.mrb[8].mxu1 %v5990_v36  ;;  %v6042_v36 = vld [vmem:[%s8284_s1 + $0x234] ss:$8 sps:$4 sm:$0xff]  }
  0x57   : > { %3390 = vmatpush1.bf16.msra.mxu1 %v5926_v26  ;;  %3726 = vmatmul.mubr.bf16.gmra.mrb[8].mxu0 %v5991_v37  ;;  %v6082_v26 = vld [vmem:[%s6844_s12 + $0xd4] ss:$100 sps:$4 sm:$0xff]  }
  0x58   : > { %3755 = vmatpush1.bf16.msra.mxu0 %v5929_v27  ;;  %3391 = vmatprep.subr.bf16.mxu1 %v5934_v28  ;;  %v6087_v27 = vld [vmem:[%s6844_s12 + $0xfc] ss:$100 sps:$4 sm:$0xff]   ;;  %v6028_v28 = vld [vmem:[%s8284_s1 + $0x210] ss:$8 sps:$4 sm:$0xff]  }
  0x59   : > { %3756 = vmatprep.subr.bf16.mxu0 %v5937_v30  ;;  %3370 = vmatprep.mubr.bf16.mxu1 %v5998_v41  ;;  %v6036_v30 = vld [vmem:[%s8284_s1 + $0x224] ss:$8 sps:$4 sm:$0xff]   ;;  %v6045_v37 = vld [vmem:[%s8284_s1 + $0x734] ss:$8 sps:$4 sm:$0xff]   ;;  %v6043_v41 = vld [vmem:[%s8284_s1 + $0x730] ss:$8 sps:$4 sm:$0xff]  }
  0x5a   : > { %3735 = vmatprep.mubr.bf16.mxu0 %v6003_v45  ;;  %v6110_v45 = vld [vmem:[%s6844_s12 + $0x198] ss:$100 sps:$4 sm:$0xff]  }
  0x5b   : > { %3392 = vmatpush1.bf16.msra.mxu1 %v5932_v31  ;;  %v6039_v31 = vld [vmem:[%s8284_s1 + $0x724] ss:$8 sps:$4 sm:$0xff]  }
  0x5c   : > { %3757 = vmatpush1.bf16.msra.mxu0 %v5935_v32  ;;  %3393 = vmatprep.subr.bf16.mxu1 %v5940_v34  ;;  %v6034_v32 = vld [vmem:[%s8284_s1 + $0x220] ss:$8 sps:$4 sm:$0xff]   ;;  %v6093_v34 = vld [vmem:[%s6844_s12 + $0xf8] ss:$100 sps:$4 sm:$0xff]  }
  0x5d   : > { %3758 = vmatprep.subr.bf16.mxu0 %v5943_v35  ;;  %v6037_v35 = vld [vmem:[%s8284_s1 + $0x720] ss:$8 sps:$4 sm:$0xff]  }
  0x5e   : > { %3371 = vmatmul.mubr.bf16.gmra.mrb[12].mxu1 %v6008_v48  ;;  %v6054_v48 = vld [vmem:[%s8284_s1 + $0x254] ss:$8 sps:$4 sm:$0xff]  }
  0x5f   : > { %3394 = vmatpush1.bf16.msra.mxu1 %v5938_v38  ;;  %3736 = vmatmul.mubr.bf16.gmra.mrb[12].mxu0 %v6009_v49  ;;  %v6100_v38 = vld [vmem:[%s6844_s12 + $0x19c] ss:$100 sps:$4 sm:$0xff]  }
  0x60   : > { %3759 = vmatpush1.bf16.msra.mxu0 %v5941_v39  ;;  %3395 = vmatprep.subr.bf16.mxu1 %v5946_v40  ;;  %v6105_v39 = vld [vmem:[%s6844_s12 + $0x1c4] ss:$100 sps:$4 sm:$0xff]   ;;  %v6040_v40 = vld [vmem:[%s8284_s1 + $0x230] ss:$8 sps:$4 sm:$0xff]   ;;  %v6057_v49 = vld [vmem:[%s8284_s1 + $0x754] ss:$8 sps:$4 sm:$0xff]  }
  0x61   : > { %3760 = vmatprep.subr.bf16.mxu0 %v5949_v42  ;;  %3413 = vmatprep.mubr.bf16.mxu1 %v6018_v54  ;;  %v6048_v42 = vld [vmem:[%s8284_s1 + $0x244] ss:$8 sps:$4 sm:$0xff]  }
  0x62   : > { %3778 = vmatprep.mubr.bf16.mxu0 %v6024_v57  ;;  %v6060_v54 = vld [vmem:[%s8284_s1 + $0x264] ss:$8 sps:$4 sm:$0xff]   ;;  %v6061_v57 = vld [vmem:[%s8284_s1 + $0x760] ss:$8 sps:$4 sm:$0xff]  }
  0x63   : > { %3396 = vmatpush1.bf16.msra.mxu1 %v5944_v43  ;;  %v6051_v43 = vld [vmem:[%s8284_s1 + $0x744] ss:$8 sps:$4 sm:$0xff]  }
  0x64   : > { %3761 = vmatpush1.bf16.msra.mxu0 %v5947_v44  ;;  %3397 = vmatprep.subr.bf16.mxu1 %v5952_v46  ;;  %v6046_v44 = vld [vmem:[%s8284_s1 + $0x240] ss:$8 sps:$4 sm:$0xff]  }
  0x65   : > { %3762 = vmatprep.subr.bf16.mxu0 %v5955_v47  ;;  %v6111_v46 = vld [vmem:[%s6844_s12 + $0x1c0] ss:$100 sps:$4 sm:$0xff]  }
  0x66   : > { %v6049_v47 = vld [vmem:[%s8284_s1 + $0x740] ss:$8 sps:$4 sm:$0xff]  }
  0x67   : > { %3398 = vmatpush1.bf16.msra.mxu1 %v5950_v50  ;;  %v6118_v50 = vld [vmem:[%s6844_s12 + $0x264] ss:$100 sps:$4 sm:$0xff]  }
  0x68   : > { %3763 = vmatpush1.bf16.msra.mxu0 %v5953_v51  ;;  %3399 = vmatprep.subr.bf16.mxu1 %v5958_v52  ;;  %v6123_v51 = vld [vmem:[%s6844_s12 + $0x28c] ss:$100 sps:$4 sm:$0xff]  }
  0x69   : > { %3764 = vmatprep.subr.bf16.mxu0 %v5961_v53  ;;  %v6052_v52 = vld [vmem:[%s8284_s1 + $0x250] ss:$8 sps:$4 sm:$0xff]  }
  0x6a   : > { %v6055_v53 = vld [vmem:[%s8284_s1 + $0x750] ss:$8 sps:$4 sm:$0xff]  }
  0x6b   : > { %3400 = vmatpush1.bf16.msra.mxu1 %v5956_v55  ;;  %v6063_v55 = vld [vmem:[%s8284_s1 + $0x764] ss:$8 sps:$4 sm:$0xff]  }
  0x6c   : > { %3765 = vmatpush1.bf16.msra.mxu0 %v5959_v56  ;;  %3401 = vmatprep.subr.bf16.mxu1 %v5966_v58  ;;  %v6058_v56 = vld [vmem:[%s8284_s1 + $0x260] ss:$8 sps:$4 sm:$0xff]  }
  0x6d   : > { %3766 = vmatprep.subr.bf16.mxu0 %v5971_v59  ;;  %v6128_v58 = vld [vmem:[%s6844_s12 + $0x260] ss:$100 sps:$4 sm:$0xff]   ;;  %v6129_v59 = vld [vmem:[%s6844_s12 + $0x288] ss:$100 sps:$4 sm:$0xff]  }
  0x6f   : > { %3402 = vmatpush1.bf16.msra.mxu1 %v5964_v60  ;;  %v6066_v60 = vld [vmem:[%s8284_s1 + $0x274] ss:$8 sps:$4 sm:$0xff]  }
  0x70   : > { %3767 = vmatpush1.bf16.msra.mxu0 %v5969_v61  ;;  %3403 = vmatprep.subr.bf16.mxu1 %v5976_v62  ;;  %v6069_v61 = vld [vmem:[%s8284_s1 + $0x774] ss:$8 sps:$4 sm:$0xff]  }
  0x71   : > { %3768 = vmatprep.subr.bf16.mxu0 %v5979_v63  ;;  %v6138_v62 = vld [vmem:[%s6844_s12 + $0x14] ss:$100 sps:$4 sm:$0xff]   ;;  %v6144_v63 = vld [vmem:[%s6844_s12 + $0x3c] ss:$100 sps:$4 sm:$0xff]  }
  0x73   : > { %3404 = vmatpush1.bf16.msra.mxu1 %v5974_v0  ;;  %v6064_v0 = vld [vmem:[%s8284_s1 + $0x270] ss:$8 sps:$4 sm:$0xff]  }
  0x74   : > { %3769 = vmatpush1.bf16.msra.mxu0 %v5977_v1  ;;  %3405 = vmatprep.subr.bf16.mxu1 %v5984_v2  ;;  %v6067_v1 = vld [vmem:[%s8284_s1 + $0x770] ss:$8 sps:$4 sm:$0xff]   ;;  %v6072_v2 = vld [vmem:[%s8284_s1 + $0x284] ss:$8 sps:$4 sm:$0xff]  }
  0x75   : > { %3770 = vmatprep.subr.bf16.mxu0 %v5989_v3  ;;  %v6075_v3 = vld [vmem:[%s8284_s1 + $0x784] ss:$8 sps:$4 sm:$0xff]  }
  0x77   : > { %3406 = vmatpush1.bf16.msra.mxu1 %v5982_v4  ;;  %v6070_v4 = vld [vmem:[%s8284_s1 + $0x280] ss:$8 sps:$4 sm:$0xff]  }
  0x78   : > { %3771 = vmatpush1.bf16.msra.mxu0 %v5987_v5  ;;  %3407 = vmatprep.subr.bf16.mxu1 %v5994_v6  ;;  %v6073_v5 = vld [vmem:[%s8284_s1 + $0x780] ss:$8 sps:$4 sm:$0xff]   ;;  %v6078_v6 = vld [vmem:[%s8284_s1 + $0x294] ss:$8 sps:$4 sm:$0xff]  }
  0x79   : > { %3772 = vmatprep.subr.bf16.mxu0 %v5997_v7  ;;  %v6081_v7 = vld [vmem:[%s8284_s1 + $0x794] ss:$8 sps:$4 sm:$0xff]  }
  0x7b   : > { %3408 = vmatpush1.bf16.msra.mxu1 %v5992_v8  ;;  %v6076_v8 = vld [vmem:[%s8284_s1 + $0x290] ss:$8 sps:$4 sm:$0xff]  }
  0x7c   : > { %3773 = vmatpush1.bf16.msra.mxu0 %v5995_v9  ;;  %3409 = vmatprep.subr.bf16.mxu1 %v6002_v10  ;;  %v6079_v9 = vld [vmem:[%s8284_s1 + $0x790] ss:$8 sps:$4 sm:$0xff]   ;;  %v6086_v10 = vld [vmem:[%s8284_s1 + $0x2a4] ss:$8 sps:$4 sm:$0xff]  }
  0x7d   : > { %3774 = vmatprep.subr.bf16.mxu0 %v6007_v11  ;;  %v6091_v11 = vld [vmem:[%s8284_s1 + $0x7a4] ss:$8 sps:$4 sm:$0xff]  }
  0x7f   : > { %3410 = vmatpush1.bf16.msra.mxu1 %v6000_v12  ;;  %v6084_v12 = vld [vmem:[%s8284_s1 + $0x2a0] ss:$8 sps:$4 sm:$0xff]  }
  0x80   : > { %3775 = vmatpush1.bf16.msra.mxu0 %v6005_v13  ;;  %3411 = vmatprep.subr.bf16.mxu1 %v6012_v14  ;;  %v6089_v13 = vld [vmem:[%s8284_s1 + $0x7a0] ss:$8 sps:$4 sm:$0xff]   ;;  %v6096_v14 = vld [vmem:[%s8284_s1 + $0x2b4] ss:$8 sps:$4 sm:$0xff]  }
  0x81   : > { %3776 = vmatprep.subr.bf16.mxu0 %v6015_v15  ;;  %v6099_v15 = vld [vmem:[%s8284_s1 + $0x7b4] ss:$8 sps:$4 sm:$0xff]  }
  0x83   : > { %3412 = vmatpush1.bf16.msra.mxu1 %v6010_v16  ;;  %v6094_v16 = vld [vmem:[%s8284_s1 + $0x2b0] ss:$8 sps:$4 sm:$0xff]  }
  0x84   : > { %3777 = vmatpush1.bf16.msra.mxu0 %v6013_v17  ;;  %3454 = vmatprep.subr.bf16.mxu1 %v6021_v18  ;;  %v6097_v17 = vld [vmem:[%s8284_s1 + $0x7b0] ss:$8 sps:$4 sm:$0xff]   ;;  %v6104_v18 = vld [vmem:[%s8284_s1 + $0x2c4] ss:$8 sps:$4 sm:$0xff]  }
  0x85   : > { %3819 = vmatprep.subr.bf16.mxu0 %v6027_v19  ;;  %v6109_v19 = vld [vmem:[%s8284_s1 + $0x7c4] ss:$8 sps:$4 sm:$0xff]  }
  0x86   : > { %3414 = vmatmul.mubr.bf16.vlgmr.msra.gmra.mrb[0].mxu1 %v6016_v20  ;;  %v6102_v20 = vld [vmem:[%s8284_s1 + $0x2c0] ss:$8 sps:$4 sm:$0xff]  }
  0x87   : > { %3779 = vmatmul.mubr.bf16.vlgmr.msra.gmra.mrb[0].mxu0 %v6022_v22  ;;  %3455 = vmatpush1.bf16.msra.mxu1 %v6019_v21  ;;  %v6107_v21 = vld [vmem:[%s8284_s1 + $0x7c0] ss:$8 sps:$4 sm:$0xff]   ;;  %v6114_v22 = vld [vmem:[%s8284_s1 + $0x2d4] ss:$8 sps:$4 sm:$0xff]  }
  0x88   : > { %3820 = vmatpush1.bf16.msra.mxu0 %v6025_v23  ;;  %3456 = vmatprep.subr.bf16.mxu1 %v6030_v24  ;;  %v6117_v23 = vld [vmem:[%s8284_s1 + $0x7d4] ss:$8 sps:$4 sm:$0xff]   ;;  %v6112_v24 = vld [vmem:[%s8284_s1 + $0x2d0] ss:$8 sps:$4 sm:$0xff]  }
  0x89   : > { %3821 = vmatprep.subr.bf16.mxu0 %v6033_v25  ;;  %3423 = vmatprep.mubr.bf16.mxu1 %v6082_v26  ;;  %v6115_v25 = vld [vmem:[%s8284_s1 + $0x7d0] ss:$8 sps:$4 sm:$0xff]   ;;  %v6122_v26 = vld [vmem:[%s8284_s1 + $0x2e4] ss:$8 sps:$4 sm:$0xff]  }
  0x8a   : > { %3788 = vmatprep.mubr.bf16.mxu0 %v6087_v27  ;;  %v6127_v27 = vld [vmem:[%s8284_s1 + $0x7e4] ss:$8 sps:$4 sm:$0xff]  }
  0x8b   : > { %3457 = vmatpush1.bf16.msra.mxu1 %v6028_v28  ;;  %v6120_v28 = vld [vmem:[%s8284_s1 + $0x2e0] ss:$8 sps:$4 sm:$0xff]  }
  0x8c   : > { %3822 = vmatpush1.bf16.msra.mxu0 %v6031_v29  ;;  %3458 = vmatprep.subr.bf16.mxu1 %v6036_v30  ;;  %v6125_v29 = vld [vmem:[%s8284_s1 + $0x7e0] ss:$8 sps:$4 sm:$0xff]   ;;  %v6132_v30 = vld [vmem:[%s8284_s1 + $0x2f4] ss:$8 sps:$4 sm:$0xff]  }
  0x8d   : > { %3823 = vmatprep.subr.bf16.mxu0 %v6039_v31  ;;  %v6135_v31 = vld [vmem:[%s8284_s1 + $0x7f4] ss:$8 sps:$4 sm:$0xff]  }
  0x8e   : > { %3424 = vmatmul.mubr.bf16.gmra.mrb[4].mxu1 %v6092_v33  ;;  %v6133_v33 = vld [vmem:[%s8284_s1 + $0x7f0] ss:$8 sps:$4 sm:$0xff]  }
  0x8f   : > { %3789 = vmatmul.mubr.bf16.gmra.mrb[4].mxu0 %v6093_v34  ;;  %3459 = vmatpush1.bf16.msra.mxu1 %v6034_v32  ;;  %v6130_v32 = vld [vmem:[%s8284_s1 + $0x2f0] ss:$8 sps:$4 sm:$0xff]   ;;  %v6141_v34 = vld [vmem:[%s8284_s1 + $0x304] ss:$8 sps:$4 sm:$0xff]  }
  0x90   : > { %3824 = vmatpush1.bf16.msra.mxu0 %v6037_v35  ;;  %3460 = vmatprep.subr.bf16.mxu1 %v6042_v36  ;;  %v6147_v35 = vld [vmem:[%s8284_s1 + $0x804] ss:$8 sps:$4 sm:$0xff]   ;;  %v6136_v36 = vld [vmem:[%s6844_s12 + $0x10] ss:$100 sps:$4 sm:$0xff]  }
  0x91   : > { %3825 = vmatprep.subr.bf16.mxu0 %v6045_v37  ;;  %3433 = vmatprep.mubr.bf16.mxu1 %v6100_v38  ;;  %v6139_v37 = vld [vmem:[%s8284_s1 + $0x300] ss:$8 sps:$4 sm:$0xff]   ;;  %v6142_v38 = vld [vmem:[%s6844_s12 + $0x38] ss:$100 sps:$4 sm:$0xff]  }
  0x92   : > { %3798 = vmatprep.mubr.bf16.mxu0 %v6105_v39  ;;  %v6145_v39 = vld [vmem:[%s8284_s1 + $0x800] ss:$8 sps:$4 sm:$0xff]  }
  0x93   : > { %3461 = vmatpush1.bf16.msra.mxu1 %v6040_v40  ;;  %v6150_v40 = vld [vmem:[%s8284_s1 + $0x314] ss:$8 sps:$4 sm:$0xff]  }
  0x94   : > { %3826 = vmatpush1.bf16.msra.mxu0 %v6043_v41  ;;  %3462 = vmatprep.subr.bf16.mxu1 %v6048_v42  ;;  %v6153_v41 = vld [vmem:[%s8284_s1 + $0x814] ss:$8 sps:$4 sm:$0xff]  }
  0x95   : > { %3827 = vmatprep.subr.bf16.mxu0 %v6051_v43  ;;  %v6202_v42 = vld [vmem:[%s6844_s12 + $0xdc] ss:$100 sps:$4 sm:$0xff]   ;;  %v6207_v43 = vld [vmem:[%s6844_s12 + $0x104] ss:$100 sps:$4 sm:$0xff]  }
  0x96   : > { %3434 = vmatmul.mubr.bf16.gmra.mrb[8].mxu1 %v6110_v45  ;;  %v6151_v45 = vld [vmem:[%s8284_s1 + $0x810] ss:$8 sps:$4 sm:$0xff]  }
  0x97   : > { %3799 = vmatmul.mubr.bf16.gmra.mrb[8].mxu0 %v6111_v46  ;;  %3463 = vmatpush1.bf16.msra.mxu1 %v6046_v44  ;;  %v6148_v44 = vld [vmem:[%s8284_s1 + $0x310] ss:$8 sps:$4 sm:$0xff]   ;;  %v6156_v46 = vld [vmem:[%s8284_s1 + $0x324] ss:$8 sps:$4 sm:$0xff]  }
  0x98   : > { %3828 = vmatpush1.bf16.msra.mxu0 %v6049_v47  ;;  %3464 = vmatprep.subr.bf16.mxu1 %v6054_v48  ;;  %v6159_v47 = vld [vmem:[%s8284_s1 + $0x824] ss:$8 sps:$4 sm:$0xff]   ;;  %v6154_v48 = vld [vmem:[%s8284_s1 + $0x320] ss:$8 sps:$4 sm:$0xff]  }
  0x99   : > { %3829 = vmatprep.subr.bf16.mxu0 %v6057_v49  ;;  %3443 = vmatprep.mubr.bf16.mxu1 %v6118_v50  ;;  %v6157_v49 = vld [vmem:[%s8284_s1 + $0x820] ss:$8 sps:$4 sm:$0xff]   ;;  %v6212_v50 = vld [vmem:[%s6844_s12 + $0xd8] ss:$100 sps:$4 sm:$0xff]  }
  0x9a   : > { %3808 = vmatprep.mubr.bf16.mxu0 %v6123_v51  ;;  %v6213_v51 = vld [vmem:[%s6844_s12 + $0x100] ss:$100 sps:$4 sm:$0xff]  }
  0x9b   : > { %3465 = vmatpush1.bf16.msra.mxu1 %v6052_v52  ;;  %v6162_v52 = vld [vmem:[%s8284_s1 + $0x334] ss:$8 sps:$4 sm:$0xff]  }
  0x9c   : > { %3830 = vmatpush1.bf16.msra.mxu0 %v6055_v53  ;;  %3466 = vmatprep.subr.bf16.mxu1 %v6060_v54  ;;  %v6165_v53 = vld [vmem:[%s8284_s1 + $0x834] ss:$8 sps:$4 sm:$0xff]   ;;  %v6220_v54 = vld [vmem:[%s6844_s12 + $0x1a4] ss:$100 sps:$4 sm:$0xff]  }
  0x9d   : > { %3831 = vmatprep.subr.bf16.mxu0 %v6063_v55  ;;  %v6225_v55 = vld [vmem:[%s6844_s12 + $0x1cc] ss:$100 sps:$4 sm:$0xff]  }
  0x9e   : > { %3444 = vmatmul.mubr.bf16.gmra.mrb[12].mxu1 %v6128_v58  ;;  %v6168_v58 = vld [vmem:[%s8284_s1 + $0x344] ss:$8 sps:$4 sm:$0xff]  }
  0x9f   : > { %3809 = vmatmul.mubr.bf16.gmra.mrb[12].mxu0 %v6129_v59  ;;  %3467 = vmatpush1.bf16.msra.mxu1 %v6058_v56  ;;  %v6160_v56 = vld [vmem:[%s8284_s1 + $0x330] ss:$8 sps:$4 sm:$0xff]   ;;  %v6171_v59 = vld [vmem:[%s8284_s1 + $0x844] ss:$8 sps:$4 sm:$0xff]  }
  0xa0   : > { %3832 = vmatpush1.bf16.msra.mxu0 %v6061_v57  ;;  %3468 = vmatprep.subr.bf16.mxu1 %v6066_v60  ;;  %v6163_v57 = vld [vmem:[%s8284_s1 + $0x830] ss:$8 sps:$4 sm:$0xff]   ;;  %v6166_v60 = vld [vmem:[%s8284_s1 + $0x340] ss:$8 sps:$4 sm:$0xff]  }
  0xa1   : > { %3833 = vmatprep.subr.bf16.mxu0 %v6069_v61  ;;  %3486 = vmatprep.mubr.bf16.mxu1 %v6138_v62  ;;  %v6169_v61 = vld [vmem:[%s8284_s1 + $0x840] ss:$8 sps:$4 sm:$0xff]  }
  0xa2   : > { %3851 = vmatprep.mubr.bf16.mxu0 %v6144_v63  ;;  %v6230_v62 = vld [vmem:[%s6844_s12 + $0x1a0] ss:$100 sps:$4 sm:$0xff]   ;;  %v6231_v63 = vld [vmem:[%s6844_s12 + $0x1c8] ss:$100 sps:$4 sm:$0xff]  }
  0xa3   : > { %3469 = vmatpush1.bf16.msra.mxu1 %v6064_v0  ;;  %v6174_v0 = vld [vmem:[%s8284_s1 + $0x354] ss:$8 sps:$4 sm:$0xff]  }
  0xa4   : > { %3834 = vmatpush1.bf16.msra.mxu0 %v6067_v1  ;;  %3470 = vmatprep.subr.bf16.mxu1 %v6072_v2  ;;  %v6177_v1 = vld [vmem:[%s8284_s1 + $0x854] ss:$8 sps:$4 sm:$0xff]   ;;  %v6238_v2 = vld [vmem:[%s6844_s12 + $0x26c] ss:$100 sps:$4 sm:$0xff]  }
  0xa5   : > { %3835 = vmatprep.subr.bf16.mxu0 %v6075_v3  ;;  %v6243_v3 = vld [vmem:[%s6844_s12 + $0x294] ss:$100 sps:$4 sm:$0xff]  }
  0xa7   : > { %3471 = vmatpush1.bf16.msra.mxu1 %v6070_v4  ;;  %v6172_v4 = vld [vmem:[%s8284_s1 + $0x350] ss:$8 sps:$4 sm:$0xff]  }
  0xa8   : > { %3836 = vmatpush1.bf16.msra.mxu0 %v6073_v5  ;;  %3472 = vmatprep.subr.bf16.mxu1 %v6078_v6  ;;  %v6175_v5 = vld [vmem:[%s8284_s1 + $0x850] ss:$8 sps:$4 sm:$0xff]   ;;  %v6180_v6 = vld [vmem:[%s8284_s1 + $0x364] ss:$8 sps:$4 sm:$0xff]  }
  0xa9   : > { %3837 = vmatprep.subr.bf16.mxu0 %v6081_v7  ;;  %v6183_v7 = vld [vmem:[%s8284_s1 + $0x864] ss:$8 sps:$4 sm:$0xff]  }
  0xab   : > { %3473 = vmatpush1.bf16.msra.mxu1 %v6076_v8  ;;  %v6178_v8 = vld [vmem:[%s8284_s1 + $0x360] ss:$8 sps:$4 sm:$0xff]  }
  0xac   : > { %3838 = vmatpush1.bf16.msra.mxu0 %v6079_v9  ;;  %3474 = vmatprep.subr.bf16.mxu1 %v6086_v10  ;;  %v6181_v9 = vld [vmem:[%s8284_s1 + $0x860] ss:$8 sps:$4 sm:$0xff]  }
  0xad   : > { %3839 = vmatprep.subr.bf16.mxu0 %v6091_v11  ;;  %v6248_v10 = vld [vmem:[%s6844_s12 + $0x268] ss:$100 sps:$4 sm:$0xff]   ;;  %v6249_v11 = vld [vmem:[%s6844_s12 + $0x290] ss:$100 sps:$4 sm:$0xff]  }
  0xaf   : > { %3475 = vmatpush1.bf16.msra.mxu1 %v6084_v12  ;;  %v6186_v12 = vld [vmem:[%s8284_s1 + $0x374] ss:$8 sps:$4 sm:$0xff]  }
  0xb0   : > { %3840 = vmatpush1.bf16.msra.mxu0 %v6089_v13  ;;  %3476 = vmatprep.subr.bf16.mxu1 %v6096_v14  ;;  %v6189_v13 = vld [vmem:[%s8284_s1 + $0x874] ss:$8 sps:$4 sm:$0xff]  }
  0xb1   : > { %3841 = vmatprep.subr.bf16.mxu0 %v6099_v15  ;;  %v6258_v14 = vld [vmem:[%s6844_s12 + $0x1c] ss:$100 sps:$4 sm:$0xff]   ;;  %v6264_v15 = vld [vmem:[%s6844_s12 + $0x44] ss:$100 sps:$4 sm:$0xff]  }
  0xb3   : > { %3477 = vmatpush1.bf16.msra.mxu1 %v6094_v16  ;;  %v6184_v16 = vld [vmem:[%s8284_s1 + $0x370] ss:$8 sps:$4 sm:$0xff]  }
  0xb4   : > { %3842 = vmatpush1.bf16.msra.mxu0 %v6097_v17  ;;  %3478 = vmatprep.subr.bf16.mxu1 %v6104_v18  ;;  %v6187_v17 = vld [vmem:[%s8284_s1 + $0x870] ss:$8 sps:$4 sm:$0xff]   ;;  %v6192_v18 = vld [vmem:[%s8284_s1 + $0x384] ss:$8 sps:$4 sm:$0xff]  }
  0xb5   : > { %3843 = vmatprep.subr.bf16.mxu0 %v6109_v19  ;;  %v6195_v19 = vld [vmem:[%s8284_s1 + $0x884] ss:$8 sps:$4 sm:$0xff]  }
  0xb7   : > { %3479 = vmatpush1.bf16.msra.mxu1 %v6102_v20  ;;  %v6190_v20 = vld [vmem:[%s8284_s1 + $0x380] ss:$8 sps:$4 sm:$0xff]  }
  0xb8   : > { %3844 = vmatpush1.bf16.msra.mxu0 %v6107_v21  ;;  %3480 = vmatprep.subr.bf16.mxu1 %v6114_v22  ;;  %v6193_v21 = vld [vmem:[%s8284_s1 + $0x880] ss:$8 sps:$4 sm:$0xff]   ;;  %v6198_v22 = vld [vmem:[%s8284_s1 + $0x394] ss:$8 sps:$4 sm:$0xff]  }
  0xb9   : > { %3845 = vmatprep.subr.bf16.mxu0 %v6117_v23  ;;  %v6201_v23 = vld [vmem:[%s8284_s1 + $0x894] ss:$8 sps:$4 sm:$0xff]  }
  0xbb   : > { %3481 = vmatpush1.bf16.msra.mxu1 %v6112_v24  ;;  %v6196_v24 = vld [vmem:[%s8284_s1 + $0x390] ss:$8 sps:$4 sm:$0xff]  }
  0xbc   : > { %3846 = vmatpush1.bf16.msra.mxu0 %v6115_v25  ;;  %3482 = vmatprep.subr.bf16.mxu1 %v6122_v26  ;;  %v6199_v25 = vld [vmem:[%s8284_s1 + $0x890] ss:$8 sps:$4 sm:$0xff]   ;;  %v6206_v26 = vld [vmem:[%s8284_s1 + $0x3a4] ss:$8 sps:$4 sm:$0xff]  }
  0xbd   : > { %3847 = vmatprep.subr.bf16.mxu0 %v6127_v27  ;;  %v6211_v27 = vld [vmem:[%s8284_s1 + $0x8a4] ss:$8 sps:$4 sm:$0xff]  }
  0xbf   : > { %3483 = vmatpush1.bf16.msra.mxu1 %v6120_v28  ;;  %v6204_v28 = vld [vmem:[%s8284_s1 + $0x3a0] ss:$8 sps:$4 sm:$0xff]  }
  0xc0   : > { %3848 = vmatpush1.bf16.msra.mxu0 %v6125_v29  ;;  %3484 = vmatprep.subr.bf16.mxu1 %v6132_v30  ;;  %v6209_v29 = vld [vmem:[%s8284_s1 + $0x8a0] ss:$8 sps:$4 sm:$0xff]   ;;  %v6216_v30 = vld [vmem:[%s8284_s1 + $0x3b4] ss:$8 sps:$4 sm:$0xff]  }
  0xc1   : > { %3849 = vmatprep.subr.bf16.mxu0 %v6135_v31  ;;  %v6219_v31 = vld [vmem:[%s8284_s1 + $0x8b4] ss:$8 sps:$4 sm:$0xff]  }
  0xc3   : > { %3485 = vmatpush1.bf16.msra.mxu1 %v6130_v32  ;;  %v6214_v32 = vld [vmem:[%s8284_s1 + $0x3b0] ss:$8 sps:$4 sm:$0xff]  }
  0xc4   : > { %3850 = vmatpush1.bf16.msra.mxu0 %v6133_v33  ;;  %3527 = vmatprep.subr.bf16.mxu1 %v6141_v34  ;;  %v6217_v33 = vld [vmem:[%s8284_s1 + $0x8b0] ss:$8 sps:$4 sm:$0xff]   ;;  %v6224_v34 = vld [vmem:[%s8284_s1 + $0x3c4] ss:$8 sps:$4 sm:$0xff]  }
  0xc5   : > { %3892 = vmatprep.subr.bf16.mxu0 %v6147_v35  ;;  %v6229_v35 = vld [vmem:[%s8284_s1 + $0x8c4] ss:$8 sps:$4 sm:$0xff]  }
  0xc6   : > { %3487 = vmatmul.mubr.bf16.vlgmr.msra.gmra.mrb[0].mxu1 %v6136_v36  ;;  %v6222_v36 = vld [vmem:[%s8284_s1 + $0x3c0] ss:$8 sps:$4 sm:$0xff]  }
  0xc7   : > { %3852 = vmatmul.mubr.bf16.vlgmr.msra.gmra.mrb[0].mxu0 %v6142_v38  ;;  %3528 = vmatpush1.bf16.msra.mxu1 %v6139_v37  ;;  %v6227_v37 = vld [vmem:[%s8284_s1 + $0x8c0] ss:$8 sps:$4 sm:$0xff]   ;;  %v6234_v38 = vld [vmem:[%s8284_s1 + $0x3d4] ss:$8 sps:$4 sm:$0xff]  }
  0xc8   : > { %3893 = vmatpush1.bf16.msra.mxu0 %v6145_v39  ;;  %3529 = vmatprep.subr.bf16.mxu1 %v6150_v40  ;;  %v6237_v39 = vld [vmem:[%s8284_s1 + $0x8d4] ss:$8 sps:$4 sm:$0xff]   ;;  %v6232_v40 = vld [vmem:[%s8284_s1 + $0x3d0] ss:$8 sps:$4 sm:$0xff]  }
  0xc9   : > { %3894 = vmatprep.subr.bf16.mxu0 %v6153_v41  ;;  %3496 = vmatprep.mubr.bf16.mxu1 %v6202_v42  ;;  %v6235_v41 = vld [vmem:[%s8284_s1 + $0x8d0] ss:$8 sps:$4 sm:$0xff]   ;;  %v6242_v42 = vld [vmem:[%s8284_s1 + $0x3e4] ss:$8 sps:$4 sm:$0xff]  }
  0xca   : > { %3861 = vmatprep.mubr.bf16.mxu0 %v6207_v43  ;;  %v6247_v43 = vld [vmem:[%s8284_s1 + $0x8e4] ss:$8 sps:$4 sm:$0xff]  }
  0xcb   : > { %3530 = vmatpush1.bf16.msra.mxu1 %v6148_v44  ;;  %v6240_v44 = vld [vmem:[%s8284_s1 + $0x3e0] ss:$8 sps:$4 sm:$0xff]  }
  0xcc   : > { %3895 = vmatpush1.bf16.msra.mxu0 %v6151_v45  ;;  %3531 = vmatprep.subr.bf16.mxu1 %v6156_v46  ;;  %v6245_v45 = vld [vmem:[%s8284_s1 + $0x8e0] ss:$8 sps:$4 sm:$0xff]   ;;  %v6252_v46 = vld [vmem:[%s8284_s1 + $0x3f4] ss:$8 sps:$4 sm:$0xff]  }
  0xcd   : > { %3896 = vmatprep.subr.bf16.mxu0 %v6159_v47  ;;  %v6255_v47 = vld [vmem:[%s8284_s1 + $0x8f4] ss:$8 sps:$4 sm:$0xff]  }
  0xce   : > { %3497 = vmatmul.mubr.bf16.gmra.mrb[4].mxu1 %v6212_v50  ;;  %v6261_v50 = vld [vmem:[%s8284_s1 + $0x404] ss:$8 sps:$4 sm:$0xff]  }
  0xcf   : > { %3862 = vmatmul.mubr.bf16.gmra.mrb[4].mxu0 %v6213_v51  ;;  %3532 = vmatpush1.bf16.msra.mxu1 %v6154_v48  ;;  %v6250_v48 = vld [vmem:[%s8284_s1 + $0x3f0] ss:$8 sps:$4 sm:$0xff]   ;;  %v6267_v51 = vld [vmem:[%s8284_s1 + $0x904] ss:$8 sps:$4 sm:$0xff]  }
  0xd0   : > { %3897 = vmatpush1.bf16.msra.mxu0 %v6157_v49  ;;  %3533 = vmatprep.subr.bf16.mxu1 %v6162_v52  ;;  %v6253_v49 = vld [vmem:[%s8284_s1 + $0x8f0] ss:$8 sps:$4 sm:$0xff]  }
  0xd1   : > { %3898 = vmatprep.subr.bf16.mxu0 %v6165_v53  ;;  %3506 = vmatprep.mubr.bf16.mxu1 %v6220_v54  ;;  %v6256_v52 = vld [vmem:[%s6844_s12 + $0x18] ss:$100 sps:$4 sm:$0xff]   ;;  %v6259_v53 = vld [vmem:[%s8284_s1 + $0x400] ss:$8 sps:$4 sm:$0xff]  }
  0xd2   : > { %3871 = vmatprep.mubr.bf16.mxu0 %v6225_v55  ;;  %v6262_v54 = vld [vmem:[%s6844_s12 + $0x40] ss:$100 sps:$4 sm:$0xff]  }
  0xd3   : > { %3534 = vmatpush1.bf16.msra.mxu1 %v6160_v56  ;;  %v6265_v55 = vld [vmem:[%s8284_s1 + $0x900] ss:$8 sps:$4 sm:$0xff]   ;;  %v6270_v56 = vld [vmem:[%s8284_s1 + $0x414] ss:$8 sps:$4 sm:$0xff]  }
  0xd4   : > { %3899 = vmatpush1.bf16.msra.mxu0 %v6163_v57  ;;  %3535 = vmatprep.subr.bf16.mxu1 %v6168_v58  ;;  %v6273_v57 = vld [vmem:[%s8284_s1 + $0x914] ss:$8 sps:$4 sm:$0xff]   ;;  %v6322_v58 = vld [vmem:[%s6844_s12 + $0xe4] ss:$100 sps:$4 sm:$0xff]  }
  0xd5   : > { %3900 = vmatprep.subr.bf16.mxu0 %v6171_v59  ;;  %v6328_v59 = vld [vmem:[%s6844_s12 + $0x10c] ss:$100 sps:$4 sm:$0xff]  }
  0xd6   : > { %3507 = vmatmul.mubr.bf16.gmra.mrb[8].mxu1 %v6230_v62  ;;  %v6276_v62 = vld [vmem:[%s8284_s1 + $0x424] ss:$8 sps:$4 sm:$0xff]  }
  0xd7   : > { %3872 = vmatmul.mubr.bf16.gmra.mrb[8].mxu0 %v6231_v63  ;;  %3536 = vmatpush1.bf16.msra.mxu1 %v6166_v60  ;;  %v6268_v60 = vld [vmem:[%s8284_s1 + $0x410] ss:$8 sps:$4 sm:$0xff]   ;;  %v6279_v63 = vld [vmem:[%s8284_s1 + $0x924] ss:$8 sps:$4 sm:$0xff]  }
  0xd8   : > { %3901 = vmatpush1.bf16.msra.mxu0 %v6169_v61  ;;  %3537 = vmatprep.subr.bf16.mxu1 %v6174_v0  ;;  %v6271_v61 = vld [vmem:[%s8284_s1 + $0x910] ss:$8 sps:$4 sm:$0xff]   ;;  %v6274_v0 = vld [vmem:[%s8284_s1 + $0x420] ss:$8 sps:$4 sm:$0xff]  }
  0xd9   : > { %3902 = vmatprep.subr.bf16.mxu0 %v6177_v1  ;;  %3516 = vmatprep.mubr.bf16.mxu1 %v6238_v2  ;;  %v6277_v1 = vld [vmem:[%s8284_s1 + $0x920] ss:$8 sps:$4 sm:$0xff]  }
  0xda   : > { %3881 = vmatprep.mubr.bf16.mxu0 %v6243_v3  ;;  %v6324_v2 = vld [vmem:[%s6844_s12 + $0xe0] ss:$100 sps:$4 sm:$0xff]   ;;  %v6333_v3 = vld [vmem:[%s6844_s12 + $0x108] ss:$100 sps:$4 sm:$0xff]  }
  0xdb   : > { %3538 = vmatpush1.bf16.msra.mxu1 %v6172_v4  ;;  %v6282_v4 = vld [vmem:[%s8284_s1 + $0x434] ss:$8 sps:$4 sm:$0xff]  }
  0xdc   : > { %3903 = vmatpush1.bf16.msra.mxu0 %v6175_v5  ;;  %3539 = vmatprep.subr.bf16.mxu1 %v6180_v6  ;;  %v6285_v5 = vld [vmem:[%s8284_s1 + $0x934] ss:$8 sps:$4 sm:$0xff]   ;;  %v6340_v6 = vld [vmem:[%s6844_s12 + $0x1ac] ss:$100 sps:$4 sm:$0xff]  }
  0xdd   : > { %3904 = vmatprep.subr.bf16.mxu0 %v6183_v7  ;;  %v6346_v7 = vld [vmem:[%s6844_s12 + $0x1d4] ss:$100 sps:$4 sm:$0xff]  }
  0xde   : > { %3517 = vmatmul.mubr.bf16.gmra.mrb[12].mxu1 %v6248_v10  ;;  %v6288_v10 = vld [vmem:[%s8284_s1 + $0x444] ss:$8 sps:$4 sm:$0xff]  }
  0xdf   : > { %3882 = vmatmul.mubr.bf16.gmra.mrb[12].mxu0 %v6249_v11  ;;  %3540 = vmatpush1.bf16.msra.mxu1 %v6178_v8  ;;  %v6280_v8 = vld [vmem:[%s8284_s1 + $0x430] ss:$8 sps:$4 sm:$0xff]   ;;  %v6291_v11 = vld [vmem:[%s8284_s1 + $0x944] ss:$8 sps:$4 sm:$0xff]  }
  0xe0   : > { %3905 = vmatpush1.bf16.msra.mxu0 %v6181_v9  ;;  %3541 = vmatprep.subr.bf16.mxu1 %v6186_v12  ;;  %v6283_v9 = vld [vmem:[%s8284_s1 + $0x930] ss:$8 sps:$4 sm:$0xff]   ;;  %v6286_v12 = vld [vmem:[%s8284_s1 + $0x440] ss:$8 sps:$4 sm:$0xff]  }
  0xe1   : > { %3906 = vmatprep.subr.bf16.mxu0 %v6189_v13  ;;  %3559 = vmatprep.mubr.bf16.mxu1 %v6258_v14  ;;  %v6289_v13 = vld [vmem:[%s8284_s1 + $0x940] ss:$8 sps:$4 sm:$0xff]  }
  0xe2   : > { %3924 = vmatprep.mubr.bf16.mxu0 %v6264_v15  ;;  %v6342_v14 = vld [vmem:[%s6844_s12 + $0x1a8] ss:$100 sps:$4 sm:$0xff]   ;;  %v6351_v15 = vld [vmem:[%s6844_s12 + $0x1d0] ss:$100 sps:$4 sm:$0xff]  }
  0xe3   : > { %3542 = vmatpush1.bf16.msra.mxu1 %v6184_v16  ;;  %v6294_v16 = vld [vmem:[%s8284_s1 + $0x454] ss:$8 sps:$4 sm:$0xff]  }
  0xe4   : > { %3907 = vmatpush1.bf16.msra.mxu0 %v6187_v17  ;;  %3543 = vmatprep.subr.bf16.mxu1 %v6192_v18  ;;  %v6297_v17 = vld [vmem:[%s8284_s1 + $0x954] ss:$8 sps:$4 sm:$0xff]  }
  0xe5   : > { %3908 = vmatprep.subr.bf16.mxu0 %v6195_v19  ;;  %v6358_v18 = vld [vmem:[%s6844_s12 + $0x274] ss:$100 sps:$4 sm:$0xff]   ;;  %v6364_v19 = vld [vmem:[%s6844_s12 + $0x29c] ss:$100 sps:$4 sm:$0xff]  }
  0xe7   : > { %3544 = vmatpush1.bf16.msra.mxu1 %v6190_v20  ;;  %v6292_v20 = vld [vmem:[%s8284_s1 + $0x450] ss:$8 sps:$4 sm:$0xff]  }
  0xe8   : > { %3909 = vmatpush1.bf16.msra.mxu0 %v6193_v21  ;;  %3545 = vmatprep.subr.bf16.mxu1 %v6198_v22  ;;  %v6295_v21 = vld [vmem:[%s8284_s1 + $0x950] ss:$8 sps:$4 sm:$0xff]   ;;  %v6300_v22 = vld [vmem:[%s8284_s1 + $0x464] ss:$8 sps:$4 sm:$0xff]  }
  0xe9   : > { %3910 = vmatprep.subr.bf16.mxu0 %v6201_v23  ;;  %v6303_v23 = vld [vmem:[%s8284_s1 + $0x964] ss:$8 sps:$4 sm:$0xff]  }
  0xeb   : > { %3546 = vmatpush1.bf16.msra.mxu1 %v6196_v24  ;;  %v6298_v24 = vld [vmem:[%s8284_s1 + $0x460] ss:$8 sps:$4 sm:$0xff]  }
  0xec   : > { %3911 = vmatpush1.bf16.msra.mxu0 %v6199_v25  ;;  %3547 = vmatprep.subr.bf16.mxu1 %v6206_v26  ;;  %v6301_v25 = vld [vmem:[%s8284_s1 + $0x960] ss:$8 sps:$4 sm:$0xff]   ;;  %v6360_v26 = vld [vmem:[%s6844_s12 + $0x270] ss:$100 sps:$4 sm:$0xff]  }
  0xed   : > { %3912 = vmatprep.subr.bf16.mxu0 %v6211_v27  ;;  %v6369_v27 = vld [vmem:[%s6844_s12 + $0x298] ss:$100 sps:$4 sm:$0xff]  }
  0xef   : > { %3548 = vmatpush1.bf16.msra.mxu1 %v6204_v28  ;;  %v6306_v28 = vld [vmem:[%s8284_s1 + $0x474] ss:$8 sps:$4 sm:$0xff]  }
  0xf0   : > { %3913 = vmatpush1.bf16.msra.mxu0 %v6209_v29  ;;  %3549 = vmatprep.subr.bf16.mxu1 %v6216_v30  ;;  %v6309_v29 = vld [vmem:[%s8284_s1 + $0x974] ss:$8 sps:$4 sm:$0xff]   ;;  %v6378_v30 = vld [vmem:[%s6844_s12 + $0x24] ss:$100 sps:$4 sm:$0xff]  }
  0xf1   : > { %3914 = vmatprep.subr.bf16.mxu0 %v6219_v31  ;;  %v6381_v31 = vld [vmem:[%s6844_s12 + $0x4c] ss:$100 sps:$4 sm:$0xff]  }
  0xf3   : > { %3550 = vmatpush1.bf16.msra.mxu1 %v6214_v32  ;;  %v6304_v32 = vld [vmem:[%s8284_s1 + $0x470] ss:$8 sps:$4 sm:$0xff]  }
  0xf4   : > { %3915 = vmatpush1.bf16.msra.mxu0 %v6217_v33  ;;  %3551 = vmatprep.subr.bf16.mxu1 %v6224_v34  ;;  %v6307_v33 = vld [vmem:[%s8284_s1 + $0x970] ss:$8 sps:$4 sm:$0xff]   ;;  %v6312_v34 = vld [vmem:[%s8284_s1 + $0x484] ss:$8 sps:$4 sm:$0xff]  }
  0xf5   : > { %3916 = vmatprep.subr.bf16.mxu0 %v6229_v35  ;;  %v6315_v35 = vld [vmem:[%s8284_s1 + $0x984] ss:$8 sps:$4 sm:$0xff]  }
  0xf7   : > { %3552 = vmatpush1.bf16.msra.mxu1 %v6222_v36  ;;  %v6310_v36 = vld [vmem:[%s8284_s1 + $0x480] ss:$8 sps:$4 sm:$0xff]  }
  0xf8   : > { %3917 = vmatpush1.bf16.msra.mxu0 %v6227_v37  ;;  %3553 = vmatprep.subr.bf16.mxu1 %v6234_v38  ;;  %v6313_v37 = vld [vmem:[%s8284_s1 + $0x980] ss:$8 sps:$4 sm:$0xff]   ;;  %v6318_v38 = vld [vmem:[%s8284_s1 + $0x494] ss:$8 sps:$4 sm:$0xff]  }
  0xf9   : > { %3918 = vmatprep.subr.bf16.mxu0 %v6237_v39  ;;  %v6321_v39 = vld [vmem:[%s8284_s1 + $0x994] ss:$8 sps:$4 sm:$0xff]  }
  0xfb   : > { %3554 = vmatpush1.bf16.msra.mxu1 %v6232_v40  ;;  %v6316_v40 = vld [vmem:[%s8284_s1 + $0x490] ss:$8 sps:$4 sm:$0xff]  }
  0xfc   : > { %3919 = vmatpush1.bf16.msra.mxu0 %v6235_v41  ;;  %3555 = vmatprep.subr.bf16.mxu1 %v6242_v42  ;;  %v6319_v41 = vld [vmem:[%s8284_s1 + $0x990] ss:$8 sps:$4 sm:$0xff]   ;;  %v6327_v42 = vld [vmem:[%s8284_s1 + $0x4a4] ss:$8 sps:$4 sm:$0xff]  }
  0xfd   : > { %3920 = vmatprep.subr.bf16.mxu0 %v6247_v43  ;;  %v6332_v43 = vld [vmem:[%s8284_s1 + $0x9a4] ss:$8 sps:$4 sm:$0xff]  }
  0xff   : > { %3556 = vmatpush1.bf16.msra.mxu1 %v6240_v44  ;;  %v6325_v44 = vld [vmem:[%s8284_s1 + $0x4a0] ss:$8 sps:$4 sm:$0xff]  }
 0x100   : > { %3921 = vmatpush1.bf16.msra.mxu0 %v6245_v45  ;;  %3557 = vmatprep.subr.bf16.mxu1 %v6252_v46  ;;  %v6330_v45 = vld [vmem:[%s8284_s1 + $0x9a0] ss:$8 sps:$4 sm:$0xff]   ;;  %v6336_v46 = vld [vmem:[%s8284_s1 + $0x4b4] ss:$8 sps:$4 sm:$0xff]  }
 0x101   : > { %3922 = vmatprep.subr.bf16.mxu0 %v6255_v47  ;;  %v6339_v47 = vld [vmem:[%s8284_s1 + $0x9b4] ss:$8 sps:$4 sm:$0xff]  }
 0x103   : > { %3558 = vmatpush1.bf16.msra.mxu1 %v6250_v48  ;;  %v6334_v48 = vld [vmem:[%s8284_s1 + $0x4b0] ss:$8 sps:$4 sm:$0xff]  }
 0x104   : > { %3923 = vmatpush1.bf16.msra.mxu0 %v6253_v49  ;;  %3600 = vmatprep.subr.bf16.mxu1 %v6261_v50  ;;  %v6337_v49 = vld [vmem:[%s8284_s1 + $0x9b0] ss:$8 sps:$4 sm:$0xff]   ;;  %v6345_v50 = vld [vmem:[%s8284_s1 + $0x4c4] ss:$8 sps:$4 sm:$0xff]  }
 0x105   : > { %3965 = vmatprep.subr.bf16.mxu0 %v6267_v51  ;;  %v6350_v51 = vld [vmem:[%s8284_s1 + $0x9c4] ss:$8 sps:$4 sm:$0xff]  }
 0x106   : > { %3560 = vmatmul.mubr.bf16.vlgmr.msra.gmra.mrb[0].mxu1 %v6256_v52  ;;  %v6343_v52 = vld [vmem:[%s8284_s1 + $0x4c0] ss:$8 sps:$4 sm:$0xff]  }
 0x107   : > { %3925 = vmatmul.mubr.bf16.vlgmr.msra.gmra.mrb[0].mxu0 %v6262_v54  ;;  %3601 = vmatpush1.bf16.msra.mxu1 %v6259_v53  ;;  %v6348_v53 = vld [vmem:[%s8284_s1 + $0x9c0] ss:$8 sps:$4 sm:$0xff]   ;;  %v6354_v54 = vld [vmem:[%s8284_s1 + $0x4d4] ss:$8 sps:$4 sm:$0xff]  }
 0x108   : > { %3966 = vmatpush1.bf16.msra.mxu0 %v6265_v55  ;;  %3602 = vmatprep.subr.bf16.mxu1 %v6270_v56  ;;  %v6357_v55 = vld [vmem:[%s8284_s1 + $0x9d4] ss:$8 sps:$4 sm:$0xff]   ;;  %v6352_v56 = vld [vmem:[%s8284_s1 + $0x4d0] ss:$8 sps:$4 sm:$0xff]  }
 0x109   : > { %3967 = vmatprep.subr.bf16.mxu0 %v6273_v57  ;;  %3569 = vmatprep.mubr.bf16.mxu1 %v6322_v58  ;;  %v6355_v57 = vld [vmem:[%s8284_s1 + $0x9d0] ss:$8 sps:$4 sm:$0xff]   ;;  %v6363_v58 = vld [vmem:[%s8284_s1 + $0x4e4] ss:$8 sps:$4 sm:$0xff]  }
 0x10a   : > { %3934 = vmatprep.mubr.bf16.mxu0 %v6328_v59  ;;  %v6368_v59 = vld [vmem:[%s8284_s1 + $0x9e4] ss:$8 sps:$4 sm:$0xff]  }
 0x10b   : > { %3603 = vmatpush1.bf16.msra.mxu1 %v6268_v60  ;;  %v6361_v60 = vld [vmem:[%s8284_s1 + $0x4e0] ss:$8 sps:$4 sm:$0xff]  }
 0x10c   : > { %3968 = vmatpush1.bf16.msra.mxu0 %v6271_v61  ;;  %3604 = vmatprep.subr.bf16.mxu1 %v6276_v62  ;;  %v6366_v61 = vld [vmem:[%s8284_s1 + $0x9e0] ss:$8 sps:$4 sm:$0xff]   ;;  %v6372_v62 = vld [vmem:[%s8284_s1 + $0x4f4] ss:$8 sps:$4 sm:$0xff]  }
 0x10d   : > { %3969 = vmatprep.subr.bf16.mxu0 %v6279_v63  ;;  %v6375_v63 = vld [vmem:[%s8284_s1 + $0x9f4] ss:$8 sps:$4 sm:$0xff]  }
 0x10e   : > { %3570 = vmatmul.mubr.bf16.gmra.mrb[4].mxu1 %v6324_v2  ;;  %v6384_v2 = vld [vmem:[%s8284_s1 + $0xa04] ss:$8 sps:$4 sm:$0xff]  }
 0x10f   : > { %3935 = vmatmul.mubr.bf16.gmra.mrb[4].mxu0 %v6333_v3  ;;  %3605 = vmatpush1.bf16.msra.mxu1 %v6274_v0  ;;  %v6370_v0 = vld [vmem:[%s8284_s1 + $0x4f0] ss:$8 sps:$4 sm:$0xff]   ;;  %v6376_v3 = vld [vmem:[%s6844_s12 + $0x20] ss:$100 sps:$4 sm:$0xff]  }
 0x110   : > { %3970 = vmatpush1.bf16.msra.mxu0 %v6277_v1  ;;  %3606 = vmatprep.subr.bf16.mxu1 %v6282_v4  ;;  %v6373_v1 = vld [vmem:[%s8284_s1 + $0x9f0] ss:$8 sps:$4 sm:$0xff]   ;;  %v6379_v4 = vld [vmem:[%s6844_s12 + $0x48] ss:$100 sps:$4 sm:$0xff]  }
 0x111   : > { %3971 = vmatprep.subr.bf16.mxu0 %v6285_v5  ;;  %3579 = vmatprep.mubr.bf16.mxu1 %v6340_v6  ;;  %v6382_v5 = vld [vmem:[%s8284_s1 + $0xa00] ss:$8 sps:$4 sm:$0xff]   ;;  %v6387_v6 = vld [vmem:[%s8284_s1 + $0xa14] ss:$8 sps:$4 sm:$0xff]  }
 0x112   : > { %3944 = vmatprep.mubr.bf16.mxu0 %v6346_v7  ;;  %v6388_v7 = vld [vmem:[%s6844_s12 + $0xec] ss:$100 sps:$4 sm:$0xff]  }
 0x113   : > { %3607 = vmatpush1.bf16.msra.mxu1 %v6280_v8  ;;  %v6421_v8 = vld [vmem:[%s6844_s12 + $0x114] ss:$100 sps:$4 sm:$0xff]  }
 0x114   : > { %3972 = vmatpush1.bf16.msra.mxu0 %v6283_v9  ;;  %3608 = vmatprep.subr.bf16.mxu1 %v6288_v10  ;;  %v6385_v9 = vld [vmem:[%s8284_s1 + $0xa10] ss:$8 sps:$4 sm:$0xff]   ;;  %v6393_v10 = vld [vmem:[%s8284_s1 + $0xa24] ss:$8 sps:$4 sm:$0xff]  }
 0x115   : > { %3973 = vmatprep.subr.bf16.mxu0 %v6291_v11  ;;  %v6390_v11 = vld [vmem:[%s6844_s12 + $0xe8] ss:$100 sps:$4 sm:$0xff]  }
 0x116   : > { %3580 = vmatmul.mubr.bf16.gmra.mrb[8].mxu1 %v6342_v14  ;;  %v6396_v14 = vld [vmem:[%s8284_s1 + $0xa34] ss:$8 sps:$4 sm:$0xff]  }
 0x117   : > { %3945 = vmatmul.mubr.bf16.gmra.mrb[8].mxu0 %v6351_v15  ;;  %3609 = vmatpush1.bf16.msra.mxu1 %v6286_v12  ;;  %v6426_v12 = vld [vmem:[%s6844_s12 + $0x110] ss:$100 sps:$4 sm:$0xff]  }
 0x118   : > { %3974 = vmatpush1.bf16.msra.mxu0 %v6289_v13  ;;  %3610 = vmatprep.subr.bf16.mxu1 %v6294_v16  ;;  %v6391_v13 = vld [vmem:[%s8284_s1 + $0xa20] ss:$8 sps:$4 sm:$0xff]   ;;  %v6397_v15 = vld [vmem:[%s6844_s12 + $0x1b4] ss:$100 sps:$4 sm:$0xff]  }
 0x119   : > { %3975 = vmatprep.subr.bf16.mxu0 %v6297_v17  ;;  %3589 = vmatprep.mubr.bf16.mxu1 %v6358_v18  ;;  %v6430_v16 = vld [vmem:[%s6844_s12 + $0x1dc] ss:$100 sps:$4 sm:$0xff]   ;;  %v6394_v17 = vld [vmem:[%s8284_s1 + $0xa30] ss:$8 sps:$4 sm:$0xff]   ;;  %v6402_v18 = vld [vmem:[%s8284_s1 + $0xa44] ss:$8 sps:$4 sm:$0xff]  }
 0x11a   : > { %3954 = vmatprep.mubr.bf16.mxu0 %v6364_v19  ;;  %v6399_v19 = vld [vmem:[%s6844_s12 + $0x1b0] ss:$100 sps:$4 sm:$0xff]  }
 0x11b   : > { %3611 = vmatpush1.bf16.msra.mxu1 %v6292_v20  ;;  %v6435_v20 = vld [vmem:[%s6844_s12 + $0x1d8] ss:$100 sps:$4 sm:$0xff]  }
 0x11c   : > { %3976 = vmatpush1.bf16.msra.mxu0 %v6295_v21  ;;  %3612 = vmatprep.subr.bf16.mxu1 %v6300_v22  ;;  %v6400_v21 = vld [vmem:[%s8284_s1 + $0xa40] ss:$8 sps:$4 sm:$0xff]   ;;  %v6405_v22 = vld [vmem:[%s8284_s1 + $0xa54] ss:$8 sps:$4 sm:$0xff]  }
 0x11d   : > { %3977 = vmatprep.subr.bf16.mxu0 %v6303_v23  ;;  %v6406_v23 = vld [vmem:[%s6844_s12 + $0x27c] ss:$100 sps:$4 sm:$0xff]  }
 0x11e   : > { %3590 = vmatmul.mubr.bf16.gmra.mrb[12].mxu1 %v6360_v26  ;;  %v6411_v26 = vld [vmem:[%s8284_s1 + $0xa64] ss:$8 sps:$4 sm:$0xff]  }
 0x11f   : > { %3955 = vmatmul.mubr.bf16.gmra.mrb[12].mxu0 %v6369_v27  ;;  %3613 = vmatpush1.bf16.msra.mxu1 %v6298_v24  ;;  %v6439_v24 = vld [vmem:[%s6844_s12 + $0x2a4] ss:$100 sps:$4 sm:$0xff]   ;;  %v6408_v27 = vld [vmem:[%s6844_s12 + $0x278] ss:$100 sps:$4 sm:$0xff]  }
 0x120   : > { %3978 = vmatpush1.bf16.msra.mxu0 %v6301_v25  ;;  %3614 = vmatprep.subr.bf16.mxu1 %v6306_v28  ;;  %v6403_v25 = vld [vmem:[%s8284_s1 + $0xa50] ss:$8 sps:$4 sm:$0xff]   ;;  %v6444_v28 = vld [vmem:[%s6844_s12 + $0x2a0] ss:$100 sps:$4 sm:$0xff]  }
 0x121   : > { %3979 = vmatprep.subr.bf16.mxu0 %v6309_v29  ;;  %3632 = vmatprep.mubr.bf16.mxu1 %v6378_v30  ;;  %v6409_v29 = vld [vmem:[%s8284_s1 + $0xa60] ss:$8 sps:$4 sm:$0xff]   ;;  %v6450_v30 = vld [vmem:[%s6844_s12 + $0x54] ss:$100 sps:$4 sm:$0xff]  }
 0x122   : > { %3997 = vmatprep.mubr.bf16.mxu0 %v6381_v31  ;;  %v6414_v31 = vld [vmem:[%s8284_s1 + $0xa74] ss:$8 sps:$4 sm:$0xff]  }
 0x123   : > { %3615 = vmatpush1.bf16.msra.mxu1 %v6304_v32  ;;  %v6412_v32 = vld [vmem:[%s8284_s1 + $0xa70] ss:$8 sps:$4 sm:$0xff]  }
 0x124   : > { %3980 = vmatpush1.bf16.msra.mxu0 %v6307_v33  ;;  %3616 = vmatprep.subr.bf16.mxu1 %v6312_v34  ;;  %v6417_v33 = vld [vmem:[%s8284_s1 + $0xa84] ss:$8 sps:$4 sm:$0xff]   ;;  %v6415_v34 = vld [vmem:[%s8284_s1 + $0xa80] ss:$8 sps:$4 sm:$0xff]  }
 0x125   : > { %3981 = vmatprep.subr.bf16.mxu0 %v6315_v35  ;;  %v6420_v35 = vld [vmem:[%s8284_s1 + $0xa94] ss:$8 sps:$4 sm:$0xff]  }
 0x127   : > { %3617 = vmatpush1.bf16.msra.mxu1 %v6310_v36  ;;  %v6418_v36 = vld [vmem:[%s8284_s1 + $0xa90] ss:$8 sps:$4 sm:$0xff]  }
 0x128   : > { %3982 = vmatpush1.bf16.msra.mxu0 %v6313_v37  ;;  %3618 = vmatprep.subr.bf16.mxu1 %v6318_v38  ;;  %v6425_v37 = vld [vmem:[%s8284_s1 + $0xaa4] ss:$8 sps:$4 sm:$0xff]   ;;  %v6423_v38 = vld [vmem:[%s8284_s1 + $0xaa0] ss:$8 sps:$4 sm:$0xff]  }
 0x129   : > { %3983 = vmatprep.subr.bf16.mxu0 %v6321_v39  ;;  %v6429_v39 = vld [vmem:[%s8284_s1 + $0xab4] ss:$8 sps:$4 sm:$0xff]  }
 0x12b   : > { %3619 = vmatpush1.bf16.msra.mxu1 %v6316_v40  ;;  %v6427_v40 = vld [vmem:[%s8284_s1 + $0xab0] ss:$8 sps:$4 sm:$0xff]  }
 0x12c   : > { %3984 = vmatpush1.bf16.msra.mxu0 %v6319_v41  ;;  %3620 = vmatprep.subr.bf16.mxu1 %v6327_v42  ;;  %v6434_v41 = vld [vmem:[%s8284_s1 + $0xac4] ss:$8 sps:$4 sm:$0xff]   ;;  %v6432_v42 = vld [vmem:[%s8284_s1 + $0xac0] ss:$8 sps:$4 sm:$0xff]  }
 0x12d   : > { %3985 = vmatprep.subr.bf16.mxu0 %v6332_v43  ;;  %v6438_v43 = vld [vmem:[%s8284_s1 + $0xad4] ss:$8 sps:$4 sm:$0xff]  }
 0x12f   : > { %3621 = vmatpush1.bf16.msra.mxu1 %v6325_v44  ;;  %v6436_v44 = vld [vmem:[%s8284_s1 + $0xad0] ss:$8 sps:$4 sm:$0xff]  }
 0x130   : > { %3986 = vmatpush1.bf16.msra.mxu0 %v6330_v45  ;;  %3622 = vmatprep.subr.bf16.mxu1 %v6336_v46  ;;  %v6443_v45 = vld [vmem:[%s8284_s1 + $0xae4] ss:$8 sps:$4 sm:$0xff]   ;;  %v6441_v46 = vld [vmem:[%s8284_s1 + $0xae0] ss:$8 sps:$4 sm:$0xff]  }
 0x131   : > { %3987 = vmatprep.subr.bf16.mxu0 %v6339_v47  ;;  %v6447_v47 = vld [vmem:[%s8284_s1 + $0xaf4] ss:$8 sps:$4 sm:$0xff]  }
 0x133   : > { %3623 = vmatpush1.bf16.msra.mxu1 %v6334_v48  ;;  %v6445_v48 = vld [vmem:[%s8284_s1 + $0xaf0] ss:$8 sps:$4 sm:$0xff]  }
 0x134   : > { %3988 = vmatpush1.bf16.msra.mxu0 %v6337_v49  ;;  %3624 = vmatprep.subr.bf16.mxu1 %v6345_v50  ;;  %v6453_v49 = vld [vmem:[%s8284_s1 + $0xb04] ss:$8 sps:$4 sm:$0xff]   ;;  %v6448_v50 = vld [vmem:[%s6844_s12 + $0x50] ss:$100 sps:$4 sm:$0xff]  }
 0x135   : > { %3989 = vmatprep.subr.bf16.mxu0 %v6350_v51  ;;  %v6451_v51 = vld [vmem:[%s8284_s1 + $0xb00] ss:$8 sps:$4 sm:$0xff]  }
 0x137   : > { %3625 = vmatpush1.bf16.msra.mxu1 %v6343_v52  ;;  %v6481_v52 = vld [vmem:[%s6844_s12 + $0x11c] ss:$100 sps:$4 sm:$0xff]  }
 0x138   : > { %3990 = vmatpush1.bf16.msra.mxu0 %v6348_v53  ;;  %3626 = vmatprep.subr.bf16.mxu1 %v6354_v54  ;;  %v6456_v53 = vld [vmem:[%s8284_s1 + $0xb14] ss:$8 sps:$4 sm:$0xff]   ;;  %v6454_v54 = vld [vmem:[%s8284_s1 + $0xb10] ss:$8 sps:$4 sm:$0xff]  }
 0x139   : > { %3991 = vmatprep.subr.bf16.mxu0 %v6357_v55  ;;  %v6459_v55 = vld [vmem:[%s8284_s1 + $0xb24] ss:$8 sps:$4 sm:$0xff]  }
 0x13b   : > { %3627 = vmatpush1.bf16.msra.mxu1 %v6352_v56  ;;  %v6483_v56 = vld [vmem:[%s6844_s12 + $0x118] ss:$100 sps:$4 sm:$0xff]  }
 0x13c   : > { %3992 = vmatpush1.bf16.msra.mxu0 %v6355_v57  ;;  %3628 = vmatprep.subr.bf16.mxu1 %v6363_v58  ;;  %v6457_v57 = vld [vmem:[%s8284_s1 + $0xb20] ss:$8 sps:$4 sm:$0xff]  }
 0x13d   : > { %3993 = vmatprep.subr.bf16.mxu0 %v6368_v59  ;;  %v6490_v58 = vld [vmem:[%s6844_s12 + $0x1e4] ss:$100 sps:$4 sm:$0xff]   ;;  %v6462_v59 = vld [vmem:[%s8284_s1 + $0xb34] ss:$8 sps:$4 sm:$0xff]  }
 0x13f   : > { %3629 = vmatpush1.bf16.msra.mxu1 %v6361_v60  ;;  %v6460_v60 = vld [vmem:[%s8284_s1 + $0xb30] ss:$8 sps:$4 sm:$0xff]  }
 0x140   : > { %3994 = vmatpush1.bf16.msra.mxu0 %v6366_v61  ;;  %3630 = vmatprep.subr.bf16.mxu1 %v6372_v62  ;;  %v6465_v61 = vld [vmem:[%s8284_s1 + $0xb44] ss:$8 sps:$4 sm:$0xff]  }
 0x141   : > { %3995 = vmatprep.subr.bf16.mxu0 %v6375_v63  ;;  %v6492_v62 = vld [vmem:[%s6844_s12 + $0x1e0] ss:$100 sps:$4 sm:$0xff]  }
 0x142   : > { %v6463_v63 = vld [vmem:[%s8284_s1 + $0xb40] ss:$8 sps:$4 sm:$0xff]  }
 0x143   : > { %3631 = vmatpush1.bf16.msra.mxu1 %v6370_v0  ;;  %v6499_v0 = vld [vmem:[%s6844_s12 + $0x2ac] ss:$100 sps:$4 sm:$0xff]  }
 0x144   : > { %3996 = vmatpush1.bf16.msra.mxu0 %v6373_v1  ;;  %v6468_v1 = vld [vmem:[%s8284_s1 + $0xb54] ss:$8 sps:$4 sm:$0xff]  }
 0x145   : > { %4038 = vmatprep.subr.bf16.mxu0 %v6384_v2  ;;  %v6466_v2 = vld [vmem:[%s8284_s1 + $0xb50] ss:$8 sps:$4 sm:$0xff]  }
 0x146   : > { %3633 = vmatmul.mubr.bf16.vlgmr.msra.gmra.mrb[0].mxu1 %v6376_v3  ;;  %v6471_v3 = vld [vmem:[%s8284_s1 + $0xb64] ss:$8 sps:$4 sm:$0xff]  }
 0x147   : > { %3998 = vmatmul.mubr.bf16.vlgmr.msra.gmra.mrb[0].mxu0 %v6379_v4  ;;  %3642 = vmatprep.mubr.bf16.mxu1 %v6388_v7  ;;  %v6501_v4 = vld [vmem:[%s6844_s12 + $0x2a8] ss:$100 sps:$4 sm:$0xff]   ;;  %v6474_v7 = vld [vmem:[%s8284_s1 + $0xb74] ss:$8 sps:$4 sm:$0xff]  }
 0x148   : > { %4039 = vmatpush1.bf16.msra.mxu0 %v6382_v5  ;;  %4007 = vmatprep.mubr.bf16.mxu0 %v6421_v8  ;;  %v6469_v5 = vld [vmem:[%s8284_s1 + $0xb60] ss:$8 sps:$4 sm:$0xff]   ;;  %v6472_v8 = vld [vmem:[%s8284_s1 + $0xb70] ss:$8 sps:$4 sm:$0xff]  }
 0x149   : > { %4040 = vmatprep.subr.bf16.mxu0 %v6387_v6  ;;  %v6510_v6 = vld [vmem:[%s6844_s12 + $0x5c] ss:$100 sps:$4 sm:$0xff]  }
 0x14c   : > { %4041 = vmatpush1.bf16.msra.mxu0 %v6385_v9  ;;  %v6477_v9 = vld [vmem:[%s8284_s1 + $0xb84] ss:$8 sps:$4 sm:$0xff]  }
 0x14d   : > { %4042 = vmatprep.subr.bf16.mxu0 %v6393_v10  ;;  %v6475_v10 = vld [vmem:[%s8284_s1 + $0xb80] ss:$8 sps:$4 sm:$0xff]  }
 0x14e   : > { %3643 = vmatmul.mubr.bf16.gmra.mrb[4].mxu1 %v6390_v11  ;;  %v6480_v11 = vld [vmem:[%s8284_s1 + $0xb94] ss:$8 sps:$4 sm:$0xff]  }
 0x14f   : > { %4008 = vmatmul.mubr.bf16.gmra.mrb[4].mxu0 %v6426_v12  ;;  %3652 = vmatprep.mubr.bf16.mxu1 %v6397_v15  ;;  %v6478_v12 = vld [vmem:[%s8284_s1 + $0xb90] ss:$8 sps:$4 sm:$0xff]   ;;  %v6489_v15 = vld [vmem:[%s8284_s1 + $0xbb4] ss:$8 sps:$4 sm:$0xff]  }
 0x150   : > { %4043 = vmatpush1.bf16.msra.mxu0 %v6391_v13  ;;  %4017 = vmatprep.mubr.bf16.mxu0 %v6430_v16  ;;  %v6486_v13 = vld [vmem:[%s8284_s1 + $0xba4] ss:$8 sps:$4 sm:$0xff]   ;;  %v6487_v16 = vld [vmem:[%s8284_s1 + $0xbb0] ss:$8 sps:$4 sm:$0xff]  }
 0x151   : > { %4044 = vmatprep.subr.bf16.mxu0 %v6396_v14  ;;  %v6484_v14 = vld [vmem:[%s8284_s1 + $0xba0] ss:$8 sps:$4 sm:$0xff]  }
 0x154   : > { %4045 = vmatpush1.bf16.msra.mxu0 %v6394_v17  ;;  %v6495_v17 = vld [vmem:[%s8284_s1 + $0xbc4] ss:$8 sps:$4 sm:$0xff]  }
 0x155   : > { %4046 = vmatprep.subr.bf16.mxu0 %v6402_v18  ;;  %v6493_v18 = vld [vmem:[%s8284_s1 + $0xbc0] ss:$8 sps:$4 sm:$0xff]  }
 0x156   : > { %3653 = vmatmul.mubr.bf16.gmra.mrb[8].mxu1 %v6399_v19  ;;  %v6498_v19 = vld [vmem:[%s8284_s1 + $0xbd4] ss:$8 sps:$4 sm:$0xff]  }
 0x157   : > { %4018 = vmatmul.mubr.bf16.gmra.mrb[8].mxu0 %v6435_v20  ;;  %3662 = vmatprep.mubr.bf16.mxu1 %v6406_v23  ;;  %v6548_v20 = vld [vmem:[%s8286_s3] ss:$8 sps:$4 sm:$0xff]   ;;  %v6496_v23 = vld [vmem:[%s8284_s1 + $0xbd0] ss:$8 sps:$4 sm:$0xff]  }
 0x158   : > { %4047 = vmatpush1.bf16.msra.mxu0 %v6400_v21  ;;  %4027 = vmatprep.mubr.bf16.mxu0 %v6439_v24  ;;  %v6550_v21 = vld [vmem:[%s8286_s3 + $0x4] ss:$8 sps:$4 sm:$0xff]  }
 0x159   : > { %4048 = vmatprep.subr.bf16.mxu0 %v6405_v22  ;;  %v6553_v22 = vld [vmem:[%s8286_s3 + $0x14] ss:$8 sps:$4 sm:$0xff]   ;;  %4485 = vmatprep.subr.bf16.mxu1 %v6550_v21  ;;  %v6504_v24 = vld [vmem:[%s8284_s1 + $0xbe4] ss:$8 sps:$4 sm:$0xff]  }
 0x15a   : > { %4486 = vmatpush1.bf16.msra.mxu1 %v6548_v20 }
 0x15b   : > { %4487 = vmatprep.subr.bf16.mxu1 %v6553_v22 }
 0x15c   : > { %4049 = vmatpush1.bf16.msra.mxu0 %v6403_v25  ;;  %v6551_v25 = vld [vmem:[%s8286_s3 + $0x10] ss:$8 sps:$4 sm:$0xff]  }
 0x15d   : > { %4050 = vmatprep.subr.bf16.mxu0 %v6411_v26  ;;  %v6556_v26 = vld [vmem:[%s8286_s3 + $0x24] ss:$8 sps:$4 sm:$0xff]  }
 0x15e   : > { %3663 = vmatmul.mubr.bf16.gmra.mrb[12].mxu1 %v6408_v27  ;;  %v6502_v27 = vld [vmem:[%s8284_s1 + $0xbe0] ss:$8 sps:$4 sm:$0xff]  }
 0x15f   : > { %4028 = vmatmul.mubr.bf16.gmra.mrb[12].mxu0 %v6444_v28  ;;  %v6507_v28 = vld [vmem:[%s8284_s1 + $0xbf4] ss:$8 sps:$4 sm:$0xff]   ;;  %4488 = vmatpush1.bf16.msra.mxu1 %v6551_v25 }
 0x160   : > { %4051 = vmatpush1.bf16.msra.mxu0 %v6409_v29  ;;  %4070 = vmatprep.mubr.bf16.mxu0 %v6450_v30  ;;  %v6554_v29 = vld [vmem:[%s8286_s3 + $0x20] ss:$8 sps:$4 sm:$0xff]   ;;  %v6559_v30 = vld [vmem:[%s8286_s3 + $0x34] ss:$8 sps:$4 sm:$0xff]  }
 0x161   : > { %4052 = vmatprep.subr.bf16.mxu0 %v6414_v31  ;;  %4489 = vmatprep.subr.bf16.mxu1 %v6556_v26  ;;  %v6505_v31 = vld [vmem:[%s8284_s1 + $0xbf0] ss:$8 sps:$4 sm:$0xff]  }
 0x163   : > { %4490 = vmatpush1.bf16.msra.mxu1 %v6554_v29 }
 0x164   : > { %4053 = vmatpush1.bf16.msra.mxu0 %v6412_v32  ;;  %v6513_v32 = vld [vmem:[%s8284_s1 + $0xc04] ss:$8 sps:$4 sm:$0xff]   ;;  %4491 = vmatprep.subr.bf16.mxu1 %v6559_v30 }
 0x165   : > { %4054 = vmatprep.subr.bf16.mxu0 %v6417_v33  ;;  %v6557_v33 = vld [vmem:[%s8286_s3 + $0x30] ss:$8 sps:$4 sm:$0xff]  }
 0x167   : > { %4492 = vmatpush1.bf16.msra.mxu1 %v6557_v33  ;;  %v6592_v33 = vld [vmem:[%s8286_s3 + $0xe4] ss:$8 sps:$4 sm:$0xff]  }
 0x168   : > { %4055 = vmatpush1.bf16.msra.mxu0 %v6415_v34  ;;  %v6562_v34 = vld [vmem:[%s8286_s3 + $0x44] ss:$8 sps:$4 sm:$0xff]  }
 0x169   : > { %4056 = vmatprep.subr.bf16.mxu0 %v6420_v35  ;;  %v6508_v35 = vld [vmem:[%s6844_s12 + $0x58] ss:$100 sps:$4 sm:$0xff]   ;;  %4493 = vmatprep.subr.bf16.mxu1 %v6562_v34  ;;  %v6590_v34 = vld [vmem:[%s8286_s3 + $0xe0] ss:$8 sps:$4 sm:$0xff]  }
 0x16c   : > { %4057 = vmatpush1.bf16.msra.mxu0 %v6418_v36  ;;  %v6511_v36 = vld [vmem:[%s8284_s1 + $0xc00] ss:$8 sps:$4 sm:$0xff]  }
 0x16d   : > { %4058 = vmatprep.subr.bf16.mxu0 %v6425_v37  ;;  %v6517_v37 = vld [vmem:[%s6844_s12 + $0x124] ss:$100 sps:$4 sm:$0xff]  }
 0x170   : > { %4059 = vmatpush1.bf16.msra.mxu0 %v6423_v38  ;;  %v6516_v38 = vld [vmem:[%s8284_s1 + $0xc14] ss:$8 sps:$4 sm:$0xff]  }
 0x171   : > { %4060 = vmatprep.subr.bf16.mxu0 %v6429_v39  ;;  %v6560_v39 = vld [vmem:[%s8286_s3 + $0x40] ss:$8 sps:$4 sm:$0xff]  }
 0x172   : > { %4494 = vmatpush1.bf16.msra.mxu1 %v6560_v39 }
 0x174   : > { %4061 = vmatpush1.bf16.msra.mxu0 %v6427_v40  ;;  %v6565_v40 = vld [vmem:[%s8286_s3 + $0x54] ss:$8 sps:$4 sm:$0xff]  }
 0x175   : > { %4062 = vmatprep.subr.bf16.mxu0 %v6434_v41  ;;  %v6514_v41 = vld [vmem:[%s8284_s1 + $0xc10] ss:$8 sps:$4 sm:$0xff]   ;;  %4495 = vmatprep.subr.bf16.mxu1 %v6565_v40 }
 0x178   : > { %4063 = vmatpush1.bf16.msra.mxu0 %v6432_v42  ;;  %v6522_v42 = vld [vmem:[%s8284_s1 + $0xc24] ss:$8 sps:$4 sm:$0xff]  }
 0x179   : > { %4064 = vmatprep.subr.bf16.mxu0 %v6438_v43  ;;  %v6563_v43 = vld [vmem:[%s8286_s3 + $0x50] ss:$8 sps:$4 sm:$0xff]  }
 0x17a   : > { %4496 = vmatpush1.bf16.msra.mxu1 %v6563_v43 }
 0x17c   : > { %4065 = vmatpush1.bf16.msra.mxu0 %v6436_v44  ;;  %v6568_v44 = vld [vmem:[%s8286_s3 + $0x64] ss:$8 sps:$4 sm:$0xff]  }
 0x17d   : > { %4066 = vmatprep.subr.bf16.mxu0 %v6443_v45  ;;  %v6519_v45 = vld [vmem:[%s6844_s12 + $0x120] ss:$100 sps:$4 sm:$0xff]   ;;  %4497 = vmatprep.subr.bf16.mxu1 %v6568_v44 }
 0x180   : > { %4067 = vmatpush1.bf16.msra.mxu0 %v6441_v46  ;;  %v6520_v46 = vld [vmem:[%s8284_s1 + $0xc20] ss:$8 sps:$4 sm:$0xff]  }
 0x181   : > { %4068 = vmatprep.subr.bf16.mxu0 %v6447_v47  ;;  %v6526_v47 = vld [vmem:[%s6844_s12 + $0x1ec] ss:$100 sps:$4 sm:$0xff]  }
 0x184   : > { %4069 = vmatpush1.bf16.msra.mxu0 %v6445_v48  ;;  %v6525_v48 = vld [vmem:[%s8284_s1 + $0xc34] ss:$8 sps:$4 sm:$0xff]  }
 0x185   : > { %4111 = vmatprep.subr.bf16.mxu0 %v6453_v49  ;;  %v6566_v49 = vld [vmem:[%s8286_s3 + $0x60] ss:$8 sps:$4 sm:$0xff]  }
 0x186   : > { %4498 = vmatpush1.bf16.msra.mxu1 %v6566_v49 }
 0x187   : > { %4071 = vmatmul.mubr.bf16.vlgmr.msra.gmra.mrb[0].mxu0 %v6448_v50  ;;  %v6571_v50 = vld [vmem:[%s8286_s3 + $0x74] ss:$8 sps:$4 sm:$0xff]  }
 0x188   : > { %4112 = vmatpush1.bf16.msra.mxu0 %v6451_v51  ;;  %4080 = vmatprep.mubr.bf16.mxu0 %v6481_v52  ;;  %v6523_v51 = vld [vmem:[%s8284_s1 + $0xc30] ss:$8 sps:$4 sm:$0xff]   ;;  %v6531_v52 = vld [vmem:[%s8284_s1 + $0xc44] ss:$8 sps:$4 sm:$0xff]  }
 0x189   : > { %4113 = vmatprep.subr.bf16.mxu0 %v6456_v53  ;;  %v6569_v53 = vld [vmem:[%s8286_s3 + $0x70] ss:$8 sps:$4 sm:$0xff]   ;;  %4499 = vmatprep.subr.bf16.mxu1 %v6571_v50 }
 0x18a   : > { %4500 = vmatpush1.bf16.msra.mxu1 %v6569_v53 }
 0x18c   : > { %4114 = vmatpush1.bf16.msra.mxu0 %v6454_v54  ;;  %v6574_v54 = vld [vmem:[%s8286_s3 + $0x84] ss:$8 sps:$4 sm:$0xff]  }
 0x18d   : > { %4115 = vmatprep.subr.bf16.mxu0 %v6459_v55  ;;  %v6528_v55 = vld [vmem:[%s6844_s12 + $0x1e8] ss:$100 sps:$4 sm:$0xff]   ;;  %4501 = vmatprep.subr.bf16.mxu1 %v6574_v54 }
 0x18f   : > { %4081 = vmatmul.mubr.bf16.gmra.mrb[4].mxu0 %v6483_v56  ;;  %v6529_v56 = vld [vmem:[%s8284_s1 + $0xc40] ss:$8 sps:$4 sm:$0xff]  }
 0x190   : > { %4116 = vmatpush1.bf16.msra.mxu0 %v6457_v57  ;;  %4090 = vmatprep.mubr.bf16.mxu0 %v6490_v58  ;;  %v6535_v57 = vld [vmem:[%s6844_s12 + $0x2b4] ss:$100 sps:$4 sm:$0xff]  }
 0x191   : > { %4117 = vmatprep.subr.bf16.mxu0 %v6462_v59  ;;  %v6534_v58 = vld [vmem:[%s8284_s1 + $0xc54] ss:$8 sps:$4 sm:$0xff]   ;;  %v6572_v59 = vld [vmem:[%s8286_s3 + $0x80] ss:$8 sps:$4 sm:$0xff]  }
 0x192   : > { %4502 = vmatpush1.bf16.msra.mxu1 %v6572_v59 }
 0x194   : > { %4118 = vmatpush1.bf16.msra.mxu0 %v6460_v60  ;;  %v6577_v60 = vld [vmem:[%s8286_s3 + $0x94] ss:$8 sps:$4 sm:$0xff]  }
 0x195   : > { %4119 = vmatprep.subr.bf16.mxu0 %v6465_v61  ;;  %v6532_v61 = vld [vmem:[%s8284_s1 + $0xc50] ss:$8 sps:$4 sm:$0xff]   ;;  %4503 = vmatprep.subr.bf16.mxu1 %v6577_v60 }
 0x197   : > { %4091 = vmatmul.mubr.bf16.gmra.mrb[8].mxu0 %v6492_v62  ;;  %v6540_v62 = vld [vmem:[%s8284_s1 + $0xc64] ss:$8 sps:$4 sm:$0xff]  }
 0x198   : > { %4120 = vmatpush1.bf16.msra.mxu0 %v6463_v63  ;;  %4100 = vmatprep.mubr.bf16.mxu0 %v6499_v0  ;;  %v6575_v63 = vld [vmem:[%s8286_s3 + $0x90] ss:$8 sps:$4 sm:$0xff]   ;;  %v6580_v0 = vld [vmem:[%s8286_s3 + $0xa4] ss:$8 sps:$4 sm:$0xff]  }
 0x199   : > { %4121 = vmatprep.subr.bf16.mxu0 %v6468_v1  ;;  %v6537_v1 = vld [vmem:[%s6844_s12 + $0x2b0] ss:$100 sps:$4 sm:$0xff]   ;;  %4504 = vmatpush1.bf16.msra.mxu1 %v6575_v63 }
 0x19a   : > { %4505 = vmatprep.subr.bf16.mxu1 %v6580_v0 }
 0x19c   : > { %4122 = vmatpush1.bf16.msra.mxu0 %v6466_v2  ;;  %v6538_v2 = vld [vmem:[%s8284_s1 + $0xc60] ss:$8 sps:$4 sm:$0xff]  }
 0x19d   : > { %4123 = vmatprep.subr.bf16.mxu0 %v6471_v3  ;;  %v6543_v3 = vld [vmem:[%s8284_s1 + $0xc74] ss:$8 sps:$4 sm:$0xff]  }
 0x19f   : > { %4101 = vmatmul.mubr.bf16.gmra.mrb[12].mxu0 %v6501_v4  ;;  %v6578_v4 = vld [vmem:[%s8286_s3 + $0xa0] ss:$8 sps:$4 sm:$0xff]  }
 0x1a0   : > { %4124 = vmatpush1.bf16.msra.mxu0 %v6469_v5  ;;  %4143 = vmatprep.mubr.bf16.mxu0 %v6510_v6  ;;  %v6583_v5 = vld [vmem:[%s8286_s3 + $0xb4] ss:$8 sps:$4 sm:$0xff]   ;;  %v6541_v6 = vld [vmem:[%s8284_s1 + $0xc70] ss:$8 sps:$4 sm:$0xff]  }
 0x1a1   : > { %4125 = vmatprep.subr.bf16.mxu0 %v6474_v7  ;;  %v6652_v7 = vmov 0   ;;  %4506 = vmatpush1.bf16.msra.mxu1 %v6578_v4 }
 0x1a2   : > { %4507 = vmatprep.subr.bf16.mxu1 %v6583_v5 }
 0x1a4   : > { %4126 = vmatpush1.bf16.msra.mxu0 %v6472_v8  ;;  %v6581_v8 = vld [vmem:[%s8286_s3 + $0xb0] ss:$8 sps:$4 sm:$0xff]  }
 0x1a5   : > { %4127 = vmatprep.subr.bf16.mxu0 %v6477_v9  ;;  %v6586_v9 = vld [vmem:[%s8286_s3 + $0xc4] ss:$8 sps:$4 sm:$0xff]   ;;  %4508 = vmatpush1.bf16.msra.mxu1 %v6581_v8 }
 0x1a6   : > { %4509 = vmatprep.subr.bf16.mxu1 %v6586_v9 }
 0x1a8   : > { %4128 = vmatpush1.bf16.msra.mxu0 %v6475_v10  ;;  %v6544_v10 = vld [vmem:[%s6844_s12 + $0x60] ss:$100 sps:$4 sm:$0xff]  }
 0x1a9   : > { %4129 = vmatprep.subr.bf16.mxu0 %v6480_v11  ;;  %v6584_v11 = vld [vmem:[%s8286_s3 + $0xc0] ss:$8 sps:$4 sm:$0xff]  }
 0x1aa   : > { %4510 = vmatpush1.bf16.msra.mxu1 %v6584_v11 }
 0x1ac   : > { %4130 = vmatpush1.bf16.msra.mxu0 %v6478_v12  ;;  %v6589_v12 = vld [vmem:[%s8286_s3 + $0xd4] ss:$8 sps:$4 sm:$0xff]  }
 0x1ad   : > { %4131 = vmatprep.subr.bf16.mxu0 %v6486_v13  ;;  %v6587_v13 = vld [vmem:[%s8286_s3 + $0xd0] ss:$8 sps:$4 sm:$0xff]   ;;  %4511 = vmatprep.subr.bf16.mxu1 %v6589_v12 }
 0x1ae   : > { %4512 = vmatpush1.bf16.msra.mxu1 %v6587_v13  ;;  %v6599_v13 = vld [vmem:[%s8288_s5 + $0x10] ss:$8 sps:$4 sm:$0xff]  }
 0x1af   : > { %4513 = vmatprep.subr.bf16.mxu1 %v6592_v33 }
 0x1b0   : > { %4132 = vmatpush1.bf16.msra.mxu0 %v6484_v14  ;;  %v6545_v14 = vld [vmem:[%s6844_s12 + $0x128] ss:$100 sps:$4 sm:$0xff]  }
 0x1b1   : > { %4133 = vmatprep.subr.bf16.mxu0 %v6489_v15  ;;  %v6546_v15 = vld [vmem:[%s6844_s12 + $0x1f0] ss:$100 sps:$4 sm:$0xff]  }
 0x1b2   : > { %4514 = vmatpush1.bf16.msra.mxu1 %v6590_v34 }
 0x1b4   : > { %4134 = vmatpush1.bf16.msra.mxu0 %v6487_v16  ;;  %v6547_v16 = vld [vmem:[%s6844_s12 + $0x2b8] ss:$100 sps:$4 sm:$0xff]  }
 0x1b5   : > { %4135 = vmatprep.subr.bf16.mxu0 %v6495_v17 }
 0x1b8   : > { %4136 = vmatpush1.bf16.msra.mxu0 %v6493_v18 }
 0x1b9   : > { %4137 = vmatprep.subr.bf16.mxu0 %v6498_v19 }
 0x1bc   : > { %4138 = vmatpush1.bf16.msra.mxu0 %v6496_v23 }
 0x1bd   : > { %4139 = vmatprep.subr.bf16.mxu0 %v6504_v24 }
 0x1c0   : > { %4140 = vmatpush1.bf16.msra.mxu0 %v6502_v27 }
 0x1c1   : > { %4141 = vmatprep.subr.bf16.mxu0 %v6507_v28 }
 0x1c4   : > { %4142 = vmatpush1.bf16.msra.mxu0 %v6505_v31 }
 0x1c5   : > { %4184 = vmatprep.subr.bf16.mxu0 %v6513_v32 }
 0x1c7   : > { %4144 = vmatmul.mubr.bf16.vlgmr.msra.gmra.mrb[0].mxu0 %v6508_v35  ;;  %v6595_v35 = vld [vmem:[%s8286_s3 + $0xf4] ss:$8 sps:$4 sm:$0xff]  }
 0x1c8   : > { %4185 = vmatpush1.bf16.msra.mxu0 %v6511_v36  ;;  %4153 = vmatprep.mubr.bf16.mxu0 %v6517_v37  ;;  %v6593_v36 = vld [vmem:[%s8286_s3 + $0xf0] ss:$8 sps:$4 sm:$0xff]   ;;  %v6598_v37 = vld [vmem:[%s8288_s5 + $0x4] ss:$8 sps:$4 sm:$0xff]  }
 0x1c9   : > { %4186 = vmatprep.subr.bf16.mxu0 %v6516_v38  ;;  %4515 = vmatprep.subr.bf16.mxu1 %v6595_v35  ;;  %v794_v38 = vlaneseq }
 0x1ca   : > { %4516 = vmatpush1.bf16.msra.mxu1 %v6593_v36 }
 0x1cb   : > { %4786 = vmatprep.subr.bf16.mxu1 %v6598_v37  ;;  %v795_v39 = vshrl.u32 %v794_v38, 7 }
 0x1cc   : > { %4187 = vmatpush1.bf16.msra.mxu0 %v6514_v41  ;;  %v792_v41 = vld [vmem:[%s8285_s2] sm:$0x3] }
 0x1cd   : > { %4188 = vmatprep.subr.bf16.mxu0 %v6522_v42  ;;  %v8126_v40 = vsub.s32 0, %v795_v39  ;;  %v8131_v42 = vsub.s32 1, %v795_v39 }
 0x1cf   : > { %4154 = vmatmul.mubr.bf16.gmra.mrb[4].mxu0 %v6519_v45  ;;  %v8134_v43 = vrot.slane %v792_v41, %v8126_v40  ;;  %v8137_v44 = vrot.slane %v792_v41, %v8131_v42 }
 0x1d0   : > { %4189 = vmatpush1.bf16.msra.mxu0 %v6520_v46  ;;  %4163 = vmatprep.mubr.bf16.mxu0 %v6526_v47 }
 0x1d1   : > { %4190 = vmatprep.subr.bf16.mxu0 %v6525_v48 }
 0x1d4   : > { %4191 = vmatpush1.bf16.msra.mxu0 %v6523_v51 }
 0x1d5   : > { %4192 = vmatprep.subr.bf16.mxu0 %v6531_v52 }
 0x1d7   : > { %4164 = vmatmul.mubr.bf16.gmra.mrb[8].mxu0 %v6528_v55 }
 0x1d8   : > { %4193 = vmatpush1.bf16.msra.mxu0 %v6529_v56  ;;  %4173 = vmatprep.mubr.bf16.mxu0 %v6535_v57 }
 0x1d9   : > { %4194 = vmatprep.subr.bf16.mxu0 %v6534_v58 }
 0x1dc   : > { %4195 = vmatpush1.bf16.msra.mxu0 %v6532_v61 }
 0x1dd   : > { %4196 = vmatprep.subr.bf16.mxu0 %v6540_v62 }
 0x1df   : > { %4174 = vmatmul.mubr.bf16.gmra.mrb[12].mxu0 %v6537_v1 }
 0x1e0   : > { %4197 = vmatpush1.bf16.msra.mxu0 %v6538_v2  ;;  %4216 = vmatprep.mubr.bf16.mxu0 %v6652_v7  ;;  %v6596_v2 = vld [vmem:[%s8288_s5] ss:$8 sps:$4 sm:$0xff]  }
 0x1e1   : > { %4198 = vmatprep.subr.bf16.mxu0 %v6543_v3 }
 0x1e4   : > { %4199 = vmatpush1.bf16.msra.mxu0 %v6541_v6  ;;  %v6601_v6 = vld [vmem:[%s8288_s5 + $0x14] ss:$8 sps:$4 sm:$0xff]  }
 0x1e7   : > { %4217 = vmatmul.mubr.bf16.vlgmr.msra.gmra.mrb[0].mxu0 %v6544_v10 }
 0x1e8   : > { %4226 = vmatprep.mubr.bf16.mxu0 %v6652_v7 }
 0x1ef   : > { %4227 = vmatmul.mubr.bf16.gmra.mrb[4].mxu0 %v6545_v14 }
 0x1f0   : > { %4236 = vmatprep.mubr.bf16.mxu0 %v6652_v7 }
 0x1f7   : > { %4237 = vmatmul.mubr.bf16.gmra.mrb[8].mxu0 %v6546_v15 }
 0x1f8   : > { %4246 = vmatprep.mubr.bf16.mxu0 %v6652_v7 }
 0x1ff   : > { %4247 = vmatmul.mubr.bf16.gmra.mrb[12].mxu0 %v6547_v16  ;;  %v6604_v16 = vld [vmem:[%s8288_s5 + $0x24] ss:$8 sps:$4 sm:$0xff]  }
 0x219   : > { %v3634_v17 = vpop.f32.mrb[0].mxu1 }
 0x21a   : > { %v3636_v18 = vpop.f32.mrb[1].mxu1  ;;  %v5582_v45 = vadd.f32 %v3634_v17, %v8134_v43 }
 0x21b   : > { %v3638_v19 = vpop.f32.mrb[2].mxu1  ;;  %v5584_v46 = vadd.f32 %v3636_v18, %v8137_v44 }
 0x21c   : > { %v3640_v20 = vpop.f32.mrb[3].mxu1  ;;  %v5586_v48 = vadd.f32 %v3638_v19, %v8134_v43 }
 0x21d   : > { %v5588_v51 = vadd.f32 %v3640_v20, %v8137_v44 }
 0x221   : > { %v3644_v21 = vpop.f32.mrb[4].mxu1 }
 0x222   : > { %v3646_v22 = vpop.f32.mrb[5].mxu1  ;;  %v5590_v61 = vadd.f32 %v3644_v21, %v8134_v43 }
 0x223   : > { %v3648_v23 = vpop.f32.mrb[6].mxu1  ;;  %v5592_v63 = vadd.f32 %v3646_v22, %v8137_v44 }
 0x224   : > { %v3650_v24 = vpop.f32.mrb[7].mxu1  ;;  %v5594_v3 = vadd.f32 %v3648_v23, %v8134_v43 }
 0x225   : > { %v5596_v7 = vadd.f32 %v3650_v24, %v8137_v44  ;;  %v6602_v24 = vld [vmem:[%s8288_s5 + $0x20] ss:$8 sps:$4 sm:$0xff]  }
 0x229   : > { %v8095_v25 = vpop.f32.mrb[8].mxu1 }
 0x22a   : > { %v8097_v26 = vpop.f32.mrb[9].mxu1  ;;  %v5598_v19 = vadd.f32 %v8095_v25, %v8134_v43  ;;  %v6607_v25 = vld [vmem:[%s8288_s5 + $0x34] ss:$8 sps:$4 sm:$0xff]  }
 0x22b   : > { %v8099_v27 = vpop.f32.mrb[10].mxu1  ;;  %v5600_v21 = vadd.f32 %v8097_v26, %v8137_v44 }
 0x22c   : > { %v8101_v28 = vpop.f32.mrb[11].mxu1  ;;  %v5602_v33 = vadd.f32 %v8099_v27, %v8134_v43  ;;  %v6605_v27 = vld [vmem:[%s8288_s5 + $0x30] ss:$8 sps:$4 sm:$0xff]  }
 0x22d   : > { %v5604_v26 = vadd.f32 %v8101_v28, %v8137_v44 }
 0x231   : > { %v8103_v29 = vpop.f32.mrb[12].mxu1 }
 0x232   : > { %v8105_v30 = vpop.f32.mrb[13].mxu1 }
 0x233   : > { %v8107_v31 = vpop.f32.mrb[14].mxu1 }
 0x234   : > { %v8109_v32 = vpop.f32.mrb[15].mxu1 }
 0x2ba   : > { %v4218_v47 = vpop.f32.mrb[0].mxu0 }
 0x2bb   : > { %v5583_v49 = vadd.f32 %v5582_v45, %v4218_v47  ;;  %v4220_v50 = vpop.f32.mrb[1].mxu0  ;;  %v6610_v47 = vld [vmem:[%s8288_s5 + $0x44] ss:$8 sps:$4 sm:$0xff]  }
 0x2bc   : > { %v5585_v52 = vadd.f32 %v5584_v46, %v4220_v50  ;;  %v4222_v53 = vpop.f32.mrb[2].mxu0 }
 0x2bd   : > { %v5587_v54 = vadd.f32 %v5586_v48, %v4222_v53  ;;  %v4224_v55 = vpop.f32.mrb[3].mxu0  ;;  %v4257_v57 = vmax.f32 %v5583_v49, 0.0  ;;  %v5606_v49 = vadd.f32 %v8103_v29, %v8134_v43  ;;  %v6613_v29 = vld [vmem:[%s8288_s5 + $0x54] ss:$8 sps:$4 sm:$0xff]  }
 0x2be   : > { %v5589_v56 = vadd.f32 %v5588_v51, %v4224_v55  ;;  %v4258_v59 = vmax.f32 %v5585_v52, 0.0  ;;  %v5608_v51 = vadd.f32 %v8105_v30, %v8137_v44  ;;  %v5610_v55 = vadd.f32 %v8107_v31, %v8134_v43  ;;  %v6611_v31 = vld [vmem:[%s8288_s5 + $0x50] ss:$8 sps:$4 sm:$0xff]  }
 0x2bf   : > { %v4259_v58 = vmax.f32 %v5587_v54, 0.0  ;;  %v6608_v54 = vld [vmem:[%s8288_s5 + $0x40] ss:$8 sps:$4 sm:$0xff]   ;;  %v5612_v30 = vadd.f32 %v8109_v32, %v8137_v44 }
 0x2c0   : > { %v4260_v60 = vmax.f32 %v5589_v56, 0.0 }
 0x2c1   : > { %v4273_v62 = vpack.c.bf16 %v4259_v58, %v4257_v57 }
 0x2c2   : > { %v4274_v0 = vpack.c.bf16 %v4260_v60, %v4258_v59  ;;  %v4228_v1 = vpop.f32.mrb[4].mxu0 }
 0x2c3   : > { %v5591_v4 = vadd.f32 %v5590_v61, %v4228_v1  ;;  %v4230_v5 = vpop.f32.mrb[5].mxu0 }
 0x2c4   : > { %v5593_v8 = vadd.f32 %v5592_v63, %v4230_v5  ;;  %v4232_v9 = vpop.f32.mrb[6].mxu0  ;;  %4517 = vmatprep.mubr.bf16.mxu1 %v4274_v0  ;;  %v6616_v0 = vld [vmem:[%s8288_s5 + $0x64] ss:$8 sps:$4 sm:$0xff]   ;;  %v6617_v5 = vld [vmem:[%s8288_s5 + $0x70] ss:$8 sps:$4 sm:$0xff]  }
 0x2c5   : > { %v5595_v10 = vadd.f32 %v5594_v3, %v4232_v9  ;;  %v4234_v11 = vpop.f32.mrb[7].mxu0  ;;  %4518 = vmatmul.mubr.bf16.vlgmr.msra.gmra.mrb[16].mxu1 %v4273_v62  ;;  %v4261_v14 = vmax.f32 %v5591_v4, 0.0  ;;  %v6614_v3 = vld [vmem:[%s8288_s5 + $0x60] ss:$8 sps:$4 sm:$0xff]   ;;  %v6619_v4 = vld [vmem:[%s8288_s5 + $0x74] ss:$8 sps:$4 sm:$0xff]  }
 0x2c6   : > { %v5597_v12 = vadd.f32 %v5596_v7, %v4234_v11  ;;  %4787 = vmatpush1.bf16.msra.mxu1 %v6596_v2  ;;  %v4262_v17 = vmax.f32 %v5593_v8, 0.0  ;;  %v6620_v7 = vld [vmem:[%s8288_s5 + $0x80] ss:$8 sps:$4 sm:$0xff]   ;;  %v6625_v8 = vld [vmem:[%s8288_s5 + $0x94] ss:$8 sps:$4 sm:$0xff]  }
 0x2c7   : > { %v4263_v15 = vmax.f32 %v5595_v10, 0.0  ;;  %4788 = vmatprep.subr.bf16.mxu1 %v6601_v6  ;;  %v6622_v6 = vld [vmem:[%s8288_s5 + $0x84] ss:$8 sps:$4 sm:$0xff]   ;;  %v6623_v9 = vld [vmem:[%s8288_s5 + $0x90] ss:$8 sps:$4 sm:$0xff]  }
 0x2c8   : > { %v4264_v18 = vmax.f32 %v5597_v12, 0.0  ;;  %v6628_v10 = vld [vmem:[%s8288_s5 + $0xa4] ss:$8 sps:$4 sm:$0xff]   ;;  %v6626_v11 = vld [vmem:[%s8288_s5 + $0xa0] ss:$8 sps:$4 sm:$0xff]  }
 0x2c9   : > { %v4275_v20 = vpack.c.bf16 %v4263_v15, %v4261_v14  ;;  %v6631_v12 = vld [vmem:[%s8288_s5 + $0xb4] ss:$8 sps:$4 sm:$0xff]   ;;  %v6634_v14 = vld [vmem:[%s8288_s5 + $0xc4] ss:$8 sps:$4 sm:$0xff]   ;;  %v6632_v15 = vld [vmem:[%s8288_s5 + $0xc0] ss:$8 sps:$4 sm:$0xff]  }
 0x2ca   : > { %v4276_v22 = vpack.c.bf16 %v4264_v18, %v4262_v17  ;;  %v4238_v23 = vpop.f32.mrb[8].mxu0  ;;  %4789 = vmatpush1.bf16.msra.mxu1 %v6599_v13  ;;  %v6629_v13 = vld [vmem:[%s8288_s5 + $0xb0] ss:$8 sps:$4 sm:$0xff]   ;;  %v6640_v18 = vld [vmem:[%s8288_s5 + $0xe4] ss:$8 sps:$4 sm:$0xff]  }
 0x2cb   : > { %v5599_v34 = vadd.f32 %v5598_v19, %v4238_v23  ;;  %v4240_v35 = vpop.f32.mrb[9].mxu0  ;;  %4790 = vmatprep.subr.bf16.mxu1 %v6604_v16  ;;  %v6637_v16 = vld [vmem:[%s8288_s5 + $0xd4] ss:$8 sps:$4 sm:$0xff]   ;;  %v6635_v17 = vld [vmem:[%s8288_s5 + $0xd0] ss:$8 sps:$4 sm:$0xff]  }
 0x2cc   : > { %v5601_v36 = vadd.f32 %v5600_v21, %v4240_v35  ;;  %v4242_v37 = vpop.f32.mrb[10].mxu0  ;;  %4527 = vmatprep.mubr.bf16.mxu1 %v4276_v22  ;;  %v6638_v19 = vld [vmem:[%s8288_s5 + $0xe0] ss:$8 sps:$4 sm:$0xff]   ;;  %v6641_v21 = vld [vmem:[%s8288_s5 + $0xf0] ss:$8 sps:$4 sm:$0xff]  }
 0x2cd   : > { %v5603_v38 = vadd.f32 %v5602_v33, %v4242_v37  ;;  %v4244_v39 = vpop.f32.mrb[11].mxu0  ;;  %4528 = vmatmul.mubr.bf16.gmra.mrb[20].mxu1 %v4275_v20  ;;  %v4265_v45 = vmax.f32 %v5599_v34, 0.0  ;;  %v6643_v20 = vld [vmem:[%s8288_s5 + $0xf4] ss:$8 sps:$4 sm:$0xff]   ;;  %v4313_v22 = vld [vmem:[%s8287_s4] sm:$0x3] }
 0x2ce   : > { %v5605_v41 = vadd.f32 %v5604_v26, %v4244_v39  ;;  %4791 = vmatpush1.bf16.msra.mxu1 %v6602_v24  ;;  %v4266_v28 = vmax.f32 %v5601_v36, 0.0  ;;  %v4318_v23 = vrot.slane %v4313_v22, %v8126_v40  ;;  %v4322_v24 = vrot.slane %v4313_v22, %v8131_v42 }
 0x2cf   : > { %v4267_v46 = vmax.f32 %v5603_v38, 0.0  ;;  %4792 = vmatprep.subr.bf16.mxu1 %v6607_v25 }
 0x2d0   : > { %v4268_v48 = vmax.f32 %v5605_v41, 0.0 }
 0x2d1   : > { %v4277_v50 = vpack.c.bf16 %v4267_v46, %v4265_v45 }
 0x2d2   : > { %v4278_v52 = vpack.c.bf16 %v4268_v48, %v4266_v28  ;;  %v4248_v53 = vpop.f32.mrb[12].mxu0  ;;  %4793 = vmatpush1.bf16.msra.mxu1 %v6605_v27 }
 0x2d3   : > { %v5607_v56 = vadd.f32 %v5606_v49, %v4248_v53  ;;  %v4250_v57 = vpop.f32.mrb[13].mxu0  ;;  %4794 = vmatprep.subr.bf16.mxu1 %v6610_v47 }
 0x2d4   : > { %v5609_v58 = vadd.f32 %v5608_v51, %v4250_v57  ;;  %v4252_v59 = vpop.f32.mrb[14].mxu0  ;;  %4537 = vmatprep.mubr.bf16.mxu1 %v4278_v52 }
 0x2d5   : > { %v5611_v60 = vadd.f32 %v5610_v55, %v4252_v59  ;;  %v4254_v61 = vpop.f32.mrb[15].mxu0  ;;  %4538 = vmatmul.mubr.bf16.gmra.mrb[24].mxu1 %v4277_v50  ;;  %v4269_v43 = vmax.f32 %v5607_v56, 0.0 }
 0x2d6   : > { %v5613_v62 = vadd.f32 %v5612_v30, %v4254_v61  ;;  %4795 = vmatpush1.bf16.msra.mxu1 %v6608_v54  ;;  %v4270_v32 = vmax.f32 %v5609_v58, 0.0 }
 0x2d7   : > { %v4271_v63 = vmax.f32 %v5611_v60, 0.0  ;;  %4796 = vmatprep.subr.bf16.mxu1 %v6613_v29 }
 0x2d8   : > { %v4272_v44 = vmax.f32 %v5613_v62, 0.0 }
 0x2d9   : > { %v4279_v1 = vpack.c.bf16 %v4271_v63, %v4269_v43 }
 0x2da   : > { %v4280_v2 = vpack.c.bf16 %v4272_v44, %v4270_v32  ;;  %4797 = vmatpush1.bf16.msra.mxu1 %v6611_v31 }
 0x2db   : > { %4798 = vmatprep.subr.bf16.mxu1 %v6616_v0 }
 0x2dc   : > { %4547 = vmatprep.mubr.bf16.mxu1 %v4280_v2 }
 0x2dd   : > { %4548 = vmatmul.mubr.bf16.gmra.mrb[28].mxu1 %v4279_v1 }
 0x2de   : > { %4799 = vmatpush1.bf16.msra.mxu1 %v6614_v3 }
 0x2df   : > { %4800 = vmatprep.subr.bf16.mxu1 %v6619_v4 }
 0x2e2   : > { %4801 = vmatpush1.bf16.msra.mxu1 %v6617_v5 }
 0x2e3   : > { %4802 = vmatprep.subr.bf16.mxu1 %v6622_v6 }
 0x2e6   : > { %4803 = vmatpush1.bf16.msra.mxu1 %v6620_v7 }
 0x2e7   : > { %4804 = vmatprep.subr.bf16.mxu1 %v6625_v8 }
 0x2ea   : > { %4805 = vmatpush1.bf16.msra.mxu1 %v6623_v9 }
 0x2eb   : > { %4806 = vmatprep.subr.bf16.mxu1 %v6628_v10 }
 0x2ee   : > { %4807 = vmatpush1.bf16.msra.mxu1 %v6626_v11 }
 0x2ef   : > { %4808 = vmatprep.subr.bf16.mxu1 %v6631_v12 }
 0x2f2   : > { %4809 = vmatpush1.bf16.msra.mxu1 %v6629_v13 }
 0x2f3   : > { %4810 = vmatprep.subr.bf16.mxu1 %v6634_v14 }
 0x2f6   : > { %4811 = vmatpush1.bf16.msra.mxu1 %v6632_v15 }
 0x2f7   : > { %4812 = vmatprep.subr.bf16.mxu1 %v6637_v16 }
 0x2fa   : > { %4813 = vmatpush1.bf16.msra.mxu1 %v6635_v17 }
 0x2fb   : > { %4814 = vmatprep.subr.bf16.mxu1 %v6640_v18 }
 0x2fe   : > { %4815 = vmatpush1.bf16.msra.mxu1 %v6638_v19  ;;  %v4614_v19 = vld [vmem:[%s8289_s6] sm:$0x3] }
 0x2ff   : > { %4816 = vmatprep.subr.bf16.mxu1 %v6643_v20  ;;  %v4619_v20 = vrot.slane %v4614_v19, %v8126_v40 }
 0x302   : > { %4817 = vmatpush1.bf16.msra.mxu1 %v6641_v21  ;;  %v4623_v21 = vrot.slane %v4614_v19, %v8131_v42 }
 0x398   : > { %v4519_v33 = vpop.f32.mrb[16].mxu1 }
 0x399   : > { %v4520_v34 = vadd.f32 %v4519_v33, %v4318_v23  ;;  %v4521_v35 = vpop.f32.mrb[17].mxu1 }
 0x39a   : > { %v4522_v25 = vadd.f32 %v4521_v35, %v4322_v24  ;;  %v4523_v26 = vpop.f32.mrb[18].mxu1 }
 0x39b   : > { %v4524_v36 = vadd.f32 %v4523_v26, %v4318_v23  ;;  %v4525_v37 = vpop.f32.mrb[19].mxu1  ;;  %v4558_v39 = vmax.f32 %v4520_v34, 0.0 }
 0x39c   : > { %v4526_v38 = vadd.f32 %v4525_v37, %v4322_v24  ;;  %v4559_v27 = vmax.f32 %v4522_v25, 0.0 }
 0x39d   : > { %v4560_v41 = vmax.f32 %v4524_v36, 0.0 }
 0x39e   : > { %v4561_v45 = vmax.f32 %v4526_v38, 0.0 }
 0x39f   : > { %v4574_v46 = vpack.c.bf16 %v4560_v41, %v4558_v39 }
 0x3a0   : > { %v4575_v47 = vpack.c.bf16 %v4561_v45, %v4559_v27  ;;  %v4529_v28 = vpop.f32.mrb[20].mxu1 }
 0x3a1   : > { %v4530_v48 = vadd.f32 %v4529_v28, %v4318_v23  ;;  %v4531_v49 = vpop.f32.mrb[21].mxu1 }
 0x3a2   : > { %v4532_v50 = vadd.f32 %v4531_v49, %v4322_v24  ;;  %v4533_v51 = vpop.f32.mrb[22].mxu1  ;;  %4818 = vmatprep.mubr.bf16.mxu1 %v4575_v47 }
 0x3a3   : > { %v4534_v52 = vadd.f32 %v4533_v51, %v4318_v23  ;;  %v4535_v53 = vpop.f32.mrb[23].mxu1  ;;  %4819 = vmatmul.mubr.bf16.vlgmr.msra.gmra.mrb[32].mxu1 %v4574_v46  ;;  %v4562_v55 = vmax.f32 %v4530_v48, 0.0 }
 0x3a4   : > { %v4536_v54 = vadd.f32 %v4535_v53, %v4322_v24  ;;  %v4563_v57 = vmax.f32 %v4532_v50, 0.0 }
 0x3a5   : > { %v4564_v56 = vmax.f32 %v4534_v52, 0.0 }
 0x3a6   : > { %v4565_v29 = vmax.f32 %v4536_v54, 0.0 }
 0x3a7   : > { %v4576_v30 = vpack.c.bf16 %v4564_v56, %v4562_v55 }
 0x3a8   : > { %v4577_v58 = vpack.c.bf16 %v4565_v29, %v4563_v57  ;;  %v4539_v59 = vpop.f32.mrb[24].mxu1 }
 0x3a9   : > { %v4540_v60 = vadd.f32 %v4539_v59, %v4318_v23  ;;  %v4541_v61 = vpop.f32.mrb[25].mxu1 }
 0x3aa   : > { %v4542_v62 = vadd.f32 %v4541_v61, %v4322_v24  ;;  %v4543_v31 = vpop.f32.mrb[26].mxu1  ;;  %4828 = vmatprep.mubr.bf16.mxu1 %v4577_v58 }
 0x3ab   : > { %v4544_v43 = vadd.f32 %v4543_v31, %v4318_v23  ;;  %v4545_v63 = vpop.f32.mrb[27].mxu1  ;;  %4829 = vmatmul.mubr.bf16.gmra.mrb[36].mxu1 %v4576_v30  ;;  %v4566_v32 = vmax.f32 %v4540_v60, 0.0 }
 0x3ac   : > { %v4546_v0 = vadd.f32 %v4545_v63, %v4322_v24  ;;  %v4567_v1 = vmax.f32 %v4542_v62, 0.0 }
 0x3ad   : > { %v4568_v44 = vmax.f32 %v4544_v43, 0.0 }
 0x3ae   : > { %v4569_v2 = vmax.f32 %v4546_v0, 0.0 }
 0x3af   : > { %v4578_v3 = vpack.c.bf16 %v4568_v44, %v4566_v32 }
 0x3b0   : > { %v4579_v4 = vpack.c.bf16 %v4569_v2, %v4567_v1  ;;  %v4549_v5 = vpop.f32.mrb[28].mxu1 }
 0x3b1   : > { %v4550_v6 = vadd.f32 %v4549_v5, %v4318_v23  ;;  %v4551_v7 = vpop.f32.mrb[29].mxu1 }
 0x3b2   : > { %v4552_v8 = vadd.f32 %v4551_v7, %v4322_v24  ;;  %v4553_v9 = vpop.f32.mrb[30].mxu1  ;;  %4838 = vmatprep.mubr.bf16.mxu1 %v4579_v4 }
 0x3b3   : > { %v4554_v10 = vadd.f32 %v4553_v9, %v4318_v23  ;;  %v4555_v11 = vpop.f32.mrb[31].mxu1  ;;  %4839 = vmatmul.mubr.bf16.gmra.mrb[40].mxu1 %v4578_v3  ;;  %v4570_v13 = vmax.f32 %v4550_v6, 0.0 }
 0x3b4   : > { %v4556_v12 = vadd.f32 %v4555_v11, %v4322_v24  ;;  %v4571_v15 = vmax.f32 %v4552_v8, 0.0 }
 0x3b5   : > { %v4572_v14 = vmax.f32 %v4554_v10, 0.0 }
 0x3b6   : > { %v4573_v16 = vmax.f32 %v4556_v12, 0.0 }
 0x3b7   : > { %v4580_v17 = vpack.c.bf16 %v4572_v14, %v4570_v13 }
 0x3b8   : > { %v4581_v18 = vpack.c.bf16 %v4573_v16, %v4571_v15 }
 0x3ba   : > { %4848 = vmatprep.mubr.bf16.mxu1 %v4581_v18 }
 0x3bb   : > { %4849 = vmatmul.mubr.bf16.gmra.mrb[44].mxu1 %v4580_v17 }
 0x476   : > { %v4820_v22 = vpop.f32.mrb[32].mxu1 }
 0x477   : > { %v4821_v23 = vadd.f32 %v4820_v22, %v4619_v20  ;;  %v4822_v33 = vpop.f32.mrb[33].mxu1 }
 0x478   : > { %v4823_v24 = vadd.f32 %v4822_v33, %v4623_v21  ;;  %v4824_v34 = vpop.f32.mrb[34].mxu1 }
 0x479   : > { %v4859_v35 = vmax.f32 %v4821_v23, 0.0  ;;  %v4825_v25 = vadd.f32 %v4824_v34, %v4619_v20  ;;  %v4826_v26 = vpop.f32.mrb[35].mxu1 }
 0x47a   : > { %v4860_v36 = vmax.f32 %v4823_v24, 0.0  ;;  %v4827_v37 = vadd.f32 %v4826_v26, %v4623_v21 }
 0x47b   : > { %v4861_v40 = vmax.f32 %v4825_v25, 0.0 }
 0x47c   : > { %v5574_v42 = vpack.c.bf16 %v4860_v36, %v4859_v35  ;;  %v4862_v38 = vmax.f32 %v4827_v37, 0.0 }
 0x47e   : > { %4923 = vst [vmem:[%s8270_s16] sm:$0xff] %v5574_v42  ;;  %v5575_v39 = vpack.c.bf16 %v4862_v38, %v4861_v40  ;;  %v4830_v41 = vpop.f32.mrb[36].mxu1 }
 0x47f   : > { %v4831_v27 = vadd.f32 %v4830_v41, %v4619_v20  ;;  %v4832_v45 = vpop.f32.mrb[37].mxu1 }
 0x480   : > { %4924 = vst [vmem:[%s8270_s16 + $0x8] sm:$0xff] %v5575_v39  ;;  %v4833_v46 = vadd.f32 %v4832_v45, %v4623_v21  ;;  %v4834_v47 = vpop.f32.mrb[38].mxu1 }
 0x481   : > { %v4863_v28 = vmax.f32 %v4831_v27, 0.0  ;;  %v4835_v48 = vadd.f32 %v4834_v47, %v4619_v20  ;;  %v4836_v49 = vpop.f32.mrb[39].mxu1 }
 0x482   : > { %v4864_v50 = vmax.f32 %v4833_v46, 0.0  ;;  %v4837_v51 = vadd.f32 %v4836_v49, %v4623_v21 }
 0x483   : > { %v4865_v52 = vmax.f32 %v4835_v48, 0.0 }
 0x484   : > { %v5576_v53 = vpack.c.bf16 %v4864_v50, %v4863_v28  ;;  %v4866_v54 = vmax.f32 %v4837_v51, 0.0 }
 0x486   : > { %4925 = vst [vmem:[%s8270_s16 + $0x10] sm:$0xff] %v5576_v53  ;;  %v5577_v55 = vpack.c.bf16 %v4866_v54, %v4865_v52  ;;  %v4840_v56 = vpop.f32.mrb[40].mxu1 }
 0x487   : > { %v4841_v57 = vadd.f32 %v4840_v56, %v4619_v20  ;;  %v4842_v29 = vpop.f32.mrb[41].mxu1 }
 0x488   : > { %4926 = vst [vmem:[%s8270_s16 + $0x18] sm:$0xff] %v5577_v55  ;;  %v4843_v30 = vadd.f32 %v4842_v29, %v4623_v21  ;;  %v4844_v58 = vpop.f32.mrb[42].mxu1 }
 0x489   : > { %v4867_v59 = vmax.f32 %v4841_v57, 0.0  ;;  %v4845_v60 = vadd.f32 %v4844_v58, %v4619_v20  ;;  %v4846_v61 = vpop.f32.mrb[43].mxu1 }
 0x48a   : > { %v4868_v62 = vmax.f32 %v4843_v30, 0.0  ;;  %v4847_v31 = vadd.f32 %v4846_v61, %v4623_v21 }
 0x48b   : > { %v4869_v43 = vmax.f32 %v4845_v60, 0.0 }
 0x48c   : > { %v5578_v63 = vpack.c.bf16 %v4868_v62, %v4867_v59  ;;  %v4870_v0 = vmax.f32 %v4847_v31, 0.0 }
 0x48e   : > { %4927 = vst [vmem:[%s8270_s16 + $0x20] sm:$0xff] %v5578_v63  ;;  %v5579_v32 = vpack.c.bf16 %v4870_v0, %v4869_v43  ;;  %v4850_v44 = vpop.f32.mrb[44].mxu1 }
 0x48f   : > { %v4851_v1 = vadd.f32 %v4850_v44, %v4619_v20  ;;  %v4852_v2 = vpop.f32.mrb[45].mxu1 }
 0x490   : > { %4928 = vst [vmem:[%s8270_s16 + $0x28] sm:$0xff] %v5579_v32  ;;  %v4853_v3 = vadd.f32 %v4852_v2, %v4623_v21  ;;  %v4854_v4 = vpop.f32.mrb[46].mxu1 }
 0x491   : > { %v4871_v5 = vmax.f32 %v4851_v1, 0.0  ;;  %v4855_v6 = vadd.f32 %v4854_v4, %v4619_v20  ;;  %v4856_v7 = vpop.f32.mrb[47].mxu1 }
 0x492   : > { %v4872_v8 = vmax.f32 %v4853_v3, 0.0  ;;  %v4857_v9 = vadd.f32 %v4856_v7, %v4623_v21 }
 0x493   : > { %v4873_v10 = vmax.f32 %v4855_v6, 0.0 }
 0x494   : > { %v5580_v11 = vpack.c.bf16 %v4872_v8, %v4871_v5  ;;  %v4874_v12 = vmax.f32 %v4857_v9, 0.0 }
 0x496   : > { %4929 = vst [vmem:[%s8270_s16 + $0x30] sm:$0xff] %v5580_v11  ;;  %v5581_v13 = vpack.c.bf16 %v4874_v12, %v4873_v10 }
 0x498   : > { %4930 = vst [vmem:[%s8270_s16 + $0x38] sm:$0xff] %v5581_v13 }
 0x499 PF: > { %s17_s24 = sadd.s32 1, %s6650_s24  }
 0x49a   : > { %p14_p4 = scmp.ge.s32.totalorder %s17_s24, 4  }
 0x49c   :  { %16 = sbr.rel (!%p14_p4) target bundleno = 1 (0x1), region = 78 }

// kernel: ninnet_forward.14
= control target key start
LH: loop header
LB: loop body
LE: loop exit
PB: predicated region body
PF: predicated region fallthrough
CT: control target
= control target key end

     0   :  { %v55_v6 = vlaneseq  ;;  %vm28_vm0 = vcmask 1041408   ;;  %vm29_vm1 = vcmask 1043458   ;;  %vm31_vm2 = vcmask 1045508   ;;  %s214_s0 = inlined_call_operand.vmem [shape: bf16[2,1,1,9,384], index: 0, kind: input, shape index: {}, may-alias: {0,2}]   ;;  %s215_s1 = inlined_call_operand.vmem [shape: bf16[9,2,384], index: 1, kind: input, shape index: {}]   ;;  %s216_s2 = inlined_call_operand.vmem [shape: bf16[2,1,1,9,384], index: 2, kind: output, shape index: {}, may-alias: {0,2}]  }
   0x1   :  { %v10_v0 = vld [vmem:[%s215_s1] sm:$0x7]  ;;  %v11_v1 = vld [vmem:[%s215_s1 + $0x3] sm:$0x7]  ;;  %v12_v2 = vld [vmem:[%s215_s1 + $0x6] sm:$0x7] }
   0x2   :  { %v13_v3 = vld [vmem:[%s215_s1 + $0x9] sm:$0x7]  ;;  %v14_v4 = vld [vmem:[%s215_s1 + $0xc] sm:$0x7]  ;;  %v15_v5 = vld [vmem:[%s215_s1 + $0xf] sm:$0x7]  ;;  %v19_v9 = vunpack.c.l.bf16 %v10_v0  ;;  %v20_v10 = vunpack.c.l.bf16 %v11_v1  ;;  %v21_v11 = vunpack.c.l.bf16 %v12_v2 }
   0x3   :  { %v16_v7 = vld [vmem:[%s215_s1 + $0x12] sm:$0x7]  ;;  %v17_v8 = vld [vmem:[%s215_s1 + $0x15] sm:$0x7]  ;;  %v22_v12 = vunpack.c.l.bf16 %v13_v3  ;;  %v18_v13 = vld [vmem:[%s215_s1 + $0x18] sm:$0x7]  ;;  %v23_v14 = vunpack.c.l.bf16 %v14_v4  ;;  %v24_v15 = vunpack.c.l.bf16 %v15_v5 }
   0x4   :  { %v25_v16 = vunpack.c.l.bf16 %v16_v7  ;;  %v26_v17 = vunpack.c.l.bf16 %v17_v8  ;;  %vm30_vm3 = vmor %vm29_vm1, %vm28_vm0  ;;  %v27_v18 = vunpack.c.l.bf16 %v18_v13  ;;  %v145_v20 = vmov 1983009808  }
   0x5   :  { %vm189_vm4 = vmor %vm31_vm2, %vm30_vm3  ;;  %v53_v21 = vunpack.c.l.s4 %v145_v20  ;;  %v56_v22 = vshrl.u32 %v55_v6, 7  ;;  %v146_v39 = vmov 1966171168  }
   0x6   :  { %v33_v23 = vsel %vm189_vm4, %v19_v9, -inf  ;;  %v34_v24 = vsel %vm189_vm4, %v20_v10, -inf  ;;  %v35_v25 = vsel %vm189_vm4, %v21_v11, -inf  ;;  %v36_v26 = vsel %vm189_vm4, %v22_v12, -inf }
   0x7   :  { %v37_v27 = vsel %vm189_vm4, %v23_v14, -inf  ;;  %v39_v28 = vsel %vm189_vm4, %v24_v15, -inf  ;;  %v41_v29 = vsel %vm189_vm4, %v25_v16, -inf  ;;  %v43_v30 = vsel %vm189_vm4, %v26_v17, -inf }
   0x8   :  { %v38_v31 = vmax.f32 %v33_v23, %v37_v27  ;;  %v40_v32 = vmax.f32 %v34_v24, %v39_v28  ;;  %v42_v33 = vmax.f32 %v35_v25, %v41_v29  ;;  %v44_v34 = vmax.f32 %v36_v26, %v43_v30 }
   0x9   :  { %v45_v35 = vsel %vm189_vm4, %v27_v18, -inf  ;;  %v54_v36 = vunpack.c.0.s8 %v53_v21  ;;  %v78_v40 = vunpack.c.l.s4 %v146_v39 }
   0xa   :  { %v46_v37 = vmax.f32 %v38_v31, %v45_v35  ;;  %v48_v38 = vmax.f32 %v42_v33, %v44_v34 }
   0xb   :  { %v57_v42 = vsub.s32 %v54_v36, %v56_v22  ;;  %v79_v44 = vunpack.c.0.s8 %v78_v40 }
   0xc   :  { %v47_v41 = vmax.f32 %v46_v37, %v40_v32 }
   0xd   :  { %v82_v49 = vsub.s32 %v79_v44, %v56_v22 }
   0xe   :  { %v49_v43 = vmax.f32 %v47_v41, %v48_v38 }
  0x10   :  { %v51_v45 = vcombine.high %v49_v43, %v49_v43  ;;  %v58_v46 = vrot.slane %v49_v43, %v57_v42 }
  0x12   :  { %v65_v47 = vrot.slane %v51_v45, %v57_v42  ;;  %v66_v48 = vcombine.high %v58_v46, %v58_v46 }
  0x14   :  { %v72_v50 = vpack.c.bf16 %v65_v47, %v65_v47  ;;  %v140_v51 = vpack.c.bf16 %v66_v48, %v58_v46 }
  0x16   :  { %v83_v52 = vrot.slane %v140_v51, %v82_v49  ;;  %v90_v53 = vrot.slane %v72_v50, %v82_v49 }
  0x18   :  { %v91_v54 = vcombine.low %v83_v52, %v90_v53 }
  0x1a   :  { %141 = vst.sshfl [vmem:[#allocation2] sm:$0x15 pattern:$0x73625140] %v91_v54 }
  0x21   :  { %v118_v55 = vld [vmem:[#allocation2] sm:$0x7] }
  0x22   :  { %142 = vst [vmem:[%s216_s2 + $0xc] sm:$0x7] %v118_v55 }

// kernel: ninnet_forward.13
= control target key start
LH: loop header
LB: loop body
LE: loop exit
PB: predicated region body
PF: predicated region fallthrough
CT: control target
= control target key end

     0   :  { %vm3665_vm0 = vmmov 0   ;;  %s4525_s1 = inlined_call_operand.vmem [shape: bf16[3456,128], index: 1, kind: input, shape index: {}]   ;;  %s4526_s0 = inlined_call_operand.vmem [shape: bf16[16,3456], index: 0, kind: input, shape index: {}]   ;;  %s4527_s2 = inlined_call_operand.vmem [shape: f32[1,128], index: 2, kind: input, shape index: {}]   ;;  %s4528_s3 = inlined_call_operand.vmem [shape: bf16[128,128], index: 3, kind: input, shape index: {}]   ;;  %s4529_s5 = inlined_call_operand.vmem [shape: bf16[128,128], index: 5, kind: input, shape index: {}]   ;;  %s4530_s4 = inlined_call_operand.vmem [shape: f32[1,128], index: 4, kind: input, shape index: {}]   ;;  %s4531_s6 = inlined_call_operand.vmem [shape: f32[1,128], index: 6, kind: input, shape index: {}]   ;;  %s4532_s7 = inlined_call_operand.vmem [shape: bf16[16,128], index: 7, kind: output, shape index: {}]  }
   0x1   :  { %v3392_v0 = vld [vmem:[%s4525_s1 + $0x40] sm:$0xff]   ;;  %v3396_v4 = vld [vmem:[%s4525_s1 + $0x48] sm:$0xff]   ;;  %v3400_v8 = vld [vmem:[%s4525_s1 + $0x50] sm:$0xff]  }
   0x2   :  { %v3393_v1 = vld [vmem:[%s4525_s1] sm:$0xff]   ;;  %3017 = vmatprep.subr.bf16.mxu0 %v3392_v0  ;;  %v3397_v5 = vld [vmem:[%s4525_s1 + $0x8] sm:$0xff]   ;;  %v3401_v9 = vld [vmem:[%s4525_s1 + $0x10] sm:$0xff]  }
   0x3   :  { %v3394_v2 = vld [vmem:[%s4525_s1 + $0xc0] sm:$0xff]   ;;  %3018 = vmatpush3.bf16.msra.mxu0 %v3393_v1  ;;  %v3398_v6 = vld [vmem:[%s4525_s1 + $0xc8] sm:$0xff]   ;;  %v3402_v10 = vld [vmem:[%s4525_s1 + $0xd0] sm:$0xff]  }
   0x4   :  { %v3395_v3 = vld [vmem:[%s4525_s1 + $0x80] sm:$0xff]   ;;  %3039 = vmatprep.subr.bf16.mxu1 %v3394_v2  ;;  %3019 = vmatprep.subr.bf16.mxu0 %v3396_v4  ;;  %v3399_v7 = vld [vmem:[%s4525_s1 + $0x88] sm:$0xff]   ;;  %v3403_v11 = vld [vmem:[%s4525_s1 + $0x90] sm:$0xff]  }
   0x5   :  { %3040 = vmatpush3.bf16.msra.mxu1 %v3395_v3  ;;  %v3404_v12 = vld [vmem:[%s4525_s1 + $0x58] sm:$0xff]   ;;  %v3408_v16 = vld [vmem:[%s4525_s1 + $0x60] sm:$0xff]   ;;  %v3412_v20 = vld [vmem:[%s4525_s1 + $0x68] sm:$0xff]  }
   0x6   :  { %3041 = vmatprep.subr.bf16.mxu1 %v3398_v6  ;;  %v3405_v13 = vld [vmem:[%s4525_s1 + $0x18] sm:$0xff]   ;;  %v3409_v17 = vld [vmem:[%s4525_s1 + $0x20] sm:$0xff]   ;;  %v3413_v21 = vld [vmem:[%s4525_s1 + $0x28] sm:$0xff]  }
   0x7   :  { %3020 = vmatpush3.bf16.msra.mxu0 %v3397_v5  ;;  %v3406_v14 = vld [vmem:[%s4525_s1 + $0xd8] sm:$0xff]   ;;  %v3410_v18 = vld [vmem:[%s4525_s1 + $0xe0] sm:$0xff]   ;;  %v3414_v22 = vld [vmem:[%s4525_s1 + $0xe8] sm:$0xff]  }
   0x8   :  { %3021 = vmatprep.subr.bf16.mxu0 %v3400_v8  ;;  %v3407_v15 = vld [vmem:[%s4525_s1 + $0x98] sm:$0xff]   ;;  %v3411_v19 = vld [vmem:[%s4525_s1 + $0xa0] sm:$0xff]   ;;  %v3415_v23 = vld [vmem:[%s4525_s1 + $0xa8] sm:$0xff]  }
   0x9   :  { %3042 = vmatpush3.bf16.msra.mxu1 %v3399_v7  ;;  %v3416_v24 = vld [vmem:[%s4525_s1 + $0x70] sm:$0xff]   ;;  %v3420_v28 = vld [vmem:[%s4525_s1 + $0x78] sm:$0xff]   ;;  %v3423_v31 = vld [vmem:[%s4526_s0] ss:$108 sps:$4 sm:$0xff]  }
   0xa   :  { %3043 = vmatprep.subr.bf16.mxu1 %v3402_v10  ;;  %v3417_v25 = vld [vmem:[%s4525_s1 + $0x30] sm:$0xff]   ;;  %v3421_v29 = vld [vmem:[%s4525_s1 + $0x38] sm:$0xff]   ;;  %v3427_v34 = vld [vmem:[%s4525_s1 + $0x140] sm:$0xff]  }
   0xb   :  { %3022 = vmatpush3.bf16.msra.mxu0 %v3401_v9  ;;  %v3418_v26 = vld [vmem:[%s4525_s1 + $0xf0] sm:$0xff]   ;;  %v3422_v30 = vld [vmem:[%s4525_s1 + $0xf8] sm:$0xff]   ;;  %v3431_v37 = vld [vmem:[%s4525_s1 + $0x100] sm:$0xff]  }
   0xc   :  { %3023 = vmatprep.subr.bf16.mxu0 %v3404_v12  ;;  %v3419_v27 = vld [vmem:[%s4525_s1 + $0xb0] sm:$0xff]   ;;  %v3426_v33 = vld [vmem:[%s4525_s1 + $0xb8] sm:$0xff]   ;;  %v3432_v38 = vld [vmem:[%s4525_s1 + $0x1c0] sm:$0xff]  }
   0xd   :  { %3044 = vmatpush3.bf16.msra.mxu1 %v3403_v11  ;;  %v3425_v32 = vld [vmem:[%s4526_s0 + $0x4] ss:$108 sps:$4 sm:$0xff]   ;;  %v3428_v35 = vld [vmem:[%s4526_s0 + $0x8] ss:$108 sps:$4 sm:$0xff]   ;;  %v3430_v36 = vld [vmem:[%s4526_s0 + $0xc] ss:$108 sps:$4 sm:$0xff]  }
   0xe   :  { %3045 = vmatprep.subr.bf16.mxu1 %v3406_v14  ;;  %1958 = vmatprep.mubr.bf16.mxu0 %v3425_v32  ;;  %v3433_v39 = vld [vmem:[%s4525_s1 + $0x180] sm:$0xff]   ;;  %v3434_v40 = vld [vmem:[%s4525_s1 + $0x148] sm:$0xff]   ;;  %v3438_v44 = vld [vmem:[%s4525_s1 + $0x150] sm:$0xff]  }
   0xf   :  { %3024 = vmatpush3.bf16.msra.mxu0 %v3405_v13  ;;  %1999 = vmatprep.mubr.bf16.mxu1 %v3430_v36  ;;  %v3435_v41 = vld [vmem:[%s4525_s1 + $0x108] sm:$0xff]   ;;  %v3439_v45 = vld [vmem:[%s4525_s1 + $0x110] sm:$0xff]   ;;  %v3442_v48 = vld [vmem:[%s4525_s1 + $0x158] sm:$0xff]  }
  0x10   :  { %3025 = vmatprep.subr.bf16.mxu0 %v3408_v16  ;;  %v3436_v42 = vld [vmem:[%s4525_s1 + $0x1c8] sm:$0xff]   ;;  %v3440_v46 = vld [vmem:[%s4525_s1 + $0x1d0] sm:$0xff]   ;;  %v3443_v49 = vld [vmem:[%s4525_s1 + $0x118] sm:$0xff]  }
  0x11   :  { %3046 = vmatpush3.bf16.msra.mxu1 %v3407_v15  ;;  %v3437_v43 = vld [vmem:[%s4525_s1 + $0x188] sm:$0xff]   ;;  %v3441_v47 = vld [vmem:[%s4525_s1 + $0x190] sm:$0xff]   ;;  %v3444_v50 = vld [vmem:[%s4525_s1 + $0x1d8] sm:$0xff]  }
  0x12   :  { %3047 = vmatprep.subr.bf16.mxu1 %v3410_v18  ;;  %v3445_v51 = vld [vmem:[%s4525_s1 + $0x198] sm:$0xff]   ;;  %v3446_v52 = vld [vmem:[%s4525_s1 + $0x160] sm:$0xff]   ;;  %v3450_v56 = vld [vmem:[%s4525_s1 + $0x168] sm:$0xff]  }
  0x13   :  { %3026 = vmatpush3.bf16.msra.mxu0 %v3409_v17  ;;  %v3447_v53 = vld [vmem:[%s4525_s1 + $0x120] sm:$0xff]   ;;  %v3451_v57 = vld [vmem:[%s4525_s1 + $0x128] sm:$0xff]   ;;  %v3454_v60 = vld [vmem:[%s4525_s1 + $0x170] sm:$0xff]  }
  0x14   :  { %3027 = vmatprep.subr.bf16.mxu0 %v3412_v20  ;;  %v3448_v54 = vld [vmem:[%s4525_s1 + $0x1e0] sm:$0xff]   ;;  %v3452_v58 = vld [vmem:[%s4525_s1 + $0x1e8] sm:$0xff]   ;;  %v3455_v61 = vld [vmem:[%s4525_s1 + $0x130] sm:$0xff]  }
  0x15   :  { %3048 = vmatpush3.bf16.msra.mxu1 %v3411_v19  ;;  %v3449_v55 = vld [vmem:[%s4525_s1 + $0x1a0] sm:$0xff]   ;;  %v3453_v59 = vld [vmem:[%s4525_s1 + $0x1a8] sm:$0xff]   ;;  %v3456_v62 = vld [vmem:[%s4525_s1 + $0x1f0] sm:$0xff]  }
  0x16   :  { %3049 = vmatprep.subr.bf16.mxu1 %v3414_v22  ;;  %v3457_v63 = vld [vmem:[%s4525_s1 + $0x1b0] sm:$0xff]   ;;  %v3458_v0 = vld [vmem:[%s4525_s1 + $0x178] sm:$0xff]   ;;  %v3465_v6 = vld [vmem:[%s4525_s1 + $0x240] sm:$0xff]  }
  0x17   :  { %3028 = vmatpush3.bf16.msra.mxu0 %v3413_v21  ;;  %v3459_v1 = vld [vmem:[%s4525_s1 + $0x138] sm:$0xff]   ;;  %v3463_v4 = vld [vmem:[%s4526_s0 + $0x14] ss:$108 sps:$4 sm:$0xff]   ;;  %v3472_v12 = vld [vmem:[%s4525_s1 + $0x248] sm:$0xff]  }
  0x18   :  { %3029 = vmatprep.subr.bf16.mxu0 %v3416_v24  ;;  %v3460_v2 = vld [vmem:[%s4525_s1 + $0x1f8] sm:$0xff]   ;;  %v3469_v9 = vld [vmem:[%s4525_s1 + $0x200] sm:$0xff]   ;;  %v3473_v13 = vld [vmem:[%s4525_s1 + $0x208] sm:$0xff]  }
  0x19   :  { %3050 = vmatpush3.bf16.msra.mxu1 %v3415_v23  ;;  %v3461_v3 = vld [vmem:[%s4526_s0 + $0x10] ss:$108 sps:$4 sm:$0xff]   ;;  %v3466_v7 = vld [vmem:[%s4526_s0 + $0x18] ss:$108 sps:$4 sm:$0xff]   ;;  %v3474_v14 = vld [vmem:[%s4525_s1 + $0x2c8] sm:$0xff]  }
  0x1a   :  { %3051 = vmatprep.subr.bf16.mxu1 %v3418_v26  ;;  %v3464_v5 = vld [vmem:[%s4525_s1 + $0x1b8] sm:$0xff]   ;;  %v3470_v10 = vld [vmem:[%s4525_s1 + $0x2c0] sm:$0xff]   ;;  %v3475_v15 = vld [vmem:[%s4525_s1 + $0x288] sm:$0xff]  }
  0x1b   :  { %3030 = vmatpush3.bf16.msra.mxu0 %v3417_v25  ;;  %v3468_v8 = vld [vmem:[%s4526_s0 + $0x1c] ss:$108 sps:$4 sm:$0xff]   ;;  %v3471_v11 = vld [vmem:[%s4525_s1 + $0x280] sm:$0xff]   ;;  %v3476_v16 = vld [vmem:[%s4525_s1 + $0x250] sm:$0xff]  }
  0x1c   :  { %3031 = vmatprep.subr.bf16.mxu0 %v3420_v28  ;;  %v3477_v17 = vld [vmem:[%s4525_s1 + $0x210] sm:$0xff]   ;;  %v3480_v20 = vld [vmem:[%s4525_s1 + $0x258] sm:$0xff]   ;;  %v3484_v24 = vld [vmem:[%s4525_s1 + $0x260] sm:$0xff]  }
  0x1d   :  { %3052 = vmatpush3.bf16.msra.mxu1 %v3419_v27  ;;  %v3478_v18 = vld [vmem:[%s4525_s1 + $0x2d0] sm:$0xff]   ;;  %v3481_v21 = vld [vmem:[%s4525_s1 + $0x218] sm:$0xff]   ;;  %v3485_v25 = vld [vmem:[%s4525_s1 + $0x220] sm:$0xff]  }
  0x1e   :  { %3053 = vmatprep.subr.bf16.mxu1 %v3422_v30  ;;  %v3479_v19 = vld [vmem:[%s4525_s1 + $0x290] sm:$0xff]   ;;  %v3482_v22 = vld [vmem:[%s4525_s1 + $0x2d8] sm:$0xff]   ;;  %v3486_v26 = vld [vmem:[%s4525_s1 + $0x2e0] sm:$0xff]  }
  0x1f   :  { %3032 = vmatpush3.bf16.msra.mxu0 %v3421_v29  ;;  %v3483_v23 = vld [vmem:[%s4525_s1 + $0x298] sm:$0xff]   ;;  %v3487_v27 = vld [vmem:[%s4525_s1 + $0x2a0] sm:$0xff]   ;;  %v3488_v28 = vld [vmem:[%s4525_s1 + $0x268] sm:$0xff]  }
  0x20   :  { %3061 = vmatprep.subr.bf16.mxu0 %v3427_v34  ;;  %v3489_v29 = vld [vmem:[%s4525_s1 + $0x228] sm:$0xff]   ;;  %v3492_v32 = vld [vmem:[%s4525_s1 + $0x270] sm:$0xff]   ;;  %v3496_v36 = vld [vmem:[%s4525_s1 + $0x278] sm:$0xff]  }
  0x21   :  { %3054 = vmatpush3.bf16.msra.mxu1 %v3426_v33  ;;  %v3490_v30 = vld [vmem:[%s4525_s1 + $0x2e8] sm:$0xff]   ;;  %v3493_v33 = vld [vmem:[%s4525_s1 + $0x230] sm:$0xff]  }
  0x22   :  { %1959 = vmatmul.mubr.bf16.vlgmr.msra.gmra.mrb[0].mxu0 %v3423_v31  ;;  %3083 = vmatprep.subr.bf16.mxu1 %v3432_v38  ;;  %v3491_v31 = vld [vmem:[%s4525_s1 + $0x2a8] sm:$0xff]   ;;  %v3494_v34 = vld [vmem:[%s4525_s1 + $0x2f0] sm:$0xff]   ;;  %v3498_v38 = vld [vmem:[%s4525_s1 + $0x2f8] sm:$0xff]  }
  0x23   :  { %3062 = vmatpush3.bf16.msra.mxu0 %v3431_v37  ;;  %2040 = vmatprep.mubr.bf16.mxu0 %v3463_v4  ;;  %v3497_v37 = vld [vmem:[%s4525_s1 + $0x238] sm:$0xff]   ;;  %v3530_v4 = vld [vmem:[%s4525_s1 + $0x370] sm:$0xff]  }
  0x24   :  { %2000 = vmatmul.mubr.bf16.vlgmr.msra.gmra.mrb[0].mxu1 %v3428_v35  ;;  %3063 = vmatprep.subr.bf16.mxu0 %v3434_v40  ;;  %v3495_v35 = vld [vmem:[%s4525_s1 + $0x2b0] sm:$0xff]  }
  0x25   :  { %3084 = vmatpush3.bf16.msra.mxu1 %v3433_v39  ;;  %2081 = vmatprep.mubr.bf16.mxu1 %v3468_v8  ;;  %v3499_v39 = vld [vmem:[%s4526_s0 + $0x20] ss:$108 sps:$4 sm:$0xff]   ;;  %v3501_v40 = vld [vmem:[%s4526_s0 + $0x24] ss:$108 sps:$4 sm:$0xff]   ;;  %v3534_v8 = vld [vmem:[%s4525_s1 + $0x378] sm:$0xff]  }
  0x26   :  { %3085 = vmatprep.subr.bf16.mxu1 %v3436_v42  ;;  %v3503_v42 = vld [vmem:[%s4525_s1 + $0x340] sm:$0xff]  }
  0x27   :  { %3064 = vmatpush3.bf16.msra.mxu0 %v3435_v41  ;;  %v3502_v41 = vld [vmem:[%s4525_s1 + $0x2b8] sm:$0xff]  }
  0x28   :  { %3065 = vmatprep.subr.bf16.mxu0 %v3438_v44  ;;  %v3506_v44 = vld [vmem:[%s4526_s0 + $0x2c] ss:$108 sps:$4 sm:$0xff]  }
  0x29   :  { %3086 = vmatpush3.bf16.msra.mxu1 %v3437_v43  ;;  %v3504_v43 = vld [vmem:[%s4526_s0 + $0x28] ss:$108 sps:$4 sm:$0xff]  }
  0x2a   :  { %3087 = vmatprep.subr.bf16.mxu1 %v3440_v46  ;;  %v3508_v46 = vld [vmem:[%s4525_s1 + $0x3c0] sm:$0xff]  }
  0x2b   :  { %3066 = vmatpush3.bf16.msra.mxu0 %v3439_v45  ;;  %v3507_v45 = vld [vmem:[%s4525_s1 + $0x300] sm:$0xff]  }
  0x2c   :  { %3067 = vmatprep.subr.bf16.mxu0 %v3442_v48  ;;  %v3510_v48 = vld [vmem:[%s4525_s1 + $0x348] sm:$0xff]  }
  0x2d   :  { %3088 = vmatpush3.bf16.msra.mxu1 %v3441_v47  ;;  %v3509_v47 = vld [vmem:[%s4525_s1 + $0x380] sm:$0xff]  }
  0x2e   :  { %3089 = vmatprep.subr.bf16.mxu1 %v3444_v50  ;;  %v3512_v50 = vld [vmem:[%s4525_s1 + $0x3c8] sm:$0xff]  }
  0x2f   :  { %3068 = vmatpush3.bf16.msra.mxu0 %v3443_v49  ;;  %v3511_v49 = vld [vmem:[%s4525_s1 + $0x308] sm:$0xff]  }
  0x30   :  { %3069 = vmatprep.subr.bf16.mxu0 %v3446_v52  ;;  %v3514_v52 = vld [vmem:[%s4525_s1 + $0x350] sm:$0xff]  }
  0x31   :  { %3090 = vmatpush3.bf16.msra.mxu1 %v3445_v51  ;;  %v3513_v51 = vld [vmem:[%s4525_s1 + $0x388] sm:$0xff]  }
  0x32   :  { %3091 = vmatprep.subr.bf16.mxu1 %v3448_v54  ;;  %v3516_v54 = vld [vmem:[%s4525_s1 + $0x3d0] sm:$0xff]  }
  0x33   :  { %3070 = vmatpush3.bf16.msra.mxu0 %v3447_v53  ;;  %v3515_v53 = vld [vmem:[%s4525_s1 + $0x310] sm:$0xff]  }
  0x34   :  { %3071 = vmatprep.subr.bf16.mxu0 %v3450_v56  ;;  %v3518_v56 = vld [vmem:[%s4525_s1 + $0x358] sm:$0xff]  }
  0x35   :  { %3092 = vmatpush3.bf16.msra.mxu1 %v3449_v55  ;;  %v3517_v55 = vld [vmem:[%s4525_s1 + $0x390] sm:$0xff]  }
  0x36   :  { %3093 = vmatprep.subr.bf16.mxu1 %v3452_v58  ;;  %v3520_v58 = vld [vmem:[%s4525_s1 + $0x3d8] sm:$0xff]  }
  0x37   :  { %3072 = vmatpush3.bf16.msra.mxu0 %v3451_v57  ;;  %v3519_v57 = vld [vmem:[%s4525_s1 + $0x318] sm:$0xff]  }
  0x38   :  { %3073 = vmatprep.subr.bf16.mxu0 %v3454_v60  ;;  %v3522_v60 = vld [vmem:[%s4525_s1 + $0x360] sm:$0xff]  }
  0x39   :  { %3094 = vmatpush3.bf16.msra.mxu1 %v3453_v59  ;;  %v3521_v59 = vld [vmem:[%s4525_s1 + $0x398] sm:$0xff]  }
  0x3a   :  { %3095 = vmatprep.subr.bf16.mxu1 %v3456_v62  ;;  %v3524_v62 = vld [vmem:[%s4525_s1 + $0x3e0] sm:$0xff]  }
  0x3b   :  { %3074 = vmatpush3.bf16.msra.mxu0 %v3455_v61  ;;  %v3523_v61 = vld [vmem:[%s4525_s1 + $0x320] sm:$0xff]  }
  0x3c   :  { %3075 = vmatprep.subr.bf16.mxu0 %v3458_v0  ;;  %v3526_v0 = vld [vmem:[%s4525_s1 + $0x368] sm:$0xff]  }
  0x3d   :  { %3096 = vmatpush3.bf16.msra.mxu1 %v3457_v63  ;;  %v3525_v63 = vld [vmem:[%s4525_s1 + $0x3a0] sm:$0xff]  }
  0x3e   :  { %3097 = vmatprep.subr.bf16.mxu1 %v3460_v2  ;;  %v3528_v2 = vld [vmem:[%s4525_s1 + $0x3e8] sm:$0xff]  }
  0x3f   :  { %3076 = vmatpush3.bf16.msra.mxu0 %v3459_v1  ;;  %v3527_v1 = vld [vmem:[%s4525_s1 + $0x328] sm:$0xff]  }
  0x40   :  { %3105 = vmatprep.subr.bf16.mxu0 %v3465_v6  ;;  %v3532_v6 = vld [vmem:[%s4525_s1 + $0x3f0] sm:$0xff]  }
  0x41   :  { %3098 = vmatpush3.bf16.msra.mxu1 %v3464_v5  ;;  %v3531_v5 = vld [vmem:[%s4525_s1 + $0x330] sm:$0xff]  }
  0x42   :  { %2041 = vmatmul.mubr.bf16.vlgmr.msra.gmra.mrb[4].mxu0 %v3461_v3  ;;  %3127 = vmatprep.subr.bf16.mxu1 %v3470_v10  ;;  %v3529_v3 = vld [vmem:[%s4525_s1 + $0x3a8] sm:$0xff]   ;;  %v3536_v10 = vld [vmem:[%s4525_s1 + $0x3f8] sm:$0xff]  }
  0x43   :  { %3106 = vmatpush3.bf16.msra.mxu0 %v3469_v9  ;;  %2122 = vmatprep.mubr.bf16.mxu0 %v3501_v40  ;;  %v3535_v9 = vld [vmem:[%s4525_s1 + $0x338] sm:$0xff]   ;;  %v3568_v40 = vld [vmem:[%s4525_s1 + $0x470] sm:$0xff]  }
  0x44   :  { %2082 = vmatmul.mubr.bf16.vlgmr.msra.gmra.mrb[4].mxu1 %v3466_v7  ;;  %3107 = vmatprep.subr.bf16.mxu0 %v3472_v12  ;;  %v3533_v7 = vld [vmem:[%s4525_s1 + $0x3b0] sm:$0xff]  }
  0x45   :  { %3128 = vmatpush3.bf16.msra.mxu1 %v3471_v11  ;;  %2163 = vmatprep.mubr.bf16.mxu1 %v3506_v44  ;;  %v3537_v11 = vld [vmem:[%s4526_s0 + $0x30] ss:$108 sps:$4 sm:$0xff]   ;;  %v3539_v12 = vld [vmem:[%s4526_s0 + $0x34] ss:$108 sps:$4 sm:$0xff]  }
  0x46   :  { %3129 = vmatprep.subr.bf16.mxu1 %v3474_v14  ;;  %v3541_v14 = vld [vmem:[%s4525_s1 + $0x440] sm:$0xff]   ;;  %v3572_v44 = vld [vmem:[%s4525_s1 + $0x478] sm:$0xff]  }
  0x47   :  { %3108 = vmatpush3.bf16.msra.mxu0 %v3473_v13  ;;  %v3540_v13 = vld [vmem:[%s4525_s1 + $0x3b8] sm:$0xff]  }
  0x48   :  { %3109 = vmatprep.subr.bf16.mxu0 %v3476_v16  ;;  %v3544_v16 = vld [vmem:[%s4526_s0 + $0x3c] ss:$108 sps:$4 sm:$0xff]  }
  0x49   :  { %3130 = vmatpush3.bf16.msra.mxu1 %v3475_v15  ;;  %v3542_v15 = vld [vmem:[%s4526_s0 + $0x38] ss:$108 sps:$4 sm:$0xff]  }
  0x4a   :  { %3131 = vmatprep.subr.bf16.mxu1 %v3478_v18  ;;  %v3546_v18 = vld [vmem:[%s4525_s1 + $0x4c0] sm:$0xff]  }
  0x4b   :  { %3110 = vmatpush3.bf16.msra.mxu0 %v3477_v17  ;;  %v3545_v17 = vld [vmem:[%s4525_s1 + $0x400] sm:$0xff]  }
  0x4c   :  { %3111 = vmatprep.subr.bf16.mxu0 %v3480_v20  ;;  %v3548_v20 = vld [vmem:[%s4525_s1 + $0x448] sm:$0xff]  }
  0x4d   :  { %3132 = vmatpush3.bf16.msra.mxu1 %v3479_v19  ;;  %v3547_v19 = vld [vmem:[%s4525_s1 + $0x480] sm:$0xff]  }
  0x4e   :  { %3133 = vmatprep.subr.bf16.mxu1 %v3482_v22  ;;  %v3550_v22 = vld [vmem:[%s4525_s1 + $0x4c8] sm:$0xff]  }
  0x4f   :  { %3112 = vmatpush3.bf16.msra.mxu0 %v3481_v21  ;;  %v3549_v21 = vld [vmem:[%s4525_s1 + $0x408] sm:$0xff]  }
  0x50   :  { %3113 = vmatprep.subr.bf16.mxu0 %v3484_v24  ;;  %v3552_v24 = vld [vmem:[%s4525_s1 + $0x450] sm:$0xff]  }
  0x51   :  { %3134 = vmatpush3.bf16.msra.mxu1 %v3483_v23  ;;  %v3551_v23 = vld [vmem:[%s4525_s1 + $0x488] sm:$0xff]  }
  0x52   :  { %3135 = vmatprep.subr.bf16.mxu1 %v3486_v26  ;;  %v3554_v26 = vld [vmem:[%s4525_s1 + $0x4d0] sm:$0xff]  }
  0x53   :  { %3114 = vmatpush3.bf16.msra.mxu0 %v3485_v25  ;;  %v3553_v25 = vld [vmem:[%s4525_s1 + $0x410] sm:$0xff]  }
  0x54   :  { %3115 = vmatprep.subr.bf16.mxu0 %v3488_v28  ;;  %v3556_v28 = vld [vmem:[%s4525_s1 + $0x458] sm:$0xff]  }
  0x55   :  { %3136 = vmatpush3.bf16.msra.mxu1 %v3487_v27  ;;  %v3555_v27 = vld [vmem:[%s4525_s1 + $0x490] sm:$0xff]  }
  0x56   :  { %3137 = vmatprep.subr.bf16.mxu1 %v3490_v30  ;;  %v3558_v30 = vld [vmem:[%s4525_s1 + $0x4d8] sm:$0xff]  }
  0x57   :  { %3116 = vmatpush3.bf16.msra.mxu0 %v3489_v29  ;;  %v3557_v29 = vld [vmem:[%s4525_s1 + $0x418] sm:$0xff]  }
  0x58   :  { %3117 = vmatprep.subr.bf16.mxu0 %v3492_v32  ;;  %v3560_v32 = vld [vmem:[%s4525_s1 + $0x460] sm:$0xff]  }
  0x59   :  { %3138 = vmatpush3.bf16.msra.mxu1 %v3491_v31  ;;  %v3559_v31 = vld [vmem:[%s4525_s1 + $0x498] sm:$0xff]  }
  0x5a   :  { %3139 = vmatprep.subr.bf16.mxu1 %v3494_v34  ;;  %v3562_v34 = vld [vmem:[%s4525_s1 + $0x4e0] sm:$0xff]  }
  0x5b   :  { %3118 = vmatpush3.bf16.msra.mxu0 %v3493_v33  ;;  %v3561_v33 = vld [vmem:[%s4525_s1 + $0x420] sm:$0xff]  }
  0x5c   :  { %3119 = vmatprep.subr.bf16.mxu0 %v3496_v36  ;;  %v3564_v36 = vld [vmem:[%s4525_s1 + $0x468] sm:$0xff]  }
  0x5d   :  { %3140 = vmatpush3.bf16.msra.mxu1 %v3495_v35  ;;  %v3563_v35 = vld [vmem:[%s4525_s1 + $0x4a0] sm:$0xff]  }
  0x5e   :  { %3141 = vmatprep.subr.bf16.mxu1 %v3498_v38  ;;  %v3566_v38 = vld [vmem:[%s4525_s1 + $0x4e8] sm:$0xff]  }
  0x5f   :  { %3120 = vmatpush3.bf16.msra.mxu0 %v3497_v37  ;;  %v3565_v37 = vld [vmem:[%s4525_s1 + $0x428] sm:$0xff]  }
  0x60   :  { %3149 = vmatprep.subr.bf16.mxu0 %v3503_v42  ;;  %v3570_v42 = vld [vmem:[%s4525_s1 + $0x4f0] sm:$0xff]  }
  0x61   :  { %3142 = vmatpush3.bf16.msra.mxu1 %v3502_v41  ;;  %v3569_v41 = vld [vmem:[%s4525_s1 + $0x430] sm:$0xff]  }
  0x62   :  { %2123 = vmatmul.mubr.bf16.vlgmr.msra.gmra.mrb[8].mxu0 %v3499_v39  ;;  %3171 = vmatprep.subr.bf16.mxu1 %v3508_v46  ;;  %v3567_v39 = vld [vmem:[%s4525_s1 + $0x4a8] sm:$0xff]   ;;  %v3574_v46 = vld [vmem:[%s4525_s1 + $0x4f8] sm:$0xff]  }
  0x63   :  { %3150 = vmatpush3.bf16.msra.mxu0 %v3507_v45  ;;  %2204 = vmatprep.mubr.bf16.mxu0 %v3539_v12  ;;  %v3573_v45 = vld [vmem:[%s4525_s1 + $0x438] sm:$0xff]   ;;  %v3606_v12 = vld [vmem:[%s4525_s1 + $0x570] sm:$0xff]  }
  0x64   :  { %2164 = vmatmul.mubr.bf16.vlgmr.msra.gmra.mrb[8].mxu1 %v3504_v43  ;;  %3151 = vmatprep.subr.bf16.mxu0 %v3510_v48  ;;  %v3571_v43 = vld [vmem:[%s4525_s1 + $0x4b0] sm:$0xff]  }
  0x65   :  { %3172 = vmatpush3.bf16.msra.mxu1 %v3509_v47  ;;  %2245 = vmatprep.mubr.bf16.mxu1 %v3544_v16  ;;  %v3575_v47 = vld [vmem:[%s4526_s0 + $0x40] ss:$108 sps:$4 sm:$0xff]   ;;  %v3577_v48 = vld [vmem:[%s4526_s0 + $0x44] ss:$108 sps:$4 sm:$0xff]   ;;  %v3610_v16 = vld [vmem:[%s4525_s1 + $0x578] sm:$0xff]  }
  0x66   :  { %3173 = vmatprep.subr.bf16.mxu1 %v3512_v50  ;;  %v3579_v50 = vld [vmem:[%s4525_s1 + $0x540] sm:$0xff]  }
  0x67   :  { %3152 = vmatpush3.bf16.msra.mxu0 %v3511_v49  ;;  %v3578_v49 = vld [vmem:[%s4525_s1 + $0x4b8] sm:$0xff]  }
  0x68   :  { %3153 = vmatprep.subr.bf16.mxu0 %v3514_v52  ;;  %v3582_v52 = vld [vmem:[%s4526_s0 + $0x4c] ss:$108 sps:$4 sm:$0xff]  }
  0x69   :  { %3174 = vmatpush3.bf16.msra.mxu1 %v3513_v51  ;;  %v3580_v51 = vld [vmem:[%s4526_s0 + $0x48] ss:$108 sps:$4 sm:$0xff]  }
  0x6a   :  { %3175 = vmatprep.subr.bf16.mxu1 %v3516_v54  ;;  %v3584_v54 = vld [vmem:[%s4525_s1 + $0x5c0] sm:$0xff]  }
  0x6b   :  { %3154 = vmatpush3.bf16.msra.mxu0 %v3515_v53  ;;  %v3583_v53 = vld [vmem:[%s4525_s1 + $0x500] sm:$0xff]  }
  0x6c   :  { %3155 = vmatprep.subr.bf16.mxu0 %v3518_v56  ;;  %v3586_v56 = vld [vmem:[%s4525_s1 + $0x548] sm:$0xff]  }
  0x6d   :  { %3176 = vmatpush3.bf16.msra.mxu1 %v3517_v55  ;;  %v3585_v55 = vld [vmem:[%s4525_s1 + $0x580] sm:$0xff]  }
  0x6e   :  { %3177 = vmatprep.subr.bf16.mxu1 %v3520_v58  ;;  %v3588_v58 = vld [vmem:[%s4525_s1 + $0x5c8] sm:$0xff]  }
  0x6f   :  { %3156 = vmatpush3.bf16.msra.mxu0 %v3519_v57  ;;  %v3587_v57 = vld [vmem:[%s4525_s1 + $0x508] sm:$0xff]  }
  0x70   :  { %3157 = vmatprep.subr.bf16.mxu0 %v3522_v60  ;;  %v3590_v60 = vld [vmem:[%s4525_s1 + $0x550] sm:$0xff]  }
  0x71   :  { %3178 = vmatpush3.bf16.msra.mxu1 %v3521_v59  ;;  %v3589_v59 = vld [vmem:[%s4525_s1 + $0x588] sm:$0xff]  }
  0x72   :  { %3179 = vmatprep.subr.bf16.mxu1 %v3524_v62  ;;  %v3592_v62 = vld [vmem:[%s4525_s1 + $0x5d0] sm:$0xff]  }
  0x73   :  { %3158 = vmatpush3.bf16.msra.mxu0 %v3523_v61  ;;  %v3591_v61 = vld [vmem:[%s4525_s1 + $0x510] sm:$0xff]  }
  0x74   :  { %3159 = vmatprep.subr.bf16.mxu0 %v3526_v0  ;;  %v3594_v0 = vld [vmem:[%s4525_s1 + $0x558] sm:$0xff]  }
  0x75   :  { %3180 = vmatpush3.bf16.msra.mxu1 %v3525_v63  ;;  %v3593_v63 = vld [vmem:[%s4525_s1 + $0x590] sm:$0xff]  }
  0x76   :  { %3181 = vmatprep.subr.bf16.mxu1 %v3528_v2  ;;  %v3596_v2 = vld [vmem:[%s4525_s1 + $0x5d8] sm:$0xff]  }
  0x77   :  { %3160 = vmatpush3.bf16.msra.mxu0 %v3527_v1  ;;  %v3595_v1 = vld [vmem:[%s4525_s1 + $0x518] sm:$0xff]  }
  0x78   :  { %3161 = vmatprep.subr.bf16.mxu0 %v3530_v4  ;;  %v3598_v4 = vld [vmem:[%s4525_s1 + $0x560] sm:$0xff]  }
  0x79   :  { %3182 = vmatpush3.bf16.msra.mxu1 %v3529_v3  ;;  %v3597_v3 = vld [vmem:[%s4525_s1 + $0x598] sm:$0xff]  }
  0x7a   :  { %3183 = vmatprep.subr.bf16.mxu1 %v3532_v6  ;;  %v3600_v6 = vld [vmem:[%s4525_s1 + $0x5e0] sm:$0xff]  }
  0x7b   :  { %3162 = vmatpush3.bf16.msra.mxu0 %v3531_v5  ;;  %v3599_v5 = vld [vmem:[%s4525_s1 + $0x520] sm:$0xff]  }
  0x7c   :  { %3163 = vmatprep.subr.bf16.mxu0 %v3534_v8  ;;  %v3602_v8 = vld [vmem:[%s4525_s1 + $0x568] sm:$0xff]  }
  0x7d   :  { %3184 = vmatpush3.bf16.msra.mxu1 %v3533_v7  ;;  %v3601_v7 = vld [vmem:[%s4525_s1 + $0x5a0] sm:$0xff]  }
  0x7e   :  { %3185 = vmatprep.subr.bf16.mxu1 %v3536_v10  ;;  %v3604_v10 = vld [vmem:[%s4525_s1 + $0x5e8] sm:$0xff]  }
  0x7f   :  { %3164 = vmatpush3.bf16.msra.mxu0 %v3535_v9  ;;  %v3603_v9 = vld [vmem:[%s4525_s1 + $0x528] sm:$0xff]  }
  0x80   :  { %3193 = vmatprep.subr.bf16.mxu0 %v3541_v14  ;;  %v3608_v14 = vld [vmem:[%s4525_s1 + $0x5f0] sm:$0xff]  }
  0x81   :  { %3186 = vmatpush3.bf16.msra.mxu1 %v3540_v13  ;;  %v3607_v13 = vld [vmem:[%s4525_s1 + $0x530] sm:$0xff]  }
  0x82   :  { %2205 = vmatmul.mubr.bf16.vlgmr.msra.gmra.mrb[12].mxu0 %v3537_v11  ;;  %3215 = vmatprep.subr.bf16.mxu1 %v3546_v18  ;;  %v3605_v11 = vld [vmem:[%s4525_s1 + $0x5a8] sm:$0xff]   ;;  %v3612_v18 = vld [vmem:[%s4525_s1 + $0x5f8] sm:$0xff]  }
  0x83   :  { %3194 = vmatpush3.bf16.msra.mxu0 %v3545_v17  ;;  %2286 = vmatprep.mubr.bf16.mxu0 %v3577_v48  ;;  %v3611_v17 = vld [vmem:[%s4525_s1 + $0x538] sm:$0xff]  }
  0x84   :  { %2246 = vmatmul.mubr.bf16.vlgmr.msra.gmra.mrb[12].mxu1 %v3542_v15  ;;  %3195 = vmatprep.subr.bf16.mxu0 %v3548_v20  ;;  %v3609_v15 = vld [vmem:[%s4525_s1 + $0x5b0] sm:$0xff]   ;;  %v3642_v48 = vld [vmem:[%s4525_s1 + $0x638] sm:$0xff]  }
  0x85   :  { %3216 = vmatpush3.bf16.msra.mxu1 %v3547_v19  ;;  %2327 = vmatprep.mubr.bf16.mxu1 %v3582_v52  ;;  %v3613_v19 = vld [vmem:[%s4526_s0 + $0x50] ss:$108 sps:$4 sm:$0xff]   ;;  %v3615_v20 = vld [vmem:[%s4526_s0 + $0x54] ss:$108 sps:$4 sm:$0xff]  }
  0x86   :  { %3217 = vmatprep.subr.bf16.mxu1 %v3550_v22  ;;  %v3617_v22 = vld [vmem:[%s4525_s1 + $0x640] sm:$0xff]  }
  0x87   :  { %3196 = vmatpush3.bf16.msra.mxu0 %v3549_v21  ;;  %v3616_v21 = vld [vmem:[%s4525_s1 + $0x5b8] sm:$0xff]  }
  0x88   :  { %3197 = vmatprep.subr.bf16.mxu0 %v3552_v24  ;;  %v3620_v24 = vld [vmem:[%s4526_s0 + $0x5c] ss:$108 sps:$4 sm:$0xff]  }
  0x89   :  { %3218 = vmatpush3.bf16.msra.mxu1 %v3551_v23  ;;  %v3618_v23 = vld [vmem:[%s4526_s0 + $0x58] ss:$108 sps:$4 sm:$0xff]  }
  0x8a   :  { %3219 = vmatprep.subr.bf16.mxu1 %v3554_v26  ;;  %v3664_v26 = vmov 0.0  }
  0x8b   :  { %3198 = vmatpush3.bf16.msra.mxu0 %v3553_v25  ;;  %v3621_v25 = vld [vmem:[%s4525_s1 + $0x600] sm:$0xff]  }
  0x8c   :  { %3199 = vmatprep.subr.bf16.mxu0 %v3556_v28  ;;  %v3623_v28 = vld [vmem:[%s4525_s1 + $0x648] sm:$0xff]  }
  0x8d   :  { %3220 = vmatpush3.bf16.msra.mxu1 %v3555_v27  ;;  %v3622_v27 = vld [vmem:[%s4525_s1 + $0x680] sm:$0xff]  }
  0x8e   :  { %3221 = vmatprep.subr.bf16.mxu1 %v3558_v30  ;;  %v3625_v30 = vld [vmem:[%s4525_s1 + $0x688] sm:$0xff]  }
  0x8f   :  { %3200 = vmatpush3.bf16.msra.mxu0 %v3557_v29  ;;  %v3624_v29 = vld [vmem:[%s4525_s1 + $0x608] sm:$0xff]  }
  0x90   :  { %3201 = vmatprep.subr.bf16.mxu0 %v3560_v32  ;;  %v3627_v32 = vld [vmem:[%s4525_s1 + $0x610] sm:$0xff]  }
  0x91   :  { %3222 = vmatpush3.bf16.msra.mxu1 %v3559_v31  ;;  %v3626_v31 = vld [vmem:[%s4525_s1 + $0x650] sm:$0xff]  }
  0x92   :  { %3223 = vmatprep.subr.bf16.mxu1 %v3562_v34  ;;  %v3629_v34 = vld [vmem:[%s4525_s1 + $0x658] sm:$0xff]  }
  0x93   :  { %3202 = vmatpush3.bf16.msra.mxu0 %v3561_v33  ;;  %v3628_v33 = vld [vmem:[%s4525_s1 + $0x690] sm:$0xff]  }
  0x94   :  { %3203 = vmatprep.subr.bf16.mxu0 %v3564_v36  ;;  %v3631_v36 = vld [vmem:[%s4525_s1 + $0x698] sm:$0xff]  }
  0x95   :  { %3224 = vmatpush3.bf16.msra.mxu1 %v3563_v35  ;;  %v3630_v35 = vld [vmem:[%s4525_s1 + $0x618] sm:$0xff]  }
  0x96   :  { %3225 = vmatprep.subr.bf16.mxu1 %v3566_v38  ;;  %v3633_v38 = vld [vmem:[%s4525_s1 + $0x620] sm:$0xff]  }
  0x97   :  { %3204 = vmatpush3.bf16.msra.mxu0 %v3565_v37  ;;  %v3632_v37 = vld [vmem:[%s4525_s1 + $0x660] sm:$0xff]  }
  0x98   :  { %3205 = vmatprep.subr.bf16.mxu0 %v3568_v40  ;;  %v3635_v40 = vld [vmem:[%s4525_s1 + $0x668] sm:$0xff]  }
  0x99   :  { %3226 = vmatpush3.bf16.msra.mxu1 %v3567_v39  ;;  %v3634_v39 = vld [vmem:[%s4525_s1 + $0x6a0] sm:$0xff]  }
  0x9a   :  { %3227 = vmatprep.subr.bf16.mxu1 %v3570_v42  ;;  %v3637_v42 = vld [vmem:[%s4525_s1 + $0x6a8] sm:$0xff]  }
  0x9b   :  { %3206 = vmatpush3.bf16.msra.mxu0 %v3569_v41  ;;  %v3636_v41 = vld [vmem:[%s4525_s1 + $0x628] sm:$0xff]  }
  0x9c   :  { %3207 = vmatprep.subr.bf16.mxu0 %v3572_v44  ;;  %v3639_v44 = vld [vmem:[%s4525_s1 + $0x630] sm:$0xff]  }
  0x9d   :  { %3228 = vmatpush3.bf16.msra.mxu1 %v3571_v43  ;;  %v3638_v43 = vld [vmem:[%s4525_s1 + $0x670] sm:$0xff]  }
  0x9e   :  { %3229 = vmatprep.subr.bf16.mxu1 %v3574_v46  ;;  %v3641_v46 = vld [vmem:[%s4525_s1 + $0x678] sm:$0xff]  }
  0x9f   :  { %3208 = vmatpush3.bf16.msra.mxu0 %v3573_v45  ;;  %v3640_v45 = vld [vmem:[%s4525_s1 + $0x6b0] sm:$0xff]  }
  0xa0   :  { %3237 = vmatprep.subr.bf16.mxu0 %v3579_v50  ;;  %v3643_v50 = vld [vmem:[%s4526_s0 + $0x60] ss:$108 sps:$4 sm:$0xff]  }
  0xa1   :  { %3230 = vmatpush3.bf16.msra.mxu1 %v3578_v49  ;;  %v3646_v49 = vld [vmem:[%s4525_s1 + $0x6b8] sm:$0xff]  }
  0xa2   :  { %2287 = vmatmul.mubr.bf16.vlgmr.msra.gmra.mrb[16].mxu0 %v3575_v47  ;;  %3259 = vmatprep.subr.bf16.mxu1 %v3584_v54  ;;  %v3645_v47 = vld [vmem:[%s4526_s0 + $0x64] ss:$108 sps:$4 sm:$0xff]  }
  0xa3   :  { %3238 = vmatpush3.bf16.msra.mxu0 %v3583_v53  ;;  %2368 = vmatprep.mubr.bf16.mxu0 %v3615_v20  ;;  %v2746_v53 = vld [vmem:[%s4527_s2] ss:$0 sm:$0xff] }
  0xa4   :  { %2328 = vmatmul.mubr.bf16.vlgmr.msra.gmra.mrb[16].mxu1 %v3580_v51  ;;  %3239 = vmatprep.subr.bf16.mxu0 %v3586_v56  ;;  %v3647_v51 = vld [vmem:[%s4526_s0 + $0x68] ss:$108 sps:$4 sm:$0xff]  }
  0xa5   :  { %3260 = vmatpush3.bf16.msra.mxu1 %v3585_v55  ;;  %2409 = vmatprep.mubr.bf16.mxu1 %v3620_v24  ;;  %v3651_v24 = vld [vmem:[%s4528_s3 + $0x18] sm:$0xff]  }
  0xa6   :  { %3261 = vmatprep.subr.bf16.mxu1 %v3588_v58 }
  0xa7   :  { %3240 = vmatpush3.bf16.msra.mxu0 %v3587_v57 }
  0xa8   :  { %3241 = vmatprep.subr.bf16.mxu0 %v3590_v60 }
  0xa9   :  { %3262 = vmatpush3.bf16.msra.mxu1 %v3589_v59 }
  0xaa   :  { %3263 = vmatprep.subr.bf16.mxu1 %v3592_v62 }
  0xab   :  { %3242 = vmatpush3.bf16.msra.mxu0 %v3591_v61 }
  0xac   :  { %3243 = vmatprep.subr.bf16.mxu0 %v3594_v0 }
  0xad   :  { %3264 = vmatpush3.bf16.msra.mxu1 %v3593_v63 }
  0xae   :  { %3265 = vmatprep.subr.bf16.mxu1 %v3596_v2 }
  0xaf   :  { %3244 = vmatpush3.bf16.msra.mxu0 %v3595_v1 }
  0xb0   :  { %3245 = vmatprep.subr.bf16.mxu0 %v3598_v4 }
  0xb1   :  { %3266 = vmatpush3.bf16.msra.mxu1 %v3597_v3 }
  0xb2   :  { %3267 = vmatprep.subr.bf16.mxu1 %v3600_v6 }
  0xb3   :  { %3246 = vmatpush3.bf16.msra.mxu0 %v3599_v5 }
  0xb4   :  { %3247 = vmatprep.subr.bf16.mxu0 %v3602_v8 }
  0xb5   :  { %3268 = vmatpush3.bf16.msra.mxu1 %v3601_v7 }
  0xb6   :  { %3269 = vmatprep.subr.bf16.mxu1 %v3604_v10 }
  0xb7   :  { %3248 = vmatpush3.bf16.msra.mxu0 %v3603_v9 }
  0xb8   :  { %3249 = vmatprep.subr.bf16.mxu0 %v3606_v12 }
  0xb9   :  { %3270 = vmatpush3.bf16.msra.mxu1 %v3605_v11 }
  0xba   :  { %3271 = vmatprep.subr.bf16.mxu1 %v3608_v14 }
  0xbb   :  { %3250 = vmatpush3.bf16.msra.mxu0 %v3607_v13 }
  0xbc   :  { %3251 = vmatprep.subr.bf16.mxu0 %v3610_v16 }
  0xbd   :  { %3272 = vmatpush3.bf16.msra.mxu1 %v3609_v15 }
  0xbe   :  { %3273 = vmatprep.subr.bf16.mxu1 %v3612_v18 }
  0xbf   :  { %3252 = vmatpush3.bf16.msra.mxu0 %v3611_v17 }
  0xc0   :  { %3281 = vmatprep.subr.bf16.mxu0 %v3617_v22  ;;  %v3649_v22 = vld [vmem:[%s4528_s3 + $0x8] sm:$0xff]  }
  0xc1   :  { %3274 = vmatpush3.bf16.msra.mxu1 %v3616_v21  ;;  %v3648_v21 = vld [vmem:[%s4528_s3] sm:$0xff]  }
  0xc2   :  { %2369 = vmatmul.mubr.bf16.vlgmr.msra.gmra.mrb[20].mxu0 %v3613_v19  ;;  %3330 = vmatprep.subr.bf16.mxu1 %v3664_v26 }
  0xc3   :  { %3282 = vmatpush3.bf16.msra.mxu0 %v3621_v25  ;;  %2450 = vmatprep.mubr.bf16.mxu0 %v3645_v47  ;;  %v3657_v47 = vld [vmem:[%s4529_s5 + $0x8] sm:$0xff]  }
  0xc4   :  { %2410 = vmatmul.mubr.bf16.vlgmr.msra.gmra.mrb[20].mxu1 %v3618_v23  ;;  %3283 = vmatprep.subr.bf16.mxu0 %v3623_v28  ;;  %v3650_v23 = vld [vmem:[%s4528_s3 + $0x10] sm:$0xff]  }
  0xc5   :  { %3331 = vmatpush3.bf16.msra.mxu1 %v3622_v27  ;;  %3346 = vmatprep.mubr.msk.bf16.mxu1 %vm3665_vm0, %v3664_v26  ;;  %v3652_v27 = vld [vmem:[%s4528_s3 + $0x20] sm:$0xff]  }
  0xc6   :  { %3332 = vmatprep.subr.bf16.mxu1 %v3664_v26 }
  0xc7   :  { %3284 = vmatpush3.bf16.msra.mxu0 %v3624_v29 }
  0xc8   :  { %3285 = vmatprep.subr.bf16.mxu0 %v3626_v31 }
  0xc9   :  { %3333 = vmatpush3.bf16.msra.mxu1 %v3625_v30 }
  0xca   :  { %3334 = vmatprep.subr.bf16.mxu1 %v3664_v26 }
  0xcb   :  { %3286 = vmatpush3.bf16.msra.mxu0 %v3627_v32 }
  0xcc   :  { %3287 = vmatprep.subr.bf16.mxu0 %v3629_v34 }
  0xcd   :  { %3335 = vmatpush3.bf16.msra.mxu1 %v3628_v33 }
  0xce   :  { %3336 = vmatprep.subr.bf16.mxu1 %v3664_v26 }
  0xcf   :  { %3288 = vmatpush3.bf16.msra.mxu0 %v3630_v35 }
  0xd0   :  { %3289 = vmatprep.subr.bf16.mxu0 %v3632_v37 }
  0xd1   :  { %3337 = vmatpush3.bf16.msra.mxu1 %v3631_v36 }
  0xd2   :  { %3338 = vmatprep.subr.bf16.mxu1 %v3664_v26 }
  0xd3   :  { %3290 = vmatpush3.bf16.msra.mxu0 %v3633_v38 }
  0xd4   :  { %3291 = vmatprep.subr.bf16.mxu0 %v3635_v40 }
  0xd5   :  { %3339 = vmatpush3.bf16.msra.mxu1 %v3634_v39 }
  0xd6   :  { %3340 = vmatprep.subr.bf16.mxu1 %v3664_v26 }
  0xd7   :  { %3292 = vmatpush3.bf16.msra.mxu0 %v3636_v41 }
  0xd8   :  { %3293 = vmatprep.subr.bf16.mxu0 %v3638_v43  ;;  %v3653_v43 = vld [vmem:[%s4528_s3 + $0x28] sm:$0xff]  }
  0xd9   :  { %3341 = vmatpush3.bf16.msra.mxu1 %v3637_v42 }
  0xda   :  { %3342 = vmatprep.subr.bf16.mxu1 %v3664_v26 }
  0xdb   :  { %3294 = vmatpush3.bf16.msra.mxu0 %v3639_v44  ;;  %v3654_v44 = vld [vmem:[%s4528_s3 + $0x30] sm:$0xff]  }
  0xdc   :  { %3295 = vmatprep.subr.bf16.mxu0 %v3641_v46  ;;  %v3656_v46 = vld [vmem:[%s4529_s5] sm:$0xff]  }
  0xdd   :  { %3343 = vmatpush3.bf16.msra.mxu1 %v3640_v45  ;;  %v3655_v45 = vld [vmem:[%s4528_s3 + $0x38] sm:$0xff]  }
  0xde   :  { %3344 = vmatprep.subr.bf16.mxu1 %v3664_v26 }
  0xdf   :  { %3296 = vmatpush3.bf16.msra.mxu0 %v3642_v48  ;;  %v3658_v48 = vld [vmem:[%s4529_s5 + $0x10] sm:$0xff]  }
  0xe0   :  { %3350 = vmatprep.subr.bf16.mxu0 %v3664_v26 }
  0xe1   :  { %3345 = vmatpush3.bf16.msra.mxu1 %v3646_v49 }
  0xe2   :  { %3370 = vmatprep.subr.bf16.mxu1 %v3664_v26  ;;  %2451 = vmatmul.mubr.bf16.vlgmr.msra.gmra.mrb[24].mxu0 %v3643_v50  ;;  %v3659_v50 = vld [vmem:[%s4529_s5 + $0x18] sm:$0xff]  }
  0xe3   :  { %3366 = vmatprep.mubr.msk.bf16.mxu0 %vm3665_vm0, %v3664_v26  ;;  %3351 = vmatpush3.bf16.msra.mxu0 %v3648_v21 }
  0xe4   :  { %3347 = vmatmul.mubr.bf16.vlgmr.msra.gmra.mrb[24].mxu1 %v3647_v51  ;;  %3352 = vmatprep.subr.bf16.mxu0 %v3664_v26 }
  0xe5   :  { %3386 = vmatprep.mubr.msk.bf16.mxu1 %vm3665_vm0, %v3664_v26  ;;  %3371 = vmatpush3.bf16.msra.mxu1 %v3656_v46 }
  0xe6   :  { %3372 = vmatprep.subr.bf16.mxu1 %v3664_v26 }
  0xe7   :  { %3353 = vmatpush3.bf16.msra.mxu0 %v3649_v22 }
  0xe8   :  { %3354 = vmatprep.subr.bf16.mxu0 %v3664_v26 }
  0xe9   :  { %3373 = vmatpush3.bf16.msra.mxu1 %v3657_v47 }
  0xea   :  { %3374 = vmatprep.subr.bf16.mxu1 %v3664_v26 }
  0xeb   :  { %3355 = vmatpush3.bf16.msra.mxu0 %v3650_v23 }
  0xec   :  { %3356 = vmatprep.subr.bf16.mxu0 %v3664_v26 }
  0xed   :  { %3375 = vmatpush3.bf16.msra.mxu1 %v3658_v48 }
  0xee   :  { %3376 = vmatprep.subr.bf16.mxu1 %v3664_v26 }
  0xef   :  { %3357 = vmatpush3.bf16.msra.mxu0 %v3651_v24 }
  0xf0   :  { %3358 = vmatprep.subr.bf16.mxu0 %v3664_v26 }
  0xf1   :  { %3377 = vmatpush3.bf16.msra.mxu1 %v3659_v50 }
  0xf2   :  { %3378 = vmatprep.subr.bf16.mxu1 %v3664_v26 }
  0xf3   :  { %3359 = vmatpush3.bf16.msra.mxu0 %v3652_v27 }
  0xf4   :  { %3360 = vmatprep.subr.bf16.mxu0 %v3664_v26 }
  0xf5   :  { %v3033_v52 = vpop.f32.mrb[0].mxu0 }
  0xf6   :  { %v3034_v54 = vpop.f32.mrb[1].mxu0 }
  0xf7   :  { %v3035_v55 = vadd.f32 %v3034_v54, %v3033_v52  ;;  %v3036_v56 = vpop.f32.mrb[2].mxu0  ;;  %v3055_v57 = vpop.f32.mrb[0].mxu1  ;;  %3361 = vmatpush3.bf16.msra.mxu0 %v3653_v43 }
  0xf8   :  { %v3037_v58 = vpop.f32.mrb[3].mxu0  ;;  %v3056_v61 = vpop.f32.mrb[1].mxu1  ;;  %3362 = vmatprep.subr.bf16.mxu0 %v3664_v26 }
  0xf9   :  { %v1961_v59 = vadd.f32 %v3035_v55, %v2746_v53  ;;  %v3038_v60 = vadd.f32 %v3037_v58, %v3036_v56  ;;  %v3057_v62 = vadd.f32 %v3056_v61, %v3055_v57  ;;  %v3058_v63 = vpop.f32.mrb[2].mxu1 }
  0xfa   :  { %v3059_v1 = vpop.f32.mrb[3].mxu1 }
  0xfb   :  { %v1964_v0 = vadd.f32 %v3038_v60, %v2746_v53  ;;  %v2002_v2 = vadd.f32 %v3057_v62, %v1961_v59  ;;  %v3060_v3 = vadd.f32 %v3059_v1, %v3058_v63  ;;  %3363 = vmatpush3.bf16.msra.mxu0 %v3654_v44  ;;  %v3660_v59 = vld [vmem:[%s4529_s5 + $0x20] sm:$0xff]  }
  0xfc   :  { %3364 = vmatprep.subr.bf16.mxu0 %v3664_v26  ;;  %3379 = vmatpush3.bf16.msra.mxu1 %v3660_v59 }
  0xfd   :  { %v2005_v4 = vadd.f32 %v3060_v3, %v1964_v0  ;;  %3380 = vmatprep.subr.bf16.mxu1 %v3664_v26 }
  0xff   :  { %3365 = vmatpush3.bf16.msra.mxu0 %v3655_v45 }
 0x115   :  { %v3077_v5 = vpop.f32.mrb[4].mxu0 }
 0x116   :  { %v3078_v6 = vpop.f32.mrb[5].mxu0 }
 0x117   :  { %v3079_v7 = vadd.f32 %v3078_v6, %v3077_v5  ;;  %v3080_v8 = vpop.f32.mrb[6].mxu0  ;;  %v3099_v11 = vpop.f32.mrb[4].mxu1 }
 0x118   :  { %v3081_v9 = vpop.f32.mrb[7].mxu0  ;;  %v3100_v13 = vpop.f32.mrb[5].mxu1 }
 0x119   :  { %v2043_v10 = vadd.f32 %v3079_v7, %v2002_v2  ;;  %v3082_v12 = vadd.f32 %v3081_v9, %v3080_v8  ;;  %v3101_v15 = vadd.f32 %v3100_v13, %v3099_v11  ;;  %v3102_v16 = vpop.f32.mrb[6].mxu1  ;;  %v3661_v2 = vld [vmem:[%s4529_s5 + $0x28] sm:$0xff]  }
 0x11a   :  { %v3103_v17 = vpop.f32.mrb[7].mxu1  ;;  %3381 = vmatpush3.bf16.msra.mxu1 %v3661_v2 }
 0x11b   :  { %v2046_v14 = vadd.f32 %v3082_v12, %v2005_v4  ;;  %v2084_v18 = vadd.f32 %v3101_v15, %v2043_v10  ;;  %v3104_v19 = vadd.f32 %v3103_v17, %v3102_v16  ;;  %3382 = vmatprep.subr.bf16.mxu1 %v3664_v26 }
 0x11d   :  { %v2087_v20 = vadd.f32 %v3104_v19, %v2046_v14 }
 0x135   :  { %v3121_v25 = vpop.f32.mrb[8].mxu0 }
 0x136   :  { %v3122_v28 = vpop.f32.mrb[9].mxu0 }
 0x137   :  { %v3123_v29 = vadd.f32 %v3122_v28, %v3121_v25  ;;  %v3124_v30 = vpop.f32.mrb[10].mxu0  ;;  %v3143_v31 = vpop.f32.mrb[8].mxu1 }
 0x138   :  { %v3125_v32 = vpop.f32.mrb[11].mxu0  ;;  %v3144_v35 = vpop.f32.mrb[9].mxu1 }
 0x139   :  { %v2125_v33 = vadd.f32 %v3123_v29, %v2084_v18  ;;  %v3126_v34 = vadd.f32 %v3125_v32, %v3124_v30  ;;  %v3145_v36 = vadd.f32 %v3144_v35, %v3143_v31  ;;  %v3146_v37 = vpop.f32.mrb[10].mxu1 }
 0x13a   :  { %v3147_v39 = vpop.f32.mrb[11].mxu1 }
 0x13b   :  { %v2128_v38 = vadd.f32 %v3126_v34, %v2087_v20  ;;  %v2166_v40 = vadd.f32 %v3145_v36, %v2125_v33  ;;  %v3148_v41 = vadd.f32 %v3147_v39, %v3146_v37 }
 0x13d   :  { %v2169_v42 = vadd.f32 %v3148_v41, %v2128_v38 }
 0x155   :  { %v3165_v49 = vpop.f32.mrb[12].mxu0 }
 0x156   :  { %v3166_v51 = vpop.f32.mrb[13].mxu0 }
 0x157   :  { %v3167_v52 = vadd.f32 %v3166_v51, %v3165_v49  ;;  %v3168_v53 = vpop.f32.mrb[14].mxu0  ;;  %v3187_v54 = vpop.f32.mrb[12].mxu1 }
 0x158   :  { %v3169_v55 = vpop.f32.mrb[15].mxu0  ;;  %v3188_v58 = vpop.f32.mrb[13].mxu1 }
 0x159   :  { %v2207_v56 = vadd.f32 %v3167_v52, %v2166_v40  ;;  %v3170_v57 = vadd.f32 %v3169_v55, %v3168_v53  ;;  %v3189_v60 = vadd.f32 %v3188_v58, %v3187_v54  ;;  %v3190_v61 = vpop.f32.mrb[14].mxu1  ;;  %v3662_v54 = vld [vmem:[%s4529_s5 + $0x30] sm:$0xff]   ;;  %v3663_v55 = vld [vmem:[%s4529_s5 + $0x38] sm:$0xff]  }
 0x15a   :  { %v3191_v63 = vpop.f32.mrb[15].mxu1  ;;  %3383 = vmatpush3.bf16.msra.mxu1 %v3662_v54 }
 0x15b   :  { %v2210_v62 = vadd.f32 %v3170_v57, %v2169_v42  ;;  %v2248_v0 = vadd.f32 %v3189_v60, %v2207_v56  ;;  %v3192_v1 = vadd.f32 %v3191_v63, %v3190_v61  ;;  %3384 = vmatprep.subr.bf16.mxu1 %v3664_v26  ;;  %v2990_v56 = vld [vmem:[%s4530_s4] ss:$0 sm:$0xff] }
 0x15c   :  { %v2999_v26 = vld [vmem:[%s4531_s6] ss:$0 sm:$0xff] }
 0x15d   :  { %v2251_v3 = vadd.f32 %v3192_v1, %v2210_v62 }
 0x15e   :  { %3385 = vmatpush3.bf16.msra.mxu1 %v3663_v55 }
 0x175   :  { %v3209_v4 = vpop.f32.mrb[16].mxu0 }
 0x176   :  { %v3210_v5 = vpop.f32.mrb[17].mxu0 }
 0x177   :  { %v3211_v6 = vadd.f32 %v3210_v5, %v3209_v4  ;;  %v3212_v7 = vpop.f32.mrb[18].mxu0  ;;  %v3231_v10 = vpop.f32.mrb[16].mxu1 }
 0x178   :  { %v3213_v8 = vpop.f32.mrb[19].mxu0  ;;  %v3232_v12 = vpop.f32.mrb[17].mxu1 }
 0x179   :  { %v2289_v9 = vadd.f32 %v3211_v6, %v2248_v0  ;;  %v3214_v11 = vadd.f32 %v3213_v8, %v3212_v7  ;;  %v3233_v14 = vadd.f32 %v3232_v12, %v3231_v10  ;;  %v3234_v15 = vpop.f32.mrb[18].mxu1 }
 0x17a   :  { %v3235_v16 = vpop.f32.mrb[19].mxu1 }
 0x17b   :  { %v2292_v13 = vadd.f32 %v3214_v11, %v2251_v3  ;;  %v2330_v17 = vadd.f32 %v3233_v14, %v2289_v9  ;;  %v3236_v18 = vadd.f32 %v3235_v16, %v3234_v15 }
 0x17d   :  { %v2333_v19 = vadd.f32 %v3236_v18, %v2292_v13 }
 0x195   :  { %v3253_v20 = vpop.f32.mrb[20].mxu0 }
 0x196   :  { %v3254_v21 = vpop.f32.mrb[21].mxu0 }
 0x197   :  { %v3255_v22 = vadd.f32 %v3254_v21, %v3253_v20  ;;  %v3256_v23 = vpop.f32.mrb[22].mxu0  ;;  %v3275_v24 = vpop.f32.mrb[20].mxu1 }
 0x198   :  { %v3257_v25 = vpop.f32.mrb[23].mxu0  ;;  %v3276_v29 = vpop.f32.mrb[21].mxu1 }
 0x199   :  { %v2371_v27 = vadd.f32 %v3255_v22, %v2330_v17  ;;  %v3258_v28 = vadd.f32 %v3257_v25, %v3256_v23  ;;  %v3277_v30 = vadd.f32 %v3276_v29, %v3275_v24  ;;  %v3278_v31 = vpop.f32.mrb[22].mxu1 }
 0x19a   :  { %v3279_v33 = vpop.f32.mrb[23].mxu1 }
 0x19b   :  { %v2374_v32 = vadd.f32 %v3258_v28, %v2333_v19  ;;  %v2412_v34 = vadd.f32 %v3277_v30, %v2371_v27  ;;  %v3280_v35 = vadd.f32 %v3279_v33, %v3278_v31 }
 0x19d   :  { %v2415_v36 = vadd.f32 %v3280_v35, %v2374_v32 }
 0x1b5   :  { %v3297_v37 = vpop.f32.mrb[24].mxu0 }
 0x1b6   :  { %v3298_v38 = vpop.f32.mrb[25].mxu0 }
 0x1b7   :  { %v2493_v39 = vpop.f32.mrb[24].mxu1  ;;  %v3299_v40 = vadd.f32 %v3298_v38, %v3297_v37  ;;  %v3300_v41 = vpop.f32.mrb[26].mxu0 }
 0x1b8   :  { %v3348_v42 = vpop.f32.mrb[25].mxu1  ;;  %v3301_v43 = vpop.f32.mrb[27].mxu0 }
 0x1b9   :  { %v2496_v44 = vpop.f32.mrb[26].mxu1  ;;  %v2453_v45 = vadd.f32 %v3299_v40, %v2412_v34  ;;  %v3302_v46 = vadd.f32 %v3301_v43, %v3300_v41 }
 0x1ba   :  { %v3349_v47 = vpop.f32.mrb[27].mxu1 }
 0x1bb   :  { %v2494_v48 = vadd.f32 %v2493_v39, %v2453_v45  ;;  %v2456_v49 = vadd.f32 %v3302_v46, %v2415_v36 }
 0x1bd   :  { %v2497_v50 = vadd.f32 %v2496_v44, %v2456_v49  ;;  %v2500_v51 = vmax.f32 %v2494_v48, 0.0 }
 0x1bf   :  { %v2501_v52 = vmax.f32 %v2497_v50, 0.0 }
 0x1c1   :  { %v2502_v53 = vpack.c.bf16 %v2501_v52, %v2500_v51 }
 0x1c3   :  { %3367 = vmatmul.mubr.bf16.vlgmr.msra.gmra.mrb[28].mxu0 %v2502_v53 }
 0x296   :  { %v2608_v57 = vpop.f32.mrb[28].mxu0 }
 0x297   :  { %v2609_v58 = vadd.f32 %v2990_v56, %v2608_v57  ;;  %v3368_v59 = vpop.f32.mrb[29].mxu0 }
 0x298   :  { %v2611_v60 = vpop.f32.mrb[30].mxu0 }
 0x299   :  { %v2612_v61 = vadd.f32 %v2990_v56, %v2611_v60  ;;  %v3369_v62 = vpop.f32.mrb[31].mxu0  ;;  %v2615_v63 = vmax.f32 %v2609_v58, 0.0 }
 0x29b   :  { %v2616_v0 = vmax.f32 %v2612_v61, 0.0 }
 0x29d   :  { %v2617_v1 = vpack.c.bf16 %v2616_v0, %v2615_v63 }
 0x29f   :  { %3387 = vmatmul.mubr.bf16.vlgmr.msra.gmra.mrb[28].mxu1 %v2617_v1 }
 0x372   :  { %v2723_v2 = vpop.f32.mrb[28].mxu1 }
 0x373   :  { %v2724_v3 = vadd.f32 %v2999_v26, %v2723_v2  ;;  %v3388_v4 = vpop.f32.mrb[29].mxu1 }
 0x374   :  { %v2726_v5 = vpop.f32.mrb[30].mxu1 }
 0x375   :  { %v2727_v6 = vadd.f32 %v2999_v26, %v2726_v5  ;;  %v3389_v7 = vpop.f32.mrb[31].mxu1  ;;  %v2730_v8 = vmax.f32 %v2724_v3, 0.0 }
 0x377   :  { %v2731_v9 = vmax.f32 %v2727_v6, 0.0 }
 0x379   :  { %v3015_v10 = vpack.c.bf16 %v2731_v9, %v2730_v8 }
 0x37b   :  { %3016 = vst [vmem:[%s4532_s7] sm:$0xff] %v3015_v10  }

// kernel: ninnet_forward.12
= control target key start
LH: loop header
LB: loop body
LE: loop exit
PB: predicated region body
PF: predicated region fallthrough
CT: control target
= control target key end

     0   :  { %s9626_s1 = inlined_call_operand.vmem [shape: bf16[2304,384], index: 1, kind: input, shape index: {}]   ;;  %s9627_s0 = inlined_call_operand.vmem [shape: bf16[32,2304], index: 0, kind: input, shape index: {}]   ;;  %s9628_s2 = inlined_call_operand.vmem [shape: f32[1,384], index: 2, kind: input, shape index: {}]   ;;  %s9629_s3 = inlined_call_operand.vmem [shape: bf16[384,384], index: 3, kind: input, shape index: {}]   ;;  %s9630_s5 = inlined_call_operand.vmem [shape: bf16[384,384], index: 5, kind: input, shape index: {}]   ;;  %s9631_s4 = inlined_call_operand.vmem [shape: f32[1,384], index: 4, kind: input, shape index: {}]   ;;  %s9632_s6 = inlined_call_operand.vmem [shape: f32[1,384], index: 6, kind: input, shape index: {}]   ;;  %s9633_s7 = inlined_call_operand.vmem [shape: bf16[32,384], index: 7, kind: output, shape index: {}]  }
   0x1   :  { %v6661_v0 = vld [vmem:[%s9626_s1 + $0x4] ss:$12 sps:$4 sm:$0xff]   ;;  %v6663_v1 = vld [vmem:[%s9626_s1] ss:$12 sps:$4 sm:$0xff]   ;;  %v6664_v2 = vld [vmem:[%s9626_s1 + $0x1c] ss:$12 sps:$4 sm:$0xff]  }
   0x2   :  { %3140 = vmatprep.subr.bf16.mxu0 %v6661_v0  ;;  %v6666_v3 = vld [vmem:[%s9626_s1 + $0x18] ss:$12 sps:$4 sm:$0xff]   ;;  %v6667_v4 = vld [vmem:[%s9626_s1 + $0x34] ss:$12 sps:$4 sm:$0xff]   ;;  %v6669_v5 = vld [vmem:[%s9626_s1 + $0x30] ss:$12 sps:$4 sm:$0xff]  }
   0x3   :  { %3141 = vmatpush1.bf16.msra.mxu0 %v6663_v1  ;;  %v6670_v6 = vld [vmem:[%s9626_s1 + $0x4c] ss:$12 sps:$4 sm:$0xff]   ;;  %v6672_v7 = vld [vmem:[%s9626_s1 + $0x48] ss:$12 sps:$4 sm:$0xff]   ;;  %v6673_v8 = vld [vmem:[%s9626_s1 + $0x64] ss:$12 sps:$4 sm:$0xff]  }
   0x4   :  { %3142 = vmatprep.subr.bf16.mxu0 %v6664_v2  ;;  %v6675_v9 = vld [vmem:[%s9626_s1 + $0x60] ss:$12 sps:$4 sm:$0xff]   ;;  %v6676_v10 = vld [vmem:[%s9626_s1 + $0x7c] ss:$12 sps:$4 sm:$0xff]   ;;  %v6678_v11 = vld [vmem:[%s9626_s1 + $0x78] ss:$12 sps:$4 sm:$0xff]  }
   0x5   :  { %v6679_v12 = vld [vmem:[%s9626_s1 + $0x94] ss:$12 sps:$4 sm:$0xff]   ;;  %v6711_v13 = vld [vmem:[%s9627_s0 + $0x4] ss:$72 sps:$4 sm:$0xff]   ;;  %v6681_v14 = vld [vmem:[%s9626_s1 + $0x90] ss:$12 sps:$4 sm:$0xff]  }
   0x6   :  { %v6682_v15 = vld [vmem:[%s9626_s1 + $0xac] ss:$12 sps:$4 sm:$0xff]   ;;  %3172 = vmatprep.mubr.bf16.mxu0 %v6711_v13  ;;  %3649 = vmatprep.mubr.bf16.mxu1 %v6711_v13  ;;  %v6684_v16 = vld [vmem:[%s9626_s1 + $0xa8] ss:$12 sps:$4 sm:$0xff]   ;;  %v6685_v17 = vld [vmem:[%s9626_s1 + $0xc4] ss:$12 sps:$4 sm:$0xff]  }
   0x7   :  { %3143 = vmatpush1.bf16.msra.mxu0 %v6666_v3  ;;  %v6724_v18 = vld [vmem:[%s9626_s1 + $0xc8] ss:$12 sps:$4 sm:$0xff]   ;;  %v6687_v20 = vld [vmem:[%s9626_s1 + $0xc0] ss:$12 sps:$4 sm:$0xff]   ;;  %v6690_v24 = vld [vmem:[%s9626_s1 + $0xd8] ss:$12 sps:$4 sm:$0xff]  }
   0x8   :  { %3144 = vmatprep.subr.bf16.mxu0 %v6667_v4  ;;  %v6725_v19 = vld [vmem:[%s9626_s1 + $0x8] ss:$12 sps:$4 sm:$0xff]   ;;  %6188 = vmatprep.subr.bf16.mxu1 %v6724_v18  ;;  %v6729_v22 = vld [vmem:[%s9626_s1 + $0xe0] ss:$12 sps:$4 sm:$0xff]   ;;  %v6734_v26 = vld [vmem:[%s9626_s1 + $0xf8] ss:$12 sps:$4 sm:$0xff]  }
   0x9   :  { %v6688_v21 = vld [vmem:[%s9626_s1 + $0xdc] ss:$12 sps:$4 sm:$0xff]   ;;  %6189 = vmatpush3.bf16.msra.mxu1 %v6725_v19  ;;  %v6730_v23 = vld [vmem:[%s9626_s1 + $0x20] ss:$12 sps:$4 sm:$0xff]   ;;  %v6735_v27 = vld [vmem:[%s9626_s1 + $0x38] ss:$12 sps:$4 sm:$0xff]  }
   0xa   :  { %v6691_v25 = vld [vmem:[%s9626_s1 + $0xf4] ss:$12 sps:$4 sm:$0xff]   ;;  %6190 = vmatprep.subr.bf16.mxu1 %v6729_v22  ;;  %v6693_v28 = vld [vmem:[%s9626_s1 + $0xf0] ss:$12 sps:$4 sm:$0xff]   ;;  %v6694_v31 = vld [vmem:[%s9626_s1 + $0x10c] ss:$12 sps:$4 sm:$0xff]  }
   0xb   :  { %3145 = vmatpush1.bf16.msra.mxu0 %v6669_v5  ;;  %v6739_v29 = vld [vmem:[%s9626_s1 + $0x110] ss:$12 sps:$4 sm:$0xff]   ;;  %v6696_v32 = vld [vmem:[%s9626_s1 + $0x108] ss:$12 sps:$4 sm:$0xff]   ;;  %v6749_v36 = vld [vmem:[%s9626_s1 + $0x140] ss:$12 sps:$4 sm:$0xff]  }
   0xc   :  { %3146 = vmatprep.subr.bf16.mxu0 %v6670_v6  ;;  %v6740_v30 = vld [vmem:[%s9626_s1 + $0x50] ss:$12 sps:$4 sm:$0xff]   ;;  %v6744_v33 = vld [vmem:[%s9626_s1 + $0x128] ss:$12 sps:$4 sm:$0xff]   ;;  %v6699_v37 = vld [vmem:[%s9626_s1 + $0x120] ss:$12 sps:$4 sm:$0xff]  }
   0xd   :  { %6191 = vmatpush3.bf16.msra.mxu1 %v6730_v23  ;;  %v6745_v34 = vld [vmem:[%s9626_s1 + $0x68] ss:$12 sps:$4 sm:$0xff]   ;;  %v6697_v35 = vld [vmem:[%s9626_s1 + $0x124] ss:$12 sps:$4 sm:$0xff]   ;;  %v6750_v39 = vld [vmem:[%s9626_s1 + $0x80] ss:$12 sps:$4 sm:$0xff]  }
   0xe   :  { %6192 = vmatprep.subr.bf16.mxu1 %v6734_v26  ;;  %v6700_v38 = vld [vmem:[%s9626_s1 + $0x13c] ss:$12 sps:$4 sm:$0xff]   ;;  %v6754_v40 = vld [vmem:[%s9626_s1 + $0x158] ss:$12 sps:$4 sm:$0xff]   ;;  %v6703_v42 = vld [vmem:[%s9626_s1 + $0x154] ss:$12 sps:$4 sm:$0xff]  }
   0xf   :  { %3147 = vmatpush1.bf16.msra.mxu0 %v6672_v7  ;;  %v6702_v41 = vld [vmem:[%s9626_s1 + $0x138] ss:$12 sps:$4 sm:$0xff]   ;;  %v6759_v44 = vld [vmem:[%s9626_s1 + $0x170] ss:$12 sps:$4 sm:$0xff]   ;;  %v6764_v48 = vld [vmem:[%s9626_s1 + $0x248] ss:$12 sps:$4 sm:$0xff]  }
  0x10   :  { %3148 = vmatprep.subr.bf16.mxu0 %v6673_v8  ;;  %v6755_v43 = vld [vmem:[%s9626_s1 + $0x98] ss:$12 sps:$4 sm:$0xff]   ;;  %v6705_v45 = vld [vmem:[%s9626_s1 + $0x150] ss:$12 sps:$4 sm:$0xff]   ;;  %v6708_v49 = vld [vmem:[%s9626_s1 + $0x168] ss:$12 sps:$4 sm:$0xff]  }
  0x11   :  { %6193 = vmatpush3.bf16.msra.mxu1 %v6735_v27  ;;  %v6706_v46 = vld [vmem:[%s9626_s1 + $0x16c] ss:$12 sps:$4 sm:$0xff]   ;;  %v6760_v47 = vld [vmem:[%s9626_s1 + $0xb0] ss:$12 sps:$4 sm:$0xff]   ;;  %v6709_v50 = vld [vmem:[%s9627_s0] ss:$72 sps:$4 sm:$0xff]  }
  0x12   :  { %6194 = vmatprep.subr.bf16.mxu1 %v6739_v29  ;;  %v6714_v51 = vld [vmem:[%s9626_s1 + $0x184] ss:$12 sps:$4 sm:$0xff]   ;;  %v6765_v52 = vld [vmem:[%s9626_s1 + $0x188] ss:$12 sps:$4 sm:$0xff]   ;;  %v6769_v53 = vld [vmem:[%s9626_s1 + $0x260] ss:$12 sps:$4 sm:$0xff]  }
  0x13   :  { %3149 = vmatpush1.bf16.msra.mxu0 %v6675_v9  ;;  %v6712_v54 = vld [vmem:[%s9626_s1 + $0x180] ss:$12 sps:$4 sm:$0xff]   ;;  %v6717_v55 = vld [vmem:[%s9626_s1 + $0x19c] ss:$12 sps:$4 sm:$0xff]   ;;  %v6774_v57 = vld [vmem:[%s9626_s1 + $0x278] ss:$12 sps:$4 sm:$0xff]  }
  0x14   :  { %3150 = vmatprep.subr.bf16.mxu0 %v6676_v10  ;;  %v6770_v56 = vld [vmem:[%s9626_s1 + $0x1a0] ss:$12 sps:$4 sm:$0xff]   ;;  %v6776_v58 = vld [vmem:[%s9627_s0 + $0x94] ss:$72 sps:$4 sm:$0xff]   ;;  %v6715_v59 = vld [vmem:[%s9626_s1 + $0x198] ss:$12 sps:$4 sm:$0xff]  }
  0x15   :  { %6195 = vmatpush3.bf16.msra.mxu1 %v6740_v30  ;;  %v6720_v60 = vld [vmem:[%s9626_s1 + $0x1b4] ss:$12 sps:$4 sm:$0xff]   ;;  %v6775_v61 = vld [vmem:[%s9626_s1 + $0x1b8] ss:$12 sps:$4 sm:$0xff]   ;;  %v6782_v63 = vld [vmem:[%s9626_s1 + $0x290] ss:$12 sps:$4 sm:$0xff]  }
  0x16   :  { %6196 = vmatprep.subr.bf16.mxu1 %v6744_v33  ;;  %v6781_v62 = vld [vmem:[%s9627_s0 + $0x90] ss:$72 sps:$4 sm:$0xff]   ;;  %v6787_v3 = vld [vmem:[%s9626_s1 + $0x2a8] ss:$12 sps:$4 sm:$0xff]   ;;  %v6795_v8 = vld [vmem:[%s9626_s1 + $0x2c0] ss:$12 sps:$4 sm:$0xff]  }
  0x17   :  { %3151 = vmatpush1.bf16.msra.mxu0 %v6678_v11  ;;  %v6718_v0 = vld [vmem:[%s9626_s1 + $0x1b0] ss:$12 sps:$4 sm:$0xff]   ;;  %v6723_v1 = vld [vmem:[%s9626_s1 + $0x1cc] ss:$12 sps:$4 sm:$0xff]   ;;  %v6721_v5 = vld [vmem:[%s9626_s1 + $0x1c8] ss:$12 sps:$4 sm:$0xff]  }
  0x18   :  { %3152 = vmatprep.subr.bf16.mxu0 %v6679_v12  ;;  %v6783_v2 = vld [vmem:[%s9626_s1 + $0x1d0] ss:$12 sps:$4 sm:$0xff]   ;;  %v6791_v4 = vld [vmem:[%s9627_s0 + $0xc] ss:$72 sps:$4 sm:$0xff]   ;;  %v6800_v12 = vld [vmem:[%s9626_s1 + $0x2d8] ss:$12 sps:$4 sm:$0xff]  }
  0x19   :  { %6197 = vmatpush3.bf16.msra.mxu1 %v6745_v34  ;;  %v6728_v6 = vld [vmem:[%s9626_s1 + $0x1e4] ss:$12 sps:$4 sm:$0xff]   ;;  %v6788_v7 = vld [vmem:[%s9626_s1 + $0x1e8] ss:$12 sps:$4 sm:$0xff]   ;;  %v6726_v9 = vld [vmem:[%s9626_s1 + $0x1e0] ss:$12 sps:$4 sm:$0xff]  }
  0x1a   :  { %6198 = vmatprep.subr.bf16.mxu1 %v6749_v36  ;;  %v6796_v10 = vld [vmem:[%s9626_s1 + $0x200] ss:$12 sps:$4 sm:$0xff]   ;;  %v6733_v11 = vld [vmem:[%s9626_s1 + $0x1fc] ss:$12 sps:$4 sm:$0xff]   ;;  %v6731_v13 = vld [vmem:[%s9626_s1 + $0x1f8] ss:$12 sps:$4 sm:$0xff]  }
  0x1b   :  { %3153 = vmatpush1.bf16.msra.mxu0 %v6681_v14  ;;  %v6738_v14 = vld [vmem:[%s9626_s1 + $0x214] ss:$12 sps:$4 sm:$0xff]   ;;  %v6743_v18 = vld [vmem:[%s9626_s1 + $0x22c] ss:$12 sps:$4 sm:$0xff]   ;;  %v6806_v19 = vld [vmem:[%s9626_s1 + $0x230] ss:$12 sps:$4 sm:$0xff]  }
  0x1c   :  { %3154 = vmatprep.subr.bf16.mxu0 %v6682_v15  ;;  %v6801_v15 = vld [vmem:[%s9626_s1 + $0x218] ss:$12 sps:$4 sm:$0xff]   ;;  %v7808_v23 = vld [vmem:[%s9627_s0 + $0x8] ss:$72 sps:$4 sm:$0xff]   ;;  %v6746_v26 = vld [vmem:[%s9626_s1 + $0x240] ss:$12 sps:$4 sm:$0xff]  }
  0x1d   :  { %6199 = vmatpush3.bf16.msra.mxu1 %v6750_v39  ;;  %v6748_v22 = vld [vmem:[%s9626_s1 + $0x244] ss:$12 sps:$4 sm:$0xff]   ;;  %v6753_v27 = vld [vmem:[%s9626_s1 + $0x25c] ss:$12 sps:$4 sm:$0xff]  }
  0x1e   :  { %6200 = vmatprep.subr.bf16.mxu1 %v6754_v40  ;;  %v6820_v29 = vld [vmem:[%s9626_s1 + $0x3f8] ss:$12 sps:$4 sm:$0xff]   ;;  %v6825_v33 = vld [vmem:[%s9626_s1 + $0x410] ss:$12 sps:$4 sm:$0xff]   ;;  %v6761_v39 = vld [vmem:[%s9626_s1 + $0x288] ss:$12 sps:$4 sm:$0xff]  }
  0x1f   :  { %3155 = vmatpush1.bf16.msra.mxu0 %v6684_v16  ;;  %v6805_v16 = vld [vmem:[%s9626_s1 + $0x2f0] ss:$12 sps:$4 sm:$0xff]   ;;  %v6751_v30 = vld [vmem:[%s9626_s1 + $0x258] ss:$12 sps:$4 sm:$0xff]  }
  0x20   :  { %3156 = vmatprep.subr.bf16.mxu0 %v6685_v17  ;;  %v6736_v17 = vld [vmem:[%s9626_s1 + $0x210] ss:$12 sps:$4 sm:$0xff]   ;;  %v7865_v40 = vld [vmem:[%s9627_s0 + $0x98] ss:$72 sps:$4 sm:$0xff]  }
  0x21   :  { %6201 = vmatpush3.bf16.msra.mxu1 %v6755_v43  ;;  %v6756_v34 = vld [vmem:[%s9626_s1 + $0x270] ss:$12 sps:$4 sm:$0xff]   ;;  %v6835_v43 = vld [vmem:[%s9626_s1 + $0x440] ss:$12 sps:$4 sm:$0xff]  }
  0x22   :  { %6202 = vmatprep.subr.bf16.mxu1 %v6759_v44  ;;  %v6826_v36 = vld [vmem:[%s9626_s1 + $0x350] ss:$12 sps:$4 sm:$0xff]   ;;  %v6766_v44 = vld [vmem:[%s9626_s1 + $0x2a0] ss:$12 sps:$4 sm:$0xff]  }
  0x23   :  { %3157 = vmatpush1.bf16.msra.mxu0 %v6687_v20  ;;  %v6810_v20 = vld [vmem:[%s9626_s1 + $0x3c8] ss:$12 sps:$4 sm:$0xff]  }
  0x24   :  { %3158 = vmatprep.subr.bf16.mxu0 %v6688_v21  ;;  %v6741_v21 = vld [vmem:[%s9626_s1 + $0x228] ss:$12 sps:$4 sm:$0xff]  }
  0x25   :  { %6203 = vmatpush3.bf16.msra.mxu1 %v6760_v47  ;;  %v6842_v47 = vld [vmem:[%s9626_s1 + $0x458] ss:$12 sps:$4 sm:$0xff]  }
  0x26   :  { %6216 = vmatprep.subr.bf16.mxu1 %v6764_v48  ;;  %v7892_v48 = vld [vmem:[%s9627_s0 + $0x14] ss:$72 sps:$4 sm:$0xff]  }
  0x27   :  { %3159 = vmatpush1.bf16.msra.mxu0 %v6690_v24  ;;  %v6811_v24 = vld [vmem:[%s9626_s1 + $0x308] ss:$12 sps:$4 sm:$0xff]  }
  0x28   :  { %3160 = vmatprep.subr.bf16.mxu0 %v6691_v25  ;;  %3650 = vmatmul.mubr.bf16.vlgmr.msra.gmra.mrb[0].mxu1 %v6709_v50  ;;  %v6815_v25 = vld [vmem:[%s9626_s1 + $0x3e0] ss:$12 sps:$4 sm:$0xff]  }
  0x29   :  { %6217 = vmatpush3.bf16.msra.mxu1 %v6765_v52  ;;  %3657 = vmatprep.mubr.bf16.mxu1 %v6776_v58  ;;  %v6848_v52 = vld [vmem:[%s9626_s1 + $0x470] ss:$12 sps:$4 sm:$0xff]  }
  0x2a   :  { %6218 = vmatprep.subr.bf16.mxu1 %v6769_v53  ;;  %v6778_v53 = vld [vmem:[%s9626_s1 + $0x2d0] ss:$12 sps:$4 sm:$0xff]  }
  0x2b   :  { %3161 = vmatpush1.bf16.msra.mxu0 %v6693_v28  ;;  %v6816_v28 = vld [vmem:[%s9626_s1 + $0x320] ss:$12 sps:$4 sm:$0xff]  }
  0x2c   :  { %3162 = vmatprep.subr.bf16.mxu0 %v6694_v31  ;;  %v6821_v31 = vld [vmem:[%s9626_s1 + $0x338] ss:$12 sps:$4 sm:$0xff]  }
  0x2d   :  { %6219 = vmatpush3.bf16.msra.mxu1 %v6770_v56  ;;  %v6856_v56 = vld [vmem:[%s9626_s1 + $0x548] ss:$12 sps:$4 sm:$0xff]  }
  0x2e   :  { %6220 = vmatprep.subr.bf16.mxu1 %v6774_v57  ;;  %v6784_v57 = vld [vmem:[%s9626_s1 + $0x2e8] ss:$12 sps:$4 sm:$0xff]  }
  0x2f   :  { %3163 = vmatpush1.bf16.msra.mxu0 %v6696_v32  ;;  %v6758_v32 = vld [vmem:[%s9626_s1 + $0x274] ss:$12 sps:$4 sm:$0xff]  }
  0x30   :  { %3164 = vmatprep.subr.bf16.mxu0 %v6697_v35  ;;  %3658 = vmatmul.mubr.bf16.gmra.mrb[4].mxu1 %v6781_v62  ;;  %v6763_v35 = vld [vmem:[%s9626_s1 + $0x28c] ss:$12 sps:$4 sm:$0xff]  }
  0x31   :  { %6221 = vmatpush3.bf16.msra.mxu1 %v6775_v61  ;;  %3698 = vmatprep.mubr.bf16.mxu1 %v6791_v4  ;;  %v6861_v61 = vld [vmem:[%s9626_s1 + $0x560] ss:$12 sps:$4 sm:$0xff]  }
  0x32   :  { %6222 = vmatprep.subr.bf16.mxu1 %v6782_v63  ;;  %v6799_v63 = vld [vmem:[%s9626_s1 + $0x31c] ss:$12 sps:$4 sm:$0xff]  }
  0x33   :  { %3165 = vmatpush1.bf16.msra.mxu0 %v6699_v37  ;;  %v6830_v37 = vld [vmem:[%s9626_s1 + $0x428] ss:$12 sps:$4 sm:$0xff]  }
  0x34   :  { %3166 = vmatprep.subr.bf16.mxu0 %v6700_v38  ;;  %v7856_v38 = vld [vmem:[%s9627_s0 + $0x9c] ss:$72 sps:$4 sm:$0xff]  }
  0x35   :  { %6223 = vmatpush3.bf16.msra.mxu1 %v6783_v2  ;;  %v6797_v2 = vld [vmem:[%s9626_s1 + $0x318] ss:$12 sps:$4 sm:$0xff]  }
  0x36   :  { %6224 = vmatprep.subr.bf16.mxu1 %v6787_v3  ;;  %v6804_v3 = vld [vmem:[%s9626_s1 + $0x334] ss:$12 sps:$4 sm:$0xff]  }
  0x37   :  { %3167 = vmatpush1.bf16.msra.mxu0 %v6702_v41  ;;  %v6831_v41 = vld [vmem:[%s9626_s1 + $0x368] ss:$12 sps:$4 sm:$0xff]  }
  0x38   :  { %3168 = vmatprep.subr.bf16.mxu0 %v6703_v42  ;;  %v6768_v42 = vld [vmem:[%s9626_s1 + $0x2a4] ss:$12 sps:$4 sm:$0xff]  }
  0x39   :  { %6225 = vmatpush3.bf16.msra.mxu1 %v6788_v7  ;;  %v6809_v7 = vld [vmem:[%s9626_s1 + $0x34c] ss:$12 sps:$4 sm:$0xff]  }
  0x3a   :  { %6226 = vmatprep.subr.bf16.mxu1 %v6795_v8  ;;  %v7972_v8 = vld [vmem:[%s9627_s0 + $0xa4] ss:$72 sps:$4 sm:$0xff]  }
  0x3b   :  { %3169 = vmatpush1.bf16.msra.mxu0 %v6705_v45  ;;  %v6773_v45 = vld [vmem:[%s9626_s1 + $0x2bc] ss:$12 sps:$4 sm:$0xff]  }
  0x3c   :  { %3170 = vmatprep.subr.bf16.mxu0 %v6706_v46  ;;  %v6836_v46 = vld [vmem:[%s9626_s1 + $0x380] ss:$12 sps:$4 sm:$0xff]  }
  0x3d   :  { %6227 = vmatpush3.bf16.msra.mxu1 %v6796_v10  ;;  %v7980_v10 = vld [vmem:[%s9627_s0 + $0xa0] ss:$72 sps:$4 sm:$0xff]  }
  0x3e   :  { %6228 = vmatprep.subr.bf16.mxu1 %v6800_v12  ;;  %v6807_v12 = vld [vmem:[%s9626_s1 + $0x348] ss:$12 sps:$4 sm:$0xff]  }
  0x3f   :  { %3171 = vmatpush1.bf16.msra.mxu0 %v6708_v49  ;;  %v6771_v49 = vld [vmem:[%s9626_s1 + $0x2b8] ss:$12 sps:$4 sm:$0xff]  }
  0x40   :  { %3193 = vmatprep.subr.bf16.mxu0 %v6714_v51  ;;  %v6780_v51 = vld [vmem:[%s9626_s1 + $0x2d4] ss:$12 sps:$4 sm:$0xff]  }
  0x41   :  { %6229 = vmatpush3.bf16.msra.mxu1 %v6801_v15  ;;  %v6881_v15 = vld [vmem:[%s9626_s1 + $0x5c0] ss:$12 sps:$4 sm:$0xff]  }
  0x42   :  { %3173 = vmatmul.mubr.bf16.vlgmr.msra.gmra.mrb[0].mxu0 %v6709_v50  ;;  %6230 = vmatprep.subr.bf16.mxu1 %v6805_v16  ;;  %v6844_v50 = vld [vmem:[%s9626_s1 + $0x398] ss:$12 sps:$4 sm:$0xff]   ;;  %v6812_v16 = vld [vmem:[%s9626_s1 + $0x360] ss:$12 sps:$4 sm:$0xff]  }
  0x43   :  { %3194 = vmatpush1.bf16.msra.mxu0 %v6712_v54  ;;  %3182 = vmatprep.mubr.bf16.mxu0 %v6776_v58  ;;  %v6786_v54 = vld [vmem:[%s9626_s1 + $0x2ec] ss:$12 sps:$4 sm:$0xff]   ;;  %v6794_v58 = vld [vmem:[%s9626_s1 + $0x304] ss:$12 sps:$4 sm:$0xff]  }
  0x44   :  { %3195 = vmatprep.subr.bf16.mxu0 %v6717_v55  ;;  %v6849_v55 = vld [vmem:[%s9626_s1 + $0x3b0] ss:$12 sps:$4 sm:$0xff]  }
  0x45   :  { %6231 = vmatpush3.bf16.msra.mxu1 %v6806_v19  ;;  %v6882_v19 = vld [vmem:[%s9626_s1 + $0x500] ss:$12 sps:$4 sm:$0xff]  }
  0x46   :  { %6244 = vmatprep.subr.bf16.mxu1 %v6810_v20  ;;  %v6888_v20 = vld [vmem:[%s9626_s1 + $0x5d8] ss:$12 sps:$4 sm:$0xff]  }
  0x47   :  { %3196 = vmatpush1.bf16.msra.mxu0 %v6715_v59  ;;  %v7928_v59 = vld [vmem:[%s9627_s0 + $0x10] ss:$72 sps:$4 sm:$0xff]  }
  0x48   :  { %3197 = vmatprep.subr.bf16.mxu0 %v6720_v60  ;;  %3699 = vmatmul.mubr.bf16.vlgmr.msra.gmra.mrb[8].mxu1 %v7808_v23  ;;  %v6857_v60 = vld [vmem:[%s9626_s1 + $0x488] ss:$12 sps:$4 sm:$0xff]  }
  0x49   :  { %6245 = vmatpush3.bf16.msra.mxu1 %v6811_v24  ;;  %3706 = vmatprep.mubr.bf16.mxu1 %v7856_v38  ;;  %v6894_v24 = vld [vmem:[%s9626_s1 + $0x5f0] ss:$12 sps:$4 sm:$0xff]  }
  0x4a   :  { %3183 = vmatmul.mubr.bf16.gmra.mrb[4].mxu0 %v6781_v62  ;;  %6246 = vmatprep.subr.bf16.mxu1 %v6815_v25  ;;  %v6792_v62 = vld [vmem:[%s9626_s1 + $0x300] ss:$12 sps:$4 sm:$0xff]   ;;  %v6822_v25 = vld [vmem:[%s9626_s1 + $0x390] ss:$12 sps:$4 sm:$0xff]  }
  0x4b   :  { %3198 = vmatpush1.bf16.msra.mxu0 %v6718_v0  ;;  %3225 = vmatprep.mubr.bf16.mxu0 %v6791_v4  ;;  %v6862_v0 = vld [vmem:[%s9626_s1 + $0x4a0] ss:$12 sps:$4 sm:$0xff]   ;;  %v6867_v4 = vld [vmem:[%s9626_s1 + $0x4b8] ss:$12 sps:$4 sm:$0xff]  }
  0x4c   :  { %3199 = vmatprep.subr.bf16.mxu0 %v6723_v1  ;;  %v6866_v1 = vld [vmem:[%s9626_s1 + $0x578] ss:$12 sps:$4 sm:$0xff]  }
  0x4d   :  { %6247 = vmatpush3.bf16.msra.mxu1 %v6816_v28  ;;  %v6902_v28 = vld [vmem:[%s9626_s1 + $0x6c8] ss:$12 sps:$4 sm:$0xff]  }
  0x4e   :  { %6248 = vmatprep.subr.bf16.mxu1 %v6820_v29  ;;  %v6827_v29 = vld [vmem:[%s9626_s1 + $0x3a8] ss:$12 sps:$4 sm:$0xff]  }
  0x4f   :  { %3200 = vmatpush1.bf16.msra.mxu0 %v6721_v5  ;;  %v6871_v5 = vld [vmem:[%s9626_s1 + $0x590] ss:$12 sps:$4 sm:$0xff]  }
  0x50   :  { %3201 = vmatprep.subr.bf16.mxu0 %v6728_v6  ;;  %3707 = vmatmul.mubr.bf16.gmra.mrb[12].mxu1 %v7865_v40  ;;  %v6802_v6 = vld [vmem:[%s9626_s1 + $0x330] ss:$12 sps:$4 sm:$0xff]  }
  0x51   :  { %6249 = vmatpush3.bf16.msra.mxu1 %v6821_v31  ;;  %3747 = vmatprep.mubr.bf16.mxu1 %v7892_v48  ;;  %v6834_v31 = vld [vmem:[%s9626_s1 + $0x3c4] ss:$12 sps:$4 sm:$0xff]  }
  0x52   :  { %6250 = vmatprep.subr.bf16.mxu1 %v6825_v33  ;;  %v6907_v33 = vld [vmem:[%s9626_s1 + $0x6e0] ss:$12 sps:$4 sm:$0xff]  }
  0x53   :  { %3202 = vmatpush1.bf16.msra.mxu0 %v6726_v9  ;;  %v6872_v9 = vld [vmem:[%s9626_s1 + $0x4d0] ss:$12 sps:$4 sm:$0xff]  }
  0x54   :  { %3203 = vmatprep.subr.bf16.mxu0 %v6733_v11  ;;  %v6876_v11 = vld [vmem:[%s9626_s1 + $0x5a8] ss:$12 sps:$4 sm:$0xff]  }
  0x55   :  { %6251 = vmatpush3.bf16.msra.mxu1 %v6826_v36  ;;  %v6908_v36 = vld [vmem:[%s9626_s1 + $0x620] ss:$12 sps:$4 sm:$0xff]  }
  0x56   :  { %6252 = vmatprep.subr.bf16.mxu1 %v6830_v37  ;;  %v6912_v37 = vld [vmem:[%s9626_s1 + $0x6f8] ss:$12 sps:$4 sm:$0xff]  }
  0x57   :  { %3204 = vmatpush1.bf16.msra.mxu0 %v6731_v13  ;;  %v6814_v13 = vld [vmem:[%s9626_s1 + $0x364] ss:$12 sps:$4 sm:$0xff]  }
  0x58   :  { %3205 = vmatprep.subr.bf16.mxu0 %v6738_v14  ;;  %v6877_v14 = vld [vmem:[%s9626_s1 + $0x4e8] ss:$12 sps:$4 sm:$0xff]  }
  0x59   :  { %6253 = vmatpush3.bf16.msra.mxu1 %v6831_v41  ;;  %v8085_v41 = vld [vmem:[%s9627_s0 + $0xac] ss:$72 sps:$4 sm:$0xff]  }
  0x5a   :  { %6254 = vmatprep.subr.bf16.mxu1 %v6835_v43  ;;  %v8093_v43 = vld [vmem:[%s9627_s0 + $0xa8] ss:$72 sps:$4 sm:$0xff]  }
  0x5b   :  { %3206 = vmatpush1.bf16.msra.mxu0 %v6736_v17  ;;  %v6819_v17 = vld [vmem:[%s9626_s1 + $0x37c] ss:$12 sps:$4 sm:$0xff]  }
  0x5c   :  { %3207 = vmatprep.subr.bf16.mxu0 %v6743_v18  ;;  %v8010_v18 = vld [vmem:[%s9627_s0 + $0x1c] ss:$72 sps:$4 sm:$0xff]  }
  0x5d   :  { %6255 = vmatpush3.bf16.msra.mxu1 %v6836_v46  ;;  %v6918_v46 = vld [vmem:[%s9626_s1 + $0x650] ss:$12 sps:$4 sm:$0xff]  }
  0x5e   :  { %6256 = vmatprep.subr.bf16.mxu1 %v6842_v47  ;;  %v6922_v47 = vld [vmem:[%s9626_s1 + $0x728] ss:$12 sps:$4 sm:$0xff]  }
  0x5f   :  { %3208 = vmatpush1.bf16.msra.mxu0 %v6741_v21  ;;  %v6817_v21 = vld [vmem:[%s9626_s1 + $0x378] ss:$12 sps:$4 sm:$0xff]  }
  0x60   :  { %3209 = vmatprep.subr.bf16.mxu0 %v6748_v22  ;;  %v6824_v22 = vld [vmem:[%s9626_s1 + $0x394] ss:$12 sps:$4 sm:$0xff]  }
  0x61   :  { %6257 = vmatpush3.bf16.msra.mxu1 %v6844_v50  ;;  %v6923_v50 = vld [vmem:[%s9626_s1 + $0x668] ss:$12 sps:$4 sm:$0xff]  }
  0x62   :  { %6258 = vmatprep.subr.bf16.mxu1 %v6848_v52  ;;  %v6927_v52 = vld [vmem:[%s9626_s1 + $0x740] ss:$12 sps:$4 sm:$0xff]  }
  0x63   :  { %3210 = vmatpush1.bf16.msra.mxu0 %v6746_v26  ;;  %v6895_v26 = vld [vmem:[%s9626_s1 + $0x530] ss:$12 sps:$4 sm:$0xff]  }
  0x64   :  { %3211 = vmatprep.subr.bf16.mxu0 %v6753_v27  ;;  %v6829_v27 = vld [vmem:[%s9626_s1 + $0x3ac] ss:$12 sps:$4 sm:$0xff]  }
  0x65   :  { %6259 = vmatpush3.bf16.msra.mxu1 %v6849_v55  ;;  %v6928_v55 = vld [vmem:[%s9626_s1 + $0x680] ss:$12 sps:$4 sm:$0xff]  }
  0x66   :  { %6272 = vmatprep.subr.bf16.mxu1 %v6856_v56  ;;  %v6934_v56 = vld [vmem:[%s9626_s1 + $0x758] ss:$12 sps:$4 sm:$0xff]  }
  0x67   :  { %3212 = vmatpush1.bf16.msra.mxu0 %v6751_v30  ;;  %v8049_v30 = vld [vmem:[%s9627_s0 + $0x18] ss:$72 sps:$4 sm:$0xff]  }
  0x68   :  { %3213 = vmatprep.subr.bf16.mxu0 %v6758_v32  ;;  %3748 = vmatmul.mubr.bf16.vlgmr.msra.gmra.mrb[16].mxu1 %v7928_v59  ;;  %v6903_v32 = vld [vmem:[%s9626_s1 + $0x608] ss:$12 sps:$4 sm:$0xff]  }
  0x69   :  { %6273 = vmatpush3.bf16.msra.mxu1 %v6857_v60  ;;  %3755 = vmatprep.mubr.bf16.mxu1 %v7972_v8  ;;  %v6936_v60 = vld [vmem:[%s9626_s1 + $0x698] ss:$12 sps:$4 sm:$0xff]  }
  0x6a   :  { %6274 = vmatprep.subr.bf16.mxu1 %v6861_v61  ;;  %v6940_v61 = vld [vmem:[%s9626_s1 + $0x770] ss:$12 sps:$4 sm:$0xff]  }
  0x6b   :  { %3214 = vmatpush1.bf16.msra.mxu0 %v6756_v34  ;;  %v6832_v34 = vld [vmem:[%s9626_s1 + $0x3c0] ss:$12 sps:$4 sm:$0xff]  }
  0x6c   :  { %3215 = vmatprep.subr.bf16.mxu0 %v6763_v35  ;;  %v6839_v35 = vld [vmem:[%s9626_s1 + $0x3dc] ss:$12 sps:$4 sm:$0xff]  }
  0x6d   :  { %6275 = vmatpush3.bf16.msra.mxu1 %v6862_v0  ;;  %v6941_v0 = vld [vmem:[%s9626_s1 + $0x6b0] ss:$12 sps:$4 sm:$0xff]  }
  0x6e   :  { %6276 = vmatprep.subr.bf16.mxu1 %v6866_v1  ;;  %v6948_v1 = vld [vmem:[%s9626_s1 + $0x848] ss:$12 sps:$4 sm:$0xff]  }
  0x6f   :  { %3216 = vmatpush1.bf16.msra.mxu0 %v6761_v39  ;;  %v6847_v39 = vld [vmem:[%s9626_s1 + $0x3f4] ss:$12 sps:$4 sm:$0xff]  }
  0x70   :  { %3217 = vmatprep.subr.bf16.mxu0 %v6768_v42  ;;  %3756 = vmatmul.mubr.bf16.gmra.mrb[20].mxu1 %v7980_v10  ;;  %v6917_v42 = vld [vmem:[%s9626_s1 + $0x710] ss:$12 sps:$4 sm:$0xff]  }
  0x71   :  { %6277 = vmatpush3.bf16.msra.mxu1 %v6867_v4  ;;  %3796 = vmatprep.mubr.bf16.mxu1 %v8010_v18  ;;  %v6949_v4 = vld [vmem:[%s9626_s1 + $0x788] ss:$12 sps:$4 sm:$0xff]  }
  0x72   :  { %6278 = vmatprep.subr.bf16.mxu1 %v6871_v5  ;;  %v6880_v5 = vld [vmem:[%s9626_s1 + $0x484] ss:$12 sps:$4 sm:$0xff]  }
  0x73   :  { %3218 = vmatpush1.bf16.msra.mxu0 %v6766_v44  ;;  %v6845_v44 = vld [vmem:[%s9626_s1 + $0x3f0] ss:$12 sps:$4 sm:$0xff]  }
  0x74   :  { %3219 = vmatprep.subr.bf16.mxu0 %v6773_v45  ;;  %v6852_v45 = vld [vmem:[%s9626_s1 + $0x40c] ss:$12 sps:$4 sm:$0xff]  }
  0x75   :  { %6279 = vmatpush3.bf16.msra.mxu1 %v6872_v9  ;;  %v6885_v9 = vld [vmem:[%s9626_s1 + $0x49c] ss:$12 sps:$4 sm:$0xff]  }
  0x76   :  { %6280 = vmatprep.subr.bf16.mxu1 %v6876_v11  ;;  %v6954_v11 = vld [vmem:[%s9626_s1 + $0x7a0] ss:$12 sps:$4 sm:$0xff]  }
  0x77   :  { %3220 = vmatpush1.bf16.msra.mxu0 %v6771_v49  ;;  %v6860_v49 = vld [vmem:[%s9626_s1 + $0x424] ss:$12 sps:$4 sm:$0xff]  }
  0x78   :  { %3221 = vmatprep.subr.bf16.mxu0 %v6780_v51  ;;  %v8121_v51 = vld [vmem:[%s9627_s0 + $0x24] ss:$72 sps:$4 sm:$0xff]  }
  0x79   :  { %6281 = vmatpush3.bf16.msra.mxu1 %v6877_v14  ;;  %v6883_v14 = vld [vmem:[%s9626_s1 + $0x498] ss:$12 sps:$4 sm:$0xff]  }
  0x7a   :  { %6282 = vmatprep.subr.bf16.mxu1 %v6881_v15  ;;  %v6981_v15 = vld [vmem:[%s9627_s0 + $0xb0] ss:$72 sps:$4 sm:$0xff]  }
  0x7b   :  { %3222 = vmatpush1.bf16.msra.mxu0 %v6778_v53  ;;  %v6858_v53 = vld [vmem:[%s9626_s1 + $0x420] ss:$12 sps:$4 sm:$0xff]  }
  0x7c   :  { %3223 = vmatprep.subr.bf16.mxu0 %v6786_v54  ;;  %v6865_v54 = vld [vmem:[%s9626_s1 + $0x43c] ss:$12 sps:$4 sm:$0xff]  }
  0x7d   :  { %6283 = vmatpush3.bf16.msra.mxu1 %v6882_v19  ;;  %v6891_v19 = vld [vmem:[%s9626_s1 + $0x4b0] ss:$12 sps:$4 sm:$0xff]  }
  0x7e   :  { %6284 = vmatprep.subr.bf16.mxu1 %v6888_v20  ;;  %v6898_v20 = vld [vmem:[%s9626_s1 + $0x4cc] ss:$12 sps:$4 sm:$0xff]  }
  0x7f   :  { %3224 = vmatpush1.bf16.msra.mxu0 %v6784_v57  ;;  %v6863_v57 = vld [vmem:[%s9626_s1 + $0x438] ss:$12 sps:$4 sm:$0xff]  }
  0x80   :  { %3246 = vmatprep.subr.bf16.mxu0 %v6794_v58  ;;  %v6870_v58 = vld [vmem:[%s9626_s1 + $0x454] ss:$12 sps:$4 sm:$0xff]  }
  0x82   :  { %3226 = vmatmul.mubr.bf16.vlgmr.msra.gmra.mrb[0].mxu0 %v7808_v23  ;;  %v6890_v23 = vld [vmem:[%s9626_s1 + $0x518] ss:$12 sps:$4 sm:$0xff]  }
  0x83   :  { %3247 = vmatpush1.bf16.msra.mxu0 %v6792_v62  ;;  %3235 = vmatprep.mubr.bf16.mxu0 %v7856_v38  ;;  %v6837_v38 = vld [vmem:[%s9626_s1 + $0x3d8] ss:$12 sps:$4 sm:$0xff]   ;;  %v6868_v62 = vld [vmem:[%s9626_s1 + $0x450] ss:$12 sps:$4 sm:$0xff]  }
  0x84   :  { %3248 = vmatprep.subr.bf16.mxu0 %v6799_v63  ;;  %6285 = vmatpush3.bf16.msra.mxu1 %v6890_v23  ;;  %v6875_v63 = vld [vmem:[%s9626_s1 + $0x46c] ss:$12 sps:$4 sm:$0xff]   ;;  %v6896_v23 = vld [vmem:[%s9626_s1 + $0x4c8] ss:$12 sps:$4 sm:$0xff]  }
  0x85   :  { %6286 = vmatprep.subr.bf16.mxu1 %v6894_v24  ;;  %v6969_v24 = vld [vmem:[%s9626_s1 + $0x7e8] ss:$12 sps:$4 sm:$0xff]  }
  0x87   :  { %3249 = vmatpush1.bf16.msra.mxu0 %v6797_v2  ;;  %v6873_v2 = vld [vmem:[%s9626_s1 + $0x468] ss:$12 sps:$4 sm:$0xff]  }
  0x88   :  { %3250 = vmatprep.subr.bf16.mxu0 %v6804_v3  ;;  %6287 = vmatpush3.bf16.msra.mxu1 %v6895_v26  ;;  %v6945_v3 = vld [vmem:[%s9627_s0 + $0x20] ss:$72 sps:$4 sm:$0xff]  }
  0x89   :  { %6300 = vmatprep.subr.bf16.mxu1 %v6902_v28  ;;  %v6973_v26 = vld [vmem:[%s9626_s1 + $0x8c0] ss:$12 sps:$4 sm:$0xff]  }
  0x8a   :  { %3236 = vmatmul.mubr.bf16.gmra.mrb[4].mxu0 %v7865_v40  ;;  %v6913_v40 = vld [vmem:[%s9626_s1 + $0x638] ss:$12 sps:$4 sm:$0xff]   ;;  %v6974_v28 = vld [vmem:[%s9626_s1 + $0x800] ss:$12 sps:$4 sm:$0xff]  }
  0x8b   :  { %3251 = vmatpush1.bf16.msra.mxu0 %v6802_v6  ;;  %3278 = vmatprep.mubr.bf16.mxu0 %v7892_v48  ;;  %v6850_v48 = vld [vmem:[%s9626_s1 + $0x408] ss:$12 sps:$4 sm:$0xff]   ;;  %v6953_v6 = vld [vmem:[%s9626_s1 + $0x860] ss:$12 sps:$4 sm:$0xff]  }
  0x8c   :  { %3252 = vmatprep.subr.bf16.mxu0 %v6809_v7  ;;  %3797 = vmatmul.mubr.bf16.vlgmr.msra.gmra.mrb[24].mxu1 %v8049_v30  ;;  %v6878_v7 = vld [vmem:[%s9626_s1 + $0x480] ss:$12 sps:$4 sm:$0xff]  }
  0x8d   :  { %6301 = vmatpush3.bf16.msra.mxu1 %v6903_v32  ;;  %3804 = vmatprep.mubr.bf16.mxu1 %v8085_v41  ;;  %v6982_v32 = vld [vmem:[%s9626_s1 + $0x818] ss:$12 sps:$4 sm:$0xff]  }
  0x8e   :  { %6302 = vmatprep.subr.bf16.mxu1 %v6907_v33  ;;  %v6986_v33 = vld [vmem:[%s9626_s1 + $0x8f0] ss:$12 sps:$4 sm:$0xff]  }
  0x8f   :  { %3253 = vmatpush1.bf16.msra.mxu0 %v6807_v12  ;;  %v6958_v12 = vld [vmem:[%s9626_s1 + $0x878] ss:$12 sps:$4 sm:$0xff]  }
  0x90   :  { %3254 = vmatprep.subr.bf16.mxu0 %v6814_v13  ;;  %v6978_v13 = vld [vmem:[%s9627_s0 + $0xb4] ss:$72 sps:$4 sm:$0xff]  }
  0x91   :  { %6303 = vmatpush3.bf16.msra.mxu1 %v6908_v36  ;;  %v6987_v36 = vld [vmem:[%s9626_s1 + $0x830] ss:$12 sps:$4 sm:$0xff]  }
  0x92   :  { %6304 = vmatprep.subr.bf16.mxu1 %v6912_v37  ;;  %v6994_v37 = vld [vmem:[%s9626_s1 + $0x9c8] ss:$12 sps:$4 sm:$0xff]  }
  0x93   :  { %3255 = vmatpush1.bf16.msra.mxu0 %v6812_v16  ;;  %v6959_v16 = vld [vmem:[%s9626_s1 + $0x7b8] ss:$12 sps:$4 sm:$0xff]  }
  0x94   :  { %3256 = vmatprep.subr.bf16.mxu0 %v6819_v17  ;;  %3805 = vmatmul.mubr.bf16.gmra.mrb[28].mxu1 %v8093_v43  ;;  %v6893_v17 = vld [vmem:[%s9626_s1 + $0x4b4] ss:$12 sps:$4 sm:$0xff]  }
  0x95   :  { %6305 = vmatpush3.bf16.msra.mxu1 %v6913_v40  ;;  %3845 = vmatprep.mubr.bf16.mxu1 %v8121_v51  ;;  %v6991_v40 = vld [vmem:[%s9627_s0 + $0x28] ss:$72 sps:$4 sm:$0xff]  }
  0x96   :  { %6306 = vmatprep.subr.bf16.mxu1 %v6917_v42  ;;  %v6995_v42 = vld [vmem:[%s9626_s1 + $0x908] ss:$12 sps:$4 sm:$0xff]  }
  0x97   :  { %3257 = vmatpush1.bf16.msra.mxu0 %v6817_v21  ;;  %v6964_v21 = vld [vmem:[%s9626_s1 + $0x7d0] ss:$12 sps:$4 sm:$0xff]  }
  0x98   :  { %3258 = vmatprep.subr.bf16.mxu0 %v6824_v22  ;;  %v6993_v22 = vld [vmem:[%s9627_s0 + $0x2c] ss:$72 sps:$4 sm:$0xff]  }
  0x99   :  { %6307 = vmatpush3.bf16.msra.mxu1 %v6918_v46  ;;  %v7024_v46 = vld [vmem:[%s9627_s0 + $0xbc] ss:$72 sps:$4 sm:$0xff]  }
  0x9a   :  { %6308 = vmatprep.subr.bf16.mxu1 %v6922_v47  ;;  %v6931_v47 = vld [vmem:[%s9626_s1 + $0x55c] ss:$12 sps:$4 sm:$0xff]  }
  0x9b   :  { %3259 = vmatpush1.bf16.msra.mxu0 %v6822_v25  ;;  %v6906_v25 = vld [vmem:[%s9626_s1 + $0x4e4] ss:$12 sps:$4 sm:$0xff]  }
  0x9c   :  { %3260 = vmatprep.subr.bf16.mxu0 %v6829_v27  ;;  %v6911_v27 = vld [vmem:[%s9626_s1 + $0x4fc] ss:$12 sps:$4 sm:$0xff]  }
  0x9d   :  { %6309 = vmatpush3.bf16.msra.mxu1 %v6923_v50  ;;  %v6929_v50 = vld [vmem:[%s9626_s1 + $0x558] ss:$12 sps:$4 sm:$0xff]  }
  0x9e   :  { %6310 = vmatprep.subr.bf16.mxu1 %v6927_v52  ;;  %v6939_v52 = vld [vmem:[%s9626_s1 + $0x574] ss:$12 sps:$4 sm:$0xff]  }
  0x9f   :  { %3261 = vmatpush1.bf16.msra.mxu0 %v6827_v29  ;;  %v6909_v29 = vld [vmem:[%s9626_s1 + $0x4f8] ss:$12 sps:$4 sm:$0xff]  }
  0xa0   :  { %3262 = vmatprep.subr.bf16.mxu0 %v6834_v31  ;;  %v6916_v31 = vld [vmem:[%s9626_s1 + $0x514] ss:$12 sps:$4 sm:$0xff]  }
  0xa1   :  { %6311 = vmatpush3.bf16.msra.mxu1 %v6928_v55  ;;  %v7009_v55 = vld [vmem:[%s9626_s1 + $0xa10] ss:$12 sps:$4 sm:$0xff]  }
  0xa2   :  { %6312 = vmatprep.subr.bf16.mxu1 %v6934_v56  ;;  %v6937_v56 = vld [vmem:[%s9626_s1 + $0x570] ss:$12 sps:$4 sm:$0xff]  }
  0xa3   :  { %3263 = vmatpush1.bf16.msra.mxu0 %v6832_v34  ;;  %v6914_v34 = vld [vmem:[%s9626_s1 + $0x510] ss:$12 sps:$4 sm:$0xff]  }
  0xa4   :  { %3264 = vmatprep.subr.bf16.mxu0 %v6839_v35  ;;  %v6921_v35 = vld [vmem:[%s9626_s1 + $0x52c] ss:$12 sps:$4 sm:$0xff]  }
  0xa5   :  { %6313 = vmatpush3.bf16.msra.mxu1 %v6936_v60  ;;  %v7010_v60 = vld [vmem:[%s9626_s1 + $0x950] ss:$12 sps:$4 sm:$0xff]  }
  0xa6   :  { %6314 = vmatprep.subr.bf16.mxu1 %v6940_v61  ;;  %v7014_v61 = vld [vmem:[%s9626_s1 + $0xa28] ss:$12 sps:$4 sm:$0xff]  }
  0xa7   :  { %3265 = vmatpush1.bf16.msra.mxu0 %v6837_v38  ;;  %v6919_v38 = vld [vmem:[%s9626_s1 + $0x528] ss:$12 sps:$4 sm:$0xff]  }
  0xa8   :  { %3266 = vmatprep.subr.bf16.mxu0 %v6847_v39  ;;  %v6926_v39 = vld [vmem:[%s9626_s1 + $0x544] ss:$12 sps:$4 sm:$0xff]  }
  0xa9   :  { %6315 = vmatpush3.bf16.msra.mxu1 %v6941_v0  ;;  %v7015_v0 = vld [vmem:[%s9626_s1 + $0x968] ss:$12 sps:$4 sm:$0xff]  }
  0xaa   :  { %6328 = vmatprep.subr.bf16.mxu1 %v6948_v1  ;;  %v7019_v1 = vld [vmem:[%s9626_s1 + $0xa40] ss:$12 sps:$4 sm:$0xff]  }
  0xab   :  { %3267 = vmatpush1.bf16.msra.mxu0 %v6845_v44  ;;  %v6999_v44 = vld [vmem:[%s9626_s1 + $0x9e0] ss:$12 sps:$4 sm:$0xff]  }
  0xac   :  { %3268 = vmatprep.subr.bf16.mxu0 %v6852_v45  ;;  %3846 = vmatmul.mubr.bf16.vlgmr.msra.gmra.mrb[32].mxu1 %v6945_v3  ;;  %v6924_v45 = vld [vmem:[%s9626_s1 + $0x540] ss:$12 sps:$4 sm:$0xff]  }
  0xad   :  { %6329 = vmatpush3.bf16.msra.mxu1 %v6949_v4  ;;  %3853 = vmatprep.mubr.bf16.mxu1 %v6978_v13  ;;  %v7020_v3 = vld [vmem:[%s9626_s1 + $0x980] ss:$12 sps:$4 sm:$0xff]   ;;  %v6957_v4 = vld [vmem:[%s9626_s1 + $0x5bc] ss:$12 sps:$4 sm:$0xff]  }
  0xae   :  { %6330 = vmatprep.subr.bf16.mxu1 %v6953_v6  ;;  %v6955_v6 = vld [vmem:[%s9626_s1 + $0x5b8] ss:$12 sps:$4 sm:$0xff]  }
  0xaf   :  { %3269 = vmatpush1.bf16.msra.mxu0 %v6850_v48  ;;  %v7000_v48 = vld [vmem:[%s9626_s1 + $0x920] ss:$12 sps:$4 sm:$0xff]  }
  0xb0   :  { %3270 = vmatprep.subr.bf16.mxu0 %v6860_v49  ;;  %v7004_v49 = vld [vmem:[%s9626_s1 + $0x9f8] ss:$12 sps:$4 sm:$0xff]  }
  0xb1   :  { %6331 = vmatpush3.bf16.msra.mxu1 %v6954_v11  ;;  %v7032_v11 = vld [vmem:[%s9626_s1 + $0xa70] ss:$12 sps:$4 sm:$0xff]   ;;  %v6967_v13 = vld [vmem:[%s9626_s1 + $0x5ec] ss:$12 sps:$4 sm:$0xff]  }
  0xb2   :  { %6332 = vmatprep.subr.bf16.mxu1 %v6958_v12  ;;  %v6960_v12 = vld [vmem:[%s9626_s1 + $0x5d0] ss:$12 sps:$4 sm:$0xff]  }
  0xb3   :  { %3271 = vmatpush1.bf16.msra.mxu0 %v6858_v53  ;;  %v7027_v53 = vld [vmem:[%s9627_s0 + $0xb8] ss:$72 sps:$4 sm:$0xff]  }
  0xb4   :  { %3272 = vmatprep.subr.bf16.mxu0 %v6865_v54  ;;  %3854 = vmatmul.mubr.bf16.gmra.mrb[36].mxu1 %v6981_v15  ;;  %v7005_v54 = vld [vmem:[%s9626_s1 + $0x938] ss:$12 sps:$4 sm:$0xff]   ;;  %v7040_v15 = vld [vmem:[%s9626_s1 + $0xb48] ss:$12 sps:$4 sm:$0xff]  }
  0xb5   :  { %6333 = vmatpush3.bf16.msra.mxu1 %v6959_v16  ;;  %3894 = vmatprep.mubr.bf16.mxu1 %v6993_v22  ;;  %v6965_v16 = vld [vmem:[%s9626_s1 + $0x5e8] ss:$12 sps:$4 sm:$0xff]  }
  0xb6   :  { %v6977_v22 = vld [vmem:[%s9626_s1 + $0x61c] ss:$12 sps:$4 sm:$0xff]  }
  0xb7   :  { %3273 = vmatpush1.bf16.msra.mxu0 %v6863_v57  ;;  %v6944_v57 = vld [vmem:[%s9626_s1 + $0x58c] ss:$12 sps:$4 sm:$0xff]  }
  0xb8   :  { %3274 = vmatprep.subr.bf16.mxu0 %v6870_v58  ;;  %v7039_v58 = vld [vmem:[%s9627_s0 + $0x34] ss:$72 sps:$4 sm:$0xff]  }
  0xbb   :  { %3275 = vmatpush1.bf16.msra.mxu0 %v6868_v62  ;;  %v6942_v62 = vld [vmem:[%s9626_s1 + $0x588] ss:$12 sps:$4 sm:$0xff]  }
  0xbc   :  { %3276 = vmatprep.subr.bf16.mxu0 %v6875_v63  ;;  %v6952_v63 = vld [vmem:[%s9626_s1 + $0x5a4] ss:$12 sps:$4 sm:$0xff]  }
  0xbf   :  { %3277 = vmatpush1.bf16.msra.mxu0 %v6873_v2  ;;  %v6950_v2 = vld [vmem:[%s9626_s1 + $0x5a0] ss:$12 sps:$4 sm:$0xff]  }
  0xc0   :  { %3299 = vmatprep.subr.bf16.mxu0 %v6880_v5  ;;  %v7026_v5 = vld [vmem:[%s9626_s1 + $0xa58] ss:$12 sps:$4 sm:$0xff]  }
  0xc2   :  { %3279 = vmatmul.mubr.bf16.vlgmr.msra.gmra.mrb[0].mxu0 %v7928_v59  ;;  %v6963_v59 = vld [vmem:[%s9626_s1 + $0x890] ss:$12 sps:$4 sm:$0xff]  }
  0xc3   :  { %3300 = vmatpush1.bf16.msra.mxu0 %v6878_v7  ;;  %3288 = vmatprep.mubr.bf16.mxu0 %v7972_v8  ;;  %v6968_v8 = vld [vmem:[%s9626_s1 + $0x8a8] ss:$12 sps:$4 sm:$0xff]  }
  0xc4   :  { %3301 = vmatprep.subr.bf16.mxu0 %v6885_v9  ;;  %6334 = vmatprep.subr.bf16.mxu1 %v6963_v59  ;;  %v6962_v7 = vld [vmem:[%s9626_s1 + $0x5d4] ss:$12 sps:$4 sm:$0xff]   ;;  %v7028_v9 = vld [vmem:[%s9626_s1 + $0x998] ss:$12 sps:$4 sm:$0xff]  }
  0xc5   :  { %6335 = vmatpush3.bf16.msra.mxu1 %v6964_v21  ;;  %v7041_v59 = vld [vmem:[%s9626_s1 + $0xa88] ss:$12 sps:$4 sm:$0xff]   ;;  %v6970_v21 = vld [vmem:[%s9626_s1 + $0x600] ss:$12 sps:$4 sm:$0xff]  }
  0xc6   :  { %6336 = vmatprep.subr.bf16.mxu1 %v6968_v8  ;;  %v7070_v8 = vld [vmem:[%s9627_s0 + $0xc4] ss:$72 sps:$4 sm:$0xff]  }
  0xc7   :  { %3302 = vmatpush1.bf16.msra.mxu0 %v6883_v14  ;;  %v7033_v14 = vld [vmem:[%s9626_s1 + $0x9b0] ss:$12 sps:$4 sm:$0xff]  }
  0xc8   :  { %3303 = vmatprep.subr.bf16.mxu0 %v6893_v17  ;;  %v7037_v17 = vld [vmem:[%s9627_s0 + $0x30] ss:$72 sps:$4 sm:$0xff]  }
  0xc9   :  { %6337 = vmatpush3.bf16.msra.mxu1 %v6969_v24  ;;  %v7050_v24 = vld [vmem:[%s9626_s1 + $0xb78] ss:$12 sps:$4 sm:$0xff]  }
  0xca   :  { %3289 = vmatmul.mubr.bf16.gmra.mrb[4].mxu0 %v7980_v10  ;;  %v6904_v10 = vld [vmem:[%s9626_s1 + $0x4e0] ss:$12 sps:$4 sm:$0xff]   ;;  %6338 = vmatprep.subr.bf16.mxu1 %v6973_v26 }
  0xcb   :  { %3304 = vmatpush1.bf16.msra.mxu0 %v6891_v19  ;;  %3331 = vmatprep.mubr.bf16.mxu0 %v8010_v18  ;;  %v6980_v18 = vld [vmem:[%s9626_s1 + $0x8d8] ss:$12 sps:$4 sm:$0xff]   ;;  %v7073_v26 = vld [vmem:[%s9627_s0 + $0xc0] ss:$72 sps:$4 sm:$0xff]  }
  0xcc   :  { %3305 = vmatprep.subr.bf16.mxu0 %v6898_v20  ;;  %v6972_v19 = vld [vmem:[%s9626_s1 + $0x604] ss:$12 sps:$4 sm:$0xff]   ;;  %v7045_v20 = vld [vmem:[%s9626_s1 + $0xb60] ss:$12 sps:$4 sm:$0xff]  }
  0xcd   :  { %6339 = vmatpush3.bf16.msra.mxu1 %v6974_v28  ;;  %v6983_v28 = vld [vmem:[%s9626_s1 + $0x630] ss:$12 sps:$4 sm:$0xff]  }
  0xce   :  { %6340 = vmatprep.subr.bf16.mxu1 %v6980_v18  ;;  %v7085_v18 = vld [vmem:[%s9627_s0 + $0x3c] ss:$72 sps:$4 sm:$0xff]  }
  0xcf   :  { %3306 = vmatpush1.bf16.msra.mxu0 %v6896_v23  ;;  %v7046_v23 = vld [vmem:[%s9626_s1 + $0xaa0] ss:$12 sps:$4 sm:$0xff]  }
  0xd0   :  { %3307 = vmatprep.subr.bf16.mxu0 %v6906_v25  ;;  %v6975_v25 = vld [vmem:[%s9626_s1 + $0x618] ss:$12 sps:$4 sm:$0xff]  }
  0xd1   :  { %6341 = vmatpush3.bf16.msra.mxu1 %v6982_v32  ;;  %v6988_v32 = vld [vmem:[%s9626_s1 + $0x648] ss:$12 sps:$4 sm:$0xff]  }
  0xd2   :  { %6342 = vmatprep.subr.bf16.mxu1 %v6986_v33  ;;  %v6998_v33 = vld [vmem:[%s9626_s1 + $0x664] ss:$12 sps:$4 sm:$0xff]  }
  0xd3   :  { %3308 = vmatpush1.bf16.msra.mxu0 %v6904_v10  ;;  %v6985_v10 = vld [vmem:[%s9626_s1 + $0x634] ss:$12 sps:$4 sm:$0xff]  }
  0xd4   :  { %3309 = vmatprep.subr.bf16.mxu0 %v6911_v27  ;;  %v7051_v27 = vld [vmem:[%s9626_s1 + $0xab8] ss:$12 sps:$4 sm:$0xff]  }
  0xd5   :  { %6343 = vmatpush3.bf16.msra.mxu1 %v6987_v36  ;;  %v6996_v36 = vld [vmem:[%s9626_s1 + $0x660] ss:$12 sps:$4 sm:$0xff]  }
  0xd6   :  { %6356 = vmatprep.subr.bf16.mxu1 %v6994_v37  ;;  %v7066_v37 = vld [vmem:[%s9626_s1 + $0xb00] ss:$12 sps:$4 sm:$0xff]  }
  0xd7   :  { %3310 = vmatpush1.bf16.msra.mxu0 %v6909_v29  ;;  %v6990_v29 = vld [vmem:[%s9626_s1 + $0x64c] ss:$12 sps:$4 sm:$0xff]  }
  0xd8   :  { %3311 = vmatprep.subr.bf16.mxu0 %v6916_v31  ;;  %3895 = vmatmul.mubr.bf16.vlgmr.msra.gmra.mrb[40].mxu1 %v6991_v40  ;;  %v7056_v31 = vld [vmem:[%s9626_s1 + $0xad0] ss:$12 sps:$4 sm:$0xff]   ;;  %v7008_v40 = vld [vmem:[%s9626_s1 + $0x694] ss:$12 sps:$4 sm:$0xff]  }
  0xd9   :  { %6357 = vmatpush3.bf16.msra.mxu1 %v6995_v42  ;;  %3902 = vmatprep.mubr.bf16.mxu1 %v7024_v46  ;;  %v7078_v42 = vld [vmem:[%s9626_s1 + $0xbf0] ss:$12 sps:$4 sm:$0xff]  }
  0xda   :  { %6358 = vmatprep.subr.bf16.mxu1 %v6999_v44  ;;  %v7006_v44 = vld [vmem:[%s9626_s1 + $0x690] ss:$12 sps:$4 sm:$0xff]  }
  0xdb   :  { %3312 = vmatpush1.bf16.msra.mxu0 %v6914_v34  ;;  %v7061_v34 = vld [vmem:[%s9626_s1 + $0xae8] ss:$12 sps:$4 sm:$0xff]   ;;  %v7079_v46 = vld [vmem:[%s9626_s1 + $0xb30] ss:$12 sps:$4 sm:$0xff]  }
  0xdc   :  { %3313 = vmatprep.subr.bf16.mxu0 %v6921_v35  ;;  %v7065_v35 = vld [vmem:[%s9626_s1 + $0xbc0] ss:$12 sps:$4 sm:$0xff]  }
  0xdd   :  { %6359 = vmatpush3.bf16.msra.mxu1 %v7000_v48  ;;  %v7011_v48 = vld [vmem:[%s9626_s1 + $0x6a8] ss:$12 sps:$4 sm:$0xff]  }
  0xde   :  { %6360 = vmatprep.subr.bf16.mxu1 %v7004_v49  ;;  %v7083_v49 = vld [vmem:[%s9627_s0 + $0x38] ss:$72 sps:$4 sm:$0xff]  }
  0xdf   :  { %3314 = vmatpush1.bf16.msra.mxu0 %v6919_v38  ;;  %v7072_v38 = vld [vmem:[%s9626_s1 + $0xbd8] ss:$12 sps:$4 sm:$0xff]  }
  0xe0   :  { %3315 = vmatprep.subr.bf16.mxu0 %v6926_v39  ;;  %3903 = vmatmul.mubr.bf16.gmra.mrb[44].mxu1 %v7027_v53  ;;  %v7074_v39 = vld [vmem:[%s9626_s1 + $0xb18] ss:$12 sps:$4 sm:$0xff]   ;;  %v7091_v53 = vld [vmem:[%s9626_s1 + $0xce0] ss:$12 sps:$4 sm:$0xff]  }
  0xe1   :  { %6361 = vmatpush3.bf16.msra.mxu1 %v7005_v54  ;;  %3943 = vmatprep.mubr.bf16.mxu1 %v7039_v58  ;;  %v7116_v54 = vld [vmem:[%s9627_s0 + $0xcc] ss:$72 sps:$4 sm:$0xff]   ;;  %v7096_v58 = vld [vmem:[%s9626_s1 + $0xcf8] ss:$12 sps:$4 sm:$0xff]  }
  0xe2   :  { %6362 = vmatprep.subr.bf16.mxu1 %v7009_v55  ;;  %v7016_v55 = vld [vmem:[%s9626_s1 + $0x6c0] ss:$12 sps:$4 sm:$0xff]  }
  0xe3   :  { %3316 = vmatpush1.bf16.msra.mxu0 %v6924_v45  ;;  %v7013_v45 = vld [vmem:[%s9626_s1 + $0x6ac] ss:$12 sps:$4 sm:$0xff]  }
  0xe4   :  { %3317 = vmatprep.subr.bf16.mxu0 %v6931_v47  ;;  %v7086_v47 = vld [vmem:[%s9626_s1 + $0xcc8] ss:$12 sps:$4 sm:$0xff]  }
  0xe5   :  { %6363 = vmatpush3.bf16.msra.mxu1 %v7010_v60  ;;  %v7021_v60 = vld [vmem:[%s9626_s1 + $0x6d8] ss:$12 sps:$4 sm:$0xff]  }
  0xe6   :  { %6364 = vmatprep.subr.bf16.mxu1 %v7014_v61  ;;  %v7118_v61 = vld [vmem:[%s9627_s0 + $0xc8] ss:$72 sps:$4 sm:$0xff]  }
  0xe7   :  { %3318 = vmatpush1.bf16.msra.mxu0 %v6929_v50  ;;  %v7087_v50 = vld [vmem:[%s9626_s1 + $0xc08] ss:$12 sps:$4 sm:$0xff]  }
  0xe8   :  { %3319 = vmatprep.subr.bf16.mxu0 %v6939_v52  ;;  %v7018_v52 = vld [vmem:[%s9626_s1 + $0x6c4] ss:$12 sps:$4 sm:$0xff]  }
  0xe9   :  { %6365 = vmatpush3.bf16.msra.mxu1 %v7015_v0  ;;  %v7101_v0 = vld [vmem:[%s9626_s1 + $0xd10] ss:$12 sps:$4 sm:$0xff]  }
  0xea   :  { %6366 = vmatprep.subr.bf16.mxu1 %v7019_v1  ;;  %v7131_v1 = vld [vmem:[%s9627_s0 + $0x44] ss:$72 sps:$4 sm:$0xff]  }
  0xeb   :  { %3320 = vmatpush1.bf16.msra.mxu0 %v6937_v56  ;;  %v7023_v56 = vld [vmem:[%s9626_s1 + $0x6dc] ss:$12 sps:$4 sm:$0xff]  }
  0xec   :  { %3321 = vmatprep.subr.bf16.mxu0 %v6944_v57  ;;  %v7092_v57 = vld [vmem:[%s9626_s1 + $0xc20] ss:$12 sps:$4 sm:$0xff]  }
  0xed   :  { %6367 = vmatpush3.bf16.msra.mxu1 %v7020_v3  ;;  %v7036_v3 = vld [vmem:[%s9626_s1 + $0x70c] ss:$12 sps:$4 sm:$0xff]  }
  0xee   :  { %6368 = vmatprep.subr.bf16.mxu1 %v7026_v5  ;;  %v7106_v5 = vld [vmem:[%s9626_s1 + $0xd28] ss:$12 sps:$4 sm:$0xff]  }
  0xef   :  { %3322 = vmatpush1.bf16.msra.mxu0 %v6942_v62  ;;  %v7031_v62 = vld [vmem:[%s9626_s1 + $0x6f4] ss:$12 sps:$4 sm:$0xff]  }
  0xf0   :  { %3323 = vmatprep.subr.bf16.mxu0 %v6952_v63  ;;  %v7097_v63 = vld [vmem:[%s9626_s1 + $0xc38] ss:$12 sps:$4 sm:$0xff]  }
  0xf1   :  { %6369 = vmatpush3.bf16.msra.mxu1 %v7028_v9  ;;  %v7107_v9 = vld [vmem:[%s9626_s1 + $0xc68] ss:$12 sps:$4 sm:$0xff]  }
  0xf2   :  { %6370 = vmatprep.subr.bf16.mxu1 %v7032_v11  ;;  %v7111_v11 = vld [vmem:[%s9626_s1 + $0xd40] ss:$12 sps:$4 sm:$0xff]  }
  0xf3   :  { %3324 = vmatpush1.bf16.msra.mxu0 %v6950_v2  ;;  %v7029_v2 = vld [vmem:[%s9626_s1 + $0x6f0] ss:$12 sps:$4 sm:$0xff]  }
  0xf4   :  { %3325 = vmatprep.subr.bf16.mxu0 %v6957_v4  ;;  %v7102_v4 = vld [vmem:[%s9626_s1 + $0xc50] ss:$12 sps:$4 sm:$0xff]  }
  0xf5   :  { %6371 = vmatpush3.bf16.msra.mxu1 %v7033_v14  ;;  %v7112_v14 = vld [vmem:[%s9626_s1 + $0xc80] ss:$12 sps:$4 sm:$0xff]  }
  0xf6   :  { %6384 = vmatprep.subr.bf16.mxu1 %v7040_v15  ;;  %v7119_v15 = vld [vmem:[%s9626_s1 + $0xd58] ss:$12 sps:$4 sm:$0xff]  }
  0xf7   :  { %3326 = vmatpush1.bf16.msra.mxu0 %v6955_v6  ;;  %v7034_v6 = vld [vmem:[%s9626_s1 + $0x708] ss:$12 sps:$4 sm:$0xff]  }
  0xf8   :  { %3327 = vmatprep.subr.bf16.mxu0 %v6962_v7  ;;  %3944 = vmatmul.mubr.bf16.vlgmr.msra.gmra.mrb[48].mxu1 %v7037_v17  ;;  %v7044_v7 = vld [vmem:[%s9626_s1 + $0x724] ss:$12 sps:$4 sm:$0xff]   ;;  %v7054_v17 = vld [vmem:[%s9626_s1 + $0x754] ss:$12 sps:$4 sm:$0xff]  }
  0xf9   :  { %6385 = vmatpush3.bf16.msra.mxu1 %v7041_v59  ;;  %3951 = vmatprep.mubr.bf16.mxu1 %v7070_v8  ;;  %v7120_v59 = vld [vmem:[%s9626_s1 + $0xc98] ss:$12 sps:$4 sm:$0xff]  }
  0xfa   :  { %6386 = vmatprep.subr.bf16.mxu1 %v7045_v20  ;;  %v7052_v20 = vld [vmem:[%s9626_s1 + $0x750] ss:$12 sps:$4 sm:$0xff]   ;;  %v7059_v8 = vld [vmem:[%s9626_s1 + $0x76c] ss:$12 sps:$4 sm:$0xff]  }
  0xfb   :  { %3328 = vmatpush1.bf16.msra.mxu0 %v6960_v12  ;;  %v7042_v12 = vld [vmem:[%s9626_s1 + $0x720] ss:$12 sps:$4 sm:$0xff]  }
  0xfc   :  { %3329 = vmatprep.subr.bf16.mxu0 %v6967_v13  ;;  %v7049_v13 = vld [vmem:[%s9626_s1 + $0x73c] ss:$12 sps:$4 sm:$0xff]  }
  0xfd   :  { %6387 = vmatpush3.bf16.msra.mxu1 %v7046_v23  ;;  %v7057_v23 = vld [vmem:[%s9626_s1 + $0x768] ss:$12 sps:$4 sm:$0xff]  }
  0xfe   :  { %6388 = vmatprep.subr.bf16.mxu1 %v7050_v24  ;;  %v7150_v24 = vld [vmem:[%s9627_s0 + $0xd4] ss:$72 sps:$4 sm:$0xff]  }
  0xff   :  { %3330 = vmatpush1.bf16.msra.mxu0 %v6965_v16  ;;  %v7047_v16 = vld [vmem:[%s9626_s1 + $0x738] ss:$12 sps:$4 sm:$0xff]  }
 0x100   :  { %3352 = vmatprep.subr.bf16.mxu0 %v6972_v19  ;;  %3952 = vmatmul.mubr.bf16.gmra.mrb[52].mxu1 %v7073_v26  ;;  %v7124_v19 = vld [vmem:[%s9626_s1 + $0xd70] ss:$12 sps:$4 sm:$0xff]   ;;  %v7062_v26 = vld [vmem:[%s9626_s1 + $0x780] ss:$12 sps:$4 sm:$0xff]  }
 0x101   :  { %6389 = vmatpush3.bf16.msra.mxu1 %v7051_v27  ;;  %3992 = vmatprep.mubr.bf16.mxu1 %v7085_v18  ;;  %v7152_v27 = vld [vmem:[%s9627_s0 + $0xd0] ss:$72 sps:$4 sm:$0xff]   ;;  %v7077_v18 = vld [vmem:[%s9626_s1 + $0x7b4] ss:$12 sps:$4 sm:$0xff]  }
 0x102   :  { %3332 = vmatmul.mubr.bf16.vlgmr.msra.gmra.mrb[0].mxu0 %v8049_v30  ;;  %v7055_v30 = vld [vmem:[%s9626_s1 + $0xb90] ss:$12 sps:$4 sm:$0xff]  }
 0x103   :  { %3353 = vmatpush1.bf16.msra.mxu0 %v6970_v21  ;;  %3341 = vmatprep.mubr.bf16.mxu0 %v8085_v41  ;;  %v7060_v41 = vld [vmem:[%s9626_s1 + $0xba8] ss:$12 sps:$4 sm:$0xff]   ;;  %v7125_v21 = vld [vmem:[%s9626_s1 + $0xcb0] ss:$12 sps:$4 sm:$0xff]  }
 0x104   :  { %3354 = vmatprep.subr.bf16.mxu0 %v6977_v22  ;;  %6390 = vmatprep.subr.bf16.mxu1 %v7055_v30  ;;  %v7129_v22 = vld [vmem:[%s9627_s0 + $0x40] ss:$72 sps:$4 sm:$0xff]  }
 0x105   :  { %6391 = vmatpush3.bf16.msra.mxu1 %v7056_v31  ;;  %v7483_v30 = vld [vmem:[%s9627_s0 + $0x20] ss:$72 sps:$4 sm:$0xff]   ;;  %v7075_v31 = vld [vmem:[%s9626_s1 + $0x7b0] ss:$12 sps:$4 sm:$0xff]  }
 0x106   :  { %6392 = vmatprep.subr.bf16.mxu1 %v7060_v41  ;;  %v7082_v41 = vld [vmem:[%s9626_s1 + $0x7cc] ss:$12 sps:$4 sm:$0xff]  }
 0x107   :  { %3355 = vmatpush1.bf16.msra.mxu0 %v6975_v25  ;;  %v7064_v25 = vld [vmem:[%s9626_s1 + $0x784] ss:$12 sps:$4 sm:$0xff]  }
 0x108   :  { %3356 = vmatprep.subr.bf16.mxu0 %v6985_v10  ;;  %v7069_v10 = vld [vmem:[%s9626_s1 + $0x79c] ss:$12 sps:$4 sm:$0xff]  }
 0x109   :  { %6393 = vmatpush3.bf16.msra.mxu1 %v7061_v34  ;;  %v7090_v34 = vld [vmem:[%s9626_s1 + $0x7e4] ss:$12 sps:$4 sm:$0xff]  }
 0x10a   :  { %3342 = vmatmul.mubr.bf16.gmra.mrb[4].mxu0 %v8093_v43  ;;  %v7003_v43 = vld [vmem:[%s9626_s1 + $0x67c] ss:$12 sps:$4 sm:$0xff]   ;;  %6394 = vmatprep.subr.bf16.mxu1 %v7065_v35  ;;  %v7486_v35 = vld [vmem:[%s9627_s0 + $0x2c] ss:$72 sps:$4 sm:$0xff]  }
 0x10b   :  { %3357 = vmatpush1.bf16.msra.mxu0 %v6983_v28  ;;  %3384 = vmatprep.mubr.bf16.mxu0 %v8121_v51  ;;  %v7001_v51 = vld [vmem:[%s9626_s1 + $0x678] ss:$12 sps:$4 sm:$0xff]  }
 0x10c   :  { %3358 = vmatprep.subr.bf16.mxu0 %v6990_v29  ;;  %v7067_v28 = vld [vmem:[%s9626_s1 + $0x798] ss:$12 sps:$4 sm:$0xff]   ;;  %v7484_v29 = vld [vmem:[%s9627_s0 + $0xb4] ss:$72 sps:$4 sm:$0xff]  }
 0x10d   :  { %6395 = vmatpush3.bf16.msra.mxu1 %v7066_v37  ;;  %v7093_v37 = vld [vmem:[%s9626_s1 + $0x7f8] ss:$12 sps:$4 sm:$0xff]  }
 0x10e   :  { %6396 = vmatprep.subr.bf16.mxu1 %v7072_v38  ;;  %v7100_v38 = vld [vmem:[%s9626_s1 + $0x814] ss:$12 sps:$4 sm:$0xff]  }
 0x10f   :  { %3359 = vmatpush1.bf16.msra.mxu0 %v6988_v32  ;;  %v7485_v32 = vld [vmem:[%s9627_s0 + $0xb0] ss:$72 sps:$4 sm:$0xff]  }
 0x110   :  { %3360 = vmatprep.subr.bf16.mxu0 %v6998_v33  ;;  %v7080_v33 = vld [vmem:[%s9626_s1 + $0x7c8] ss:$12 sps:$4 sm:$0xff]  }
 0x111   :  { %6397 = vmatpush3.bf16.msra.mxu1 %v7074_v39  ;;  %v7105_v39 = vld [vmem:[%s9626_s1 + $0x82c] ss:$12 sps:$4 sm:$0xff]  }
 0x112   :  { %6398 = vmatprep.subr.bf16.mxu1 %v7078_v42  ;;  %v7110_v42 = vld [vmem:[%s9626_s1 + $0x844] ss:$12 sps:$4 sm:$0xff]  }
 0x113   :  { %3361 = vmatpush1.bf16.msra.mxu0 %v6996_v36  ;;  %v7088_v36 = vld [vmem:[%s9626_s1 + $0x7e0] ss:$12 sps:$4 sm:$0xff]  }
 0x114   :  { %3362 = vmatprep.subr.bf16.mxu0 %v7003_v43  ;;  %v7095_v43 = vld [vmem:[%s9626_s1 + $0x7fc] ss:$12 sps:$4 sm:$0xff]  }
 0x115   :  { %6399 = vmatpush3.bf16.msra.mxu1 %v7079_v46  ;;  %v7113_v46 = vld [vmem:[%s9626_s1 + $0x858] ss:$12 sps:$4 sm:$0xff]  }
 0x116   :  { %6412 = vmatprep.subr.bf16.mxu1 %v7086_v47  ;;  %v7123_v47 = vld [vmem:[%s9626_s1 + $0x874] ss:$12 sps:$4 sm:$0xff]  }
 0x117   :  { %3363 = vmatpush1.bf16.msra.mxu0 %v7001_v51  ;;  %v7098_v51 = vld [vmem:[%s9626_s1 + $0x810] ss:$12 sps:$4 sm:$0xff]  }
 0x118   :  { %3364 = vmatprep.subr.bf16.mxu0 %v7008_v40  ;;  %3993 = vmatmul.mubr.bf16.vlgmr.msra.gmra.mrb[56].mxu1 %v7083_v49  ;;  %v7103_v40 = vld [vmem:[%s9626_s1 + $0x828] ss:$12 sps:$4 sm:$0xff]   ;;  %v7128_v49 = vld [vmem:[%s9626_s1 + $0x88c] ss:$12 sps:$4 sm:$0xff]  }
 0x119   :  { %6413 = vmatpush3.bf16.msra.mxu1 %v7087_v50  ;;  %4000 = vmatprep.mubr.bf16.mxu1 %v7116_v54  ;;  %v7126_v50 = vld [vmem:[%s9626_s1 + $0x888] ss:$12 sps:$4 sm:$0xff]  }
 0x11a   :  { %6414 = vmatprep.subr.bf16.mxu1 %v7091_v53  ;;  %v7132_v53 = vld [vmem:[%s9626_s1 + $0x8a0] ss:$12 sps:$4 sm:$0xff]   ;;  %v7137_v54 = vld [vmem:[%s9626_s1 + $0x8bc] ss:$12 sps:$4 sm:$0xff]  }
 0x11b   :  { %3365 = vmatpush1.bf16.msra.mxu0 %v7006_v44  ;;  %v7108_v44 = vld [vmem:[%s9626_s1 + $0x840] ss:$12 sps:$4 sm:$0xff]  }
 0x11c   :  { %3366 = vmatprep.subr.bf16.mxu0 %v7013_v45  ;;  %v7115_v45 = vld [vmem:[%s9626_s1 + $0x85c] ss:$12 sps:$4 sm:$0xff]  }
 0x11d   :  { %6415 = vmatpush3.bf16.msra.mxu1 %v7092_v57  ;;  %v7138_v57 = vld [vmem:[%s9626_s1 + $0x8d0] ss:$12 sps:$4 sm:$0xff]  }
 0x11e   :  { %6416 = vmatprep.subr.bf16.mxu1 %v7096_v58  ;;  %v7143_v58 = vld [vmem:[%s9626_s1 + $0x8ec] ss:$12 sps:$4 sm:$0xff]  }
 0x11f   :  { %3367 = vmatpush1.bf16.msra.mxu0 %v7011_v48  ;;  %v7121_v48 = vld [vmem:[%s9626_s1 + $0x870] ss:$12 sps:$4 sm:$0xff]  }
 0x120   :  { %3368 = vmatprep.subr.bf16.mxu0 %v7018_v52  ;;  %4001 = vmatmul.mubr.bf16.gmra.mrb[60].mxu1 %v7118_v61  ;;  %v7134_v52 = vld [vmem:[%s9626_s1 + $0x8a4] ss:$12 sps:$4 sm:$0xff]  }
 0x121   :  { %6417 = vmatpush3.bf16.msra.mxu1 %v7097_v63  ;;  %4041 = vmatprep.mubr.bf16.mxu1 %v7131_v1  ;;  %v7146_v61 = vld [vmem:[%s9626_s1 + $0x904] ss:$12 sps:$4 sm:$0xff]   ;;  %v7149_v63 = vld [vmem:[%s9626_s1 + $0x91c] ss:$12 sps:$4 sm:$0xff]  }
 0x122   :  { %6418 = vmatprep.subr.bf16.mxu1 %v7101_v0  ;;  %v6204_v0 = vpop.f32.mrb[0].mxu1  ;;  %v7487_v1 = vld [vmem:[%s9627_s0 + $0x28] ss:$72 sps:$4 sm:$0xff]  }
 0x123   :  { %3369 = vmatpush1.bf16.msra.mxu0 %v7016_v55  ;;  %v7135_v55 = vld [vmem:[%s9626_s1 + $0x8b8] ss:$12 sps:$4 sm:$0xff]  }
 0x124   :  { %3370 = vmatprep.subr.bf16.mxu0 %v7023_v56  ;;  %v7140_v56 = vld [vmem:[%s9626_s1 + $0x8d4] ss:$12 sps:$4 sm:$0xff]  }
 0x125   :  { %6419 = vmatpush3.bf16.msra.mxu1 %v7102_v4  ;;  %v641_v4 = vlaneseq }
 0x126   :  { %6420 = vmatprep.subr.bf16.mxu1 %v7106_v5  ;;  %v6205_v5 = vpop.f32.mrb[1].mxu1 }
 0x127   :  { %3371 = vmatpush1.bf16.msra.mxu0 %v7021_v60  ;;  %v7141_v60 = vld [vmem:[%s9626_s1 + $0x8e8] ss:$12 sps:$4 sm:$0xff]  }
 0x128   :  { %3372 = vmatprep.subr.bf16.mxu0 %v7031_v62  ;;  %v7144_v62 = vld [vmem:[%s9626_s1 + $0x900] ss:$12 sps:$4 sm:$0xff]  }
 0x129   :  { %6421 = vmatpush3.bf16.msra.mxu1 %v7107_v9  ;;  %v6207_v9 = vpop.f32.mrb[2].mxu1 }
 0x12a   :  { %6422 = vmatprep.subr.bf16.mxu1 %v7111_v11  ;;  %v8741_v11 = vshrl.u32 %v641_v4, 7 }
 0x12b   :  { %3373 = vmatpush1.bf16.msra.mxu0 %v7029_v2  ;;  %v7147_v2 = vld [vmem:[%s9626_s1 + $0x918] ss:$12 sps:$4 sm:$0xff]  }
 0x12c   :  { %3374 = vmatprep.subr.bf16.mxu0 %v7036_v3  ;;  %v7488_v3 = vld [vmem:[%s9627_s0 + $0xbc] ss:$72 sps:$4 sm:$0xff]  }
 0x12d   :  { %6423 = vmatpush3.bf16.msra.mxu1 %v7112_v14 }
 0x12e   :  { %6424 = vmatprep.subr.bf16.mxu1 %v7119_v15 }
 0x12f   :  { %3375 = vmatpush1.bf16.msra.mxu0 %v7034_v6  ;;  %v7155_v6 = vld [vmem:[%s9626_s1 + $0x934] ss:$12 sps:$4 sm:$0xff]  }
 0x130   :  { %3376 = vmatprep.subr.bf16.mxu0 %v7044_v7  ;;  %v6206_v7 = vadd.f32 %v6205_v5, %v6204_v0  ;;  %v7168_v5 = vld [vmem:[%s9626_s1 + $0x9a8] ss:$12 sps:$4 sm:$0xff]  }
 0x131   :  { %6425 = vmatpush3.bf16.msra.mxu1 %v7120_v59 }
 0x132   :  { %6426 = vmatprep.subr.bf16.mxu1 %v7124_v19  ;;  %v7158_v19 = vld [vmem:[%s9626_s1 + $0x94c] ss:$12 sps:$4 sm:$0xff]  }
 0x133   :  { %3377 = vmatpush1.bf16.msra.mxu0 %v7042_v12  ;;  %v6208_v12 = vpop.f32.mrb[3].mxu1 }
 0x134   :  { %3378 = vmatprep.subr.bf16.mxu0 %v7049_v13  ;;  %v639_v13 = vld [vmem:[%s9628_s2] sm:$0x7]  ;;  %v6209_v14 = vadd.f32 %v6208_v12, %v6207_v9  ;;  %v6210_v15 = vpop.f32.mrb[4].mxu1 }
 0x135   :  { %6427 = vmatpush3.bf16.msra.mxu1 %v7125_v21  ;;  %v6211_v59 = vpop.f32.mrb[5].mxu1 }
 0x136   :  { %v6213_v21 = vpop.f32.mrb[6].mxu1 }
 0x137   :  { %3379 = vmatpush1.bf16.msra.mxu0 %v7047_v16  ;;  %v7153_v16 = vld [vmem:[%s9626_s1 + $0x930] ss:$12 sps:$4 sm:$0xff]  }
 0x138   :  { %3380 = vmatprep.subr.bf16.mxu0 %v7054_v17  ;;  %4042 = vmatmul.mubr.bf16.vlgmr.msra.gmra.mrb[64].mxu1 %v7129_v22  ;;  %v8750_v17 = vsub.s32 2, %v8741_v11  ;;  %v6214_v22 = vpop.f32.mrb[7].mxu1 }
 0x139   :  { %4049 = vmatprep.mubr.bf16.mxu1 %v7150_v24  ;;  %v6215_v24 = vadd.f32 %v6214_v22, %v6213_v21  ;;  %v7176_v21 = vld [vmem:[%s9626_s1 + $0x9dc] ss:$12 sps:$4 sm:$0xff]  }
 0x13b   :  { %3381 = vmatpush1.bf16.msra.mxu0 %v7052_v20  ;;  %v6212_v20 = vadd.f32 %v6211_v59, %v6210_v15 }
 0x13c   :  { %3382 = vmatprep.subr.bf16.mxu0 %v7059_v8  ;;  %v652_v8 = vrot.slane %v639_v13, %v8750_v17 }
 0x13f   :  { %3383 = vmatpush1.bf16.msra.mxu0 %v7057_v23  ;;  %v7489_v23 = vld [vmem:[%s9627_s0 + $0xb8] ss:$72 sps:$4 sm:$0xff]  }
 0x140   :  { %3405 = vmatprep.subr.bf16.mxu0 %v7064_v25  ;;  %4050 = vmatmul.mubr.bf16.gmra.mrb[68].mxu1 %v7152_v27  ;;  %v6232_v25 = vpop.f32.mrb[8].mxu1  ;;  %v3652_v27 = vadd.f32 %v6206_v7, %v652_v8  ;;  %v7173_v7 = vld [vmem:[%s9626_s1 + $0x9c4] ss:$12 sps:$4 sm:$0xff]  }
 0x142   :  { %3385 = vmatmul.mubr.bf16.vlgmr.msra.gmra.mrb[0].mxu0 %v7483_v30  ;;  %v6233_v30 = vpop.f32.mrb[9].mxu1 }
 0x143   :  { %3406 = vmatpush1.bf16.msra.mxu0 %v7062_v26  ;;  %3394 = vmatprep.mubr.bf16.mxu0 %v7484_v29  ;;  %v7156_v26 = vld [vmem:[%s9626_s1 + $0x948] ss:$12 sps:$4 sm:$0xff]   ;;  %v6234_v29 = vadd.f32 %v6233_v30, %v6232_v25 }
 0x144   :  { %3407 = vmatprep.subr.bf16.mxu0 %v7069_v10  ;;  %v7490_v10 = vld [vmem:[%s9627_s0 + $0x34] ss:$72 sps:$4 sm:$0xff]  }
 0x147   :  { %3408 = vmatpush1.bf16.msra.mxu0 %v7067_v28  ;;  %v7161_v28 = vld [vmem:[%s9626_s1 + $0x964] ss:$12 sps:$4 sm:$0xff]  }
 0x148   :  { %3409 = vmatprep.subr.bf16.mxu0 %v7077_v18  ;;  %v3655_v18 = vadd.f32 %v6209_v14, %v652_v8 }
 0x14a   :  { %3395 = vmatmul.mubr.bf16.gmra.mrb[4].mxu0 %v7485_v32  ;;  %v3660_v32 = vadd.f32 %v6212_v20, %v652_v8 }
 0x14b   :  { %3410 = vmatpush1.bf16.msra.mxu0 %v7075_v31  ;;  %3437 = vmatprep.mubr.bf16.mxu0 %v7486_v35  ;;  %v6235_v31 = vpop.f32.mrb[10].mxu1 }
 0x14c   :  { %3411 = vmatprep.subr.bf16.mxu0 %v7082_v41  ;;  %v6236_v41 = vpop.f32.mrb[11].mxu1 }
 0x14d   :  { %v6238_v35 = vpop.f32.mrb[12].mxu1 }
 0x14f   :  { %3412 = vmatpush1.bf16.msra.mxu0 %v7080_v33  ;;  %v3701_v33 = vadd.f32 %v6234_v29, %v3652_v27  ;;  %v7174_v27 = vld [vmem:[%s9626_s1 + $0x9d8] ss:$12 sps:$4 sm:$0xff]  }
 0x150   :  { %3413 = vmatprep.subr.bf16.mxu0 %v7090_v34  ;;  %v6237_v34 = vadd.f32 %v6236_v41, %v6235_v31 }
 0x153   :  { %3414 = vmatpush1.bf16.msra.mxu0 %v7088_v36  ;;  %v7159_v36 = vld [vmem:[%s9626_s1 + $0x960] ss:$12 sps:$4 sm:$0xff]  }
 0x154   :  { %3415 = vmatprep.subr.bf16.mxu0 %v7095_v43  ;;  %v6239_v43 = vpop.f32.mrb[13].mxu1 }
 0x157   :  { %3416 = vmatpush1.bf16.msra.mxu0 %v7093_v37  ;;  %v7164_v37 = vld [vmem:[%s9626_s1 + $0x97c] ss:$12 sps:$4 sm:$0xff]  }
 0x158   :  { %3417 = vmatprep.subr.bf16.mxu0 %v7100_v38  ;;  %v3663_v38 = vadd.f32 %v6215_v24, %v652_v8 }
 0x15b   :  { %3418 = vmatpush1.bf16.msra.mxu0 %v7098_v51  ;;  %v3704_v51 = vadd.f32 %v6237_v34, %v3655_v18 }
 0x15c   :  { %3419 = vmatprep.subr.bf16.mxu0 %v7105_v39  ;;  %v6240_v39 = vadd.f32 %v6239_v43, %v6238_v35  ;;  %v7177_v35 = vld [vmem:[%s9626_s1 + $0x9f0] ss:$12 sps:$4 sm:$0xff]   ;;  %v7182_v43 = vld [vmem:[%s9626_s1 + $0xa0c] ss:$12 sps:$4 sm:$0xff]  }
 0x15f   :  { %3420 = vmatpush1.bf16.msra.mxu0 %v7103_v40  ;;  %v6241_v40 = vpop.f32.mrb[14].mxu1 }
 0x160   :  { %3421 = vmatprep.subr.bf16.mxu0 %v7110_v42  ;;  %v6242_v42 = vpop.f32.mrb[15].mxu1 }
 0x163   :  { %3422 = vmatpush1.bf16.msra.mxu0 %v7108_v44  ;;  %v3709_v44 = vadd.f32 %v6240_v39, %v3660_v32 }
 0x164   :  { %3423 = vmatprep.subr.bf16.mxu0 %v7115_v45  ;;  %v6243_v45 = vadd.f32 %v6242_v42, %v6241_v40 }
 0x167   :  { %3424 = vmatpush1.bf16.msra.mxu0 %v7113_v46  ;;  %v6260_v46 = vpop.f32.mrb[16].mxu1 }
 0x168   :  { %3425 = vmatprep.subr.bf16.mxu0 %v7123_v47  ;;  %v7162_v47 = vld [vmem:[%s9626_s1 + $0x978] ss:$12 sps:$4 sm:$0xff]  }
 0x16b   :  { %3426 = vmatpush1.bf16.msra.mxu0 %v7121_v48  ;;  %v6261_v48 = vpop.f32.mrb[17].mxu1 }
 0x16c   :  { %3427 = vmatprep.subr.bf16.mxu0 %v7128_v49  ;;  %v7167_v49 = vld [vmem:[%s9626_s1 + $0x994] ss:$12 sps:$4 sm:$0xff]  }
 0x16f   :  { %3428 = vmatpush1.bf16.msra.mxu0 %v7126_v50  ;;  %v3712_v50 = vadd.f32 %v6243_v45, %v3663_v38  ;;  %v7185_v45 = vld [vmem:[%s9626_s1 + $0xa24] ss:$12 sps:$4 sm:$0xff]  }
 0x170   :  { %3429 = vmatprep.subr.bf16.mxu0 %v7134_v52  ;;  %v6262_v52 = vadd.f32 %v6261_v48, %v6260_v46  ;;  %v7188_v48 = vld [vmem:[%s9626_s1 + $0xa3c] ss:$12 sps:$4 sm:$0xff]  }
 0x173   :  { %3430 = vmatpush1.bf16.msra.mxu0 %v7132_v53  ;;  %v6263_v53 = vpop.f32.mrb[18].mxu1 }
 0x174   :  { %3431 = vmatprep.subr.bf16.mxu0 %v7137_v54  ;;  %v6264_v54 = vpop.f32.mrb[19].mxu1 }
 0x177   :  { %3432 = vmatpush1.bf16.msra.mxu0 %v7135_v55  ;;  %v3750_v55 = vadd.f32 %v6262_v52, %v3701_v33  ;;  %v7186_v52 = vld [vmem:[%s9626_s1 + $0xa38] ss:$12 sps:$4 sm:$0xff]  }
 0x178   :  { %3433 = vmatprep.subr.bf16.mxu0 %v7140_v56  ;;  %v6265_v56 = vadd.f32 %v6264_v54, %v6263_v53 }
 0x17b   :  { %3434 = vmatpush1.bf16.msra.mxu0 %v7138_v57  ;;  %v6266_v57 = vpop.f32.mrb[20].mxu1 }
 0x17c   :  { %3435 = vmatprep.subr.bf16.mxu0 %v7143_v58  ;;  %v7165_v58 = vld [vmem:[%s9626_s1 + $0x990] ss:$12 sps:$4 sm:$0xff]  }
 0x17f   :  { %3436 = vmatpush1.bf16.msra.mxu0 %v7141_v60  ;;  %v6267_v60 = vpop.f32.mrb[21].mxu1 }
 0x180   :  { %3458 = vmatprep.subr.bf16.mxu0 %v7146_v61  ;;  %v7170_v61 = vld [vmem:[%s9626_s1 + $0x9ac] ss:$12 sps:$4 sm:$0xff]   ;;  %v6269_v0 = vpop.f32.mrb[22].mxu1 }
 0x182   :  { %3438 = vmatmul.mubr.bf16.vlgmr.msra.gmra.mrb[0].mxu0 %v7487_v1  ;;  %v6270_v1 = vpop.f32.mrb[23].mxu1 }
 0x183   :  { %3459 = vmatpush1.bf16.msra.mxu0 %v7144_v62  ;;  %3447 = vmatprep.mubr.bf16.mxu0 %v7488_v3  ;;  %v3753_v62 = vadd.f32 %v6265_v56, %v3704_v51  ;;  %v6271_v3 = vadd.f32 %v6270_v1, %v6269_v0  ;;  %v6288_v4 = vpop.f32.mrb[24].mxu1  ;;  %v7192_v1 = vld [vmem:[%s9626_s1 + $0xa68] ss:$12 sps:$4 sm:$0xff]  }
 0x184   :  { %3460 = vmatprep.subr.bf16.mxu0 %v7149_v63  ;;  %v6268_v63 = vadd.f32 %v6267_v60, %v6266_v57  ;;  %v7189_v60 = vld [vmem:[%s9626_s1 + $0xa50] ss:$12 sps:$4 sm:$0xff]  }
 0x185   :  { %v3761_v9 = vadd.f32 %v6271_v3, %v3712_v50 }
 0x187   :  { %3461 = vmatpush1.bf16.msra.mxu0 %v7147_v2  ;;  %v3758_v2 = vadd.f32 %v6268_v63, %v3709_v44  ;;  %v7180_v44 = vld [vmem:[%s9626_s1 + $0xa08] ss:$12 sps:$4 sm:$0xff]  }
 0x188   :  { %3462 = vmatprep.subr.bf16.mxu0 %v7155_v6  ;;  %v6289_v6 = vpop.f32.mrb[25].mxu1 }
 0x189   :  { %v6290_v12 = vadd.f32 %v6289_v6, %v6288_v4  ;;  %v6291_v13 = vpop.f32.mrb[26].mxu1  ;;  %v7197_v4 = vld [vmem:[%s9626_s1 + $0xa84] ss:$12 sps:$4 sm:$0xff]  }
 0x18a   :  { %3448 = vmatmul.mubr.bf16.gmra.mrb[4].mxu0 %v7489_v23  ;;  %v6292_v14 = vpop.f32.mrb[27].mxu1 }
 0x18b   :  { %3463 = vmatpush1.bf16.msra.mxu0 %v7153_v16  ;;  %3490 = vmatprep.mubr.bf16.mxu0 %v7490_v10  ;;  %v3799_v15 = vadd.f32 %v6290_v12, %v3750_v55  ;;  %v6293_v16 = vadd.f32 %v6292_v14, %v6291_v13  ;;  %v6294_v59 = vpop.f32.mrb[28].mxu1  ;;  %v7191_v55 = vld [vmem:[%s9626_s1 + $0xa54] ss:$12 sps:$4 sm:$0xff]   ;;  %v7200_v13 = vld [vmem:[%s9626_s1 + $0xa9c] ss:$12 sps:$4 sm:$0xff]  }
 0x18c   :  { %3464 = vmatprep.subr.bf16.mxu0 %v7158_v19  ;;  %v7171_v19 = vld [vmem:[%s9626_s1 + $0x9c0] ss:$12 sps:$4 sm:$0xff]   ;;  %v6295_v20 = vpop.f32.mrb[29].mxu1  ;;  %v7491_v14 = vld [vmem:[%s9627_s0 + $0x30] ss:$72 sps:$4 sm:$0xff]  }
 0x18d   :  { %v3802_v8 = vadd.f32 %v6293_v16, %v3753_v62  ;;  %v6296_v22 = vadd.f32 %v6295_v20, %v6294_v59  ;;  %v6297_v23 = vpop.f32.mrb[30].mxu1  ;;  %v7194_v62 = vld [vmem:[%s9626_s1 + $0xa6c] ss:$12 sps:$4 sm:$0xff]   ;;  %v7203_v59 = vld [vmem:[%s9626_s1 + $0xab4] ss:$12 sps:$4 sm:$0xff]  }
 0x18e   :  { %v6298_v24 = vpop.f32.mrb[31].mxu1  ;;  %v7492_v16 = vld [vmem:[%s9627_s0 + $0xc4] ss:$72 sps:$4 sm:$0xff]  }
 0x18f   :  { %3465 = vmatpush1.bf16.msra.mxu0 %v7156_v26  ;;  %v3807_v25 = vadd.f32 %v6296_v22, %v3758_v2  ;;  %v6299_v26 = vadd.f32 %v6298_v24, %v6297_v23  ;;  %v6316_v10 = vpop.f32.mrb[32].mxu1  ;;  %v7206_v20 = vld [vmem:[%s9626_s1 + $0xacc] ss:$12 sps:$4 sm:$0xff]   ;;  %v7493_v22 = vld [vmem:[%s9627_s0 + $0xc0] ss:$72 sps:$4 sm:$0xff]  }
 0x190   :  { %3466 = vmatprep.subr.bf16.mxu0 %v7161_v28  ;;  %v6317_v30 = vpop.f32.mrb[33].mxu1  ;;  %v7179_v28 = vld [vmem:[%s9626_s1 + $0x9f4] ss:$12 sps:$4 sm:$0xff]   ;;  %v7494_v23 = vld [vmem:[%s9627_s0 + $0x3c] ss:$72 sps:$4 sm:$0xff]  }
 0x191   :  { %v3810_v18 = vadd.f32 %v6299_v26, %v3761_v9  ;;  %v6318_v29 = vadd.f32 %v6317_v30, %v6316_v10  ;;  %v6319_v31 = vpop.f32.mrb[34].mxu1  ;;  %v7195_v9 = vld [vmem:[%s9626_s1 + $0xa80] ss:$12 sps:$4 sm:$0xff]   ;;  %v7296_v26 = vld [vmem:[%s9629_s3 + $0x1c] ss:$12 sps:$4 sm:$0xff]  }
 0x192   :  { %v6320_v41 = vpop.f32.mrb[35].mxu1  ;;  %v7291_v24 = vld [vmem:[%s9629_s3] ss:$12 sps:$4 sm:$0xff]   ;;  %v7294_v30 = vld [vmem:[%s9629_s3 + $0x18] ss:$12 sps:$4 sm:$0xff]  }
 0x193   :  { %3467 = vmatpush1.bf16.msra.mxu0 %v7159_v36  ;;  %v3848_v32 = vadd.f32 %v6318_v29, %v3799_v15  ;;  %v6321_v33 = vadd.f32 %v6320_v41, %v6319_v31  ;;  %v6322_v34 = vpop.f32.mrb[36].mxu1  ;;  %v7198_v15 = vld [vmem:[%s9626_s1 + $0xa98] ss:$12 sps:$4 sm:$0xff]   ;;  %v7207_v10 = vld [vmem:[%s9626_s1 + $0xae0] ss:$12 sps:$4 sm:$0xff]  }
 0x194   :  { %3468 = vmatprep.subr.bf16.mxu0 %v7164_v37  ;;  %v6323_v36 = vpop.f32.mrb[37].mxu1  ;;  %v7210_v29 = vld [vmem:[%s9626_s1 + $0xaf8] ss:$12 sps:$4 sm:$0xff]   ;;  %v7215_v31 = vld [vmem:[%s9626_s1 + $0xb14] ss:$12 sps:$4 sm:$0xff]  }
 0x195   :  { %v3851_v37 = vadd.f32 %v6321_v33, %v3802_v8  ;;  %v6324_v38 = vadd.f32 %v6323_v36, %v6322_v34  ;;  %v6325_v51 = vpop.f32.mrb[38].mxu1  ;;  %v7209_v8 = vld [vmem:[%s9626_s1 + $0xae4] ss:$12 sps:$4 sm:$0xff]   ;;  %v7302_v36 = vld [vmem:[%s9629_s3 + $0x4c] ss:$12 sps:$4 sm:$0xff]  }
 0x196   :  { %v6326_v39 = vpop.f32.mrb[39].mxu1  ;;  %v7297_v34 = vld [vmem:[%s9629_s3 + $0x30] ss:$12 sps:$4 sm:$0xff]  }
 0x197   :  { %3469 = vmatpush1.bf16.msra.mxu0 %v7162_v47  ;;  %v3856_v40 = vadd.f32 %v6324_v38, %v3807_v25  ;;  %v6327_v42 = vadd.f32 %v6326_v39, %v6325_v51  ;;  %v7183_v47 = vld [vmem:[%s9626_s1 + $0xa20] ss:$12 sps:$4 sm:$0xff]   ;;  %v7293_v25 = vld [vmem:[%s9629_s3 + $0x4] ss:$12 sps:$4 sm:$0xff]  }
 0x198   :  { %3470 = vmatprep.subr.bf16.mxu0 %v7167_v49  ;;  %4573 = vmatprep.subr.bf16.mxu1 %v7293_v25  ;;  %v7213_v38 = vld [vmem:[%s9626_s1 + $0xb10] ss:$12 sps:$4 sm:$0xff]   ;;  %v7218_v51 = vld [vmem:[%s9626_s1 + $0xb2c] ss:$12 sps:$4 sm:$0xff]  }
 0x199   :  { %v3859_v46 = vadd.f32 %v6327_v42, %v3810_v18  ;;  %4574 = vmatpush1.bf16.msra.mxu1 %v7291_v24  ;;  %v7305_v42 = vld [vmem:[%s9629_s3 + $0x64] ss:$12 sps:$4 sm:$0xff]  }
 0x19a   :  { %4575 = vmatprep.subr.bf16.mxu1 %v7296_v26 }
 0x19b   :  { %3471 = vmatpush1.bf16.msra.mxu0 %v7165_v58 }
 0x19c   :  { %3472 = vmatprep.subr.bf16.mxu0 %v7170_v61 }
 0x19d   :  { %4576 = vmatpush1.bf16.msra.mxu1 %v7294_v30 }
 0x19f   :  { %3473 = vmatpush1.bf16.msra.mxu0 %v7168_v5 }
 0x1a0   :  { %3474 = vmatprep.subr.bf16.mxu0 %v7173_v7 }
 0x1a3   :  { %3475 = vmatpush1.bf16.msra.mxu0 %v7171_v19  ;;  %v7201_v19 = vld [vmem:[%s9626_s1 + $0xab0] ss:$12 sps:$4 sm:$0xff]  }
 0x1a4   :  { %3476 = vmatprep.subr.bf16.mxu0 %v7176_v21  ;;  %v7204_v21 = vld [vmem:[%s9626_s1 + $0xac8] ss:$12 sps:$4 sm:$0xff]  }
 0x1a7   :  { %3477 = vmatpush1.bf16.msra.mxu0 %v7174_v27  ;;  %v7212_v27 = vld [vmem:[%s9626_s1 + $0xafc] ss:$12 sps:$4 sm:$0xff]  }
 0x1a8   :  { %3478 = vmatprep.subr.bf16.mxu0 %v7179_v28  ;;  %v7299_v28 = vld [vmem:[%s9629_s3 + $0x34] ss:$12 sps:$4 sm:$0xff]  }
 0x1a9   :  { %4577 = vmatprep.subr.bf16.mxu1 %v7299_v28  ;;  %v7324_v28 = vld [vmem:[%s9629_s3 + $0x108] ss:$12 sps:$4 sm:$0xff]  }
 0x1aa   :  { %4578 = vmatpush1.bf16.msra.mxu1 %v7297_v34 }
 0x1ab   :  { %3479 = vmatpush1.bf16.msra.mxu0 %v7177_v35  ;;  %v6344_v49 = vpop.f32.mrb[40].mxu1  ;;  %4579 = vmatprep.subr.bf16.mxu1 %v7302_v36  ;;  %v7245_v36 = vld [vmem:[%s9626_s1 + $0xc04] ss:$12 sps:$4 sm:$0xff]  }
 0x1ac   :  { %3480 = vmatprep.subr.bf16.mxu0 %v7182_v43  ;;  %v6345_v50 = vpop.f32.mrb[41].mxu1 }
 0x1ad   :  { %v6346_v53 = vadd.f32 %v6345_v50, %v6344_v49  ;;  %v6347_v54 = vpop.f32.mrb[42].mxu1  ;;  %v7303_v50 = vld [vmem:[%s9629_s3 + $0x60] ss:$12 sps:$4 sm:$0xff]  }
 0x1ae   :  { %v6348_v56 = vpop.f32.mrb[43].mxu1 }
 0x1af   :  { %3481 = vmatpush1.bf16.msra.mxu0 %v7180_v44  ;;  %v8828_v57 = vadd.f32 %v6346_v53, %v3848_v32  ;;  %v6349_v58 = vadd.f32 %v6348_v56, %v6347_v54  ;;  %v7308_v53 = vld [vmem:[%s9629_s3 + $0x7c] ss:$12 sps:$4 sm:$0xff]   ;;  %v7219_v54 = vld [vmem:[%s9626_s1 + $0xb40] ss:$12 sps:$4 sm:$0xff]  }
 0x1b0   :  { %3482 = vmatprep.subr.bf16.mxu0 %v7185_v45  ;;  %v7216_v45 = vld [vmem:[%s9626_s1 + $0xb28] ss:$12 sps:$4 sm:$0xff]  }
 0x1b1   :  { %v8833_v61 = vadd.f32 %v6349_v58, %v3851_v37  ;;  %v7224_v58 = vld [vmem:[%s9626_s1 + $0xb5c] ss:$12 sps:$4 sm:$0xff]  }
 0x1b3   :  { %3483 = vmatpush1.bf16.msra.mxu0 %v7183_v47  ;;  %v6350_v63 = vpop.f32.mrb[44].mxu1 }
 0x1b4   :  { %3484 = vmatprep.subr.bf16.mxu0 %v7188_v48  ;;  %v6351_v0 = vpop.f32.mrb[45].mxu1 }
 0x1b5   :  { %v6352_v2 = vadd.f32 %v6351_v0, %v6350_v63  ;;  %v6353_v3 = vpop.f32.mrb[46].mxu1  ;;  %v7309_v63 = vld [vmem:[%s9629_s3 + $0x90] ss:$12 sps:$4 sm:$0xff]   ;;  %v7227_v0 = vld [vmem:[%s9626_s1 + $0xb74] ss:$12 sps:$4 sm:$0xff]  }
 0x1b6   :  { %v6354_v5 = vpop.f32.mrb[47].mxu1 }
 0x1b7   :  { %3485 = vmatpush1.bf16.msra.mxu0 %v7186_v52  ;;  %v8844_v6 = vadd.f32 %v6352_v2, %v3856_v40  ;;  %v6355_v7 = vadd.f32 %v6354_v5, %v6353_v3  ;;  %v7300_v40 = vld [vmem:[%s9629_s3 + $0x48] ss:$12 sps:$4 sm:$0xff]   ;;  %v7225_v2 = vld [vmem:[%s9626_s1 + $0xb70] ss:$12 sps:$4 sm:$0xff]  }
 0x1b8   :  { %3486 = vmatprep.subr.bf16.mxu0 %v7191_v55  ;;  %4580 = vmatpush1.bf16.msra.mxu1 %v7300_v40  ;;  %v7312_v3 = vld [vmem:[%s9629_s3 + $0xa8] ss:$12 sps:$4 sm:$0xff]   ;;  %v7317_v5 = vld [vmem:[%s9629_s3 + $0xc4] ss:$12 sps:$4 sm:$0xff]  }
 0x1b9   :  { %v8849_v12 = vadd.f32 %v6355_v7, %v3859_v46  ;;  %v7221_v46 = vld [vmem:[%s9626_s1 + $0xb44] ss:$12 sps:$4 sm:$0xff]   ;;  %4581 = vmatprep.subr.bf16.mxu1 %v7305_v42  ;;  %v7315_v7 = vld [vmem:[%s9629_s3 + $0xc0] ss:$12 sps:$4 sm:$0xff]   ;;  %v7248_v42 = vld [vmem:[%s9626_s1 + $0xc1c] ss:$12 sps:$4 sm:$0xff]  }
 0x1bb   :  { %3487 = vmatpush1.bf16.msra.mxu0 %v7189_v60  ;;  %v7311_v60 = vld [vmem:[%s9629_s3 + $0x94] ss:$12 sps:$4 sm:$0xff]  }
 0x1bc   :  { %3488 = vmatprep.subr.bf16.mxu0 %v7194_v62  ;;  %4582 = vmatpush1.bf16.msra.mxu1 %v7303_v50  ;;  %v7222_v62 = vld [vmem:[%s9626_s1 + $0xb58] ss:$12 sps:$4 sm:$0xff]  }
 0x1bd   :  { %4583 = vmatprep.subr.bf16.mxu1 %v7308_v53  ;;  %v7254_v50 = vld [vmem:[%s9626_s1 + $0xc4c] ss:$12 sps:$4 sm:$0xff]   ;;  %v7252_v53 = vld [vmem:[%s9626_s1 + $0xc48] ss:$12 sps:$4 sm:$0xff]  }
 0x1bf   :  { %3489 = vmatpush1.bf16.msra.mxu0 %v7192_v1  ;;  %v7314_v1 = vld [vmem:[%s9629_s3 + $0xac] ss:$12 sps:$4 sm:$0xff]  }
 0x1c0   :  { %3511 = vmatprep.subr.bf16.mxu0 %v7197_v4  ;;  %v7230_v4 = vld [vmem:[%s9626_s1 + $0xb8c] ss:$12 sps:$4 sm:$0xff]  }
 0x1c2   :  { %3491 = vmatmul.mubr.bf16.vlgmr.msra.gmra.mrb[0].mxu0 %v7491_v14  ;;  %v7318_v14 = vld [vmem:[%s9629_s3 + $0xd8] ss:$12 sps:$4 sm:$0xff]  }
 0x1c3   :  { %3512 = vmatpush1.bf16.msra.mxu0 %v7195_v9  ;;  %3500 = vmatprep.mubr.bf16.mxu0 %v7492_v16  ;;  %v7233_v9 = vld [vmem:[%s9626_s1 + $0xba4] ss:$12 sps:$4 sm:$0xff]   ;;  %v7323_v16 = vld [vmem:[%s9629_s3 + $0xf4] ss:$12 sps:$4 sm:$0xff]  }
 0x1c4   :  { %3513 = vmatprep.subr.bf16.mxu0 %v7200_v13  ;;  %v7231_v13 = vld [vmem:[%s9626_s1 + $0xba0] ss:$12 sps:$4 sm:$0xff]  }
 0x1c7   :  { %3514 = vmatpush1.bf16.msra.mxu0 %v7198_v15  ;;  %v7236_v15 = vld [vmem:[%s9626_s1 + $0xbbc] ss:$12 sps:$4 sm:$0xff]  }
 0x1c8   :  { %3515 = vmatprep.subr.bf16.mxu0 %v7203_v59  ;;  %v7234_v59 = vld [vmem:[%s9626_s1 + $0xbb8] ss:$12 sps:$4 sm:$0xff]  }
 0x1ca   :  { %3501 = vmatmul.mubr.bf16.gmra.mrb[4].mxu0 %v7493_v22  ;;  %v7326_v22 = vld [vmem:[%s9629_s3 + $0x10c] ss:$12 sps:$4 sm:$0xff]  }
 0x1cb   :  { %3516 = vmatpush1.bf16.msra.mxu0 %v7201_v19  ;;  %3543 = vmatprep.mubr.bf16.mxu0 %v7494_v23  ;;  %v6372_v18 = vpop.f32.mrb[48].mxu1 }
 0x1cc   :  { %3517 = vmatprep.subr.bf16.mxu0 %v7206_v20  ;;  %v6373_v41 = vpop.f32.mrb[49].mxu1  ;;  %v7321_v20 = vld [vmem:[%s9629_s3 + $0xf0] ss:$12 sps:$4 sm:$0xff]  }
 0x1cd   :  { %v6374_v32 = vadd.f32 %v6373_v41, %v6372_v18  ;;  %v6375_v33 = vpop.f32.mrb[50].mxu1  ;;  %v7242_v18 = vld [vmem:[%s9626_s1 + $0xbec] ss:$12 sps:$4 sm:$0xff]  }
 0x1ce   :  { %v6376_v35 = vpop.f32.mrb[51].mxu1 }
 0x1cf   :  { %3518 = vmatpush1.bf16.msra.mxu0 %v7204_v21  ;;  %v8918_v43 = vadd.f32 %v6374_v32, %v8828_v57  ;;  %v6377_v37 = vadd.f32 %v6376_v35, %v6375_v33  ;;  %v7306_v57 = vld [vmem:[%s9629_s3 + $0x78] ss:$12 sps:$4 sm:$0xff]   ;;  %v7239_v21 = vld [vmem:[%s9626_s1 + $0xbd4] ss:$12 sps:$4 sm:$0xff]  }
 0x1d0   :  { %3519 = vmatprep.subr.bf16.mxu0 %v7209_v8  ;;  %4584 = vmatpush1.bf16.msra.mxu1 %v7306_v57  ;;  %v7240_v32 = vld [vmem:[%s9626_s1 + $0xbe8] ss:$12 sps:$4 sm:$0xff]   ;;  %v7327_v35 = vld [vmem:[%s9629_s3 + $0x120] ss:$12 sps:$4 sm:$0xff]  }
 0x1d1   :  { %v8927_v39 = vadd.f32 %v6377_v37, %v8833_v61  ;;  %4585 = vmatprep.subr.bf16.mxu1 %v7311_v60  ;;  %v7332_v37 = vld [vmem:[%s9629_s3 + $0x13c] ss:$12 sps:$4 sm:$0xff]  }
 0x1d2   :  { %v7260_v57 = vld [vmem:[%s9626_s1 + $0xc7c] ss:$12 sps:$4 sm:$0xff]  }
 0x1d3   :  { %3520 = vmatpush1.bf16.msra.mxu0 %v7207_v10  ;;  %v6378_v44 = vpop.f32.mrb[52].mxu1 }
 0x1d4   :  { %3521 = vmatprep.subr.bf16.mxu0 %v7212_v27  ;;  %v6379_v47 = vpop.f32.mrb[53].mxu1  ;;  %4586 = vmatpush1.bf16.msra.mxu1 %v7309_v63  ;;  %v7237_v27 = vld [vmem:[%s9626_s1 + $0xbd0] ss:$12 sps:$4 sm:$0xff]  }
 0x1d5   :  { %v6380_v48 = vadd.f32 %v6379_v47, %v6378_v44  ;;  %v6381_v49 = vpop.f32.mrb[54].mxu1  ;;  %4587 = vmatprep.subr.bf16.mxu1 %v7314_v1  ;;  %v7330_v44 = vld [vmem:[%s9629_s3 + $0x138] ss:$12 sps:$4 sm:$0xff]   ;;  %v7496_v47 = vld [vmem:[%s9627_s0 + $0xcc] ss:$72 sps:$4 sm:$0xff]  }
 0x1d6   :  { %v6382_v52 = vpop.f32.mrb[55].mxu1 }
 0x1d7   :  { %3522 = vmatpush1.bf16.msra.mxu0 %v7210_v29  ;;  %v8951_v55 = vadd.f32 %v6380_v48, %v8844_v6  ;;  %v6383_v56 = vadd.f32 %v6382_v52, %v6381_v49  ;;  %v7228_v6 = vld [vmem:[%s9626_s1 + $0xb88] ss:$12 sps:$4 sm:$0xff]   ;;  %v7329_v29 = vld [vmem:[%s9629_s3 + $0x124] ss:$12 sps:$4 sm:$0xff]  }
 0x1d8   :  { %3523 = vmatprep.subr.bf16.mxu0 %v7215_v31  ;;  %4588 = vmatpush1.bf16.msra.mxu1 %v7312_v3  ;;  %v7251_v48 = vld [vmem:[%s9626_s1 + $0xc34] ss:$12 sps:$4 sm:$0xff]   ;;  %v7249_v49 = vld [vmem:[%s9626_s1 + $0xc30] ss:$12 sps:$4 sm:$0xff]  }
 0x1d9   :  { %v8963_v61 = vadd.f32 %v6383_v56, %v8849_v12  ;;  %v7320_v12 = vld [vmem:[%s9629_s3 + $0xdc] ss:$12 sps:$4 sm:$0xff]   ;;  %4589 = vmatprep.subr.bf16.mxu1 %v7317_v5  ;;  %v7255_v56 = vld [vmem:[%s9626_s1 + $0xc60] ss:$12 sps:$4 sm:$0xff]  }
 0x1da   :  { %v7497_v52 = vld [vmem:[%s9627_s0 + $0xc8] ss:$72 sps:$4 sm:$0xff]  }
 0x1db   :  { %3524 = vmatpush1.bf16.msra.mxu0 %v7213_v38 }
 0x1dc   :  { %3525 = vmatprep.subr.bf16.mxu0 %v7218_v51  ;;  %4590 = vmatpush1.bf16.msra.mxu1 %v7315_v7  ;;  %v7266_v7 = vld [vmem:[%s9626_s1 + $0xcac] ss:$12 sps:$4 sm:$0xff]  }
 0x1dd   :  { %4591 = vmatprep.subr.bf16.mxu1 %v7320_v12 }
 0x1df   :  { %3526 = vmatpush1.bf16.msra.mxu0 %v7216_v45  ;;  %v7495_v45 = vld [vmem:[%s9627_s0 + $0x38] ss:$72 sps:$4 sm:$0xff]  }
 0x1e0   :  { %3527 = vmatprep.subr.bf16.mxu0 %v7221_v46  ;;  %4592 = vmatpush1.bf16.msra.mxu1 %v7318_v14  ;;  %v7246_v46 = vld [vmem:[%s9626_s1 + $0xc18] ss:$12 sps:$4 sm:$0xff]   ;;  %v7264_v14 = vld [vmem:[%s9626_s1 + $0xca8] ss:$12 sps:$4 sm:$0xff]  }
 0x1e1   :  { %4593 = vmatprep.subr.bf16.mxu1 %v7323_v16 }
 0x1e3   :  { %3528 = vmatpush1.bf16.msra.mxu0 %v7219_v54  ;;  %v7498_v54 = vld [vmem:[%s9627_s0 + $0x44] ss:$72 sps:$4 sm:$0xff]  }
 0x1e4   :  { %3529 = vmatprep.subr.bf16.mxu0 %v7224_v58  ;;  %4594 = vmatpush1.bf16.msra.mxu1 %v7321_v20 }
 0x1e5   :  { %4595 = vmatprep.subr.bf16.mxu1 %v7326_v22  ;;  %v7267_v22 = vld [vmem:[%s9626_s1 + $0xcc0] ss:$12 sps:$4 sm:$0xff]  }
 0x1e7   :  { %3530 = vmatpush1.bf16.msra.mxu0 %v7222_v62 }
 0x1e8   :  { %3531 = vmatprep.subr.bf16.mxu0 %v7227_v0  ;;  %4596 = vmatpush1.bf16.msra.mxu1 %v7324_v28  ;;  %v7263_v0 = vld [vmem:[%s9626_s1 + $0xc94] ss:$12 sps:$4 sm:$0xff]   ;;  %v7273_v28 = vld [vmem:[%s9626_s1 + $0xcf0] ss:$12 sps:$4 sm:$0xff]  }
 0x1e9   :  { %4597 = vmatprep.subr.bf16.mxu1 %v7329_v29  ;;  %v7276_v29 = vld [vmem:[%s9626_s1 + $0xd08] ss:$12 sps:$4 sm:$0xff]  }
 0x1eb   :  { %3532 = vmatpush1.bf16.msra.mxu0 %v7225_v2  ;;  %v6400_v19 = vpop.f32.mrb[56].mxu1 }
 0x1ec   :  { %3533 = vmatprep.subr.bf16.mxu0 %v7230_v4  ;;  %v6401_v8 = vpop.f32.mrb[57].mxu1  ;;  %4598 = vmatpush1.bf16.msra.mxu1 %v7327_v35  ;;  %v7261_v4 = vld [vmem:[%s9626_s1 + $0xc90] ss:$12 sps:$4 sm:$0xff]  }
 0x1ed   :  { %v6402_v23 = vadd.f32 %v6401_v8, %v6400_v19  ;;  %v6403_v24 = vpop.f32.mrb[58].mxu1  ;;  %4599 = vmatprep.subr.bf16.mxu1 %v7332_v37  ;;  %v7269_v19 = vld [vmem:[%s9626_s1 + $0xcc4] ss:$12 sps:$4 sm:$0xff]   ;;  %v7499_v37 = vld [vmem:[%s9627_s0 + $0x40] ss:$72 sps:$4 sm:$0xff]  }
 0x1ee   :  { %v6404_v25 = vpop.f32.mrb[59].mxu1  ;;  %v7285_v35 = vld [vmem:[%s9626_s1 + $0xd50] ss:$12 sps:$4 sm:$0xff]  }
 0x1ef   :  { %3534 = vmatpush1.bf16.msra.mxu0 %v7228_v6  ;;  %v9026_v26 = vadd.f32 %v6402_v23, %v8918_v43  ;;  %v6405_v10 = vadd.f32 %v6404_v25, %v6403_v24  ;;  %v7272_v25 = vld [vmem:[%s9626_s1 + $0xcdc] ss:$12 sps:$4 sm:$0xff]  }
 0x1f0   :  { %3535 = vmatprep.subr.bf16.mxu0 %v7233_v9  ;;  %4600 = vmatpush1.bf16.msra.mxu1 %v7330_v44  ;;  %v7336_v44 = vld [vmem:[%s9629_s3 + $0x168] ss:$12 sps:$4 sm:$0xff]  }
 0x1f1   :  { %v9032_v30 = vadd.f32 %v6405_v10, %v8927_v39  ;;  %v7243_v39 = vld [vmem:[%s9626_s1 + $0xc00] ss:$12 sps:$4 sm:$0xff]   ;;  %v7270_v10 = vld [vmem:[%s9626_s1 + $0xcd8] ss:$12 sps:$4 sm:$0xff]  }
 0x1f3   :  { %3536 = vmatpush1.bf16.msra.mxu0 %v7231_v13  ;;  %v6406_v31 = vpop.f32.mrb[60].mxu1 }
 0x1f4   :  { %3537 = vmatprep.subr.bf16.mxu0 %v7236_v15  ;;  %v6407_v41 = vpop.f32.mrb[61].mxu1 }
 0x1f5   :  { %v6408_v33 = vadd.f32 %v6407_v41, %v6406_v31  ;;  %v6409_v34 = vpop.f32.mrb[62].mxu1  ;;  %v7281_v31 = vld [vmem:[%s9626_s1 + $0xd24] ss:$12 sps:$4 sm:$0xff]   ;;  %v7279_v41 = vld [vmem:[%s9626_s1 + $0xd20] ss:$12 sps:$4 sm:$0xff]  }
 0x1f6   :  { %v6410_v43 = vpop.f32.mrb[63].mxu1 }
 0x1f7   :  { %3538 = vmatpush1.bf16.msra.mxu0 %v7234_v59  ;;  %v9056_v38 = vadd.f32 %v6408_v33, %v8951_v55  ;;  %v6411_v51 = vadd.f32 %v6410_v43, %v6409_v34  ;;  %v7257_v55 = vld [vmem:[%s9626_s1 + $0xc64] ss:$12 sps:$4 sm:$0xff]   ;;  %v7287_v34 = vld [vmem:[%s9626_s1 + $0xd54] ss:$12 sps:$4 sm:$0xff]  }
 0x1f8   :  { %3539 = vmatprep.subr.bf16.mxu0 %v7239_v21  ;;  %v7282_v33 = vld [vmem:[%s9626_s1 + $0xd38] ss:$12 sps:$4 sm:$0xff]   ;;  %v7288_v43 = vld [vmem:[%s9626_s1 + $0xd68] ss:$12 sps:$4 sm:$0xff]  }
 0x1f9   :  { %v9062_v40 = vadd.f32 %v6411_v51, %v8963_v61  ;;  %v7258_v61 = vld [vmem:[%s9626_s1 + $0xc78] ss:$12 sps:$4 sm:$0xff]  }
 0x1fa   :  { %v7501_v51 = vld [vmem:[%s9627_s0 + $0xd0] ss:$72 sps:$4 sm:$0xff]  }
 0x1fb   :  { %3540 = vmatpush1.bf16.msra.mxu0 %v7237_v27 }
 0x1fc   :  { %3541 = vmatprep.subr.bf16.mxu0 %v7242_v18  ;;  %v7278_v18 = vld [vmem:[%s9626_s1 + $0xd0c] ss:$12 sps:$4 sm:$0xff]  }
 0x1ff   :  { %3542 = vmatpush1.bf16.msra.mxu0 %v7240_v32  ;;  %v7284_v32 = vld [vmem:[%s9626_s1 + $0xd3c] ss:$12 sps:$4 sm:$0xff]  }
 0x200   :  { %3564 = vmatprep.subr.bf16.mxu0 %v7245_v36  ;;  %v7290_v36 = vld [vmem:[%s9626_s1 + $0xd6c] ss:$12 sps:$4 sm:$0xff]  }
 0x202   :  { %3544 = vmatmul.mubr.bf16.vlgmr.msra.gmra.mrb[0].mxu0 %v7495_v45  ;;  %v7341_v45 = vld [vmem:[%s9629_s3 + $0x184] ss:$12 sps:$4 sm:$0xff]  }
 0x203   :  { %3565 = vmatpush1.bf16.msra.mxu0 %v7243_v39  ;;  %3553 = vmatprep.mubr.bf16.mxu0 %v7496_v47  ;;  %v7335_v39 = vld [vmem:[%s9629_s3 + $0x154] ss:$12 sps:$4 sm:$0xff]   ;;  %v9205_v47 = vsub.s32 1, %v8741_v11 }
 0x204   :  { %3566 = vmatprep.subr.bf16.mxu0 %v7248_v42  ;;  %4601 = vmatprep.subr.bf16.mxu1 %v7335_v39  ;;  %v7338_v42 = vld [vmem:[%s9629_s3 + $0x16c] ss:$12 sps:$4 sm:$0xff]   ;;  %v7370_v39 = vld [vmem:[%s9629_s3 + $0x50] ss:$12 sps:$4 sm:$0xff]  }
 0x207   :  { %3567 = vmatpush1.bf16.msra.mxu0 %v7246_v46  ;;  %v9202_v46 = vsub.s32 0, %v8741_v11 }
 0x208   :  { %3568 = vmatprep.subr.bf16.mxu0 %v7251_v48  ;;  %v7502_v48 = vld [vmem:[%s9628_s2] sm:$0x7] }
 0x20a   :  { %3554 = vmatmul.mubr.bf16.gmra.mrb[4].mxu0 %v7497_v52 }
 0x20b   :  { %3569 = vmatpush1.bf16.msra.mxu0 %v7249_v49  ;;  %3596 = vmatprep.mubr.bf16.mxu0 %v7498_v54  ;;  %v6428_v58 = vpop.f32.mrb[64].mxu1  ;;  %v644_v49 = vrot.slane %v7502_v48, %v9202_v46 }
 0x20c   :  { %3570 = vmatprep.subr.bf16.mxu0 %v7254_v50  ;;  %v6429_v60 = vpop.f32.mrb[65].mxu1  ;;  %v648_v50 = vrot.slane %v7502_v48, %v9205_v47  ;;  %v7375_v48 = vld [vmem:[%s9629_s3 + $0x158] ss:$12 sps:$4 sm:$0xff]  }
 0x20d   :  { %v6430_v62 = vadd.f32 %v6429_v60, %v6428_v58  ;;  %v6431_v63 = vpop.f32.mrb[66].mxu1 }
 0x20e   :  { %v6432_v1 = vpop.f32.mrb[67].mxu1 }
 0x20f   :  { %3571 = vmatpush1.bf16.msra.mxu0 %v7252_v53  ;;  %v4044_v2 = vadd.f32 %v6430_v62, %v9026_v26  ;;  %v6433_v3 = vadd.f32 %v6432_v1, %v6431_v63 }
 0x210   :  { %3572 = vmatprep.subr.bf16.mxu0 %v7257_v55 }
 0x211   :  { %v4060_v5 = vmax.f32 %v4044_v2, 0.0  ;;  %v4047_v6 = vadd.f32 %v6433_v3, %v9032_v30  ;;  %v7275_v30 = vld [vmem:[%s9626_s1 + $0xcf4] ss:$12 sps:$4 sm:$0xff]  }
 0x212   :  { %v7339_v3 = vld [vmem:[%s9629_s3 + $0x180] ss:$12 sps:$4 sm:$0xff]  }
 0x213   :  { %3573 = vmatpush1.bf16.msra.mxu0 %v7255_v56  ;;  %v4063_v9 = vmax.f32 %v4047_v6, 0.0  ;;  %v6434_v12 = vpop.f32.mrb[68].mxu1 }
 0x214   :  { %3574 = vmatprep.subr.bf16.mxu0 %v7260_v57  ;;  %v6435_v13 = vpop.f32.mrb[69].mxu1 }
 0x215   :  { %v9123_v15 = vpack.c.bf16 %v4063_v9, %v4060_v5  ;;  %v6436_v16 = vadd.f32 %v6435_v13, %v6434_v12  ;;  %v6437_v59 = vpop.f32.mrb[70].mxu1 }
 0x216   :  { %v6438_v20 = vpop.f32.mrb[71].mxu1 }
 0x217   :  { %3575 = vmatpush1.bf16.msra.mxu0 %v7258_v61  ;;  %v4052_v21 = vadd.f32 %v6436_v16, %v9056_v38  ;;  %v6439_v8 = vadd.f32 %v6438_v20, %v6437_v59  ;;  %v7500_v38 = vld [vmem:[%s9627_s0 + $0xd4] ss:$72 sps:$4 sm:$0xff]   ;;  %v7342_v16 = vld [vmem:[%s9629_s3 + $0x198] ss:$12 sps:$4 sm:$0xff]  }
 0x218   :  { %3576 = vmatprep.subr.bf16.mxu0 %v7263_v0  ;;  %v7347_v59 = vld [vmem:[%s9629_s3 + $0x1b4] ss:$12 sps:$4 sm:$0xff]  }
 0x219   :  { %v4066_v23 = vmax.f32 %v4052_v21, 0.0  ;;  %v4055_v24 = vadd.f32 %v6439_v8, %v9062_v40  ;;  %v7333_v40 = vld [vmem:[%s9629_s3 + $0x150] ss:$12 sps:$4 sm:$0xff]  }
 0x21a   :  { %4602 = vmatpush1.bf16.msra.mxu1 %v7333_v40  ;;  %v7371_v40 = vld [vmem:[%s9629_s3 + $0x128] ss:$12 sps:$4 sm:$0xff]  }
 0x21b   :  { %3577 = vmatpush1.bf16.msra.mxu0 %v7261_v4  ;;  %v4069_v26 = vmax.f32 %v4055_v24, 0.0  ;;  %4603 = vmatprep.subr.bf16.mxu1 %v7338_v42  ;;  %v7344_v4 = vld [vmem:[%s9629_s3 + $0x19c] ss:$12 sps:$4 sm:$0xff]  }
 0x21c   :  { %3578 = vmatprep.subr.bf16.mxu0 %v7266_v7  ;;  %v7372_v42 = vld [vmem:[%s9629_s3 + $0x68] ss:$12 sps:$4 sm:$0xff]  }
 0x21d   :  { %v9139_v27 = vpack.c.bf16 %v4069_v26, %v4066_v23  ;;  %v7348_v26 = vld [vmem:[%s9629_s3 + $0x1c8] ss:$12 sps:$4 sm:$0xff]  }
 0x21e   :  { %4604 = vmatpush1.bf16.msra.mxu1 %v7336_v44  ;;  %v7373_v44 = vld [vmem:[%s9629_s3 + $0x140] ss:$12 sps:$4 sm:$0xff]  }
 0x21f   :  { %3579 = vmatpush1.bf16.msra.mxu0 %v7264_v14  ;;  %4626 = vmatprep.subr.bf16.mxu1 %v7341_v45  ;;  %v7374_v45 = vld [vmem:[%s9629_s3 + $0x80] ss:$12 sps:$4 sm:$0xff]  }
 0x220   :  { %3580 = vmatprep.subr.bf16.mxu0 %v7269_v19 }
 0x223   :  { %3581 = vmatpush1.bf16.msra.mxu0 %v7267_v22  ;;  %v7345_v22 = vld [vmem:[%s9629_s3 + $0x1b0] ss:$12 sps:$4 sm:$0xff]  }
 0x224   :  { %3582 = vmatprep.subr.bf16.mxu0 %v7272_v25  ;;  %v7350_v25 = vld [vmem:[%s9629_s3 + $0x1cc] ss:$12 sps:$4 sm:$0xff]  }
 0x227   :  { %3583 = vmatpush1.bf16.msra.mxu0 %v7270_v10  ;;  %v7353_v10 = vld [vmem:[%s9629_s3 + $0x1e4] ss:$12 sps:$4 sm:$0xff]  }
 0x228   :  { %3584 = vmatprep.subr.bf16.mxu0 %v7275_v30  ;;  %v7503_v30 = vmov 0  }
 0x22b   :  { %3585 = vmatpush1.bf16.msra.mxu0 %v7273_v28  ;;  %v7351_v28 = vld [vmem:[%s9629_s3 + $0x1e0] ss:$12 sps:$4 sm:$0xff]  }
 0x22c   :  { %3586 = vmatprep.subr.bf16.mxu0 %v7278_v18  ;;  %v7356_v18 = vld [vmem:[%s9629_s3 + $0x1fc] ss:$12 sps:$4 sm:$0xff]  }
 0x22f   :  { %3587 = vmatpush1.bf16.msra.mxu0 %v7276_v29  ;;  %v7354_v29 = vld [vmem:[%s9629_s3 + $0x1f8] ss:$12 sps:$4 sm:$0xff]  }
 0x230   :  { %3588 = vmatprep.subr.bf16.mxu0 %v7281_v31  ;;  %v7359_v31 = vld [vmem:[%s9629_s3 + $0x214] ss:$12 sps:$4 sm:$0xff]  }
 0x233   :  { %3589 = vmatpush1.bf16.msra.mxu0 %v7279_v41  ;;  %v7357_v41 = vld [vmem:[%s9629_s3 + $0x210] ss:$12 sps:$4 sm:$0xff]  }
 0x234   :  { %3590 = vmatprep.subr.bf16.mxu0 %v7284_v32  ;;  %v7362_v32 = vld [vmem:[%s9629_s3 + $0x22c] ss:$12 sps:$4 sm:$0xff]  }
 0x237   :  { %3591 = vmatpush1.bf16.msra.mxu0 %v7282_v33  ;;  %v7360_v33 = vld [vmem:[%s9629_s3 + $0x228] ss:$12 sps:$4 sm:$0xff]  }
 0x238   :  { %3592 = vmatprep.subr.bf16.mxu0 %v7287_v34  ;;  %v7363_v34 = vld [vmem:[%s9629_s3 + $0xc8] ss:$12 sps:$4 sm:$0xff]  }
 0x23b   :  { %3593 = vmatpush1.bf16.msra.mxu0 %v7285_v35  ;;  %v7364_v35 = vld [vmem:[%s9629_s3 + $0x8] ss:$12 sps:$4 sm:$0xff]  }
 0x23c   :  { %3594 = vmatprep.subr.bf16.mxu0 %v7290_v36  ;;  %v7365_v36 = vld [vmem:[%s9629_s3 + $0xe0] ss:$12 sps:$4 sm:$0xff]  }
 0x23f   :  { %3595 = vmatpush1.bf16.msra.mxu0 %v7288_v43  ;;  %v7366_v43 = vld [vmem:[%s9629_s3 + $0x20] ss:$12 sps:$4 sm:$0xff]  }
 0x242   :  { %3597 = vmatmul.mubr.bf16.vlgmr.msra.gmra.mrb[0].mxu0 %v7499_v37  ;;  %v7367_v37 = vld [vmem:[%s9629_s3 + $0xf8] ss:$12 sps:$4 sm:$0xff]  }
 0x243   :  { %3606 = vmatprep.mubr.bf16.mxu0 %v7500_v38  ;;  %v7368_v38 = vld [vmem:[%s9629_s3 + $0x38] ss:$12 sps:$4 sm:$0xff]  }
 0x24a   :  { %3607 = vmatmul.mubr.bf16.gmra.mrb[4].mxu0 %v7501_v51  ;;  %v7369_v51 = vld [vmem:[%s9629_s3 + $0x110] ss:$12 sps:$4 sm:$0xff]  }
 0x315   :  { %v3598_v52 = vpop.f32.mrb[0].mxu0 }
 0x316   :  { %v6556_v53 = vadd.f32 %v3598_v52, %v644_v49  ;;  %v3600_v54 = vpop.f32.mrb[1].mxu0  ;;  %v7378_v52 = vld [vmem:[%s9629_s3 + $0xb0] ss:$12 sps:$4 sm:$0xff]  }
 0x317   :  { %v6557_v55 = vadd.f32 %v3600_v54, %v648_v50  ;;  %v3602_v56 = vpop.f32.mrb[2].mxu0  ;;  %v7380_v54 = vld [vmem:[%s9629_s3 + $0x1a0] ss:$12 sps:$4 sm:$0xff]  }
 0x318   :  { %v6558_v57 = vadd.f32 %v3602_v56, %v644_v49  ;;  %v3604_v58 = vpop.f32.mrb[3].mxu0  ;;  %v4058_v60 = vmax.f32 %v6556_v53, 0.0  ;;  %v7379_v53 = vld [vmem:[%s9629_s3 + $0x188] ss:$12 sps:$4 sm:$0xff]   ;;  %v7382_v56 = vld [vmem:[%s9629_s3 + $0x1d0] ss:$12 sps:$4 sm:$0xff]  }
 0x319   :  { %v6559_v61 = vadd.f32 %v3604_v58, %v648_v50  ;;  %v4059_v11 = vmax.f32 %v6557_v55, 0.0  ;;  %v7381_v55 = vld [vmem:[%s9629_s3 + $0x1b8] ss:$12 sps:$4 sm:$0xff]   ;;  %v7384_v58 = vld [vmem:[%s9629_s3 + $0x200] ss:$12 sps:$4 sm:$0xff]  }
 0x31a   :  { %v4061_v62 = vmax.f32 %v6558_v57, 0.0  ;;  %v7383_v57 = vld [vmem:[%s9629_s3 + $0x1e8] ss:$12 sps:$4 sm:$0xff]  }
 0x31b   :  { %v4062_v63 = vmax.f32 %v6559_v61, 0.0  ;;  %v7389_v61 = vld [vmem:[%s9630_s5 + $0x4] ss:$12 sps:$4 sm:$0xff]  }
 0x31c   :  { %v9212_v0 = vpack.c.bf16 %v4061_v62, %v4058_v60  ;;  %v7385_v60 = vld [vmem:[%s9629_s3 + $0x218] ss:$12 sps:$4 sm:$0xff]   ;;  %v7387_v62 = vld [vmem:[%s9630_s5] ss:$12 sps:$4 sm:$0xff]  }
 0x31d   :  { %v9214_v1 = vpack.c.bf16 %v4062_v63, %v4059_v11  ;;  %v3608_v2 = vpop.f32.mrb[4].mxu0  ;;  %v7392_v11 = vld [vmem:[%s9630_s5 + $0x1c] ss:$12 sps:$4 sm:$0xff]   ;;  %v7390_v63 = vld [vmem:[%s9630_s5 + $0x18] ss:$12 sps:$4 sm:$0xff]  }
 0x31e   :  { %v6560_v5 = vadd.f32 %v3608_v2, %v644_v49  ;;  %v3610_v6 = vpop.f32.mrb[5].mxu0  ;;  %v7396_v2 = vld [vmem:[%s9630_s5 + $0x48] ss:$12 sps:$4 sm:$0xff]  }
 0x31f   :  { %v6561_v7 = vadd.f32 %v3610_v6, %v648_v50  ;;  %v3612_v9 = vpop.f32.mrb[6].mxu0  ;;  %4605 = vmatprep.mubr.bf16.mxu1 %v9214_v1  ;;  %v7402_v6 = vld [vmem:[%s9630_s5 + $0x78] ss:$12 sps:$4 sm:$0xff]  }
 0x320   :  { %v6562_v12 = vadd.f32 %v3612_v9, %v644_v49  ;;  %v3614_v13 = vpop.f32.mrb[7].mxu0  ;;  %4606 = vmatmul.mubr.bf16.vlgmr.msra.gmra.mrb[72].mxu1 %v9212_v0  ;;  %v4064_v19 = vmax.f32 %v6560_v5, 0.0  ;;  %v7376_v49 = vld [vmem:[%s9629_s3 + $0x98] ss:$12 sps:$4 sm:$0xff]   ;;  %v7404_v5 = vld [vmem:[%s9630_s5 + $0x7c] ss:$12 sps:$4 sm:$0xff]  }
 0x321   :  { %v6563_v14 = vadd.f32 %v3614_v13, %v648_v50  ;;  %4627 = vmatpush1.bf16.msra.mxu1 %v7339_v3  ;;  %v4065_v21 = vmax.f32 %v6561_v7, 0.0  ;;  %v7377_v50 = vld [vmem:[%s9629_s3 + $0x170] ss:$12 sps:$4 sm:$0xff]   ;;  %v7407_v7 = vld [vmem:[%s9630_s5 + $0x94] ss:$12 sps:$4 sm:$0xff]  }
 0x322   :  { %v4067_v20 = vmax.f32 %v6562_v12, 0.0  ;;  %4628 = vmatprep.subr.bf16.mxu1 %v7344_v4  ;;  %v7401_v3 = vld [vmem:[%s9630_s5 + $0x64] ss:$12 sps:$4 sm:$0xff]   ;;  %v7399_v4 = vld [vmem:[%s9630_s5 + $0x60] ss:$12 sps:$4 sm:$0xff]  }
 0x323   :  { %v4068_v8 = vmax.f32 %v6563_v14, 0.0  ;;  %v7405_v9 = vld [vmem:[%s9630_s5 + $0x90] ss:$12 sps:$4 sm:$0xff]   ;;  %v7410_v12 = vld [vmem:[%s9630_s5 + $0xac] ss:$12 sps:$4 sm:$0xff]  }
 0x324   :  { %v9233_v23 = vpack.c.bf16 %v4067_v20, %v4064_v19  ;;  %v7408_v13 = vld [vmem:[%s9630_s5 + $0xa8] ss:$12 sps:$4 sm:$0xff]   ;;  %v7413_v14 = vld [vmem:[%s9630_s5 + $0xc4] ss:$12 sps:$4 sm:$0xff]  }
 0x325   :  { %v9235_v24 = vpack.c.bf16 %v4068_v8, %v4065_v21  ;;  %4629 = vmatpush1.bf16.msra.mxu1 %v7342_v16  ;;  %v7411_v16 = vld [vmem:[%s9630_s5 + $0xc0] ss:$12 sps:$4 sm:$0xff]   ;;  %v7414_v19 = vld [vmem:[%s9630_s5 + $0xd8] ss:$12 sps:$4 sm:$0xff]   ;;  %v7417_v21 = vld [vmem:[%s9630_s5 + $0xf0] ss:$12 sps:$4 sm:$0xff]  }
 0x326   :  { %4630 = vmatprep.subr.bf16.mxu1 %v7347_v59  ;;  %v7416_v59 = vld [vmem:[%s9630_s5 + $0xdc] ss:$12 sps:$4 sm:$0xff]   ;;  %v7419_v20 = vld [vmem:[%s9630_s5 + $0xf4] ss:$12 sps:$4 sm:$0xff]   ;;  %v7422_v8 = vld [vmem:[%s9630_s5 + $0x10c] ss:$12 sps:$4 sm:$0xff]  }
 0x327   :  { %4615 = vmatprep.mubr.bf16.mxu1 %v9235_v24 }
 0x328   :  { %4616 = vmatmul.mubr.bf16.gmra.mrb[76].mxu1 %v9233_v23 }
 0x329   :  { %4631 = vmatpush1.bf16.msra.mxu1 %v7345_v22  ;;  %4658 = vmatprep.mubr.bf16.mxu1 %v7503_v30  ;;  %v7420_v22 = vld [vmem:[%s9630_s5 + $0x108] ss:$12 sps:$4 sm:$0xff]  }
 0x32a   :  { %4632 = vmatprep.subr.bf16.mxu1 %v7350_v25  ;;  %v7428_v25 = vld [vmem:[%s9630_s5 + $0x13c] ss:$12 sps:$4 sm:$0xff]  }
 0x32d   :  { %4633 = vmatpush1.bf16.msra.mxu1 %v7348_v26  ;;  %v7426_v26 = vld [vmem:[%s9630_s5 + $0x138] ss:$12 sps:$4 sm:$0xff]  }
 0x32e   :  { %4634 = vmatprep.subr.bf16.mxu1 %v7353_v10  ;;  %v7431_v10 = vld [vmem:[%s9630_s5 + $0x154] ss:$12 sps:$4 sm:$0xff]  }
 0x331   :  { %4635 = vmatpush1.bf16.msra.mxu1 %v7351_v28  ;;  %v7429_v28 = vld [vmem:[%s9630_s5 + $0x150] ss:$12 sps:$4 sm:$0xff]  }
 0x332   :  { %4636 = vmatprep.subr.bf16.mxu1 %v7356_v18  ;;  %v7434_v18 = vld [vmem:[%s9630_s5 + $0x16c] ss:$12 sps:$4 sm:$0xff]  }
 0x335   :  { %4637 = vmatpush1.bf16.msra.mxu1 %v7354_v29  ;;  %v7432_v29 = vld [vmem:[%s9630_s5 + $0x168] ss:$12 sps:$4 sm:$0xff]  }
 0x336   :  { %4638 = vmatprep.subr.bf16.mxu1 %v7359_v31  ;;  %v7437_v31 = vld [vmem:[%s9630_s5 + $0x184] ss:$12 sps:$4 sm:$0xff]  }
 0x339   :  { %4639 = vmatpush1.bf16.msra.mxu1 %v7357_v41  ;;  %v7438_v41 = vld [vmem:[%s9630_s5 + $0x188] ss:$12 sps:$4 sm:$0xff]  }
 0x33a   :  { %4640 = vmatprep.subr.bf16.mxu1 %v7362_v32  ;;  %6536 = vmatprep.subr.bf16.mxu0 %v7438_v41  ;;  %v7442_v32 = vld [vmem:[%s9630_s5 + $0x1a0] ss:$12 sps:$4 sm:$0xff]  }
 0x33b   :  { %6537 = vmatpush3.bf16.msra.mxu0 %v7438_v41  ;;  %v7467_v41 = vld [vmem:[%s9630_s5 + $0xc8] ss:$12 sps:$4 sm:$0xff]  }
 0x33c   :  { %6538 = vmatprep.subr.bf16.mxu0 %v7442_v32 }
 0x33d   :  { %4641 = vmatpush1.bf16.msra.mxu1 %v7360_v33  ;;  %v7446_v33 = vld [vmem:[%s9630_s5 + $0x1b8] ss:$12 sps:$4 sm:$0xff]  }
 0x33e   :  { %6440 = vmatprep.subr.bf16.mxu1 %v7363_v34  ;;  %v7450_v34 = vld [vmem:[%s9630_s5 + $0x1d0] ss:$12 sps:$4 sm:$0xff]  }
 0x33f   :  { %6539 = vmatpush3.bf16.msra.mxu0 %v7442_v32 }
 0x340   :  { %4659 = vmatmul.mubr.bf16.vlgmr.msra.gmra.mrb[72].mxu1 %v9123_v15  ;;  %6540 = vmatprep.subr.bf16.mxu0 %v7446_v33 }
 0x341   :  { %6441 = vmatpush3.bf16.msra.mxu1 %v7364_v35  ;;  %4668 = vmatprep.mubr.bf16.mxu1 %v7503_v30  ;;  %v7454_v35 = vld [vmem:[%s9630_s5 + $0x1e8] ss:$12 sps:$4 sm:$0xff]  }
 0x342   :  { %6442 = vmatprep.subr.bf16.mxu1 %v7365_v36  ;;  %v7458_v36 = vld [vmem:[%s9630_s5 + $0x200] ss:$12 sps:$4 sm:$0xff]  }
 0x343   :  { %6541 = vmatpush3.bf16.msra.mxu0 %v7446_v33 }
 0x344   :  { %6542 = vmatprep.subr.bf16.mxu0 %v7450_v34 }
 0x345   :  { %6443 = vmatpush3.bf16.msra.mxu1 %v7366_v43  ;;  %v7462_v43 = vld [vmem:[%s9630_s5 + $0x218] ss:$12 sps:$4 sm:$0xff]  }
 0x346   :  { %6444 = vmatprep.subr.bf16.mxu1 %v7367_v37  ;;  %v7466_v37 = vld [vmem:[%s9630_s5 + $0x230] ss:$12 sps:$4 sm:$0xff]  }
 0x347   :  { %6543 = vmatpush3.bf16.msra.mxu0 %v7450_v34 }
 0x348   :  { %4669 = vmatmul.mubr.bf16.gmra.mrb[76].mxu1 %v9139_v27  ;;  %6544 = vmatprep.subr.bf16.mxu0 %v7454_v35 }
 0x349   :  { %6445 = vmatpush3.bf16.msra.mxu1 %v7368_v38  ;;  %4711 = vmatprep.mubr.bf16.mxu1 %v9214_v1  ;;  %v7393_v1 = vld [vmem:[%s9630_s5 + $0x30] ss:$12 sps:$4 sm:$0xff]   ;;  %v9477_v38 = vld [vmem:[%s9631_s4] sm:$0x7] }
 0x34a   :  { %6446 = vmatprep.subr.bf16.mxu1 %v7369_v51  ;;  %v4177_v51 = vrot.slane %v9477_v38, %v9202_v46 }
 0x34b   :  { %6545 = vmatpush3.bf16.msra.mxu0 %v7454_v35 }
 0x34c   :  { %6546 = vmatprep.subr.bf16.mxu0 %v7458_v36 }
 0x34d   :  { %6447 = vmatpush3.bf16.msra.mxu1 %v7370_v39  ;;  %v4181_v39 = vrot.slane %v9477_v38, %v9205_v47 }
 0x34e   :  { %6448 = vmatprep.subr.bf16.mxu1 %v7371_v40 }
 0x34f   :  { %6547 = vmatpush3.bf16.msra.mxu0 %v7458_v36 }
 0x350   :  { %6548 = vmatprep.subr.bf16.mxu0 %v7462_v43 }
 0x351   :  { %6449 = vmatpush3.bf16.msra.mxu1 %v7372_v42 }
 0x352   :  { %6450 = vmatprep.subr.bf16.mxu1 %v7373_v44 }
 0x353   :  { %6549 = vmatpush3.bf16.msra.mxu0 %v7462_v43 }
 0x354   :  { %6550 = vmatprep.subr.bf16.mxu0 %v7466_v37 }
 0x355   :  { %6451 = vmatpush3.bf16.msra.mxu1 %v7374_v45 }
 0x356   :  { %6452 = vmatprep.subr.bf16.mxu1 %v7375_v48 }
 0x357   :  { %6551 = vmatpush3.bf16.msra.mxu0 %v7466_v37  ;;  %v4185_v37 = vrot.slane %v9477_v38, %v8750_v17  ;;  %v7468_v38 = vld [vmem:[%s9630_s5 + $0x8] ss:$12 sps:$4 sm:$0xff]  }
 0x359   :  { %6453 = vmatpush3.bf16.msra.mxu1 %v7376_v49 }
 0x35a   :  { %6454 = vmatprep.subr.bf16.mxu1 %v7377_v50 }
 0x35d   :  { %6455 = vmatpush3.bf16.msra.mxu1 %v7378_v52 }
 0x35e   :  { %6516 = vmatprep.subr.bf16.mxu1 %v7379_v53 }
 0x360   :  { %4712 = vmatmul.mubr.bf16.vlgmr.msra.gmra.mrb[80].mxu1 %v9212_v0  ;;  %v7395_v0 = vld [vmem:[%s9630_s5 + $0x34] ss:$12 sps:$4 sm:$0xff]  }
 0x361   :  { %4719 = vmatprep.mubr.bf16.mxu1 %v9235_v24  ;;  %6517 = vmatpush3.bf16.msra.mxu1 %v7379_v53  ;;  %v7423_v24 = vld [vmem:[%s9630_s5 + $0x120] ss:$12 sps:$4 sm:$0xff]  }
 0x362   :  { %6518 = vmatprep.subr.bf16.mxu1 %v7380_v54 }
 0x365   :  { %6519 = vmatpush3.bf16.msra.mxu1 %v7380_v54 }
 0x366   :  { %6520 = vmatprep.subr.bf16.mxu1 %v7381_v55 }
 0x368   :  { %4720 = vmatmul.mubr.bf16.gmra.mrb[84].mxu1 %v9233_v23  ;;  %v7425_v23 = vld [vmem:[%s9630_s5 + $0x124] ss:$12 sps:$4 sm:$0xff]  }
 0x369   :  { %6521 = vmatpush3.bf16.msra.mxu1 %v7381_v55  ;;  %6532 = vmatprep.mubr.bf16.mxu1 %v9123_v15  ;;  %v7386_v15 = vld [vmem:[%s9629_s3 + $0x230] ss:$12 sps:$4 sm:$0xff]  }
 0x36a   :  { %6522 = vmatprep.subr.bf16.mxu1 %v7382_v56 }
 0x36d   :  { %6523 = vmatpush3.bf16.msra.mxu1 %v7382_v56 }
 0x36e   :  { %6524 = vmatprep.subr.bf16.mxu1 %v7383_v57 }
 0x371   :  { %6525 = vmatpush3.bf16.msra.mxu1 %v7383_v57 }
 0x372   :  { %6526 = vmatprep.subr.bf16.mxu1 %v7384_v58 }
 0x375   :  { %6527 = vmatpush3.bf16.msra.mxu1 %v7384_v58 }
 0x376   :  { %6528 = vmatprep.subr.bf16.mxu1 %v7385_v60 }
 0x379   :  { %6529 = vmatpush3.bf16.msra.mxu1 %v7385_v60 }
 0x37a   :  { %6530 = vmatprep.subr.bf16.mxu1 %v7386_v15 }
 0x37d   :  { %6531 = vmatpush3.bf16.msra.mxu1 %v7386_v15  ;;  %v7435_v15 = vld [vmem:[%s9630_s5 + $0x180] ss:$12 sps:$4 sm:$0xff]  }
 0x37e   :  { %5292 = vmatprep.subr.bf16.mxu1 %v7389_v61 }
 0x380   :  { %6533 = vmatmul.mubr.bf16.vlgmr.msra.gmra.mrb[88].mxu1 %v9139_v27  ;;  %v7398_v27 = vld [vmem:[%s9630_s5 + $0x4c] ss:$12 sps:$4 sm:$0xff]  }
 0x381   :  { %5293 = vmatpush1.bf16.msra.mxu1 %v7387_v62 }
 0x382   :  { %5294 = vmatprep.subr.bf16.mxu1 %v7392_v11  ;;  %v7441_v11 = vld [vmem:[%s9630_s5 + $0x19c] ss:$12 sps:$4 sm:$0xff]  }
 0x385   :  { %5295 = vmatpush1.bf16.msra.mxu1 %v7390_v63 }
 0x386   :  { %5296 = vmatprep.subr.bf16.mxu1 %v7395_v0 }
 0x389   :  { %5297 = vmatpush1.bf16.msra.mxu1 %v7393_v1 }
 0x38a   :  { %5298 = vmatprep.subr.bf16.mxu1 %v7398_v27 }
 0x38d   :  { %5299 = vmatpush1.bf16.msra.mxu1 %v7396_v2 }
 0x38e   :  { %5300 = vmatprep.subr.bf16.mxu1 %v7401_v3  ;;  %v7439_v3 = vld [vmem:[%s9630_s5 + $0x198] ss:$12 sps:$4 sm:$0xff]  }
 0x391   :  { %5301 = vmatpush1.bf16.msra.mxu1 %v7399_v4 }
 0x392   :  { %5302 = vmatprep.subr.bf16.mxu1 %v7404_v5 }
 0x395   :  { %5303 = vmatpush1.bf16.msra.mxu1 %v7402_v6  ;;  %v7445_v6 = vld [vmem:[%s9630_s5 + $0x1b4] ss:$12 sps:$4 sm:$0xff]  }
 0x396   :  { %5304 = vmatprep.subr.bf16.mxu1 %v7407_v7 }
 0x399   :  { %5305 = vmatpush1.bf16.msra.mxu1 %v7405_v9 }
 0x39a   :  { %5306 = vmatprep.subr.bf16.mxu1 %v7410_v12 }
 0x39d   :  { %5307 = vmatpush1.bf16.msra.mxu1 %v7408_v13 }
 0x39e   :  { %5308 = vmatprep.subr.bf16.mxu1 %v7413_v14  ;;  %v7443_v14 = vld [vmem:[%s9630_s5 + $0x1b0] ss:$12 sps:$4 sm:$0xff]  }
 0x3a1   :  { %5309 = vmatpush1.bf16.msra.mxu1 %v7411_v16  ;;  %v7449_v16 = vld [vmem:[%s9630_s5 + $0x1cc] ss:$12 sps:$4 sm:$0xff]  }
 0x3a2   :  { %5310 = vmatprep.subr.bf16.mxu1 %v7416_v59  ;;  %v7447_v59 = vld [vmem:[%s9630_s5 + $0x1c8] ss:$12 sps:$4 sm:$0xff]  }
 0x3a5   :  { %5311 = vmatpush1.bf16.msra.mxu1 %v7414_v19  ;;  %v7453_v19 = vld [vmem:[%s9630_s5 + $0x1e4] ss:$12 sps:$4 sm:$0xff]  }
 0x3a6   :  { %5312 = vmatprep.subr.bf16.mxu1 %v7419_v20  ;;  %v7451_v20 = vld [vmem:[%s9630_s5 + $0x1e0] ss:$12 sps:$4 sm:$0xff]  }
 0x3a9   :  { %5313 = vmatpush1.bf16.msra.mxu1 %v7417_v21  ;;  %v7457_v21 = vld [vmem:[%s9630_s5 + $0x1fc] ss:$12 sps:$4 sm:$0xff]  }
 0x3aa   :  { %5314 = vmatprep.subr.bf16.mxu1 %v7422_v8  ;;  %v7455_v8 = vld [vmem:[%s9630_s5 + $0x1f8] ss:$12 sps:$4 sm:$0xff]  }
 0x3ad   :  { %5315 = vmatpush1.bf16.msra.mxu1 %v7420_v22  ;;  %v7461_v22 = vld [vmem:[%s9630_s5 + $0x214] ss:$12 sps:$4 sm:$0xff]  }
 0x3ae   :  { %5316 = vmatprep.subr.bf16.mxu1 %v7425_v23 }
 0x3b1   :  { %5317 = vmatpush1.bf16.msra.mxu1 %v7423_v24  ;;  %v7459_v24 = vld [vmem:[%s9630_s5 + $0x210] ss:$12 sps:$4 sm:$0xff]  }
 0x3b2   :  { %5318 = vmatprep.subr.bf16.mxu1 %v7428_v25 }
 0x3b5   :  { %5319 = vmatpush1.bf16.msra.mxu1 %v7426_v26  ;;  %v7465_v26 = vld [vmem:[%s9630_s5 + $0x22c] ss:$12 sps:$4 sm:$0xff]  }
 0x3b6   :  { %5320 = vmatprep.subr.bf16.mxu1 %v7431_v10 }
 0x3b9   :  { %5321 = vmatpush1.bf16.msra.mxu1 %v7429_v28 }
 0x3ba   :  { %5322 = vmatprep.subr.bf16.mxu1 %v7434_v18 }
 0x3bd   :  { %5323 = vmatpush1.bf16.msra.mxu1 %v7432_v29 }
 0x3be   :  { %5345 = vmatprep.subr.bf16.mxu1 %v7437_v31  ;;  %v7463_v31 = vld [vmem:[%s9630_s5 + $0x228] ss:$12 sps:$4 sm:$0xff]  }
 0x413   :  { %v4660_v40 = vpop.f32.mrb[72].mxu1 }
 0x414   :  { %v6564_v42 = vadd.f32 %v4660_v40, %v4177_v51  ;;  %v4662_v44 = vpop.f32.mrb[73].mxu1 }
 0x415   :  { %v6565_v45 = vadd.f32 %v4662_v44, %v4181_v39  ;;  %v4664_v48 = vpop.f32.mrb[74].mxu1 }
 0x416   :  { %v6566_v49 = vadd.f32 %v4664_v48, %v4177_v51  ;;  %v4666_v50 = vpop.f32.mrb[75].mxu1  ;;  %v4777_v53 = vmax.f32 %v6564_v42, 0.0 }
 0x417   :  { %v6567_v52 = vadd.f32 %v4666_v50, %v4181_v39  ;;  %v4778_v55 = vmax.f32 %v6565_v45, 0.0 }
 0x418   :  { %v4780_v54 = vmax.f32 %v6566_v49, 0.0 }
 0x419   :  { %v4781_v56 = vmax.f32 %v6567_v52, 0.0 }
 0x41a   :  { %v9483_v57 = vpack.c.bf16 %v4780_v54, %v4777_v53 }
 0x41b   :  { %v9485_v58 = vpack.c.bf16 %v4781_v56, %v4778_v55  ;;  %v4670_v60 = vpop.f32.mrb[76].mxu1 }
 0x41c   :  { %v6568_v61 = vadd.f32 %v4670_v60, %v4177_v51  ;;  %v4672_v62 = vpop.f32.mrb[77].mxu1 }
 0x41d   :  { %v6569_v63 = vadd.f32 %v4672_v62, %v4181_v39  ;;  %v4674_v0 = vpop.f32.mrb[78].mxu1  ;;  %5324 = vmatprep.mubr.bf16.mxu1 %v9485_v58 }
 0x41e   :  { %v6570_v1 = vadd.f32 %v4674_v0, %v4177_v51  ;;  %v4676_v27 = vpop.f32.mrb[79].mxu1  ;;  %5325 = vmatmul.mubr.bf16.vlgmr.msra.gmra.mrb[92].mxu1 %v9483_v57  ;;  %v4783_v4 = vmax.f32 %v6568_v61, 0.0  ;;  %v7471_v0 = vld [vmem:[%s9630_s5 + $0xf8] ss:$12 sps:$4 sm:$0xff]  }
 0x41f   :  { %v6571_v2 = vadd.f32 %v4676_v27, %v4181_v39  ;;  %5346 = vmatpush1.bf16.msra.mxu1 %v7435_v15  ;;  %v4784_v7 = vmax.f32 %v6569_v63, 0.0  ;;  %v7470_v63 = vld [vmem:[%s9630_s5 + $0x20] ss:$12 sps:$4 sm:$0xff]   ;;  %v7473_v27 = vld [vmem:[%s9630_s5 + $0x110] ss:$12 sps:$4 sm:$0xff]  }
 0x420   :  { %v4786_v5 = vmax.f32 %v6570_v1, 0.0  ;;  %5347 = vmatprep.subr.bf16.mxu1 %v7441_v11  ;;  %v7469_v11 = vld [vmem:[%s9630_s5 + $0xe0] ss:$12 sps:$4 sm:$0xff]   ;;  %v7472_v1 = vld [vmem:[%s9630_s5 + $0x38] ss:$12 sps:$4 sm:$0xff]  }
 0x421   :  { %v4787_v9 = vmax.f32 %v6571_v2, 0.0  ;;  %v7475_v2 = vld [vmem:[%s9630_s5 + $0x128] ss:$12 sps:$4 sm:$0xff]  }
 0x422   :  { %v9501_v12 = vpack.c.bf16 %v4786_v5, %v4783_v4  ;;  %v7477_v4 = vld [vmem:[%s9630_s5 + $0x140] ss:$12 sps:$4 sm:$0xff]   ;;  %v7479_v5 = vld [vmem:[%s9630_s5 + $0x158] ss:$12 sps:$4 sm:$0xff]  }
 0x423   :  { %v9503_v13 = vpack.c.bf16 %v4787_v9, %v4784_v7  ;;  %5348 = vmatpush1.bf16.msra.mxu1 %v7439_v3  ;;  %v7476_v3 = vld [vmem:[%s9630_s5 + $0x68] ss:$12 sps:$4 sm:$0xff]   ;;  %v7481_v7 = vld [vmem:[%s9630_s5 + $0x170] ss:$12 sps:$4 sm:$0xff]  }
 0x424   :  { %5349 = vmatprep.subr.bf16.mxu1 %v7445_v6  ;;  %v7480_v6 = vld [vmem:[%s9630_s5 + $0x98] ss:$12 sps:$4 sm:$0xff]   ;;  %v7482_v9 = vld [vmem:[%s9630_s5 + $0xb0] ss:$12 sps:$4 sm:$0xff]  }
 0x425   :  { %5334 = vmatprep.mubr.bf16.mxu1 %v9503_v13 }
 0x426   :  { %5335 = vmatmul.mubr.bf16.gmra.mrb[96].mxu1 %v9501_v12 }
 0x427   :  { %5350 = vmatpush1.bf16.msra.mxu1 %v7443_v14  ;;  %5377 = vmatprep.mubr.bf16.mxu1 %v7503_v30  ;;  %v4891_v14 = vld [vmem:[%s9632_s6] sm:$0x7] }
 0x428   :  { %5351 = vmatprep.subr.bf16.mxu1 %v7449_v16  ;;  %v4896_v16 = vrot.slane %v4891_v14, %v9202_v46 }
 0x42b   :  { %5352 = vmatpush1.bf16.msra.mxu1 %v7447_v59  ;;  %v4900_v59 = vrot.slane %v4891_v14, %v9205_v47 }
 0x42c   :  { %5353 = vmatprep.subr.bf16.mxu1 %v7453_v19 }
 0x42f   :  { %5354 = vmatpush1.bf16.msra.mxu1 %v7451_v20 }
 0x430   :  { %5355 = vmatprep.subr.bf16.mxu1 %v7457_v21 }
 0x433   :  { %v6456_v23 = vpop.f32.mrb[80].mxu1  ;;  %5356 = vmatpush1.bf16.msra.mxu1 %v7455_v8 }
 0x434   :  { %v6457_v25 = vpop.f32.mrb[81].mxu1  ;;  %5357 = vmatprep.subr.bf16.mxu1 %v7461_v22 }
 0x435   :  { %v6458_v10 = vadd.f32 %v6457_v25, %v6456_v23  ;;  %v6459_v28 = vpop.f32.mrb[82].mxu1 }
 0x436   :  { %v6460_v18 = vpop.f32.mrb[83].mxu1 }
 0x437   :  { %v6461_v29 = vadd.f32 %v6460_v18, %v6459_v28  ;;  %5358 = vmatpush1.bf16.msra.mxu1 %v7459_v24  ;;  %v4714_v40 = vadd.f32 %v6458_v10, %v4185_v37 }
 0x438   :  { %5359 = vmatprep.subr.bf16.mxu1 %v7465_v26 }
 0x439   :  { %v4717_v50 = vadd.f32 %v6461_v29, %v4185_v37 }
 0x43b   :  { %v6462_v32 = vpop.f32.mrb[84].mxu1  ;;  %5360 = vmatpush1.bf16.msra.mxu1 %v7463_v31 }
 0x43c   :  { %v6463_v33 = vpop.f32.mrb[85].mxu1  ;;  %6478 = vmatprep.subr.bf16.mxu1 %v7467_v41 }
 0x43d   :  { %v6464_v34 = vadd.f32 %v6463_v33, %v6462_v32  ;;  %v6465_v35 = vpop.f32.mrb[86].mxu1 }
 0x43e   :  { %v6466_v36 = vpop.f32.mrb[87].mxu1 }
 0x43f   :  { %v6467_v43 = vadd.f32 %v6466_v36, %v6465_v35  ;;  %v4722_v51 = vadd.f32 %v6464_v34, %v4185_v37 }
 0x441   :  { %v4725_v45 = vadd.f32 %v6467_v43, %v4185_v37 }
 0x453   :  { %v6534_v39 = vpop.f32.mrb[88].mxu1 }
 0x454   :  { %v4771_v42 = vadd.f32 %v6534_v39, %v4722_v51  ;;  %v4762_v44 = vpop.f32.mrb[89].mxu1 }
 0x455   :  { %v4763_v48 = vadd.f32 %v4762_v44, %v4714_v40  ;;  %v6535_v49 = vpop.f32.mrb[90].mxu1 }
 0x456   :  { %v4774_v52 = vadd.f32 %v6535_v49, %v4725_v45  ;;  %v4765_v53 = vpop.f32.mrb[91].mxu1  ;;  %v4785_v55 = vmax.f32 %v4771_v42, 0.0 }
 0x457   :  { %v4766_v54 = vadd.f32 %v4765_v53, %v4717_v50  ;;  %v4779_v60 = vmax.f32 %v4763_v48, 0.0  ;;  %v4904_v48 = vrot.slane %v4891_v14, %v8750_v17 }
 0x458   :  { %v4788_v56 = vmax.f32 %v4774_v52, 0.0 }
 0x459   :  { %v4782_v15 = vmax.f32 %v4766_v54, 0.0 }
 0x45a   :  { %v4794_v61 = vpack.c.bf16 %v4788_v56, %v4785_v55 }
 0x45b   :  { %v4791_v62 = vpack.c.bf16 %v4782_v15, %v4779_v60 }
 0x45d   :  { %5378 = vmatmul.mubr.bf16.vlgmr.msra.gmra.mrb[92].mxu1 %v4791_v62  ;;  %6552 = vmatprep.mubr.bf16.mxu0 %v4791_v62 }
 0x45e   :  { %6479 = vmatpush3.bf16.msra.mxu1 %v7468_v38  ;;  %6553 = vmatmul.mubr.bf16.vlgmr.msra.gmra.mrb[8].mxu0 %v4794_v61 }
 0x45f   :  { %6480 = vmatprep.subr.bf16.mxu1 %v7469_v11  ;;  %5387 = vmatprep.mubr.bf16.mxu1 %v7503_v30  ;;  %v7474_v30 = vld [vmem:[%s9630_s5 + $0x50] ss:$12 sps:$4 sm:$0xff]  }
 0x462   :  { %6481 = vmatpush3.bf16.msra.mxu1 %v7470_v63 }
 0x463   :  { %6482 = vmatprep.subr.bf16.mxu1 %v7471_v0 }
 0x465   :  { %5388 = vmatmul.mubr.bf16.gmra.mrb[96].mxu1 %v4794_v61 }
 0x466   :  { %6483 = vmatpush3.bf16.msra.mxu1 %v7472_v1  ;;  %5430 = vmatprep.mubr.bf16.mxu1 %v9485_v58  ;;  %v7478_v58 = vld [vmem:[%s9630_s5 + $0x80] ss:$12 sps:$4 sm:$0xff]  }
 0x467   :  { %6484 = vmatprep.subr.bf16.mxu1 %v7473_v27 }
 0x46a   :  { %6485 = vmatpush3.bf16.msra.mxu1 %v7474_v30 }
 0x46b   :  { %6486 = vmatprep.subr.bf16.mxu1 %v7475_v2 }
 0x46e   :  { %6487 = vmatpush3.bf16.msra.mxu1 %v7476_v3 }
 0x46f   :  { %6488 = vmatprep.subr.bf16.mxu1 %v7477_v4 }
 0x472   :  { %6489 = vmatpush3.bf16.msra.mxu1 %v7478_v58 }
 0x473   :  { %6490 = vmatprep.subr.bf16.mxu1 %v7479_v5 }
 0x476   :  { %6491 = vmatpush3.bf16.msra.mxu1 %v7480_v6 }
 0x477   :  { %6492 = vmatprep.subr.bf16.mxu1 %v7481_v7 }
 0x47a   :  { %6493 = vmatpush3.bf16.msra.mxu1 %v7482_v9 }
 0x47d   :  { %5431 = vmatmul.mubr.bf16.vlgmr.msra.gmra.mrb[100].mxu1 %v9483_v57 }
 0x47e   :  { %5438 = vmatprep.mubr.bf16.mxu1 %v9503_v13 }
 0x485   :  { %5439 = vmatmul.mubr.bf16.gmra.mrb[104].mxu1 %v9501_v12 }
 0x530   :  { %v5379_v19 = vpop.f32.mrb[92].mxu1 }
 0x531   :  { %v6572_v20 = vadd.f32 %v5379_v19, %v4896_v16  ;;  %v5381_v21 = vpop.f32.mrb[93].mxu1  ;;  %v6554_v8 = vpop.f32.mrb[8].mxu0 }
 0x532   :  { %v6573_v22 = vadd.f32 %v5381_v21, %v4900_v59  ;;  %v5383_v23 = vpop.f32.mrb[94].mxu1  ;;  %v5481_v24 = vpop.f32.mrb[9].mxu0 }
 0x533   :  { %v5496_v57 = vmax.f32 %v6572_v20, 0.0  ;;  %v6574_v25 = vadd.f32 %v5383_v23, %v4896_v16  ;;  %v5385_v13 = vpop.f32.mrb[95].mxu1  ;;  %v6555_v26 = vpop.f32.mrb[10].mxu0 }
 0x534   :  { %v5497_v12 = vmax.f32 %v6573_v22, 0.0  ;;  %v6575_v10 = vadd.f32 %v5385_v13, %v4900_v59  ;;  %v5484_v28 = vpop.f32.mrb[11].mxu0 }
 0x535   :  { %v5499_v18 = vmax.f32 %v6574_v25, 0.0 }
 0x536   :  { %v6180_v29 = vpack.c.bf16 %v5497_v12, %v5496_v57  ;;  %v5500_v31 = vmax.f32 %v6575_v10, 0.0 }
 0x538   :  { %5548 = vst [vmem:[%s9633_s7] sm:$0xff] %v6180_v29  ;;  %v6182_v46 = vpack.c.bf16 %v5500_v31, %v5499_v18  ;;  %v5389_v47 = vpop.f32.mrb[96].mxu1 }
 0x539   :  { %v6576_v41 = vadd.f32 %v5389_v47, %v4896_v16  ;;  %v5391_v32 = vpop.f32.mrb[97].mxu1 }
 0x53a   :  { %5550 = vst [vmem:[%s9633_s7 + $0xc] sm:$0xff] %v6182_v46  ;;  %v6577_v33 = vadd.f32 %v5391_v32, %v4900_v59  ;;  %v5393_v34 = vpop.f32.mrb[98].mxu1 }
 0x53b   :  { %v5502_v35 = vmax.f32 %v6576_v41, 0.0  ;;  %v6578_v36 = vadd.f32 %v5393_v34, %v4896_v16  ;;  %v5395_v43 = vpop.f32.mrb[99].mxu1 }
 0x53c   :  { %v5503_v37 = vmax.f32 %v6577_v33, 0.0  ;;  %v6579_v51 = vadd.f32 %v5395_v43, %v4900_v59 }
 0x53d   :  { %v5505_v39 = vmax.f32 %v6578_v36, 0.0 }
 0x53e   :  { %v6184_v40 = vpack.c.bf16 %v5503_v37, %v5502_v35  ;;  %v5506_v42 = vmax.f32 %v6579_v51, 0.0 }
 0x540   :  { %5552 = vst [vmem:[%s9633_s7 + $0x18] sm:$0xff] %v6184_v40  ;;  %v6186_v44 = vpack.c.bf16 %v5506_v42, %v5505_v39 }
 0x542   :  { %5554 = vst [vmem:[%s9633_s7 + $0x24] sm:$0xff] %v6186_v44 }
 0x550   :  { %v6494_v45 = vpop.f32.mrb[100].mxu1 }
 0x551   :  { %v6495_v49 = vpop.f32.mrb[101].mxu1 }
 0x552   :  { %v6496_v50 = vadd.f32 %v6495_v49, %v6494_v45  ;;  %v6497_v52 = vpop.f32.mrb[102].mxu1 }
 0x553   :  { %v6498_v53 = vpop.f32.mrb[103].mxu1 }
 0x554   :  { %v5433_v54 = vadd.f32 %v6496_v50, %v4904_v48  ;;  %v6499_v55 = vadd.f32 %v6498_v53, %v6497_v52 }
 0x556   :  { %v5482_v56 = vadd.f32 %v5481_v24, %v5433_v54  ;;  %v5436_v60 = vadd.f32 %v6499_v55, %v4904_v48 }
 0x558   :  { %v5498_v15 = vmax.f32 %v5482_v56, 0.0  ;;  %v5485_v61 = vadd.f32 %v5484_v28, %v5436_v60  ;;  %v6500_v38 = vpop.f32.mrb[104].mxu1 }
 0x559   :  { %v6501_v62 = vpop.f32.mrb[105].mxu1 }
 0x55a   :  { %v6181_v11 = vpack.c.bf16 %v5498_v15, %v5498_v15  ;;  %v5501_v63 = vmax.f32 %v5485_v61, 0.0  ;;  %v6502_v0 = vadd.f32 %v6501_v62, %v6500_v38  ;;  %v6503_v1 = vpop.f32.mrb[106].mxu1 }
 0x55b   :  { %v6504_v27 = vpop.f32.mrb[107].mxu1 }
 0x55c   :  { %5549 = vst [vmem:[%s9633_s7 + $0x8] sm:$0xf] %v6181_v11  ;;  %v6183_v17 = vpack.c.bf16 %v5501_v63, %v5501_v63  ;;  %v5441_v30 = vadd.f32 %v6502_v0, %v4904_v48  ;;  %v6505_v2 = vadd.f32 %v6504_v27, %v6503_v1 }
 0x55e   :  { %5551 = vst [vmem:[%s9633_s7 + $0x14] sm:$0xf] %v6183_v17  ;;  %v5490_v3 = vadd.f32 %v6554_v8, %v5441_v30  ;;  %v5444_v4 = vadd.f32 %v6505_v2, %v4904_v48 }
 0x560   :  { %v5504_v58 = vmax.f32 %v5490_v3, 0.0  ;;  %v5493_v5 = vadd.f32 %v6555_v26, %v5444_v4 }
 0x562   :  { %v6185_v6 = vpack.c.bf16 %v5504_v58, %v5504_v58  ;;  %v5507_v7 = vmax.f32 %v5493_v5, 0.0 }
 0x564   :  { %5553 = vst [vmem:[%s9633_s7 + $0x20] sm:$0xf] %v6185_v6  ;;  %v6187_v9 = vpack.c.bf16 %v5507_v7, %v5507_v7 }
 0x566   :  { %5555 = vst [vmem:[%s9633_s7 + $0x2c] sm:$0xf] %v6187_v9 }

</bundles_post_ra>
